<compile_context>
chip_gen: v7x
topology: tpu7x:2x2x1
jax: 0.10.0
libtpu: 0.0.40
codegen_flags: <defaults>
</compile_context>

<pallas_src>
import numpy as np
import jax
import jax.numpy as jnp
from jax import lax
from jax.experimental import pallas as pl
from jax.experimental.pallas import tpu as pltpu


# ----------------------------- architecture constants -----------------------
H1, W1, CIN = 28, 28, 3          # MNIST-M input is 3 x 28 x 28
C = 32                           # channels of every conv layer
H2, W2 = H1 // 2, W1 // 2        # 14, 14 after pool1
H3, W3 = H2 // 2, W2 // 2        # 7, 7  after pool2
HF, WF = H3 // 2, W3 // 2        # 3, 3  after pool3 (floor)
L0 = W1 * CIN                    # 84 input lanes (lane = w*3 + c)
PH1, PH2, PH3 = 512, 256, 128    # lane-dense half widths (multiples of 128)
NCLS = 10
NCLS_PAD = 128                   # lane-dense FC output, sliced to 10 outside
B = 8                            # images per grid step (multiple of 8)


# ----------------------------- fused kernel ---------------------------------
def _fused_kernel(x_ref,
                  w1_ref, b1_ref, w2_ref, b2_ref, w3_ref, b3_ref,
                  wf1_ref, bf1_ref, wf2_ref, bf2_ref, wf3_ref, bf3_ref,
                  o_ref,
                  pad1, pad2, pad3):
    f32 = jnp.float32

    # ---------------- conv1 (k=5, padding='same') + pool + relu -------------
    pad1[0:2 * B, :] = jnp.zeros((2 * B, L0), f32)
    pad1[(2 + H1) * B:(4 + H1) * B, :] = jnp.zeros((2 * B, L0), f32)
    pad1[2 * B:(2 + H1) * B, :] = x_ref[...]

    acc = jnp.zeros((H1 * B, 2 * PH1), f32)
    for dy in range(5):
        acc = acc + jnp.dot(pad1[dy * B:(dy + H1) * B, :], w1_ref[dy],
                            preferred_element_type=f32)
    acc = acc + b1_ref[...]
    # W-max-pool: even/odd output columns were routed to the two lane halves.
    pooled = jnp.maximum(acc[:, :PH1], acc[:, PH1:])
    # H-max-pool + ReLU, scattered straight into the H-padded conv2 input.
    pad2[0:B, :] = jnp.zeros((B, PH1), f32)
    pad2[(1 + H2) * B:(2 + H2) * B, :] = jnp.zeros((B, PH1), f32)
    for ho in range(H2):
        blk = jnp.maximum(pooled[(2 * ho) * B:(2 * ho + 1) * B, :],
                          pooled[(2 * ho + 1) * B:(2 * ho + 2) * B, :])
        pad2[(1 + ho) * B:(2 + ho) * B, :] = jnp.maximum(blk, 0.0)
    # TODO(synk): nn.Dropout2d(p=0.1) is identity at inference; train-mode
    # channel dropout is not implemented.

    # ---------------- conv2 (k=3, padding='same') + pool + relu -------------
    acc = jnp.zeros((H2 * B, 2 * PH2), f32)
    for dy in range(3):
        acc = acc + jnp.dot(pad2[dy * B:(dy + H2) * B, :], w2_ref[dy],
                            preferred_element_type=f32)
    acc = acc + b2_ref[...]
    pooled = jnp.maximum(acc[:, :PH2], acc[:, PH2:])
    pad3[0:B, :] = jnp.zeros((B, PH2), f32)
    pad3[(1 + H3) * B:(2 + H3) * B, :] = jnp.zeros((B, PH2), f32)
    for ho in range(H3):
        blk = jnp.maximum(pooled[(2 * ho) * B:(2 * ho + 1) * B, :],
                          pooled[(2 * ho + 1) * B:(2 * ho + 2) * B, :])
        pad3[(1 + ho) * B:(2 + ho) * B, :] = jnp.maximum(blk, 0.0)

    # ------------- conv3 (k=3) + pool + relu + fused FC head ----------------
    acc = jnp.zeros((H3 * B, 2 * PH3), f32)
    for dy in range(3):
        acc = acc + jnp.dot(pad3[dy * B:(dy + H3) * B, :], w3_ref[dy],
                            preferred_element_type=f32)
    acc = acc + b3_ref[...]
    pooled = jnp.maximum(acc[:, :PH3], acc[:, PH3:])

    # H-pool (floor: row 6 dropped) + ReLU + fc1 (NCHW flatten folded into wf1)
    h1 = jnp.zeros((B, 128), f32) + bf1_ref[...]
    for ho in range(HF):
        blk = jnp.maximum(pooled[(2 * ho) * B:(2 * ho + 1) * B, :],
                          pooled[(2 * ho + 1) * B:(2 * ho + 2) * B, :])
        blk = jnp.maximum(blk, 0.0)
        h1 = h1 + jnp.dot(blk, wf1_ref[ho], preferred_element_type=f32)

    h2 = jnp.dot(h1, wf2_ref[...], preferred_element_type=f32) + bf2_ref[...]
    logits = jnp.dot(h2, wf3_ref[...], preferred_element_type=f32) + bf3_ref[...]

    # log-softmax over the 10 real classes (padded lanes masked out)
    col = lax.broadcasted_iota(jnp.int32, (B, NCLS_PAD), 1)
    logits = jnp.where(col < NCLS, logits, -1e30)
    m = jnp.max(logits, axis=1, keepdims=True)
    z = logits - m
    lse = jnp.log(jnp.sum(jnp.exp(z), axis=1, keepdims=True))
    o_ref[...] = z - lse


# ----------------------------- weight preparation ---------------------------
def _build_conv_toeplitz(w_hwio, b, W_in, L_in, in_valid, w_of_lane, c_of_lane,
                         W_out, pad, PH):
    """Per-dy banded matrices turning the 'same' conv over W into one matmul
    per vertical tap. Output lane j = (w%2)*PH + (w//2)*Cout + c, so the 2x1
    W-max-pool becomes max(left half, right half)."""
    k = w_hwio.shape[0]
    c_out_n = w_hwio.shape[3]
    L_out = 2 * PH
    j = np.arange(L_out)
    parity = (j >= PH).astype(np.int64)
    jj = j - parity * PH
    w2 = jj // c_out_n
    c_out = jj % c_out_n
    w_out = 2 * w2 + parity
    out_valid = w_out < W_out

    dx = w_of_lane[:, None] - (w_out[None, :] - pad)            # (L_in, L_out)
    valid = (in_valid[:, None] & out_valid[None, :] & (dx >= 0) & (dx < k))
    dx_c = np.clip(dx, 0, k - 1)
    cin_idx = np.broadcast_to(c_of_lane[:, None], dx.shape)
    cout_idx = np.broadcast_to(c_out[None, :], dx.shape)
    valid_j = jnp.asarray(valid)

    mats = []
    for dy in range(k):
        m = w_hwio[dy][dx_c, cin_idx, cout_idx]                 # (L_in, L_out)
        mats.append(jnp.where(valid_j, m, 0.0))
    w_toe = jnp.stack(mats).astype(jnp.float32)                 # (k, L_in, L_out)

    b_t = jnp.where(jnp.asarray(out_valid), b[c_out], 0.0)
    b_t = b_t.reshape(1, L_out).astype(jnp.float32)
    return w_toe, b_t


def _build_fc1(w_fc1):
    """Fold the PyTorch NCHW flatten (c*9 + h*3 + w) and the sparse pooled lane
    layout (lane = w*32 + c) into three (128, 128) fc1 weight slabs (one per h)."""
    j = np.arange(PH3)
    w = j // C
    c = j % C
    valid = w < WF
    mats = []
    for ho in range(HF):
        fidx = np.where(valid, c * (HF * WF) + ho * WF + w, 0)
        m = jnp.where(jnp.asarray(valid)[:, None], w_fc1[fidx, :], 0.0)
        mats.append(m)
    return jnp.stack(mats).astype(jnp.float32)                  # (3, 128, 128)


def _prepare_kernel_params(p):
    j0 = np.arange(L0)
    w1, b1 = _build_conv_toeplitz(p["conv1_w"], p["conv1_b"], W_in=W1, L_in=L0,
                                  in_valid=np.ones(L0, dtype=bool),
                                  w_of_lane=j0 // CIN, c_of_lane=j0 % CIN,
                                  W_out=W1, pad=2, PH=PH1)
    j1 = np.arange(PH1)
    w2, b2 = _build_conv_toeplitz(p["conv2_w"], p["conv2_b"], W_in=W2, L_in=PH1,
                                  in_valid=(j1 // C) < W2,
                                  w_of_lane=j1 // C, c_of_lane=j1 % C,
                                  W_out=W2, pad=1, PH=PH2)
    j2 = np.arange(PH2)
    w3, b3 = _build_conv_toeplitz(p["conv3_w"], p["conv3_b"], W_in=W3, L_in=PH2,
                                  in_valid=(j2 // C) < W3,
                                  w_of_lane=j2 // C, c_of_lane=j2 % C,
                                  W_out=W3, pad=1, PH=PH3)
    wf1 = _build_fc1(p["fc1_w"])
    wf3 = jnp.zeros((64, NCLS_PAD), jnp.float32).at[:, :NCLS].set(p["fc3_w"])
    bf3 = jnp.zeros((1, NCLS_PAD), jnp.float32).at[0, :NCLS].set(p["fc3_b"])
    return dict(w1=w1, b1=b1, w2=w2, b2=b2, w3=w3, b3=b3,
                wf1=wf1,
                bf1=p["fc1_b"].reshape(1, 128).astype(jnp.float32),
                wf2=p["fc2_w"].astype(jnp.float32),
                bf2=p["fc2_b"].reshape(1, 64).astype(jnp.float32),
                wf3=wf3, bf3=bf3)


# ----------------------------- forward wrapper ------------------------------
def cnn_mnistm_forward(x_nchw, params):
    kp = _prepare_kernel_params(params)
    N = x_nchw.shape[0]
    nb = -(-N // B)
    n_pad = nb * B

    # NCHW -> NHWC -> fold (w, c) into lanes, pack B images per block with
    # rows ordered h*B + b so each grid step gets one contiguous (H1*B, L0) slab.
    x = jnp.transpose(x_nchw, (0, 2, 3, 1)).astype(jnp.float32)
    x = x.reshape(N, H1, L0)
    x = jnp.pad(x, ((0, n_pad - N), (0, 0), (0, 0)))
    x = x.reshape(nb, B, H1, L0).transpose(0, 2, 1, 3).reshape(nb * H1 * B, L0)

    weights = (kp["w1"], kp["b1"], kp["w2"], kp["b2"], kp["w3"], kp["b3"],
               kp["wf1"], kp["bf1"], kp["wf2"], kp["bf2"], kp["wf3"], kp["bf3"])

    def _resident(a):
        idx = (lambda n: (0, 0, 0)) if a.ndim == 3 else (lambda n: (0, 0))
        return pl.BlockSpec(a.shape, idx)

    out = pl.pallas_call(
        _fused_kernel,
        out_shape=jax.ShapeDtypeStruct((n_pad, NCLS_PAD), jnp.float32),
        grid=(nb,),
        in_specs=[pl.BlockSpec((H1 * B, L0), lambda n: (n, 0))]
                 + [_resident(a) for a in weights],
        out_specs=pl.BlockSpec((B, NCLS_PAD), lambda n: (n, 0)),
        scratch_shapes=[
            pltpu.VMEM(((H1 + 4) * B, L0), jnp.float32),   # H-padded conv1 input
            pltpu.VMEM(((H2 + 2) * B, PH1), jnp.float32),  # H-padded conv2 input
            pltpu.VMEM(((H3 + 2) * B, PH2), jnp.float32),  # H-padded conv3 input
        ],
        compiler_params=pltpu.CompilerParams(
            dimension_semantics=("parallel",),
            vmem_limit_bytes=48 * 1024 * 1024),
    )(x, *weights)
    return out[:N, :NCLS]


# ----------------------------- params / reference ---------------------------
def init_params(key):
    ks = jax.random.split(key, 12)

    def u(k, shape, fan_in):
        bound = 1.0 / (fan_in ** 0.5)
        return jax.random.uniform(k, shape, jnp.float32, -bound, bound)

    return {
        "conv1_w": u(ks[0], (5, 5, 3, 32), 5 * 5 * 3),
        "conv1_b": u(ks[1], (32,), 5 * 5 * 3),
        "conv2_w": u(ks[2], (3, 3, 32, 32), 3 * 3 * 32),
        "conv2_b": u(ks[3], (32,), 3 * 3 * 32),
        "conv3_w": u(ks[4], (3, 3, 32, 32), 3 * 3 * 32),
        "conv3_b": u(ks[5], (32,), 3 * 3 * 32),
        "fc1_w": u(ks[6], (288, 128), 288),
        "fc1_b": u(ks[7], (128,), 288),
        "fc2_w": u(ks[8], (128, 64), 128),
        "fc2_b": u(ks[9], (64,), 128),
        "fc3_w": u(ks[10], (64, 10), 64),
        "fc3_b": u(ks[11], (10,), 64),
    }


def reference_forward(x_nchw, p):
    x = jnp.transpose(x_nchw, (0, 2, 3, 1)).astype(jnp.float32)

    def conv_same(x, w, b):
        y = lax.conv_general_dilated(
            x, w, (1, 1), "SAME", dimension_numbers=("NHWC", "HWIO", "NHWC"))
        return y + b

    def pool(x):
        return lax.reduce_window(x, -jnp.inf, lax.max,
                                 (1, 2, 2, 1), (1, 2, 2, 1), "VALID")

    x = jnp.maximum(pool(conv_same(x, p["conv1_w"], p["conv1_b"])), 0.0)
    x = jnp.maximum(pool(conv_same(x, p["conv2_w"], p["conv2_b"])), 0.0)
    x = jnp.maximum(pool(conv_same(x, p["conv3_w"], p["conv3_b"])), 0.0)
    flat = jnp.transpose(x, (0, 3, 1, 2)).reshape(x.shape[0], -1)
    h = flat @ p["fc1_w"] + p["fc1_b"]
    h = h @ p["fc2_w"] + p["fc2_b"]
    logits = h @ p["fc3_w"] + p["fc3_b"]
    return jax.nn.log_softmax(logits, axis=1)


if __name__ == "__main__":
    key = jax.random.PRNGKey(0)
    kp, kx = jax.random.split(key)
    params = init_params(kp)

    # MNIST-M input: NCHW, 3 x 28 x 28 (so the final feature map is 32 x 3 x 3,
    # matching the module's `view(-1, 3*3*32)`). Small batch = 2.
    x = jax.random.normal(kx, (2, 3, 28, 28), dtype=jnp.float32)

    fwd = jax.jit(cnn_mnistm_forward)
    out = jax.block_until_ready(fwd(x, params))
    assert out.shape == (2, 10), out.shape

    ref = jax.block_until_ready(reference_forward(x, params))
    err = float(jnp.max(jnp.abs(out - ref)))
    if err > 2e-4:
        raise AssertionError(f"Pallas output mismatch vs reference: max abs err {err}")

    print("KERNEL_OK")
</pallas_src>

<mosaic_0001>
module attributes {stable_mosaic.version = 11 : i64} {
  func.func @_fused_kernel(%arg0: i32, %arg1: memref<224x84xf32, #tpu.memory_space<vmem>>, %arg2: memref<5x84x1024xf32, #tpu.memory_space<vmem>>, %arg3: memref<1x1024xf32, #tpu.memory_space<vmem>>, %arg4: memref<3x512x512xf32, #tpu.memory_space<vmem>>, %arg5: memref<1x512xf32, #tpu.memory_space<vmem>>, %arg6: memref<3x256x256xf32, #tpu.memory_space<vmem>>, %arg7: memref<1x256xf32, #tpu.memory_space<vmem>>, %arg8: memref<3x128x128xf32, #tpu.memory_space<vmem>>, %arg9: memref<1x128xf32, #tpu.memory_space<vmem>>, %arg10: memref<128x64xf32, #tpu.memory_space<vmem>>, %arg11: memref<1x64xf32, #tpu.memory_space<vmem>>, %arg12: memref<64x128xf32, #tpu.memory_space<vmem>>, %arg13: memref<1x128xf32, #tpu.memory_space<vmem>>, %arg14: memref<8x128xf32, #tpu.memory_space<vmem>>, %arg15: memref<256x84xf32, #tpu.memory_space<vmem>>, %arg16: memref<128x512xf32, #tpu.memory_space<vmem>>, %arg17: memref<72x256xf32, #tpu.memory_space<vmem>>) attributes {dimension_semantics = [#tpu.dimension_semantics<parallel>], iteration_bounds = array<i64: 1>, scalar_prefetch = 0 : i64, scratch_operands = 3 : i64, tpu.core_type = #tpu.core_type<tc>, window_params = [{transform_indices = @transform_0, window_bounds = array<i64: 224, 84>}, {pipeline_mode = #tpu.pipeline_mode<synchronous>, transform_indices = @transform_1, window_bounds = array<i64: 5, 84, 1024>}, {pipeline_mode = #tpu.pipeline_mode<synchronous>, transform_indices = @transform_2, window_bounds = array<i64: 1, 1024>}, {pipeline_mode = #tpu.pipeline_mode<synchronous>, transform_indices = @transform_3, window_bounds = array<i64: 3, 512, 512>}, {pipeline_mode = #tpu.pipeline_mode<synchronous>, transform_indices = @transform_4, window_bounds = array<i64: 1, 512>}, {pipeline_mode = #tpu.pipeline_mode<synchronous>, transform_indices = @transform_5, window_bounds = array<i64: 3, 256, 256>}, {pipeline_mode = #tpu.pipeline_mode<synchronous>, transform_indices = @transform_6, window_bounds = array<i64: 1, 256>}, {pipeline_mode = #tpu.pipeline_mode<synchronous>, transform_indices = @transform_7, window_bounds = array<i64: 3, 128, 128>}, {pipeline_mode = #tpu.pipeline_mode<synchronous>, transform_indices = @transform_8, window_bounds = array<i64: 1, 128>}, {pipeline_mode = #tpu.pipeline_mode<synchronous>, transform_indices = @transform_9, window_bounds = array<i64: 128, 64>}, {pipeline_mode = #tpu.pipeline_mode<synchronous>, transform_indices = @transform_10, window_bounds = array<i64: 1, 64>}, {pipeline_mode = #tpu.pipeline_mode<synchronous>, transform_indices = @transform_11, window_bounds = array<i64: 64, 128>}, {pipeline_mode = #tpu.pipeline_mode<synchronous>, transform_indices = @transform_12, window_bounds = array<i64: 1, 128>}, {transform_indices = @transform_13, window_bounds = array<i64: 8, 128>}]} {
    %cst = arith.constant 0.000000e+00 : f32
    %0 = vector.broadcast %cst : f32 to vector<16x84xf32>
    %c0 = arith.constant 0 : index
    %c0_0 = arith.constant 0 : index
    %1 = vector.load %arg15[%c0, %c0_0] : memref<256x84xf32, #tpu.memory_space<vmem>>, vector<16x84xf32>
    tpu.vector_store %arg15[%c0, %c0_0], %0 {strides = array<i32>} : memref<256x84xf32, #tpu.memory_space<vmem>>, vector<16x84xf32>,
    %cst_1 = arith.constant 0.000000e+00 : f32
    %2 = vector.broadcast %cst_1 : f32 to vector<16x84xf32>
    %c240 = arith.constant 240 : index
    %c0_2 = arith.constant 0 : index
    %3 = vector.load %arg15[%c240, %c0_2] : memref<256x84xf32, #tpu.memory_space<vmem>>, vector<16x84xf32>
    tpu.vector_store %arg15[%c240, %c0_2], %2 {strides = array<i32>} : memref<256x84xf32, #tpu.memory_space<vmem>>, vector<16x84xf32>,
    %c0_3 = arith.constant 0 : index
    %c0_4 = arith.constant 0 : index
    %4 = vector.load %arg1[%c0_3, %c0_4] : memref<224x84xf32, #tpu.memory_space<vmem>>, vector<224x84xf32>
    %c16 = arith.constant 16 : index
    %c0_5 = arith.constant 0 : index
    %5 = vector.load %arg15[%c16, %c0_5] : memref<256x84xf32, #tpu.memory_space<vmem>>, vector<224x84xf32>
    tpu.vector_store %arg15[%c16, %c0_5], %4 {strides = array<i32>} : memref<256x84xf32, #tpu.memory_space<vmem>>, vector<224x84xf32>,
    %cst_6 = arith.constant 0.000000e+00 : f32
    %6 = vector.broadcast %cst_6 : f32 to vector<224x1024xf32>
    %c0_7 = arith.constant 0 : index
    %c0_8 = arith.constant 0 : index
    %7 = vector.load %arg15[%c0_7, %c0_8] : memref<256x84xf32, #tpu.memory_space<vmem>>, vector<224x84xf32>
    %c0_9 = arith.constant 0 : index
    %c0_10 = arith.constant 0 : index
    %c0_11 = arith.constant 0 : index
    %8 = vector.load %arg2[%c0_9, %c0_10, %c0_11] : memref<5x84x1024xf32, #tpu.memory_space<vmem>>, vector<1x84x1024xf32>
    %9 = vector.shape_cast %8 : vector<1x84x1024xf32> to vector<84x1024xf32>
    %cst_12 = arith.constant dense<0.000000e+00> : vector<224x1024xf32>
    %10 = tpu.matmul %7, %9, %cst_12 {dimension_numbers = #tpu.dot_dimension_numbers<[1], [0], [0], [1], [0, 0, 1, 1], [], []>} : vector<224x84xf32>, vector<84x1024xf32>, vector<224x1024xf32> -> vector<224x1024xf32>
    %11 = arith.addf %6, %10 : vector<224x1024xf32>
    %c8 = arith.constant 8 : index
    %c0_13 = arith.constant 0 : index
    %12 = vector.load %arg15[%c8, %c0_13] : memref<256x84xf32, #tpu.memory_space<vmem>>, vector<224x84xf32>
    %c1 = arith.constant 1 : index
    %c0_14 = arith.constant 0 : index
    %c0_15 = arith.constant 0 : index
    %13 = vector.load %arg2[%c1, %c0_14, %c0_15] : memref<5x84x1024xf32, #tpu.memory_space<vmem>>, vector<1x84x1024xf32>
    %14 = vector.shape_cast %13 : vector<1x84x1024xf32> to vector<84x1024xf32>
    %cst_16 = arith.constant dense<0.000000e+00> : vector<224x1024xf32>
    %15 = tpu.matmul %12, %14, %cst_16 {dimension_numbers = #tpu.dot_dimension_numbers<[1], [0], [0], [1], [0, 0, 1, 1], [], []>} : vector<224x84xf32>, vector<84x1024xf32>, vector<224x1024xf32> -> vector<224x1024xf32>
    %16 = arith.addf %11, %15 : vector<224x1024xf32>
    %c16_17 = arith.constant 16 : index
    %c0_18 = arith.constant 0 : index
    %17 = vector.load %arg15[%c16_17, %c0_18] : memref<256x84xf32, #tpu.memory_space<vmem>>, vector<224x84xf32>
    %c2 = arith.constant 2 : index
    %c0_19 = arith.constant 0 : index
    %c0_20 = arith.constant 0 : index
    %18 = vector.load %arg2[%c2, %c0_19, %c0_20] : memref<5x84x1024xf32, #tpu.memory_space<vmem>>, vector<1x84x1024xf32>
    %19 = vector.shape_cast %18 : vector<1x84x1024xf32> to vector<84x1024xf32>
    %cst_21 = arith.constant dense<0.000000e+00> : vector<224x1024xf32>
    %20 = tpu.matmul %17, %19, %cst_21 {dimension_numbers = #tpu.dot_dimension_numbers<[1], [0], [0], [1], [0, 0, 1, 1], [], []>} : vector<224x84xf32>, vector<84x1024xf32>, vector<224x1024xf32> -> vector<224x1024xf32>
    %21 = arith.addf %16, %20 : vector<224x1024xf32>
    %c24 = arith.constant 24 : index
    %c0_22 = arith.constant 0 : index
    %22 = vector.load %arg15[%c24, %c0_22] : memref<256x84xf32, #tpu.memory_space<vmem>>, vector<224x84xf32>
    %c3 = arith.constant 3 : index
    %c0_23 = arith.constant 0 : index
    %c0_24 = arith.constant 0 : index
    %23 = vector.load %arg2[%c3, %c0_23, %c0_24] : memref<5x84x1024xf32, #tpu.memory_space<vmem>>, vector<1x84x1024xf32>
    %24 = vector.shape_cast %23 : vector<1x84x1024xf32> to vector<84x1024xf32>
    %cst_25 = arith.constant dense<0.000000e+00> : vector<224x1024xf32>
    %25 = tpu.matmul %22, %24, %cst_25 {dimension_numbers = #tpu.dot_dimension_numbers<[1], [0], [0], [1], [0, 0, 1, 1], [], []>} : vector<224x84xf32>, vector<84x1024xf32>, vector<224x1024xf32> -> vector<224x1024xf32>
    %26 = arith.addf %21, %25 : vector<224x1024xf32>
    %c32 = arith.constant 32 : index
    %c0_26 = arith.constant 0 : index
    %27 = vector.load %arg15[%c32, %c0_26] : memref<256x84xf32, #tpu.memory_space<vmem>>, vector<224x84xf32>
    %c4 = arith.constant 4 : index
    %c0_27 = arith.constant 0 : index
    %c0_28 = arith.constant 0 : index
    %28 = vector.load %arg2[%c4, %c0_27, %c0_28] : memref<5x84x1024xf32, #tpu.memory_space<vmem>>, vector<1x84x1024xf32>
    %29 = vector.shape_cast %28 : vector<1x84x1024xf32> to vector<84x1024xf32>
    %cst_29 = arith.constant dense<0.000000e+00> : vector<224x1024xf32>
    %30 = tpu.matmul %27, %29, %cst_29 {dimension_numbers = #tpu.dot_dimension_numbers<[1], [0], [0], [1], [0, 0, 1, 1], [], []>} : vector<224x84xf32>, vector<84x1024xf32>, vector<224x1024xf32> -> vector<224x1024xf32>
    %31 = arith.addf %26, %30 : vector<224x1024xf32>
    %c0_30 = arith.constant 0 : index
    %c0_31 = arith.constant 0 : index
    %32 = vector.load %arg3[%c0_30, %c0_31] : memref<1x1024xf32, #tpu.memory_space<vmem>>, vector<1x1024xf32>
    %33 = vector.broadcast %32 : vector<1x1024xf32> to vector<224x1024xf32>
    %34 = arith.addf %31, %33 : vector<224x1024xf32>
    %35 = vector.extract_strided_slice %34 {offsets = [0, 0], sizes = [224, 512], strides = [1, 1]} : vector<224x1024xf32> to vector<224x512xf32>
    %36 = vector.extract_strided_slice %34 {offsets = [0, 512], sizes = [224, 512], strides = [1, 1]} : vector<224x1024xf32> to vector<224x512xf32>
    %37 = arith.maximumf %35, %36 : vector<224x512xf32>
    %cst_32 = arith.constant 0.000000e+00 : f32
    %38 = vector.broadcast %cst_32 : f32 to vector<8x512xf32>
    %c0_33 = arith.constant 0 : index
    %c0_34 = arith.constant 0 : index
    %39 = vector.load %arg16[%c0_33, %c0_34] : memref<128x512xf32, #tpu.memory_space<vmem>>, vector<8x512xf32>
    tpu.vector_store %arg16[%c0_33, %c0_34], %38 {strides = array<i32>} : memref<128x512xf32, #tpu.memory_space<vmem>>, vector<8x512xf32>,
    %cst_35 = arith.constant 0.000000e+00 : f32
    %40 = vector.broadcast %cst_35 : f32 to vector<8x512xf32>
    %c120 = arith.constant 120 : index
    %c0_36 = arith.constant 0 : index
    %41 = vector.load %arg16[%c120, %c0_36] : memref<128x512xf32, #tpu.memory_space<vmem>>, vector<8x512xf32>
    tpu.vector_store %arg16[%c120, %c0_36], %40 {strides = array<i32>} : memref<128x512xf32, #tpu.memory_space<vmem>>, vector<8x512xf32>,
    %42 = vector.extract_strided_slice %37 {offsets = [0, 0], sizes = [8, 512], strides = [1, 1]} : vector<224x512xf32> to vector<8x512xf32>
    %43 = vector.extract_strided_slice %37 {offsets = [8, 0], sizes = [8, 512], strides = [1, 1]} : vector<224x512xf32> to vector<8x512xf32>
    %44 = arith.maximumf %42, %43 : vector<8x512xf32>
    %cst_37 = arith.constant 0.000000e+00 : f32
    %45 = vector.broadcast %cst_37 : f32 to vector<8x512xf32>
    %46 = arith.maximumf %44, %45 : vector<8x512xf32>
    %c8_38 = arith.constant 8 : index
    %c0_39 = arith.constant 0 : index
    %47 = vector.load %arg16[%c8_38, %c0_39] : memref<128x512xf32, #tpu.memory_space<vmem>>, vector<8x512xf32>
    tpu.vector_store %arg16[%c8_38, %c0_39], %46 {strides = array<i32>} : memref<128x512xf32, #tpu.memory_space<vmem>>, vector<8x512xf32>,
    %48 = vector.extract_strided_slice %37 {offsets = [16, 0], sizes = [8, 512], strides = [1, 1]} : vector<224x512xf32> to vector<8x512xf32>
    %49 = vector.extract_strided_slice %37 {offsets = [24, 0], sizes = [8, 512], strides = [1, 1]} : vector<224x512xf32> to vector<8x512xf32>
    %50 = arith.maximumf %48, %49 : vector<8x512xf32>
    %cst_40 = arith.constant 0.000000e+00 : f32
    %51 = vector.broadcast %cst_40 : f32 to vector<8x512xf32>
    %52 = arith.maximumf %50, %51 : vector<8x512xf32>
    %c16_41 = arith.constant 16 : index
    %c0_42 = arith.constant 0 : index
    %53 = vector.load %arg16[%c16_41, %c0_42] : memref<128x512xf32, #tpu.memory_space<vmem>>, vector<8x512xf32>
    tpu.vector_store %arg16[%c16_41, %c0_42], %52 {strides = array<i32>} : memref<128x512xf32, #tpu.memory_space<vmem>>, vector<8x512xf32>,
    %54 = vector.extract_strided_slice %37 {offsets = [32, 0], sizes = [8, 512], strides = [1, 1]} : vector<224x512xf32> to vector<8x512xf32>
    %55 = vector.extract_strided_slice %37 {offsets = [40, 0], sizes = [8, 512], strides = [1, 1]} : vector<224x512xf32> to vector<8x512xf32>
    %56 = arith.maximumf %54, %55 : vector<8x512xf32>
    %cst_43 = arith.constant 0.000000e+00 : f32
    %57 = vector.broadcast %cst_43 : f32 to vector<8x512xf32>
    %58 = arith.maximumf %56, %57 : vector<8x512xf32>
    %c24_44 = arith.constant 24 : index
    %c0_45 = arith.constant 0 : index
    %59 = vector.load %arg16[%c24_44, %c0_45] : memref<128x512xf32, #tpu.memory_space<vmem>>, vector<8x512xf32>
    tpu.vector_store %arg16[%c24_44, %c0_45], %58 {strides = array<i32>} : memref<128x512xf32, #tpu.memory_space<vmem>>, vector<8x512xf32>,
    %60 = vector.extract_strided_slice %37 {offsets = [48, 0], sizes = [8, 512], strides = [1, 1]} : vector<224x512xf32> to vector<8x512xf32>
    %61 = vector.extract_strided_slice %37 {offsets = [56, 0], sizes = [8, 512], strides = [1, 1]} : vector<224x512xf32> to vector<8x512xf32>
    %62 = arith.maximumf %60, %61 : vector<8x512xf32>
    %cst_46 = arith.constant 0.000000e+00 : f32
    %63 = vector.broadcast %cst_46 : f32 to vector<8x512xf32>
    %64 = arith.maximumf %62, %63 : vector<8x512xf32>
    %c32_47 = arith.constant 32 : index
    %c0_48 = arith.constant 0 : index
    %65 = vector.load %arg16[%c32_47, %c0_48] : memref<128x512xf32, #tpu.memory_space<vmem>>, vector<8x512xf32>
    tpu.vector_store %arg16[%c32_47, %c0_48], %64 {strides = array<i32>} : memref<128x512xf32, #tpu.memory_space<vmem>>, vector<8x512xf32>,
    %66 = vector.extract_strided_slice %37 {offsets = [64, 0], sizes = [8, 512], strides = [1, 1]} : vector<224x512xf32> to vector<8x512xf32>
    %67 = vector.extract_strided_slice %37 {offsets = [72, 0], sizes = [8, 512], strides = [1, 1]} : vector<224x512xf32> to vector<8x512xf32>
    %68 = arith.maximumf %66, %67 : vector<8x512xf32>
    %cst_49 = arith.constant 0.000000e+00 : f32
    %69 = vector.broadcast %cst_49 : f32 to vector<8x512xf32>
    %70 = arith.maximumf %68, %69 : vector<8x512xf32>
    %c40 = arith.constant 40 : index
    %c0_50 = arith.constant 0 : index
    %71 = vector.load %arg16[%c40, %c0_50] : memref<128x512xf32, #tpu.memory_space<vmem>>, vector<8x512xf32>
    tpu.vector_store %arg16[%c40, %c0_50], %70 {strides = array<i32>} : memref<128x512xf32, #tpu.memory_space<vmem>>, vector<8x512xf32>,
    %72 = vector.extract_strided_slice %37 {offsets = [80, 0], sizes = [8, 512], strides = [1, 1]} : vector<224x512xf32> to vector<8x512xf32>
    %73 = vector.extract_strided_slice %37 {offsets = [88, 0], sizes = [8, 512], strides = [1, 1]} : vector<224x512xf32> to vector<8x512xf32>
    %74 = arith.maximumf %72, %73 : vector<8x512xf32>
    %cst_51 = arith.constant 0.000000e+00 : f32
    %75 = vector.broadcast %cst_51 : f32 to vector<8x512xf32>
    %76 = arith.maximumf %74, %75 : vector<8x512xf32>
    %c48 = arith.constant 48 : index
    %c0_52 = arith.constant 0 : index
    %77 = vector.load %arg16[%c48, %c0_52] : memref<128x512xf32, #tpu.memory_space<vmem>>, vector<8x512xf32>
    tpu.vector_store %arg16[%c48, %c0_52], %76 {strides = array<i32>} : memref<128x512xf32, #tpu.memory_space<vmem>>, vector<8x512xf32>,
    %78 = vector.extract_strided_slice %37 {offsets = [96, 0], sizes = [8, 512], strides = [1, 1]} : vector<224x512xf32> to vector<8x512xf32>
    %79 = vector.extract_strided_slice %37 {offsets = [104, 0], sizes = [8, 512], strides = [1, 1]} : vector<224x512xf32> to vector<8x512xf32>
    %80 = arith.maximumf %78, %79 : vector<8x512xf32>
    %cst_53 = arith.constant 0.000000e+00 : f32
    %81 = vector.broadcast %cst_53 : f32 to vector<8x512xf32>
    %82 = arith.maximumf %80, %81 : vector<8x512xf32>
    %c56 = arith.constant 56 : index
    %c0_54 = arith.constant 0 : index
    %83 = vector.load %arg16[%c56, %c0_54] : memref<128x512xf32, #tpu.memory_space<vmem>>, vector<8x512xf32>
    tpu.vector_store %arg16[%c56, %c0_54], %82 {strides = array<i32>} : memref<128x512xf32, #tpu.memory_space<vmem>>, vector<8x512xf32>,
    %84 = vector.extract_strided_slice %37 {offsets = [112, 0], sizes = [8, 512], strides = [1, 1]} : vector<224x512xf32> to vector<8x512xf32>
    %85 = vector.extract_strided_slice %37 {offsets = [120, 0], sizes = [8, 512], strides = [1, 1]} : vector<224x512xf32> to vector<8x512xf32>
    %86 = arith.maximumf %84, %85 : vector<8x512xf32>
    %cst_55 = arith.constant 0.000000e+00 : f32
    %87 = vector.broadcast %cst_55 : f32 to vector<8x512xf32>
    %88 = arith.maximumf %86, %87 : vector<8x512xf32>
    %c64 = arith.constant 64 : index
    %c0_56 = arith.constant 0 : index
    %89 = vector.load %arg16[%c64, %c0_56] : memref<128x512xf32, #tpu.memory_space<vmem>>, vector<8x512xf32>
    tpu.vector_store %arg16[%c64, %c0_56], %88 {strides = array<i32>} : memref<128x512xf32, #tpu.memory_space<vmem>>, vector<8x512xf32>,
    %90 = vector.extract_strided_slice %37 {offsets = [128, 0], sizes = [8, 512], strides = [1, 1]} : vector<224x512xf32> to vector<8x512xf32>
    %91 = vector.extract_strided_slice %37 {offsets = [136, 0], sizes = [8, 512], strides = [1, 1]} : vector<224x512xf32> to vector<8x512xf32>
    %92 = arith.maximumf %90, %91 : vector<8x512xf32>
    %cst_57 = arith.constant 0.000000e+00 : f32
    %93 = vector.broadcast %cst_57 : f32 to vector<8x512xf32>
    %94 = arith.maximumf %92, %93 : vector<8x512xf32>
    %c72 = arith.constant 72 : index
    %c0_58 = arith.constant 0 : index
    %95 = vector.load %arg16[%c72, %c0_58] : memref<128x512xf32, #tpu.memory_space<vmem>>, vector<8x512xf32>
    tpu.vector_store %arg16[%c72, %c0_58], %94 {strides = array<i32>} : memref<128x512xf32, #tpu.memory_space<vmem>>, vector<8x512xf32>,
    %96 = vector.extract_strided_slice %37 {offsets = [144, 0], sizes = [8, 512], strides = [1, 1]} : vector<224x512xf32> to vector<8x512xf32>
    %97 = vector.extract_strided_slice %37 {offsets = [152, 0], sizes = [8, 512], strides = [1, 1]} : vector<224x512xf32> to vector<8x512xf32>
    %98 = arith.maximumf %96, %97 : vector<8x512xf32>
    %cst_59 = arith.constant 0.000000e+00 : f32
    %99 = vector.broadcast %cst_59 : f32 to vector<8x512xf32>
    %100 = arith.maximumf %98, %99 : vector<8x512xf32>
    %c80 = arith.constant 80 : index
    %c0_60 = arith.constant 0 : index
    %101 = vector.load %arg16[%c80, %c0_60] : memref<128x512xf32, #tpu.memory_space<vmem>>, vector<8x512xf32>
    tpu.vector_store %arg16[%c80, %c0_60], %100 {strides = array<i32>} : memref<128x512xf32, #tpu.memory_space<vmem>>, vector<8x512xf32>,
    %102 = vector.extract_strided_slice %37 {offsets = [160, 0], sizes = [8, 512], strides = [1, 1]} : vector<224x512xf32> to vector<8x512xf32>
    %103 = vector.extract_strided_slice %37 {offsets = [168, 0], sizes = [8, 512], strides = [1, 1]} : vector<224x512xf32> to vector<8x512xf32>
    %104 = arith.maximumf %102, %103 : vector<8x512xf32>
    %cst_61 = arith.constant 0.000000e+00 : f32
    %105 = vector.broadcast %cst_61 : f32 to vector<8x512xf32>
    %106 = arith.maximumf %104, %105 : vector<8x512xf32>
    %c88 = arith.constant 88 : index
    %c0_62 = arith.constant 0 : index
    %107 = vector.load %arg16[%c88, %c0_62] : memref<128x512xf32, #tpu.memory_space<vmem>>, vector<8x512xf32>
    tpu.vector_store %arg16[%c88, %c0_62], %106 {strides = array<i32>} : memref<128x512xf32, #tpu.memory_space<vmem>>, vector<8x512xf32>,
    %108 = vector.extract_strided_slice %37 {offsets = [176, 0], sizes = [8, 512], strides = [1, 1]} : vector<224x512xf32> to vector<8x512xf32>
    %109 = vector.extract_strided_slice %37 {offsets = [184, 0], sizes = [8, 512], strides = [1, 1]} : vector<224x512xf32> to vector<8x512xf32>
    %110 = arith.maximumf %108, %109 : vector<8x512xf32>
    %cst_63 = arith.constant 0.000000e+00 : f32
    %111 = vector.broadcast %cst_63 : f32 to vector<8x512xf32>
    %112 = arith.maximumf %110, %111 : vector<8x512xf32>
    %c96 = arith.constant 96 : index
    %c0_64 = arith.constant 0 : index
    %113 = vector.load %arg16[%c96, %c0_64] : memref<128x512xf32, #tpu.memory_space<vmem>>, vector<8x512xf32>
    tpu.vector_store %arg16[%c96, %c0_64], %112 {strides = array<i32>} : memref<128x512xf32, #tpu.memory_space<vmem>>, vector<8x512xf32>,
    %114 = vector.extract_strided_slice %37 {offsets = [192, 0], sizes = [8, 512], strides = [1, 1]} : vector<224x512xf32> to vector<8x512xf32>
    %115 = vector.extract_strided_slice %37 {offsets = [200, 0], sizes = [8, 512], strides = [1, 1]} : vector<224x512xf32> to vector<8x512xf32>
    %116 = arith.maximumf %114, %115 : vector<8x512xf32>
    %cst_65 = arith.constant 0.000000e+00 : f32
    %117 = vector.broadcast %cst_65 : f32 to vector<8x512xf32>
    %118 = arith.maximumf %116, %117 : vector<8x512xf32>
    %c104 = arith.constant 104 : index
    %c0_66 = arith.constant 0 : index
    %119 = vector.load %arg16[%c104, %c0_66] : memref<128x512xf32, #tpu.memory_space<vmem>>, vector<8x512xf32>
    tpu.vector_store %arg16[%c104, %c0_66], %118 {strides = array<i32>} : memref<128x512xf32, #tpu.memory_space<vmem>>, vector<8x512xf32>,
    %120 = vector.extract_strided_slice %37 {offsets = [208, 0], sizes = [8, 512], strides = [1, 1]} : vector<224x512xf32> to vector<8x512xf32>
    %121 = vector.extract_strided_slice %37 {offsets = [216, 0], sizes = [8, 512], strides = [1, 1]} : vector<224x512xf32> to vector<8x512xf32>
    %122 = arith.maximumf %120, %121 : vector<8x512xf32>
    %cst_67 = arith.constant 0.000000e+00 : f32
    %123 = vector.broadcast %cst_67 : f32 to vector<8x512xf32>
    %124 = arith.maximumf %122, %123 : vector<8x512xf32>
    %c112 = arith.constant 112 : index
    %c0_68 = arith.constant 0 : index
    %125 = vector.load %arg16[%c112, %c0_68] : memref<128x512xf32, #tpu.memory_space<vmem>>, vector<8x512xf32>
    tpu.vector_store %arg16[%c112, %c0_68], %124 {strides = array<i32>} : memref<128x512xf32, #tpu.memory_space<vmem>>, vector<8x512xf32>,
    %cst_69 = arith.constant 0.000000e+00 : f32
    %126 = vector.broadcast %cst_69 : f32 to vector<112x512xf32>
    %c0_70 = arith.constant 0 : index
    %c0_71 = arith.constant 0 : index
    %127 = vector.load %arg16[%c0_70, %c0_71] : memref<128x512xf32, #tpu.memory_space<vmem>>, vector<112x512xf32>
    %c0_72 = arith.constant 0 : index
    %c0_73 = arith.constant 0 : index
    %c0_74 = arith.constant 0 : index
    %128 = vector.load %arg4[%c0_72, %c0_73, %c0_74] : memref<3x512x512xf32, #tpu.memory_space<vmem>>, vector<1x512x512xf32>
    %129 = vector.shape_cast %128 : vector<1x512x512xf32> to vector<512x512xf32>
    %cst_75 = arith.constant dense<0.000000e+00> : vector<112x512xf32>
    %130 = tpu.matmul %127, %129, %cst_75 {dimension_numbers = #tpu.dot_dimension_numbers<[1], [0], [0], [1], [0, 0, 1, 1], [], []>} : vector<112x512xf32>, vector<512x512xf32>, vector<112x512xf32> -> vector<112x512xf32>
    %131 = arith.addf %126, %130 : vector<112x512xf32>
    %c8_76 = arith.constant 8 : index
    %c0_77 = arith.constant 0 : index
    %132 = vector.load %arg16[%c8_76, %c0_77] : memref<128x512xf32, #tpu.memory_space<vmem>>, vector<112x512xf32>
    %c1_78 = arith.constant 1 : index
    %c0_79 = arith.constant 0 : index
    %c0_80 = arith.constant 0 : index
    %133 = vector.load %arg4[%c1_78, %c0_79, %c0_80] : memref<3x512x512xf32, #tpu.memory_space<vmem>>, vector<1x512x512xf32>
    %134 = vector.shape_cast %133 : vector<1x512x512xf32> to vector<512x512xf32>
    %cst_81 = arith.constant dense<0.000000e+00> : vector<112x512xf32>
    %135 = tpu.matmul %132, %134, %cst_81 {dimension_numbers = #tpu.dot_dimension_numbers<[1], [0], [0], [1], [0, 0, 1, 1], [], []>} : vector<112x512xf32>, vector<512x512xf32>, vector<112x512xf32> -> vector<112x512xf32>
    %136 = arith.addf %131, %135 : vector<112x512xf32>
    %c16_82 = arith.constant 16 : index
    %c0_83 = arith.constant 0 : index
    %137 = vector.load %arg16[%c16_82, %c0_83] : memref<128x512xf32, #tpu.memory_space<vmem>>, vector<112x512xf32>
    %c2_84 = arith.constant 2 : index
    %c0_85 = arith.constant 0 : index
    %c0_86 = arith.constant 0 : index
    %138 = vector.load %arg4[%c2_84, %c0_85, %c0_86] : memref<3x512x512xf32, #tpu.memory_space<vmem>>, vector<1x512x512xf32>
    %139 = vector.shape_cast %138 : vector<1x512x512xf32> to vector<512x512xf32>
    %cst_87 = arith.constant dense<0.000000e+00> : vector<112x512xf32>
    %140 = tpu.matmul %137, %139, %cst_87 {dimension_numbers = #tpu.dot_dimension_numbers<[1], [0], [0], [1], [0, 0, 1, 1], [], []>} : vector<112x512xf32>, vector<512x512xf32>, vector<112x512xf32> -> vector<112x512xf32>
    %141 = arith.addf %136, %140 : vector<112x512xf32>
    %c0_88 = arith.constant 0 : index
    %c0_89 = arith.constant 0 : index
    %142 = vector.load %arg5[%c0_88, %c0_89] : memref<1x512xf32, #tpu.memory_space<vmem>>, vector<1x512xf32>
    %143 = vector.broadcast %142 : vector<1x512xf32> to vector<112x512xf32>
    %144 = arith.addf %141, %143 : vector<112x512xf32>
    %145 = vector.extract_strided_slice %144 {offsets = [0, 0], sizes = [112, 256], strides = [1, 1]} : vector<112x512xf32> to vector<112x256xf32>
    %146 = vector.extract_strided_slice %144 {offsets = [0, 256], sizes = [112, 256], strides = [1, 1]} : vector<112x512xf32> to vector<112x256xf32>
    %147 = arith.maximumf %145, %146 : vector<112x256xf32>
    %cst_90 = arith.constant 0.000000e+00 : f32
    %148 = vector.broadcast %cst_90 : f32 to vector<8x256xf32>
    %c0_91 = arith.constant 0 : index
    %c0_92 = arith.constant 0 : index
    %149 = vector.load %arg17[%c0_91, %c0_92] : memref<72x256xf32, #tpu.memory_space<vmem>>, vector<8x256xf32>
    tpu.vector_store %arg17[%c0_91, %c0_92], %148 {strides = array<i32>} : memref<72x256xf32, #tpu.memory_space<vmem>>, vector<8x256xf32>,
    %cst_93 = arith.constant 0.000000e+00 : f32
    %150 = vector.broadcast %cst_93 : f32 to vector<8x256xf32>
    %c64_94 = arith.constant 64 : index
    %c0_95 = arith.constant 0 : index
    %151 = vector.load %arg17[%c64_94, %c0_95] : memref<72x256xf32, #tpu.memory_space<vmem>>, vector<8x256xf32>
    tpu.vector_store %arg17[%c64_94, %c0_95], %150 {strides = array<i32>} : memref<72x256xf32, #tpu.memory_space<vmem>>, vector<8x256xf32>,
    %152 = vector.extract_strided_slice %147 {offsets = [0, 0], sizes = [8, 256], strides = [1, 1]} : vector<112x256xf32> to vector<8x256xf32>
    %153 = vector.extract_strided_slice %147 {offsets = [8, 0], sizes = [8, 256], strides = [1, 1]} : vector<112x256xf32> to vector<8x256xf32>
    %154 = arith.maximumf %152, %153 : vector<8x256xf32>
    %cst_96 = arith.constant 0.000000e+00 : f32
    %155 = vector.broadcast %cst_96 : f32 to vector<8x256xf32>
    %156 = arith.maximumf %154, %155 : vector<8x256xf32>
    %c8_97 = arith.constant 8 : index
    %c0_98 = arith.constant 0 : index
    %157 = vector.load %arg17[%c8_97, %c0_98] : memref<72x256xf32, #tpu.memory_space<vmem>>, vector<8x256xf32>
    tpu.vector_store %arg17[%c8_97, %c0_98], %156 {strides = array<i32>} : memref<72x256xf32, #tpu.memory_space<vmem>>, vector<8x256xf32>,
    %158 = vector.extract_strided_slice %147 {offsets = [16, 0], sizes = [8, 256], strides = [1, 1]} : vector<112x256xf32> to vector<8x256xf32>
    %159 = vector.extract_strided_slice %147 {offsets = [24, 0], sizes = [8, 256], strides = [1, 1]} : vector<112x256xf32> to vector<8x256xf32>
    %160 = arith.maximumf %158, %159 : vector<8x256xf32>
    %cst_99 = arith.constant 0.000000e+00 : f32
    %161 = vector.broadcast %cst_99 : f32 to vector<8x256xf32>
    %162 = arith.maximumf %160, %161 : vector<8x256xf32>
    %c16_100 = arith.constant 16 : index
    %c0_101 = arith.constant 0 : index
    %163 = vector.load %arg17[%c16_100, %c0_101] : memref<72x256xf32, #tpu.memory_space<vmem>>, vector<8x256xf32>
    tpu.vector_store %arg17[%c16_100, %c0_101], %162 {strides = array<i32>} : memref<72x256xf32, #tpu.memory_space<vmem>>, vector<8x256xf32>,
    %164 = vector.extract_strided_slice %147 {offsets = [32, 0], sizes = [8, 256], strides = [1, 1]} : vector<112x256xf32> to vector<8x256xf32>
    %165 = vector.extract_strided_slice %147 {offsets = [40, 0], sizes = [8, 256], strides = [1, 1]} : vector<112x256xf32> to vector<8x256xf32>
    %166 = arith.maximumf %164, %165 : vector<8x256xf32>
    %cst_102 = arith.constant 0.000000e+00 : f32
    %167 = vector.broadcast %cst_102 : f32 to vector<8x256xf32>
    %168 = arith.maximumf %166, %167 : vector<8x256xf32>
    %c24_103 = arith.constant 24 : index
    %c0_104 = arith.constant 0 : index
    %169 = vector.load %arg17[%c24_103, %c0_104] : memref<72x256xf32, #tpu.memory_space<vmem>>, vector<8x256xf32>
    tpu.vector_store %arg17[%c24_103, %c0_104], %168 {strides = array<i32>} : memref<72x256xf32, #tpu.memory_space<vmem>>, vector<8x256xf32>,
    %170 = vector.extract_strided_slice %147 {offsets = [48, 0], sizes = [8, 256], strides = [1, 1]} : vector<112x256xf32> to vector<8x256xf32>
    %171 = vector.extract_strided_slice %147 {offsets = [56, 0], sizes = [8, 256], strides = [1, 1]} : vector<112x256xf32> to vector<8x256xf32>
    %172 = arith.maximumf %170, %171 : vector<8x256xf32>
    %cst_105 = arith.constant 0.000000e+00 : f32
    %173 = vector.broadcast %cst_105 : f32 to vector<8x256xf32>
    %174 = arith.maximumf %172, %173 : vector<8x256xf32>
    %c32_106 = arith.constant 32 : index
    %c0_107 = arith.constant 0 : index
    %175 = vector.load %arg17[%c32_106, %c0_107] : memref<72x256xf32, #tpu.memory_space<vmem>>, vector<8x256xf32>
    tpu.vector_store %arg17[%c32_106, %c0_107], %174 {strides = array<i32>} : memref<72x256xf32, #tpu.memory_space<vmem>>, vector<8x256xf32>,
    %176 = vector.extract_strided_slice %147 {offsets = [64, 0], sizes = [8, 256], strides = [1, 1]} : vector<112x256xf32> to vector<8x256xf32>
    %177 = vector.extract_strided_slice %147 {offsets = [72, 0], sizes = [8, 256], strides = [1, 1]} : vector<112x256xf32> to vector<8x256xf32>
    %178 = arith.maximumf %176, %177 : vector<8x256xf32>
    %cst_108 = arith.constant 0.000000e+00 : f32
    %179 = vector.broadcast %cst_108 : f32 to vector<8x256xf32>
    %180 = arith.maximumf %178, %179 : vector<8x256xf32>
    %c40_109 = arith.constant 40 : index
    %c0_110 = arith.constant 0 : index
    %181 = vector.load %arg17[%c40_109, %c0_110] : memref<72x256xf32, #tpu.memory_space<vmem>>, vector<8x256xf32>
    tpu.vector_store %arg17[%c40_109, %c0_110], %180 {strides = array<i32>} : memref<72x256xf32, #tpu.memory_space<vmem>>, vector<8x256xf32>,
    %182 = vector.extract_strided_slice %147 {offsets = [80, 0], sizes = [8, 256], strides = [1, 1]} : vector<112x256xf32> to vector<8x256xf32>
    %183 = vector.extract_strided_slice %147 {offsets = [88, 0], sizes = [8, 256], strides = [1, 1]} : vector<112x256xf32> to vector<8x256xf32>
    %184 = arith.maximumf %182, %183 : vector<8x256xf32>
    %cst_111 = arith.constant 0.000000e+00 : f32
    %185 = vector.broadcast %cst_111 : f32 to vector<8x256xf32>
    %186 = arith.maximumf %184, %185 : vector<8x256xf32>
    %c48_112 = arith.constant 48 : index
    %c0_113 = arith.constant 0 : index
    %187 = vector.load %arg17[%c48_112, %c0_113] : memref<72x256xf32, #tpu.memory_space<vmem>>, vector<8x256xf32>
    tpu.vector_store %arg17[%c48_112, %c0_113], %186 {strides = array<i32>} : memref<72x256xf32, #tpu.memory_space<vmem>>, vector<8x256xf32>,
    %188 = vector.extract_strided_slice %147 {offsets = [96, 0], sizes = [8, 256], strides = [1, 1]} : vector<112x256xf32> to vector<8x256xf32>
    %189 = vector.extract_strided_slice %147 {offsets = [104, 0], sizes = [8, 256], strides = [1, 1]} : vector<112x256xf32> to vector<8x256xf32>
    %190 = arith.maximumf %188, %189 : vector<8x256xf32>
    %cst_114 = arith.constant 0.000000e+00 : f32
    %191 = vector.broadcast %cst_114 : f32 to vector<8x256xf32>
    %192 = arith.maximumf %190, %191 : vector<8x256xf32>
    %c56_115 = arith.constant 56 : index
    %c0_116 = arith.constant 0 : index
    %193 = vector.load %arg17[%c56_115, %c0_116] : memref<72x256xf32, #tpu.memory_space<vmem>>, vector<8x256xf32>
    tpu.vector_store %arg17[%c56_115, %c0_116], %192 {strides = array<i32>} : memref<72x256xf32, #tpu.memory_space<vmem>>, vector<8x256xf32>,
    %cst_117 = arith.constant 0.000000e+00 : f32
    %194 = vector.broadcast %cst_117 : f32 to vector<56x256xf32>
    %c0_118 = arith.constant 0 : index
    %c0_119 = arith.constant 0 : index
    %195 = vector.load %arg17[%c0_118, %c0_119] : memref<72x256xf32, #tpu.memory_space<vmem>>, vector<56x256xf32>
    %c0_120 = arith.constant 0 : index
    %c0_121 = arith.constant 0 : index
    %c0_122 = arith.constant 0 : index
    %196 = vector.load %arg6[%c0_120, %c0_121, %c0_122] : memref<3x256x256xf32, #tpu.memory_space<vmem>>, vector<1x256x256xf32>
    %197 = vector.shape_cast %196 : vector<1x256x256xf32> to vector<256x256xf32>
    %cst_123 = arith.constant dense<0.000000e+00> : vector<56x256xf32>
    %198 = tpu.matmul %195, %197, %cst_123 {dimension_numbers = #tpu.dot_dimension_numbers<[1], [0], [0], [1], [0, 0, 1, 1], [], []>} : vector<56x256xf32>, vector<256x256xf32>, vector<56x256xf32> -> vector<56x256xf32>
    %199 = arith.addf %194, %198 : vector<56x256xf32>
    %c8_124 = arith.constant 8 : index
    %c0_125 = arith.constant 0 : index
    %200 = vector.load %arg17[%c8_124, %c0_125] : memref<72x256xf32, #tpu.memory_space<vmem>>, vector<56x256xf32>
    %c1_126 = arith.constant 1 : index
    %c0_127 = arith.constant 0 : index
    %c0_128 = arith.constant 0 : index
    %201 = vector.load %arg6[%c1_126, %c0_127, %c0_128] : memref<3x256x256xf32, #tpu.memory_space<vmem>>, vector<1x256x256xf32>
    %202 = vector.shape_cast %201 : vector<1x256x256xf32> to vector<256x256xf32>
    %cst_129 = arith.constant dense<0.000000e+00> : vector<56x256xf32>
    %203 = tpu.matmul %200, %202, %cst_129 {dimension_numbers = #tpu.dot_dimension_numbers<[1], [0], [0], [1], [0, 0, 1, 1], [], []>} : vector<56x256xf32>, vector<256x256xf32>, vector<56x256xf32> -> vector<56x256xf32>
    %204 = arith.addf %199, %203 : vector<56x256xf32>
    %c16_130 = arith.constant 16 : index
    %c0_131 = arith.constant 0 : index
    %205 = vector.load %arg17[%c16_130, %c0_131] : memref<72x256xf32, #tpu.memory_space<vmem>>, vector<56x256xf32>
    %c2_132 = arith.constant 2 : index
    %c0_133 = arith.constant 0 : index
    %c0_134 = arith.constant 0 : index
    %206 = vector.load %arg6[%c2_132, %c0_133, %c0_134] : memref<3x256x256xf32, #tpu.memory_space<vmem>>, vector<1x256x256xf32>
    %207 = vector.shape_cast %206 : vector<1x256x256xf32> to vector<256x256xf32>
    %cst_135 = arith.constant dense<0.000000e+00> : vector<56x256xf32>
    %208 = tpu.matmul %205, %207, %cst_135 {dimension_numbers = #tpu.dot_dimension_numbers<[1], [0], [0], [1], [0, 0, 1, 1], [], []>} : vector<56x256xf32>, vector<256x256xf32>, vector<56x256xf32> -> vector<56x256xf32>
    %209 = arith.addf %204, %208 : vector<56x256xf32>
    %c0_136 = arith.constant 0 : index
    %c0_137 = arith.constant 0 : index
    %210 = vector.load %arg7[%c0_136, %c0_137] : memref<1x256xf32, #tpu.memory_space<vmem>>, vector<1x256xf32>
    %211 = vector.broadcast %210 : vector<1x256xf32> to vector<56x256xf32>
    %212 = arith.addf %209, %211 : vector<56x256xf32>
    %213 = vector.extract_strided_slice %212 {offsets = [0, 0], sizes = [56, 128], strides = [1, 1]} : vector<56x256xf32> to vector<56x128xf32>
    %214 = vector.extract_strided_slice %212 {offsets = [0, 128], sizes = [56, 128], strides = [1, 1]} : vector<56x256xf32> to vector<56x128xf32>
    %215 = arith.maximumf %213, %214 : vector<56x128xf32>
    %cst_138 = arith.constant 0.000000e+00 : f32
    %216 = vector.broadcast %cst_138 : f32 to vector<8x128xf32>
    %c0_139 = arith.constant 0 : index
    %c0_140 = arith.constant 0 : index
    %217 = vector.load %arg9[%c0_139, %c0_140] : memref<1x128xf32, #tpu.memory_space<vmem>>, vector<1x128xf32>
    %218 = vector.broadcast %217 : vector<1x128xf32> to vector<8x128xf32>
    %219 = arith.addf %216, %218 : vector<8x128xf32>
    %220 = vector.extract_strided_slice %215 {offsets = [0, 0], sizes = [8, 128], strides = [1, 1]} : vector<56x128xf32> to vector<8x128xf32>
    %221 = vector.extract_strided_slice %215 {offsets = [8, 0], sizes = [8, 128], strides = [1, 1]} : vector<56x128xf32> to vector<8x128xf32>
    %222 = arith.maximumf %220, %221 : vector<8x128xf32>
    %cst_141 = arith.constant 0.000000e+00 : f32
    %223 = vector.broadcast %cst_141 : f32 to vector<8x128xf32>
    %224 = arith.maximumf %222, %223 : vector<8x128xf32>
    %c0_142 = arith.constant 0 : index
    %c0_143 = arith.constant 0 : index
    %c0_144 = arith.constant 0 : index
    %225 = vector.load %arg8[%c0_142, %c0_143, %c0_144] : memref<3x128x128xf32, #tpu.memory_space<vmem>>, vector<1x128x128xf32>
    %226 = vector.shape_cast %225 : vector<1x128x128xf32> to vector<128x128xf32>
    %cst_145 = arith.constant dense<0.000000e+00> : vector<8x128xf32>
    %227 = tpu.matmul %224, %226, %cst_145 {dimension_numbers = #tpu.dot_dimension_numbers<[1], [0], [0], [1], [0, 0, 1, 1], [], []>} : vector<8x128xf32>, vector<128x128xf32>, vector<8x128xf32> -> vector<8x128xf32>
    %228 = arith.addf %219, %227 : vector<8x128xf32>
    %229 = vector.extract_strided_slice %215 {offsets = [16, 0], sizes = [8, 128], strides = [1, 1]} : vector<56x128xf32> to vector<8x128xf32>
    %230 = vector.extract_strided_slice %215 {offsets = [24, 0], sizes = [8, 128], strides = [1, 1]} : vector<56x128xf32> to vector<8x128xf32>
    %231 = arith.maximumf %229, %230 : vector<8x128xf32>
    %cst_146 = arith.constant 0.000000e+00 : f32
    %232 = vector.broadcast %cst_146 : f32 to vector<8x128xf32>
    %233 = arith.maximumf %231, %232 : vector<8x128xf32>
    %c1_147 = arith.constant 1 : index
    %c0_148 = arith.constant 0 : index
    %c0_149 = arith.constant 0 : index
    %234 = vector.load %arg8[%c1_147, %c0_148, %c0_149] : memref<3x128x128xf32, #tpu.memory_space<vmem>>, vector<1x128x128xf32>
    %235 = vector.shape_cast %234 : vector<1x128x128xf32> to vector<128x128xf32>
    %cst_150 = arith.constant dense<0.000000e+00> : vector<8x128xf32>
    %236 = tpu.matmul %233, %235, %cst_150 {dimension_numbers = #tpu.dot_dimension_numbers<[1], [0], [0], [1], [0, 0, 1, 1], [], []>} : vector<8x128xf32>, vector<128x128xf32>, vector<8x128xf32> -> vector<8x128xf32>
    %237 = arith.addf %228, %236 : vector<8x128xf32>
    %238 = vector.extract_strided_slice %215 {offsets = [32, 0], sizes = [8, 128], strides = [1, 1]} : vector<56x128xf32> to vector<8x128xf32>
    %239 = vector.extract_strided_slice %215 {offsets = [40, 0], sizes = [8, 128], strides = [1, 1]} : vector<56x128xf32> to vector<8x128xf32>
    %240 = arith.maximumf %238, %239 : vector<8x128xf32>
    %cst_151 = arith.constant 0.000000e+00 : f32
    %241 = vector.broadcast %cst_151 : f32 to vector<8x128xf32>
    %242 = arith.maximumf %240, %241 : vector<8x128xf32>
    %c2_152 = arith.constant 2 : index
    %c0_153 = arith.constant 0 : index
    %c0_154 = arith.constant 0 : index
    %243 = vector.load %arg8[%c2_152, %c0_153, %c0_154] : memref<3x128x128xf32, #tpu.memory_space<vmem>>, vector<1x128x128xf32>
    %244 = vector.shape_cast %243 : vector<1x128x128xf32> to vector<128x128xf32>
    %cst_155 = arith.constant dense<0.000000e+00> : vector<8x128xf32>
    %245 = tpu.matmul %242, %244, %cst_155 {dimension_numbers = #tpu.dot_dimension_numbers<[1], [0], [0], [1], [0, 0, 1, 1], [], []>} : vector<8x128xf32>, vector<128x128xf32>, vector<8x128xf32> -> vector<8x128xf32>
    %246 = arith.addf %237, %245 : vector<8x128xf32>
    %c0_156 = arith.constant 0 : index
    %c0_157 = arith.constant 0 : index
    %247 = vector.load %arg10[%c0_156, %c0_157] : memref<128x64xf32, #tpu.memory_space<vmem>>, vector<128x64xf32>
    %cst_158 = arith.constant dense<0.000000e+00> : vector<8x64xf32>
    %248 = tpu.matmul %246, %247, %cst_158 {dimension_numbers = #tpu.dot_dimension_numbers<[1], [0], [0], [1], [0, 0, 1, 1], [], []>} : vector<8x128xf32>, vector<128x64xf32>, vector<8x64xf32> -> vector<8x64xf32>
    %c0_159 = arith.constant 0 : index
    %c0_160 = arith.constant 0 : index
    %249 = vector.load %arg11[%c0_159, %c0_160] : memref<1x64xf32, #tpu.memory_space<vmem>>, vector<1x64xf32>
    %250 = vector.broadcast %249 : vector<1x64xf32> to vector<8x64xf32>
    %251 = arith.addf %248, %250 : vector<8x64xf32>
    %c0_161 = arith.constant 0 : index
    %c0_162 = arith.constant 0 : index
    %252 = vector.load %arg12[%c0_161, %c0_162] : memref<64x128xf32, #tpu.memory_space<vmem>>, vector<64x128xf32>
    %cst_163 = arith.constant dense<0.000000e+00> : vector<8x128xf32>
    %253 = tpu.matmul %251, %252, %cst_163 {dimension_numbers = #tpu.dot_dimension_numbers<[1], [0], [0], [1], [0, 0, 1, 1], [], []>} : vector<8x64xf32>, vector<64x128xf32>, vector<8x128xf32> -> vector<8x128xf32>
    %c0_164 = arith.constant 0 : index
    %c0_165 = arith.constant 0 : index
    %254 = vector.load %arg13[%c0_164, %c0_165] : memref<1x128xf32, #tpu.memory_space<vmem>>, vector<1x128xf32>
    %255 = vector.broadcast %254 : vector<1x128xf32> to vector<8x128xf32>
    %256 = arith.addf %253, %255 : vector<8x128xf32>
    %257 = tpu.iota {dimensions = array<i32: 1>} : vector<8x128xi32>
    %c10_i32 = arith.constant 10 : i32
    %258 = vector.broadcast %c10_i32 : i32 to vector<8x128xi32>
    %259 = arith.cmpi slt, %257, %258 : vector<8x128xi32>
    %cst_166 = arith.constant -1.000000e+30 : f32
    %260 = vector.broadcast %cst_166 : f32 to vector<8x128xf32>
    %261 = arith.select %259, %256, %260 : vector<8x128xi1>, vector<8x128xf32>
    %cst_167 = arith.constant dense<0xFF800000> : vector<8xf32>
    %262 = vector.multi_reduction <maximumf>, %261, %cst_167 [1] : vector<8x128xf32> to vector<8xf32>
    %263 = vector.shape_cast %262 : vector<8xf32> to vector<8x1xf32>
    %264 = vector.broadcast %263 : vector<8x1xf32> to vector<8x128xf32>
    %265 = arith.subf %261, %264 : vector<8x128xf32>
    %266 = math.exp %265 : vector<8x128xf32>
    %cst_168 = arith.constant dense<0.000000e+00> : vector<8xf32>
    %267 = vector.multi_reduction <add>, %266, %cst_168 [1] : vector<8x128xf32> to vector<8xf32>
    %268 = vector.shape_cast %267 : vector<8xf32> to vector<8x1xf32>
    %269 = math.log %268 : vector<8x1xf32>
    %270 = vector.broadcast %269 : vector<8x1xf32> to vector<8x128xf32>
    %271 = arith.subf %265, %270 : vector<8x128xf32>
    %c0_169 = arith.constant 0 : index
    %c0_170 = arith.constant 0 : index
    %272 = vector.load %arg14[%c0_169, %c0_170] : memref<8x128xf32, #tpu.memory_space<vmem>>, vector<8x128xf32>
    tpu.vector_store %arg14[%c0_169, %c0_170], %271 {strides = array<i32>} : memref<8x128xf32, #tpu.memory_space<vmem>>, vector<8x128xf32>,
    return
  }
  func.func @transform_0(%arg0: i32) -> (i32, i32) {
    %c0_i32 = arith.constant 0 : i32
    %c0_i32_0 = arith.constant 0 : i32
    return %arg0, %c0_i32 : i32, i32
  }
  func.func @transform_1(%arg0: i32) -> (i32, i32, i32) {
    %c0_i32 = arith.constant 0 : i32
    %c0_i32_0 = arith.constant 0 : i32
    %c0_i32_1 = arith.constant 0 : i32
    %c0_i32_2 = arith.constant 0 : i32
    return %c0_i32, %c0_i32_0, %c0_i32_1 : i32, i32, i32
  }
  func.func @transform_2(%arg0: i32) -> (i32, i32) {
    %c0_i32 = arith.constant 0 : i32
    %c0_i32_0 = arith.constant 0 : i32
    %c0_i32_1 = arith.constant 0 : i32
    return %c0_i32, %c0_i32_0 : i32, i32
  }
  func.func @transform_3(%arg0: i32) -> (i32, i32, i32) {
    %c0_i32 = arith.constant 0 : i32
    %c0_i32_0 = arith.constant 0 : i32
    %c0_i32_1 = arith.constant 0 : i32
    %c0_i32_2 = arith.constant 0 : i32
    return %c0_i32, %c0_i32_0, %c0_i32_1 : i32, i32, i32
  }
  func.func @transform_4(%arg0: i32) -> (i32, i32) {
    %c0_i32 = arith.constant 0 : i32
    %c0_i32_0 = arith.constant 0 : i32
    %c0_i32_1 = arith.constant 0 : i32
    return %c0_i32, %c0_i32_0 : i32, i32
  }
  func.func @transform_5(%arg0: i32) -> (i32, i32, i32) {
    %c0_i32 = arith.constant 0 : i32
    %c0_i32_0 = arith.constant 0 : i32
    %c0_i32_1 = arith.constant 0 : i32
    %c0_i32_2 = arith.constant 0 : i32
    return %c0_i32, %c0_i32_0, %c0_i32_1 : i32, i32, i32
  }
  func.func @transform_6(%arg0: i32) -> (i32, i32) {
    %c0_i32 = arith.constant 0 : i32
    %c0_i32_0 = arith.constant 0 : i32
    %c0_i32_1 = arith.constant 0 : i32
    return %c0_i32, %c0_i32_0 : i32, i32
  }
  func.func @transform_7(%arg0: i32) -> (i32, i32, i32) {
    %c0_i32 = arith.constant 0 : i32
    %c0_i32_0 = arith.constant 0 : i32
    %c0_i32_1 = arith.constant 0 : i32
    %c0_i32_2 = arith.constant 0 : i32
    return %c0_i32, %c0_i32_0, %c0_i32_1 : i32, i32, i32
  }
  func.func @transform_8(%arg0: i32) -> (i32, i32) {
    %c0_i32 = arith.constant 0 : i32
    %c0_i32_0 = arith.constant 0 : i32
    %c0_i32_1 = arith.constant 0 : i32
    return %c0_i32, %c0_i32_0 : i32, i32
  }
  func.func @transform_9(%arg0: i32) -> (i32, i32) {
    %c0_i32 = arith.constant 0 : i32
    %c0_i32_0 = arith.constant 0 : i32
    %c0_i32_1 = arith.constant 0 : i32
    return %c0_i32, %c0_i32_0 : i32, i32
  }
  func.func @transform_10(%arg0: i32) -> (i32, i32) {
    %c0_i32 = arith.constant 0 : i32
    %c0_i32_0 = arith.constant 0 : i32
    %c0_i32_1 = arith.constant 0 : i32
    return %c0_i32, %c0_i32_0 : i32, i32
  }
  func.func @transform_11(%arg0: i32) -> (i32, i32) {
    %c0_i32 = arith.constant 0 : i32
    %c0_i32_0 = arith.constant 0 : i32
    %c0_i32_1 = arith.constant 0 : i32
    return %c0_i32, %c0_i32_0 : i32, i32
  }
  func.func @transform_12(%arg0: i32) -> (i32, i32) {
    %c0_i32 = arith.constant 0 : i32
    %c0_i32_0 = arith.constant 0 : i32
    %c0_i32_1 = arith.constant 0 : i32
    return %c0_i32, %c0_i32_0 : i32, i32
  }
  func.func @transform_13(%arg0: i32) -> (i32, i32) {
    %c0_i32 = arith.constant 0 : i32
    %c0_i32_0 = arith.constant 0 : i32
    return %arg0, %c0_i32 : i32, i32
  }
}

</mosaic_0001>

<bundles_post_ra>
// kernel: cnn_mnistm_forward.1
= control target key start
LH: loop header
LB: loop body
LE: loop exit
PB: predicated region body
PF: predicated region fallthrough
CT: control target
= control target key end

     0   :  { %vm44_vm0 = vcmask 687104   ;;  %v24029_v3 = vmov 0.0   ;;  %vm395_vm1 = vcmask 1043456   ;;  %vm15562_vm2 = vmmov 0   ;;  %s24015_s1 = inlined_call_operand.vmem [shape: f32[5,84,1024], index: 1, kind: input, shape index: {}]   ;;  %s24016_s0 = inlined_call_operand.vmem [shape: f32[224,84], index: 0, kind: input, shape index: {}]   ;;  %s24017_s3 = inlined_call_operand.vmem [shape: f32[3,512,512], index: 3, kind: input, shape index: {}]   ;;  %s24018_s2 = inlined_call_operand.vmem [shape: f32[1,1024], index: 2, kind: input, shape index: {}]   ;;  %s24019_s5 = inlined_call_operand.vmem [shape: f32[3,256,256], index: 5, kind: input, shape index: {}]   ;;  %s24020_s4 = inlined_call_operand.vmem [shape: f32[1,512], index: 4, kind: input, shape index: {}]   ;;  %s24021_s7 = inlined_call_operand.vmem [shape: f32[3,128,128], index: 7, kind: input, shape index: {}]   ;;  %s24022_s6 = inlined_call_operand.vmem [shape: f32[1,256], index: 6, kind: input, shape index: {}]   ;;  %s24023_s9 = inlined_call_operand.vmem [shape: f32[128,64], index: 9, kind: input, shape index: {}]   ;;  %s24024_s11 = inlined_call_operand.vmem [shape: f32[64,128], index: 11, kind: input, shape index: {}]   ;;  %s24025_s8 = inlined_call_operand.vmem [shape: f32[1,128], index: 8, kind: input, shape index: {}]   ;;  %s24026_s10 = inlined_call_operand.vmem [shape: f32[1,64], index: 10, kind: input, shape index: {}]   ;;  %s24027_s12 = inlined_call_operand.vmem [shape: f32[1,128], index: 12, kind: input, shape index: {}]   ;;  %s24028_s13 = inlined_call_operand.vmem [shape: f32[8,128], index: 13, kind: output, shape index: {}]  }
   0x1   :  { %v10950_v0 = vld [vmem:[%s24015_s1 + $0x2c8] sm:$0xff]  ;;  %v10949_v2 = vld [vmem:[%s24015_s1 + $0x2c0] sm:$0xff]  ;;  %484 = vmatprep.mubr.f32.mxu0 %v24029_v3  ;;  %616 = vmatprep.mubr.f32.mxu1 %v24029_v3  ;;  %46 = vst.msk [vmem:[#allocation2 + $0x8] sm:$0xff] %vm44_vm0, %v24029_v3  ;;  %45 = vst.msk [vmem:[#allocation2] sm:$0xff] %vm44_vm0, %v24029_v3  ;;  %vm10856_vm3 = vcmask 523264  }
   0x2   :  { %v10958_v1 = vld [vmem:[%s24015_s1 + $0x308] sm:$0xff]  ;;  %47 = vst.msk [vmem:[#allocation2 + $0xf0] sm:$0xff] %vm44_vm0, %v24029_v3  ;;  %48 = vst.msk [vmem:[#allocation2 + $0xf8] sm:$0xff] %vm44_vm0, %v24029_v3  ;;  %v10957_v5 = vld [vmem:[%s24015_s1 + $0x300] sm:$0xff] }
   0x3   :  { %v12813_v4 = vpack.c.bf16 %v10958_v1, %v10950_v0  ;;  %v10966_v6 = vld [vmem:[%s24015_s1 + $0x348] sm:$0xff]  ;;  %v12815_v8 = vpack.c.bf16 %v10957_v5, %v10949_v2  ;;  %v10965_v10 = vld [vmem:[%s24015_s1 + $0x340] sm:$0xff]  ;;  %v71_v28 = vld [vmem:[%s24016_s0 + $0xb0] sm:$0xff] }
   0x4   :  { %v10974_v7 = vld [vmem:[%s24015_s1 + $0x388] sm:$0xff]  ;;  %v10973_v11 = vld [vmem:[%s24015_s1 + $0x380] sm:$0xff]  ;;  %99 = vst.msk [vmem:[#allocation2 + $0xc0] sm:$0xff] %vm44_vm0, %v71_v28  ;;  %v72_v34 = vld [vmem:[%s24016_s0 + $0xb8] sm:$0xff] }
   0x5   :  { %v12817_v9 = vpack.c.bf16 %v10974_v7, %v10966_v6  ;;  %v10982_v12 = vld [vmem:[%s24015_s1 + $0x3c8] sm:$0xff]  ;;  %12814 = vmatprep.subr.bf16.mxu0 %v12813_v4  ;;  %14281 = vmatprep.subr.bf16.mxu1 %v12813_v4  ;;  %v12819_v14 = vpack.c.bf16 %v10973_v11, %v10965_v10  ;;  %v10981_v16 = vld [vmem:[%s24015_s1 + $0x3c0] sm:$0xff]  ;;  %100 = vst.msk [vmem:[#allocation2 + $0xc8] sm:$0xff] %vm44_vm0, %v72_v34  ;;  %v51_v35 = vld [vmem:[%s24016_s0 + $0x10] sm:$0xff] }
   0x6   :  { %v10990_v13 = vld [vmem:[%s24015_s1 + $0x408] sm:$0xff]  ;;  %12816 = vmatpush1.bf16.msra.mxu0 %v12815_v8  ;;  %14287 = vmatpush1.bf16.msra.mxu1 %v12815_v8  ;;  %v10989_v17 = vld [vmem:[%s24015_s1 + $0x400] sm:$0xff]  ;;  %79 = vst.msk [vmem:[#allocation2 + $0x20] sm:$0xff] %vm44_vm0, %v51_v35  ;;  %v52_v38 = vld [vmem:[%s24016_s0 + $0x18] sm:$0xff] }
   0x7   :  { %12818 = vmatprep.subr.bf16.mxu0 %v12817_v9  ;;  %14282 = vmatprep.subr.bf16.mxu1 %v12817_v9  ;;  %v12821_v15 = vpack.c.bf16 %v10990_v13, %v10982_v12  ;;  %v10998_v18 = vld [vmem:[%s24015_s1 + $0x448] sm:$0xff]  ;;  %v12823_v21 = vpack.c.bf16 %v10989_v17, %v10981_v16  ;;  %v10997_v23 = vld [vmem:[%s24015_s1 + $0x440] sm:$0xff]  ;;  %80 = vst.msk [vmem:[#allocation2 + $0x28] sm:$0xff] %vm44_vm0, %v52_v38  ;;  %v10952_v44 = vld [vmem:[%s24015_s1 + $0x2d8] sm:$0xff] }
   0x8   :  { %v11006_v19 = vld [vmem:[%s24015_s1 + $0x488] sm:$0xff]  ;;  %v11005_v24 = vld [vmem:[%s24015_s1 + $0x480] sm:$0xff]  ;;  %v10960_v45 = vld [vmem:[%s24015_s1 + $0x318] sm:$0xff] }
   0x9   :  { %v70_v20 = vld [vmem:[%s24016_s0 + $0xa8] sm:$0xff]  ;;  %v12825_v22 = vpack.c.bf16 %v11006_v19, %v10998_v18  ;;  %v49_v27 = vld [vmem:[%s24016_s0] sm:$0xff]  ;;  %v12827_v29 = vpack.c.bf16 %v11005_v24, %v10997_v23  ;;  %v10951_v49 = vld [vmem:[%s24015_s1 + $0x2d0] sm:$0xff]  ;;  %v12833_v55 = vpack.c.bf16 %v10960_v45, %v10952_v44 }
   0xa   :  { %12820 = vmatpush1.bf16.msra.mxu0 %v12819_v14  ;;  %14288 = vmatpush1.bf16.msra.mxu1 %v12819_v14  ;;  %98 = vst.msk [vmem:[#allocation2 + $0xb8] sm:$0xff] %vm44_vm0, %v70_v20  ;;  %v11014_v25 = vld [vmem:[%s24015_s1 + $0x4c8] sm:$0xff]  ;;  %77 = vst.msk [vmem:[#allocation2 + $0x10] sm:$0xff] %vm44_vm0, %v49_v27  ;;  %v11013_v32 = vld [vmem:[%s24015_s1 + $0x4c0] sm:$0xff] }
   0xb   :  { %12822 = vmatprep.subr.bf16.mxu0 %v12821_v15  ;;  %14283 = vmatprep.subr.bf16.mxu1 %v12821_v15  ;;  %v11022_v26 = vld [vmem:[%s24015_s1 + $0x508] sm:$0xff]  ;;  %v11021_v33 = vld [vmem:[%s24015_s1 + $0x500] sm:$0xff]  ;;  %v10959_v50 = vld [vmem:[%s24015_s1 + $0x310] sm:$0xff] }
   0xc   :  { %v50_v30 = vld [vmem:[%s24016_s0 + $0x8] sm:$0xff]  ;;  %v12829_v31 = vpack.c.bf16 %v11022_v26, %v11014_v25  ;;  %v73_v36 = vld [vmem:[%s24016_s0 + $0xc0] sm:$0xff]  ;;  %v12831_v37 = vpack.c.bf16 %v11021_v33, %v11013_v32  ;;  %v10968_v51 = vld [vmem:[%s24015_s1 + $0x358] sm:$0xff]  ;;  %v12835_v62 = vpack.c.bf16 %v10959_v50, %v10951_v49 }
   0xd   :  { %78 = vst.msk [vmem:[#allocation2 + $0x18] sm:$0xff] %vm44_vm0, %v50_v30  ;;  %101 = vst.msk [vmem:[#allocation2 + $0xd0] sm:$0xff] %vm44_vm0, %v73_v36  ;;  %v11030_v39 = vld [vmem:[%s24015_s1 + $0x548] sm:$0xf]  ;;  %v11029_v42 = vld [vmem:[%s24015_s1 + $0x540] sm:$0xf] }
   0xe   :  { %12824 = vmatpush1.bf16.msra.mxu0 %v12823_v21  ;;  %14289 = vmatpush1.bf16.msra.mxu1 %v12823_v21  ;;  %v10954_v40 = vld [vmem:[%s24015_s1 + $0x2e8] sm:$0xff]  ;;  %v10953_v47 = vld [vmem:[%s24015_s1 + $0x2e0] sm:$0xff]  ;;  %v10976_v56 = vld [vmem:[%s24015_s1 + $0x398] sm:$0xff] }
   0xf   :  { %12826 = vmatprep.subr.bf16.mxu0 %v12825_v22  ;;  %14284 = vmatprep.subr.bf16.mxu1 %v12825_v22  ;;  %v74_v41 = vld [vmem:[%s24016_s0 + $0xc8] sm:$0xff]  ;;  %v10961_v48 = vld [vmem:[%s24015_s1 + $0x320] sm:$0xff]  ;;  %v75_v57 = vld [vmem:[%s24016_s0 + $0xd0] sm:$0xff]  ;;  %v12837_v9 = vpack.c.bf16 %v10976_v56, %v10968_v51 }
  0x10   :  { %v10962_v43 = vld [vmem:[%s24015_s1 + $0x328] sm:$0xff]  ;;  %102 = vst.msk [vmem:[#allocation2 + $0xd8] sm:$0xff] %vm44_vm0, %v74_v41  ;;  %v53_v52 = vld [vmem:[%s24016_s0 + $0x20] sm:$0xff]  ;;  %v12855_v58 = vpack.c.bf16 %v10961_v48, %v10953_v47  ;;  %v10967_v59 = vld [vmem:[%s24015_s1 + $0x350] sm:$0xff] }
  0x11   :  { %v15757_v46 = vld [vmem:[#allocation2 + $0x8] sm:$0xff]  ;;  %v15779_v53 = vld [vmem:[#allocation2 + $0xb8] sm:$0xff]  ;;  %v12853_v54 = vpack.c.bf16 %v10962_v43, %v10954_v40  ;;  %81 = vst.msk [vmem:[#allocation2 + $0x30] sm:$0xff] %vm44_vm0, %v53_v52  ;;  %v10975_v60 = vld [vmem:[%s24015_s1 + $0x390] sm:$0xff] }
  0x12   :  { %12828 = vmatpush1.bf16.msra.mxu0 %v12827_v29  ;;  %14290 = vmatpush1.bf16.msra.mxu1 %v12827_v29  ;;  %103 = vst.msk [vmem:[#allocation2 + $0xe0] sm:$0xff] %vm44_vm0, %v75_v57  ;;  %v54_v61 = vld [vmem:[%s24016_s0 + $0x28] sm:$0xff]  ;;  %v55_v1 = vld [vmem:[%s24016_s0 + $0x30] sm:$0xff]  ;;  %v10984_v4 = vld [vmem:[%s24015_s1 + $0x3d8] sm:$0xff]  ;;  %v12839_v16 = vpack.c.bf16 %v10975_v60, %v10967_v59 }
  0x13   :  { %12830 = vmatprep.subr.bf16.mxu0 %v12829_v31  ;;  %14285 = vmatprep.subr.bf16.mxu1 %v12829_v31  ;;  %v10970_v63 = vld [vmem:[%s24015_s1 + $0x368] sm:$0xff]  ;;  %82 = vst.msk [vmem:[#allocation2 + $0x38] sm:$0xff] %vm44_vm0, %v54_v61  ;;  %v15814_v2 = vld [vmem:[#allocation2 + $0x10] sm:$0xff]  ;;  %v10992_v5 = vld [vmem:[%s24015_s1 + $0x418] sm:$0xff] }
  0x14   :  { %v10978_v0 = vld [vmem:[%s24015_s1 + $0x3a8] sm:$0xff]  ;;  %v10969_v6 = vld [vmem:[%s24015_s1 + $0x360] sm:$0xff]  ;;  %83 = vst.msk [vmem:[#allocation2 + $0x40] sm:$0xff] %vm44_vm0, %v55_v1  ;;  %v56_v10 = vld [vmem:[%s24016_s0 + $0x38] sm:$0xff]  ;;  %v12841_v26 = vpack.c.bf16 %v10992_v5, %v10984_v4 }
  0x15   :  { %v10977_v7 = vld [vmem:[%s24015_s1 + $0x3a0] sm:$0xff]  ;;  %v10983_v12 = vld [vmem:[%s24015_s1 + $0x3d0] sm:$0xff]  ;;  %v12857_v14 = vpack.c.bf16 %v10978_v0, %v10970_v63  ;;  %84 = vst.msk [vmem:[#allocation2 + $0x48] sm:$0xff] %vm44_vm0, %v56_v10  ;;  %v58_v15 = vld [vmem:[%s24016_s0 + $0x48] sm:$0xff] }
  0x16   :  { %12832 = vmatpush1.bf16.msra.mxu0 %v12831_v37  ;;  %14291 = vmatpush1.bf16.msra.mxu1 %v12831_v37  ;;  %v15829_v8 = vld [vmem:[#allocation2 + $0xc0] sm:$0xff]  ;;  %v10991_v13 = vld [vmem:[%s24015_s1 + $0x410] sm:$0xff]  ;;  %v12859_v17 = vpack.c.bf16 %v10977_v7, %v10969_v6  ;;  %v10986_v18 = vld [vmem:[%s24015_s1 + $0x3e8] sm:$0xff]  ;;  %86 = vst.msk [vmem:[#allocation2 + $0x58] sm:$0xff] %vm44_vm0, %v58_v15 }
  0x17   :  { %11037 = vmatprep.subr.msk.mxu0 %vm395_vm1, %v11030_v39  ;;  %14286 = vmatprep.subr.msk.mxu1 %vm395_vm1, %v11030_v39  ;;  %v57_v11 = vld [vmem:[%s24016_s0 + $0x40] sm:$0xff]  ;;  %v10994_v19 = vld [vmem:[%s24015_s1 + $0x428] sm:$0xff]  ;;  %v59_v20 = vld [vmem:[%s24016_s0 + $0x50] sm:$0xff]  ;;  %v12843_v33 = vpack.c.bf16 %v10991_v13, %v10983_v12 }
  0x18   :  { %85 = vst.msk [vmem:[#allocation2 + $0x50] sm:$0xff] %vm44_vm0, %v57_v11  ;;  %v11000_v21 = vld [vmem:[%s24015_s1 + $0x458] sm:$0xff]  ;;  %v10985_v22 = vld [vmem:[%s24015_s1 + $0x3e0] sm:$0xff]  ;;  %87 = vst.msk [vmem:[#allocation2 + $0x60] sm:$0xff] %vm44_vm0, %v59_v20  ;;  %v12861_v30 = vpack.c.bf16 %v10994_v19, %v10986_v18 }
  0x19   :  { %v10993_v23 = vld [vmem:[%s24015_s1 + $0x420] sm:$0xff]  ;;  %v15875_v24 = vld [vmem:[#allocation2 + $0x18] sm:$0xff]  ;;  %v15877_v25 = vld [vmem:[#allocation2 + $0xc8] sm:$0xff] }
  0x1a   :  { %11038 = vmatpush1.msk.msra.mxu0 %vm395_vm1, %v11029_v42  ;;  %14292 = vmatpush1.msk.msra.mxu1 %vm395_vm1, %v11029_v42  ;;  %v11008_v27 = vld [vmem:[%s24015_s1 + $0x498] sm:$0xff]  ;;  %v10999_v28 = vld [vmem:[%s24015_s1 + $0x450] sm:$0xff]  ;;  %v61_v32 = vld [vmem:[%s24016_s0 + $0x60] sm:$0xff]  ;;  %v12863_v34 = vpack.c.bf16 %v10993_v23, %v10985_v22 }
  0x1b   :  { %11039 = vmatmul.mubr.msk.f32.vlgmr.msra.gmra.mrb[0].mxu0 %vm44_vm0, %v15757_v46  ;;  %11061 = vmatmul.mubr.msk.f32.vlgmr.msra.gmra.mrb[0].mxu1 %vm44_vm0, %v15779_v53  ;;  %v11007_v29 = vld [vmem:[%s24015_s1 + $0x490] sm:$0xff]  ;;  %v60_v31 = vld [vmem:[%s24016_s0 + $0x58] sm:$0xff]  ;;  %v11002_v35 = vld [vmem:[%s24015_s1 + $0x468] sm:$0xff]  ;;  %89 = vst.msk [vmem:[#allocation2 + $0x70] sm:$0xff] %vm44_vm0, %v61_v32  ;;  %v12845_v44 = vpack.c.bf16 %v11008_v27, %v11000_v21 }
  0x1c   :  { %12854 = vmatprep.subr.bf16.mxu0 %v12853_v54  ;;  %12834 = vmatprep.subr.bf16.mxu1 %v12833_v55  ;;  %v11010_v36 = vld [vmem:[%s24015_s1 + $0x4a8] sm:$0xff]  ;;  %88 = vst.msk [vmem:[#allocation2 + $0x68] sm:$0xff] %vm44_vm0, %v60_v31  ;;  %v11016_v38 = vld [vmem:[%s24015_s1 + $0x4d8] sm:$0xff]  ;;  %v11001_v40 = vld [vmem:[%s24015_s1 + $0x460] sm:$0xff]  ;;  %v12847_v51 = vpack.c.bf16 %v11007_v29, %v10999_v28 }
  0x1d   :  { %12856 = vmatpush1.bf16.msra.mxu0 %v12855_v58  ;;  %490 = vmatprep.mubr.f32.mxu0 %v24029_v3  ;;  %v62_v37 = vld [vmem:[%s24016_s0 + $0x68] sm:$0xff]  ;;  %v11024_v39 = vld [vmem:[%s24015_s1 + $0x518] sm:$0xff]  ;;  %v11009_v41 = vld [vmem:[%s24015_s1 + $0x4a0] sm:$0xff]  ;;  %v12865_v49 = vpack.c.bf16 %v11010_v36, %v11002_v35 }
  0x1e   :  { %622 = vmatprep.mubr.f32.mxu1 %v24029_v3  ;;  %12836 = vmatpush1.bf16.msra.mxu1 %v12835_v62  ;;  %90 = vst.msk [vmem:[#allocation2 + $0x78] sm:$0xff] %vm44_vm0, %v62_v37  ;;  %v15924_v42 = vld [vmem:[#allocation2 + $0x20] sm:$0xff]  ;;  %v15926_v43 = vld [vmem:[#allocation2 + $0xd0] sm:$0xff]  ;;  %v11018_v50 = vld [vmem:[%s24015_s1 + $0x4e8] sm:$0xff]  ;;  %v12867_v52 = vpack.c.bf16 %v11009_v41, %v11001_v40  ;;  %v12849_v62 = vpack.c.bf16 %v11024_v39, %v11016_v38 }
  0x1f   :  { %11040 = vmatmul.mubr.msk.f32.gmra.mrb[2].mxu0 %vm44_vm0, %v15814_v2  ;;  %11062 = vmatmul.mubr.msk.f32.gmra.mrb[2].mxu1 %vm44_vm0, %v15829_v8  ;;  %v63_v45 = vld [vmem:[%s24016_s0 + $0x70] sm:$0xff]  ;;  %v11026_v54 = vld [vmem:[%s24015_s1 + $0x528] sm:$0xff]  ;;  %v11017_v55 = vld [vmem:[%s24015_s1 + $0x4e0] sm:$0xff] }
  0x20   :  { %12838 = vmatprep.subr.bf16.mxu1 %v12837_v9  ;;  %496 = vmatprep.mubr.f32.mxu0 %v24029_v3  ;;  %v11015_v47 = vld [vmem:[%s24015_s1 + $0x4d0] sm:$0xff]  ;;  %91 = vst.msk [vmem:[#allocation2 + $0x80] sm:$0xff] %vm44_vm0, %v63_v45  ;;  %v11025_v56 = vld [vmem:[%s24015_s1 + $0x520] sm:$0xff]  ;;  %v64_v57 = vld [vmem:[%s24016_s0 + $0x78] sm:$0xff]  ;;  %v12869_v0 = vpack.c.bf16 %v11026_v54, %v11018_v50 }
  0x21   :  { %628 = vmatprep.mubr.f32.mxu1 %v24029_v3  ;;  %12858 = vmatprep.subr.bf16.mxu0 %v12857_v14  ;;  %v11023_v48 = vld [vmem:[%s24015_s1 + $0x510] sm:$0xff]  ;;  %v65_v58 = vld [vmem:[%s24016_s0 + $0x80] sm:$0xff]  ;;  %v66_v59 = vld [vmem:[%s24016_s0 + $0x88] sm:$0xff]  ;;  %92 = vst.msk [vmem:[#allocation2 + $0x88] sm:$0xff] %vm44_vm0, %v64_v57  ;;  %v12871_v4 = vpack.c.bf16 %v11025_v56, %v11017_v55 }
  0x22   :  { %12840 = vmatpush1.bf16.msra.mxu1 %v12839_v16  ;;  %12860 = vmatpush1.bf16.msra.mxu0 %v12859_v17  ;;  %v15965_v60 = vld [vmem:[#allocation2 + $0x28] sm:$0xff]  ;;  %v15967_v61 = vld [vmem:[#allocation2 + $0xd8] sm:$0xff]  ;;  %93 = vst.msk [vmem:[#allocation2 + $0x90] sm:$0xff] %vm44_vm0, %v65_v58  ;;  %94 = vst.msk [vmem:[#allocation2 + $0x98] sm:$0xff] %vm44_vm0, %v66_v59  ;;  %v12851_v1 = vpack.c.bf16 %v11023_v48, %v11015_v47 }
  0x23   :  { %11041 = vmatmul.mubr.msk.f32.gmra.mrb[4].mxu0 %vm44_vm0, %v15875_v24  ;;  %11063 = vmatmul.mubr.msk.f32.gmra.mrb[4].mxu1 %vm44_vm0, %v15877_v25  ;;  %v67_v63 = vld [vmem:[%s24016_s0 + $0x90] sm:$0xff]  ;;  %v68_v5 = vld [vmem:[%s24016_s0 + $0x98] sm:$0xff]  ;;  %v69_v6 = vld [vmem:[%s24016_s0 + $0xa0] sm:$0xff] }
  0x24   :  { %12842 = vmatprep.subr.bf16.mxu1 %v12841_v26  ;;  %502 = vmatprep.mubr.f32.mxu0 %v24029_v3  ;;  %95 = vst.msk [vmem:[#allocation2 + $0xa0] sm:$0xff] %vm44_vm0, %v67_v63  ;;  %v15988_v7 = vld [vmem:[#allocation2 + $0x30] sm:$0xff]  ;;  %v15990_v9 = vld [vmem:[#allocation2 + $0xe0] sm:$0xff]  ;;  %v11032_v10 = vld [vmem:[%s24015_s1 + $0x558] sm:$0xf] }
  0x25   :  { %634 = vmatprep.mubr.f32.mxu1 %v24029_v3  ;;  %12862 = vmatprep.subr.bf16.mxu0 %v12861_v30  ;;  %96 = vst.msk [vmem:[#allocation2 + $0xa8] sm:$0xff] %vm44_vm0, %v68_v5  ;;  %97 = vst.msk [vmem:[#allocation2 + $0xb0] sm:$0xff] %vm44_vm0, %v69_v6  ;;  %v11031_v11 = vld [vmem:[%s24015_s1 + $0x550] sm:$0xf]  ;;  %v10956_v12 = vld [vmem:[%s24015_s1 + $0x2f8] sm:$0xff] }
  0x26   :  { %12844 = vmatpush1.bf16.msra.mxu1 %v12843_v33  ;;  %12864 = vmatpush1.bf16.msra.mxu0 %v12863_v34  ;;  %v10964_v13 = vld [vmem:[%s24015_s1 + $0x338] sm:$0xff]  ;;  %v11034_v14 = vld [vmem:[%s24015_s1 + $0x568] sm:$0xf]  ;;  %v10955_v17 = vld [vmem:[%s24015_s1 + $0x2f0] sm:$0xff] }
  0x27   :  { %11042 = vmatmul.mubr.msk.f32.gmra.mrb[6].mxu0 %vm44_vm0, %v15924_v42  ;;  %11064 = vmatmul.mubr.msk.f32.gmra.mrb[6].mxu1 %vm44_vm0, %v15926_v43  ;;  %v134_v15 = vld [vmem:[%s24015_s1 + $0x8] sm:$0xff]  ;;  %v10963_v18 = vld [vmem:[%s24015_s1 + $0x330] sm:$0xff]  ;;  %v11033_v19 = vld [vmem:[%s24015_s1 + $0x560] sm:$0xf]  ;;  %v12873_v21 = vpack.c.bf16 %v10964_v13, %v10956_v12 }
  0x28   :  { %12846 = vmatprep.subr.bf16.mxu1 %v12845_v44  ;;  %508 = vmatprep.mubr.f32.mxu0 %v24029_v3  ;;  %v142_v16 = vld [vmem:[%s24015_s1 + $0x48] sm:$0xff]  ;;  %v16031_v20 = vld [vmem:[#allocation2 + $0x38] sm:$0xff]  ;;  %v12875_v23 = vpack.c.bf16 %v10963_v18, %v10955_v17  ;;  %v10971_v28 = vld [vmem:[%s24015_s1 + $0x370] sm:$0xff] }
  0x29   :  { %640 = vmatprep.mubr.f32.mxu1 %v24029_v3  ;;  %12866 = vmatprep.subr.bf16.mxu0 %v12865_v49  ;;  %v12893_v22 = vpack.c.bf16 %v142_v16, %v134_v15  ;;  %v10972_v26 = vld [vmem:[%s24015_s1 + $0x378] sm:$0xff]  ;;  %v10979_v29 = vld [vmem:[%s24015_s1 + $0x3b0] sm:$0xff]  ;;  %v16055_v30 = vld [vmem:[#allocation2 + $0x40] sm:$0xff] }
  0x2a   :  { %12848 = vmatpush1.bf16.msra.mxu1 %v12847_v51  ;;  %12868 = vmatpush1.bf16.msra.mxu0 %v12867_v52  ;;  %v10980_v27 = vld [vmem:[%s24015_s1 + $0x3b8] sm:$0xff]  ;;  %v12879_v32 = vpack.c.bf16 %v10979_v29, %v10971_v28  ;;  %v10987_v35 = vld [vmem:[%s24015_s1 + $0x3f0] sm:$0xff]  ;;  %v16075_v37 = vld [vmem:[#allocation2 + $0x48] sm:$0xff] }
  0x2b   :  { %11043 = vmatmul.mubr.msk.f32.gmra.mrb[8].mxu0 %vm44_vm0, %v15965_v60  ;;  %11065 = vmatmul.mubr.msk.f32.gmra.mrb[8].mxu1 %vm44_vm0, %v15967_v61  ;;  %v12877_v31 = vpack.c.bf16 %v10980_v27, %v10972_v26  ;;  %v10988_v33 = vld [vmem:[%s24015_s1 + $0x3f8] sm:$0xff]  ;;  %v10995_v36 = vld [vmem:[%s24015_s1 + $0x430] sm:$0xff]  ;;  %v16123_v58 = vld [vmem:[#allocation2 + $0x60] sm:$0xff] }
  0x2c   :  { %12850 = vmatprep.subr.bf16.mxu1 %v12849_v62  ;;  %514 = vmatprep.mubr.f32.mxu0 %v24029_v3  ;;  %v10996_v34 = vld [vmem:[%s24015_s1 + $0x438] sm:$0xff]  ;;  %v12883_v39 = vpack.c.bf16 %v10995_v36, %v10987_v35  ;;  %v11003_v44 = vld [vmem:[%s24015_s1 + $0x470] sm:$0xff]  ;;  %v16209_v15 = vld [vmem:[#allocation2 + $0xa8] sm:$0xff] }
  0x2d   :  { %646 = vmatprep.mubr.f32.mxu1 %v24029_v3  ;;  %12870 = vmatprep.subr.bf16.mxu0 %v12869_v0  ;;  %v12881_v38 = vpack.c.bf16 %v10996_v34, %v10988_v33  ;;  %v11004_v40 = vld [vmem:[%s24015_s1 + $0x478] sm:$0xff]  ;;  %v11011_v45 = vld [vmem:[%s24015_s1 + $0x4b0] sm:$0xff]  ;;  %v133_v17 = vld [vmem:[%s24015_s1] sm:$0xff] }
  0x2e   :  { %12852 = vmatpush1.bf16.msra.mxu1 %v12851_v1  ;;  %12872 = vmatpush1.bf16.msra.mxu0 %v12871_v4  ;;  %v11012_v41 = vld [vmem:[%s24015_s1 + $0x4b8] sm:$0xff]  ;;  %v16095_v47 = vld [vmem:[#allocation2 + $0x50] sm:$0xff]  ;;  %v12887_v49 = vpack.c.bf16 %v11011_v45, %v11003_v44  ;;  %v16143_v1 = vld [vmem:[#allocation2 + $0x68] sm:$0xff] }
  0x2f   :  { %11044 = vmatmul.mubr.msk.f32.gmra.mrb[10].mxu0 %vm44_vm0, %v15988_v7  ;;  %11066 = vmatmul.mubr.msk.f32.gmra.mrb[10].mxu1 %vm44_vm0, %v15990_v9  ;;  %v12885_v48 = vpack.c.bf16 %v11012_v41, %v11004_v40  ;;  %v11020_v50 = vld [vmem:[%s24015_s1 + $0x4f8] sm:$0xff]  ;;  %v11019_v52 = vld [vmem:[%s24015_s1 + $0x4f0] sm:$0xff]  ;;  %v141_v18 = vld [vmem:[%s24015_s1 + $0x40] sm:$0xff] }
  0x30   :  { %11067 = vmatprep.subr.msk.mxu1 %vm395_vm1, %v11032_v10  ;;  %520 = vmatprep.mubr.f32.mxu0 %v24029_v3  ;;  %v11028_v51 = vld [vmem:[%s24015_s1 + $0x538] sm:$0xff]  ;;  %v11027_v54 = vld [vmem:[%s24015_s1 + $0x530] sm:$0xff]  ;;  %v16169_v10 = vld [vmem:[#allocation2 + $0x80] sm:$0xff] }
  0x31   :  { %717 = vmatprep.mubr.f32.mxu1 %v24029_v3  ;;  %11097 = vmatprep.subr.msk.mxu0 %vm395_vm1, %v11034_v14  ;;  %v16115_v55 = vld [vmem:[#allocation2 + $0x58] sm:$0xff]  ;;  %v12889_v56 = vpack.c.bf16 %v11028_v51, %v11020_v50  ;;  %v12891_v57 = vpack.c.bf16 %v11027_v54, %v11019_v52  ;;  %v11035_v0 = vld [vmem:[%s24015_s1 + $0x570] sm:$0xf]  ;;  %v16201_v14 = vld [vmem:[#allocation2 + $0xa0] sm:$0xff] }
  0x32   :  { %11068 = vmatpush1.msk.msra.mxu1 %vm395_vm1, %v11031_v11  ;;  %11098 = vmatpush1.msk.msra.mxu0 %vm395_vm1, %v11033_v19  ;;  %v11036_v59 = vld [vmem:[%s24015_s1 + $0x578] sm:$0xf]  ;;  %v16153_v5 = vld [vmem:[#allocation2 + $0x70] sm:$0xff]  ;;  %v16177_v11 = vld [vmem:[#allocation2 + $0x88] sm:$0xff] }
  0x33   :  { %11045 = vmatmul.mubr.msk.f32.gmra.mrb[12].mxu0 %vm44_vm0, %v16031_v20  ;;  %11069 = vmatmul.mubr.msk.f32.vlgmr.msra.gmra.mrb[12].mxu1 %vm44_vm0, %v15757_v46  ;;  %v136_v62 = vld [vmem:[%s24015_s1 + $0x18] sm:$0xff]  ;;  %v16185_v12 = vld [vmem:[#allocation2 + $0x90] sm:$0xff]  ;;  %v150_v19 = vld [vmem:[%s24015_s1 + $0x88] sm:$0xff] }
  0x34   :  { %526 = vmatprep.mubr.f32.mxu0 %v24029_v3  ;;  %723 = vmatprep.mubr.f32.mxu1 %v24029_v3  ;;  %v144_v63 = vld [vmem:[%s24015_s1 + $0x58] sm:$0xff]  ;;  %v16217_v16 = vld [vmem:[#allocation2 + $0xb0] sm:$0xff]  ;;  %v149_v26 = vld [vmem:[%s24015_s1 + $0x80] sm:$0xff] }
  0x35   :  { %12874 = vmatprep.subr.bf16.mxu1 %v12873_v21  ;;  %12894 = vmatprep.subr.bf16.mxu0 %v12893_v22  ;;  %v12913_v4 = vpack.c.bf16 %v144_v63, %v136_v62  ;;  %v16161_v6 = vld [vmem:[#allocation2 + $0x78] sm:$0xff]  ;;  %v158_v21 = vld [vmem:[%s24015_s1 + $0xc8] sm:$0xff]  ;;  %v12895_v22 = vpack.c.bf16 %v141_v18, %v133_v17  ;;  %v157_v27 = vld [vmem:[%s24015_s1 + $0xc0] sm:$0xff] }
  0x36   :  { %12876 = vmatpush1.bf16.msra.mxu1 %v12875_v23  ;;  %v16193_v13 = vld [vmem:[#allocation2 + $0x98] sm:$0xff]  ;;  %v12897_v23 = vpack.c.bf16 %v158_v21, %v150_v19  ;;  %v166_v28 = vld [vmem:[%s24015_s1 + $0x108] sm:$0xff]  ;;  %v165_v33 = vld [vmem:[%s24015_s1 + $0x100] sm:$0xff] }
  0x37   :  { %11046 = vmatmul.mubr.msk.f32.gmra.mrb[14].mxu0 %vm44_vm0, %v16055_v30  ;;  %11070 = vmatmul.mubr.msk.f32.gmra.mrb[14].mxu1 %vm44_vm0, %v15814_v2  ;;  %v174_v29 = vld [vmem:[%s24015_s1 + $0x148] sm:$0xff]  ;;  %v173_v34 = vld [vmem:[%s24015_s1 + $0x140] sm:$0xff]  ;;  %v135_v63 = vld [vmem:[%s24015_s1 + $0x10] sm:$0xff] }
  0x38   :  { %532 = vmatprep.mubr.f32.mxu0 %v24029_v3  ;;  %729 = vmatprep.mubr.f32.mxu1 %v24029_v3  ;;  %v182_v35 = vld [vmem:[%s24015_s1 + $0x188] sm:$0xff]  ;;  %v181_v40 = vld [vmem:[%s24015_s1 + $0x180] sm:$0xff]  ;;  %v160_v17 = vld [vmem:[%s24015_s1 + $0xd8] sm:$0xff] }
  0x39   :  { %12878 = vmatprep.subr.bf16.mxu1 %v12877_v31  ;;  %v12899_v31 = vpack.c.bf16 %v157_v27, %v149_v26  ;;  %v190_v36 = vld [vmem:[%s24015_s1 + $0x1c8] sm:$0xff]  ;;  %v189_v41 = vld [vmem:[%s24015_s1 + $0x1c0] sm:$0xff]  ;;  %v151_v21 = vld [vmem:[%s24015_s1 + $0x90] sm:$0xff] }
  0x3a   :  { %12880 = vmatpush1.bf16.msra.mxu1 %v12879_v32  ;;  %v12901_v32 = vpack.c.bf16 %v174_v29, %v166_v28  ;;  %v198_v44 = vld [vmem:[%s24015_s1 + $0x208] sm:$0xff]  ;;  %v197_v50 = vld [vmem:[%s24015_s1 + $0x200] sm:$0xff]  ;;  %v176_v26 = vld [vmem:[%s24015_s1 + $0x158] sm:$0xff] }
  0x3b   :  { %11047 = vmatmul.mubr.msk.f32.gmra.mrb[16].mxu0 %vm44_vm0, %v16075_v37  ;;  %11071 = vmatmul.mubr.msk.f32.gmra.mrb[16].mxu1 %vm44_vm0, %v15875_v24  ;;  %v206_v45 = vld [vmem:[%s24015_s1 + $0x248] sm:$0xff]  ;;  %v205_v51 = vld [vmem:[%s24015_s1 + $0x240] sm:$0xff]  ;;  %v175_v29 = vld [vmem:[%s24015_s1 + $0x150] sm:$0xff] }
  0x3c   :  { %538 = vmatprep.mubr.f32.mxu0 %v24029_v3  ;;  %735 = vmatprep.mubr.f32.mxu1 %v24029_v3  ;;  %v12911_v52 = vpack.c.bf16 %v205_v51, %v197_v50  ;;  %v214_v54 = vld [vmem:[%s24015_s1 + $0x288] sm:$0xf]  ;;  %v140_v50 = vld [vmem:[%s24015_s1 + $0x38] sm:$0xff] }
  0x3d   :  { %12882 = vmatprep.subr.bf16.mxu1 %v12881_v38  ;;  %v12903_v38 = vpack.c.bf16 %v173_v34, %v165_v33  ;;  %v148_v51 = vld [vmem:[%s24015_s1 + $0x78] sm:$0xff] }
  0x3e   :  { %12884 = vmatpush1.bf16.msra.mxu1 %v12883_v39  ;;  %v12905_v39 = vpack.c.bf16 %v190_v36, %v182_v35  ;;  %v183_v35 = vld [vmem:[%s24015_s1 + $0x190] sm:$0xff] }
  0x3f   :  { %11048 = vmatmul.mubr.msk.f32.gmra.mrb[18].mxu0 %vm44_vm0, %v16095_v47  ;;  %11072 = vmatmul.mubr.msk.f32.gmra.mrb[18].mxu1 %vm44_vm0, %v15924_v42  ;;  %v191_v36 = vld [vmem:[%s24015_s1 + $0x1d0] sm:$0xff] }
  0x40   :  { %544 = vmatprep.mubr.f32.mxu0 %v24029_v3  ;;  %741 = vmatprep.mubr.f32.mxu1 %v24029_v3 }
  0x41   :  { %12886 = vmatprep.subr.bf16.mxu1 %v12885_v48  ;;  %v12907_v48 = vpack.c.bf16 %v189_v41, %v181_v40  ;;  %v12927_v40 = vpack.c.bf16 %v191_v36, %v183_v35 }
  0x42   :  { %12888 = vmatpush1.bf16.msra.mxu1 %v12887_v49  ;;  %v12909_v49 = vpack.c.bf16 %v206_v45, %v198_v44  ;;  %v199_v44 = vld [vmem:[%s24015_s1 + $0x210] sm:$0xff] }
  0x43   :  { %11049 = vmatmul.mubr.msk.f32.gmra.mrb[20].mxu0 %vm44_vm0, %v16115_v55  ;;  %11073 = vmatmul.mubr.msk.f32.gmra.mrb[20].mxu1 %vm44_vm0, %v15965_v60  ;;  %v207_v45 = vld [vmem:[%s24015_s1 + $0x250] sm:$0xff] }
  0x44   :  { %550 = vmatprep.mubr.f32.mxu0 %v24029_v3  ;;  %747 = vmatprep.mubr.f32.mxu1 %v24029_v3 }
  0x45   :  { %12890 = vmatprep.subr.bf16.mxu1 %v12889_v56  ;;  %v138_v56 = vld [vmem:[%s24015_s1 + $0x28] sm:$0xff] }
  0x46   :  { %12892 = vmatpush1.bf16.msra.mxu1 %v12891_v57  ;;  %v146_v57 = vld [vmem:[%s24015_s1 + $0x68] sm:$0xff] }
  0x47   :  { %11050 = vmatmul.mubr.msk.f32.gmra.mrb[22].mxu0 %vm44_vm0, %v16123_v58  ;;  %11074 = vmatmul.mubr.msk.f32.gmra.mrb[22].mxu1 %vm44_vm0, %v15988_v7  ;;  %v12933_v62 = vpack.c.bf16 %v146_v57, %v138_v56  ;;  %v162_v56 = vld [vmem:[%s24015_s1 + $0xe8] sm:$0xff]  ;;  %v16541_v57 = vld [vmem:[#allocation2] sm:$0xff] }
  0x48   :  { %556 = vmatprep.mubr.f32.mxu0 %v24029_v3  ;;  %753 = vmatprep.mubr.f32.mxu1 %v24029_v3 }
  0x49   :  { %11127 = vmatprep.subr.msk.mxu1 %vm395_vm1, %v11036_v59  ;;  %v213_v59 = vld [vmem:[%s24015_s1 + $0x280] sm:$0xf] }
  0x4a   :  { %11128 = vmatpush1.msk.msra.mxu1 %vm395_vm1, %v11035_v0  ;;  %v143_v0 = vld [vmem:[%s24015_s1 + $0x50] sm:$0xff] }
  0x4b   :  { %11051 = vmatmul.mubr.msk.f32.gmra.mrb[24].mxu0 %vm44_vm0, %v16143_v1  ;;  %11075 = vmatmul.mubr.msk.f32.gmra.mrb[24].mxu1 %vm44_vm0, %v16031_v20  ;;  %v12915_v18 = vpack.c.bf16 %v143_v0, %v135_v63  ;;  %v153_v63 = vld [vmem:[%s24015_s1 + $0xa0] sm:$0xff] }
  0x4c   :  { %562 = vmatprep.mubr.f32.mxu0 %v24029_v3  ;;  %759 = vmatprep.mubr.f32.mxu1 %v24029_v3  ;;  %v161_v0 = vld [vmem:[%s24015_s1 + $0xe0] sm:$0xff] }
  0x4d   :  { %12914 = vmatprep.subr.bf16.mxu1 %v12913_v4  ;;  %v152_v4 = vld [vmem:[%s24015_s1 + $0x98] sm:$0xff] }
  0x4e   :  { %v12917_v19 = vpack.c.bf16 %v160_v17, %v152_v4  ;;  %v170_v4 = vld [vmem:[%s24015_s1 + $0x128] sm:$0xff] }
  0x4f   :  { %11052 = vmatmul.mubr.msk.f32.gmra.mrb[26].mxu0 %vm44_vm0, %v16153_v5  ;;  %11076 = vmatmul.mubr.msk.f32.gmra.mrb[26].mxu1 %vm44_vm0, %v16055_v30  ;;  %v178_v17 = vld [vmem:[%s24015_s1 + $0x168] sm:$0xff] }
  0x50   :  { %568 = vmatprep.mubr.f32.mxu0 %v24029_v3  ;;  %765 = vmatprep.mubr.f32.mxu1 %v24029_v3 }
  0x53   :  { %11053 = vmatmul.mubr.msk.f32.gmra.mrb[28].mxu0 %vm44_vm0, %v16161_v6  ;;  %11077 = vmatmul.mubr.msk.f32.gmra.mrb[28].mxu1 %vm44_vm0, %v16075_v37 }
  0x54   :  { %574 = vmatprep.mubr.f32.mxu0 %v24029_v3  ;;  %771 = vmatprep.mubr.f32.mxu1 %v24029_v3 }
  0x57   :  { %11054 = vmatmul.mubr.msk.f32.gmra.mrb[30].mxu0 %vm44_vm0, %v16169_v10  ;;  %11078 = vmatmul.mubr.msk.f32.gmra.mrb[30].mxu1 %vm44_vm0, %v16095_v47 }
  0x58   :  { %580 = vmatprep.mubr.f32.mxu0 %v24029_v3  ;;  %777 = vmatprep.mubr.f32.mxu1 %v24029_v3 }
  0x5b   :  { %11055 = vmatmul.mubr.msk.f32.gmra.mrb[32].mxu0 %vm44_vm0, %v16177_v11  ;;  %11079 = vmatmul.mubr.msk.f32.gmra.mrb[32].mxu1 %vm44_vm0, %v16115_v55 }
  0x5c   :  { %586 = vmatprep.mubr.f32.mxu0 %v24029_v3  ;;  %783 = vmatprep.mubr.f32.mxu1 %v24029_v3 }
  0x5f   :  { %11056 = vmatmul.mubr.msk.f32.gmra.mrb[34].mxu0 %vm44_vm0, %v16185_v12  ;;  %11080 = vmatmul.mubr.msk.f32.gmra.mrb[34].mxu1 %vm44_vm0, %v16123_v58 }
  0x60   :  { %592 = vmatprep.mubr.f32.mxu0 %v24029_v3  ;;  %789 = vmatprep.mubr.f32.mxu1 %v24029_v3 }
  0x63   :  { %11057 = vmatmul.mubr.msk.f32.gmra.mrb[36].mxu0 %vm44_vm0, %v16193_v13  ;;  %11081 = vmatmul.mubr.msk.f32.gmra.mrb[36].mxu1 %vm44_vm0, %v16143_v1 }
  0x64   :  { %598 = vmatprep.mubr.f32.mxu0 %v24029_v3  ;;  %795 = vmatprep.mubr.f32.mxu1 %v24029_v3 }
  0x67   :  { %11058 = vmatmul.mubr.msk.f32.gmra.mrb[38].mxu0 %vm44_vm0, %v16201_v14  ;;  %11082 = vmatmul.mubr.msk.f32.gmra.mrb[38].mxu1 %vm44_vm0, %v16153_v5 }
  0x68   :  { %604 = vmatprep.mubr.f32.mxu0 %v24029_v3  ;;  %801 = vmatprep.mubr.f32.mxu1 %v24029_v3 }
  0x6b   :  { %11059 = vmatmul.mubr.msk.f32.gmra.mrb[40].mxu0 %vm44_vm0, %v16209_v15  ;;  %11083 = vmatmul.mubr.msk.f32.gmra.mrb[40].mxu1 %vm44_vm0, %v16161_v6 }
  0x6c   :  { %610 = vmatprep.mubr.f32.mxu0 %v24029_v3  ;;  %807 = vmatprep.mubr.f32.mxu1 %v24029_v3 }
  0x6f   :  { %11060 = vmatmul.mubr.msk.f32.gmra.mrb[42].mxu0 %vm44_vm0, %v16217_v16  ;;  %11084 = vmatmul.mubr.msk.f32.gmra.mrb[42].mxu1 %vm44_vm0, %v16169_v10 }
  0x70   :  { %813 = vmatprep.mubr.f32.mxu1 %v24029_v3  ;;  %950 = vmatprep.mubr.f32.mxu0 %v24029_v3 }
  0x73   :  { %11085 = vmatmul.mubr.msk.f32.gmra.mrb[44].mxu1 %vm44_vm0, %v16177_v11  ;;  %11099 = vmatmul.mubr.msk.f32.vlgmr.msra.gmra.mrb[44].mxu0 %vm44_vm0, %v15757_v46 }
  0x74   :  { %12896 = vmatpush1.bf16.msra.mxu0 %v12895_v22  ;;  %819 = vmatprep.mubr.f32.mxu1 %v24029_v3  ;;  %v159_v22 = vld [vmem:[%s24015_s1 + $0xd0] sm:$0xff] }
  0x75   :  { %956 = vmatprep.mubr.f32.mxu0 %v24029_v3  ;;  %12898 = vmatprep.subr.bf16.mxu0 %v12897_v23  ;;  %v168_v23 = vld [vmem:[%s24015_s1 + $0x118] sm:$0xff]  ;;  %v12919_v27 = vpack.c.bf16 %v159_v22, %v151_v21  ;;  %v169_v21 = vld [vmem:[%s24015_s1 + $0x120] sm:$0xff] }
  0x76   :  { %v12921_v28 = vpack.c.bf16 %v176_v26, %v168_v23  ;;  %v177_v22 = vld [vmem:[%s24015_s1 + $0x160] sm:$0xff]  ;;  %v16569_v23 = vld [vmem:[#allocation2 + $0x8] sm:$0xff] }
  0x77   :  { %11086 = vmatmul.mubr.msk.f32.gmra.mrb[46].mxu1 %vm44_vm0, %v16185_v12  ;;  %11100 = vmatmul.mubr.msk.f32.gmra.mrb[46].mxu0 %vm44_vm0, %v15814_v2  ;;  %v186_v26 = vld [vmem:[%s24015_s1 + $0x1a8] sm:$0xff] }
  0x78   :  { %825 = vmatprep.mubr.f32.mxu1 %v24029_v3  ;;  %962 = vmatprep.mubr.f32.mxu0 %v24029_v3 }
  0x79   :  { %12900 = vmatpush1.bf16.msra.mxu0 %v12899_v31  ;;  %v184_v31 = vld [vmem:[%s24015_s1 + $0x198] sm:$0xff] }
  0x7a   :  { %12902 = vmatprep.subr.bf16.mxu0 %v12901_v32  ;;  %v192_v32 = vld [vmem:[%s24015_s1 + $0x1d8] sm:$0xff] }
  0x7b   :  { %11087 = vmatmul.mubr.msk.f32.gmra.mrb[48].mxu1 %vm44_vm0, %v16193_v13  ;;  %11101 = vmatmul.mubr.msk.f32.gmra.mrb[48].mxu0 %vm44_vm0, %v15875_v24  ;;  %v12925_v34 = vpack.c.bf16 %v192_v32, %v184_v31  ;;  %v193_v31 = vld [vmem:[%s24015_s1 + $0x1e0] sm:$0xff]  ;;  %v202_v32 = vld [vmem:[%s24015_s1 + $0x228] sm:$0xff] }
  0x7c   :  { %831 = vmatprep.mubr.f32.mxu1 %v24029_v3  ;;  %968 = vmatprep.mubr.f32.mxu0 %v24029_v3 }
  0x7d   :  { %12904 = vmatpush1.bf16.msra.mxu0 %v12903_v38  ;;  %v200_v38 = vld [vmem:[%s24015_s1 + $0x218] sm:$0xff] }
  0x7e   :  { %12906 = vmatprep.subr.bf16.mxu0 %v12905_v39  ;;  %v208_v39 = vld [vmem:[%s24015_s1 + $0x258] sm:$0xff] }
  0x7f   :  { %11088 = vmatmul.mubr.msk.f32.gmra.mrb[50].mxu1 %vm44_vm0, %v16201_v14  ;;  %11102 = vmatmul.mubr.msk.f32.gmra.mrb[50].mxu0 %vm44_vm0, %v15924_v42  ;;  %v12929_v41 = vpack.c.bf16 %v208_v39, %v200_v38  ;;  %v209_v38 = vld [vmem:[%s24015_s1 + $0x260] sm:$0xff] }
  0x80   :  { %837 = vmatprep.mubr.f32.mxu1 %v24029_v3  ;;  %974 = vmatprep.mubr.f32.mxu0 %v24029_v3 }
  0x81   :  { %12908 = vmatpush1.bf16.msra.mxu0 %v12907_v48  ;;  %v12931_v48 = vpack.c.bf16 %v207_v45, %v199_v44  ;;  %v11278_v45 = vld [vmem:[%s24015_s1 + $0x588] sm:$0xff] }
  0x82   :  { %12910 = vmatprep.subr.bf16.mxu0 %v12909_v49  ;;  %v216_v49 = vld [vmem:[%s24015_s1 + $0x298] sm:$0xf] }
  0x83   :  { %11089 = vmatmul.mubr.msk.f32.gmra.mrb[52].mxu1 %vm44_vm0, %v16209_v15  ;;  %11103 = vmatmul.mubr.msk.f32.gmra.mrb[52].mxu0 %vm44_vm0, %v15965_v60 }
  0x84   :  { %843 = vmatprep.mubr.f32.mxu1 %v24029_v3  ;;  %980 = vmatprep.mubr.f32.mxu0 %v24029_v3 }
  0x85   :  { %12912 = vmatpush1.bf16.msra.mxu0 %v12911_v52  ;;  %v215_v52 = vld [vmem:[%s24015_s1 + $0x290] sm:$0xf] }
  0x86   :  { %11157 = vmatprep.subr.msk.mxu0 %vm395_vm1, %v214_v54  ;;  %v12953_v54 = vpack.c.bf16 %v148_v51, %v140_v50 }
  0x87   :  { %11090 = vmatmul.mubr.msk.f32.gmra.mrb[54].mxu1 %vm44_vm0, %v16217_v16  ;;  %11104 = vmatmul.mubr.msk.f32.gmra.mrb[54].mxu0 %vm44_vm0, %v15988_v7 }
  0x88   :  { %849 = vmatprep.mubr.f32.mxu1 %v24029_v3  ;;  %986 = vmatprep.mubr.f32.mxu0 %v24029_v3 }
  0x89   :  { %11158 = vmatpush1.msk.msra.mxu0 %vm395_vm1, %v213_v59 }
  0x8a   :  { %12934 = vmatprep.subr.bf16.mxu0 %v12933_v62 }
  0x8b   :  { %11091 = vmatmul.mubr.msk.f32.gmra.mrb[56].mxu1 %vm44_vm0, %v15779_v53  ;;  %11105 = vmatmul.mubr.msk.f32.gmra.mrb[56].mxu0 %vm44_vm0, %v16031_v20 }
  0x8c   :  { %855 = vmatprep.mubr.f32.mxu1 %v24029_v3  ;;  %992 = vmatprep.mubr.f32.mxu0 %v24029_v3 }
  0x8f   :  { %11092 = vmatmul.mubr.msk.f32.gmra.mrb[58].mxu1 %vm44_vm0, %v15829_v8  ;;  %11106 = vmatmul.mubr.msk.f32.gmra.mrb[58].mxu0 %vm44_vm0, %v16055_v30 }
  0x90   :  { %861 = vmatprep.mubr.f32.mxu1 %v24029_v3  ;;  %998 = vmatprep.mubr.f32.mxu0 %v24029_v3 }
  0x93   :  { %11093 = vmatmul.mubr.msk.f32.gmra.mrb[60].mxu1 %vm44_vm0, %v15877_v25  ;;  %11107 = vmatmul.mubr.msk.f32.gmra.mrb[60].mxu0 %vm44_vm0, %v16075_v37 }
  0x94   :  { %867 = vmatprep.mubr.f32.mxu1 %v24029_v3  ;;  %1004 = vmatprep.mubr.f32.mxu0 %v24029_v3 }
  0x97   :  { %11094 = vmatmul.mubr.msk.f32.gmra.mrb[62].mxu1 %vm44_vm0, %v15926_v43  ;;  %11108 = vmatmul.mubr.msk.f32.gmra.mrb[62].mxu0 %vm44_vm0, %v16095_v47 }
  0x98   :  { %873 = vmatprep.mubr.f32.mxu1 %v24029_v3  ;;  %1010 = vmatprep.mubr.f32.mxu0 %v24029_v3 }
  0x9b   :  { %11095 = vmatmul.mubr.msk.f32.gmra.mrb[64].mxu1 %vm44_vm0, %v15967_v61  ;;  %11109 = vmatmul.mubr.msk.f32.gmra.mrb[64].mxu0 %vm44_vm0, %v16115_v55 }
  0x9c   :  { %879 = vmatprep.mubr.f32.mxu1 %v24029_v3  ;;  %1016 = vmatprep.mubr.f32.mxu0 %v24029_v3 }
  0x9f   :  { %11096 = vmatmul.mubr.msk.f32.gmra.mrb[66].mxu1 %vm44_vm0, %v15990_v9  ;;  %11110 = vmatmul.mubr.msk.f32.gmra.mrb[66].mxu0 %vm44_vm0, %v16123_v58 }
  0xa0   :  { %1022 = vmatprep.mubr.f32.mxu0 %v24029_v3  ;;  %1183 = vmatprep.mubr.f32.mxu1 %v24029_v3 }
  0xa3   :  { %11111 = vmatmul.mubr.msk.f32.gmra.mrb[68].mxu0 %vm44_vm0, %v16143_v1  ;;  %11129 = vmatmul.mubr.msk.f32.vlgmr.msra.gmra.mrb[68].mxu1 %vm44_vm0, %v15757_v46  ;;  %v167_v46 = vld [vmem:[%s24015_s1 + $0x110] sm:$0xff] }
  0xa4   :  { %1028 = vmatprep.mubr.f32.mxu0 %v24029_v3  ;;  %1189 = vmatprep.mubr.f32.mxu1 %v24029_v3  ;;  %v12923_v33 = vpack.c.bf16 %v175_v29, %v167_v46  ;;  %v185_v29 = vld [vmem:[%s24015_s1 + $0x1a0] sm:$0xff] }
  0xa5   :  { %12916 = vmatpush1.bf16.msra.mxu1 %v12915_v18  ;;  %v12939_v18 = vpack.c.bf16 %v161_v0, %v153_v63  ;;  %v164_v63 = vld [vmem:[%s24015_s1 + $0xf8] sm:$0xff] }
  0xa6   :  { %12918 = vmatprep.subr.bf16.mxu1 %v12917_v19  ;;  %v12941_v19 = vpack.c.bf16 %v178_v17, %v170_v4  ;;  %v163_v17 = vld [vmem:[%s24015_s1 + $0xf0] sm:$0xff] }
  0xa7   :  { %11112 = vmatmul.mubr.msk.f32.gmra.mrb[70].mxu0 %vm44_vm0, %v16153_v5  ;;  %11130 = vmatmul.mubr.msk.f32.gmra.mrb[70].mxu1 %vm44_vm0, %v15814_v2 }
  0xa8   :  { %1034 = vmatprep.mubr.f32.mxu0 %v24029_v3  ;;  %1195 = vmatprep.mubr.f32.mxu1 %v24029_v3 }
  0xa9   :  { %12920 = vmatpush1.bf16.msra.mxu1 %v12919_v27  ;;  %v194_v27 = vld [vmem:[%s24015_s1 + $0x1e8] sm:$0xff] }
  0xaa   :  { %12922 = vmatprep.subr.bf16.mxu1 %v12921_v28  ;;  %v12943_v28 = vpack.c.bf16 %v177_v22, %v169_v21  ;;  %v12945_v46 = vpack.c.bf16 %v194_v27, %v186_v26  ;;  %v171_v26 = vld [vmem:[%s24015_s1 + $0x130] sm:$0xff] }
  0xab   :  { %11113 = vmatmul.mubr.msk.f32.gmra.mrb[72].mxu0 %vm44_vm0, %v16161_v6  ;;  %11131 = vmatmul.mubr.msk.f32.gmra.mrb[72].mxu1 %vm44_vm0, %v15875_v24  ;;  %v179_v27 = vld [vmem:[%s24015_s1 + $0x170] sm:$0xff] }
  0xac   :  { %1040 = vmatprep.mubr.f32.mxu0 %v24029_v3  ;;  %1201 = vmatprep.mubr.f32.mxu1 %v24029_v3 }
  0xad   :  { %12924 = vmatpush1.bf16.msra.mxu1 %v12923_v33  ;;  %v210_v33 = vld [vmem:[%s24015_s1 + $0x268] sm:$0xff] }
  0xae   :  { %12926 = vmatprep.subr.bf16.mxu1 %v12925_v34  ;;  %v12947_v34 = vpack.c.bf16 %v193_v31, %v185_v29  ;;  %v12949_v36 = vpack.c.bf16 %v210_v33, %v202_v32  ;;  %v12963_v29 = vpack.c.bf16 %v179_v27, %v171_v26  ;;  %v187_v32 = vld [vmem:[%s24015_s1 + $0x1b0] sm:$0xff]  ;;  %v11317_v26 = vld [vmem:[%s24015_s1 + $0x6c0] sm:$0xff]  ;;  %v11326_v27 = vld [vmem:[%s24015_s1 + $0x708] sm:$0xff] }
  0xaf   :  { %11114 = vmatmul.mubr.msk.f32.gmra.mrb[74].mxu0 %vm44_vm0, %v16169_v10  ;;  %11132 = vmatmul.mubr.msk.f32.gmra.mrb[74].mxu1 %vm44_vm0, %v15924_v42  ;;  %v195_v33 = vld [vmem:[%s24015_s1 + $0x1f0] sm:$0xff] }
  0xb0   :  { %1046 = vmatprep.mubr.f32.mxu0 %v24029_v3  ;;  %1207 = vmatprep.mubr.f32.mxu1 %v24029_v3 }
  0xb1   :  { %12928 = vmatpush1.bf16.msra.mxu1 %v12927_v40 }
  0xb2   :  { %12930 = vmatprep.subr.bf16.mxu1 %v12929_v41 }
  0xb3   :  { %11115 = vmatmul.mubr.msk.f32.gmra.mrb[76].mxu0 %vm44_vm0, %v16177_v11  ;;  %11133 = vmatmul.mubr.msk.f32.gmra.mrb[76].mxu1 %vm44_vm0, %v15965_v60 }
  0xb4   :  { %1052 = vmatprep.mubr.f32.mxu0 %v24029_v3  ;;  %1213 = vmatprep.mubr.f32.mxu1 %v24029_v3 }
  0xb5   :  { %12932 = vmatpush1.bf16.msra.mxu1 %v12931_v48  ;;  %v11286_v48 = vld [vmem:[%s24015_s1 + $0x5c8] sm:$0xff] }
  0xb6   :  { %11187 = vmatprep.subr.msk.mxu1 %vm395_vm1, %v216_v49  ;;  %v217_v49 = vld [vmem:[%s24015_s1 + $0x2a0] sm:$0xf]  ;;  %v12973_v50 = vpack.c.bf16 %v11286_v48, %v11278_v45  ;;  %v211_v45 = vld [vmem:[%s24015_s1 + $0x270] sm:$0xff]  ;;  %v16779_v48 = vld [vmem:[#allocation2 + $0x18] sm:$0xff] }
  0xb7   :  { %11116 = vmatmul.mubr.msk.f32.gmra.mrb[78].mxu0 %vm44_vm0, %v16185_v12  ;;  %11134 = vmatmul.mubr.msk.f32.gmra.mrb[78].mxu1 %vm44_vm0, %v15988_v7 }
  0xb8   :  { %1058 = vmatprep.mubr.f32.mxu0 %v24029_v3  ;;  %1219 = vmatprep.mubr.f32.mxu1 %v24029_v3 }
  0xb9   :  { %11188 = vmatpush1.msk.msra.mxu1 %vm395_vm1, %v215_v52 }
  0xba   :  { %12954 = vmatprep.subr.bf16.mxu1 %v12953_v54  ;;  %v16651_v54 = vld [vmem:[#allocation2 + $0xb8] sm:$0xff] }
  0xbb   :  { %11117 = vmatmul.mubr.msk.f32.gmra.mrb[80].mxu0 %vm44_vm0, %v16193_v13  ;;  %11135 = vmatmul.mubr.msk.f32.gmra.mrb[80].mxu1 %vm44_vm0, %v16031_v20 }
  0xbc   :  { %1064 = vmatprep.mubr.f32.mxu0 %v24029_v3  ;;  %1225 = vmatprep.mubr.f32.mxu1 %v24029_v3 }
  0xbf   :  { %11118 = vmatmul.mubr.msk.f32.gmra.mrb[82].mxu0 %vm44_vm0, %v16201_v14  ;;  %11136 = vmatmul.mubr.msk.f32.gmra.mrb[82].mxu1 %vm44_vm0, %v16055_v30 }
  0xc0   :  { %1070 = vmatprep.mubr.f32.mxu0 %v24029_v3  ;;  %1231 = vmatprep.mubr.f32.mxu1 %v24029_v3 }
  0xc3   :  { %11119 = vmatmul.mubr.msk.f32.gmra.mrb[84].mxu0 %vm44_vm0, %v16209_v15  ;;  %11137 = vmatmul.mubr.msk.f32.gmra.mrb[84].mxu1 %vm44_vm0, %v16075_v37 }
  0xc4   :  { %1076 = vmatprep.mubr.f32.mxu0 %v24029_v3  ;;  %1237 = vmatprep.mubr.f32.mxu1 %v24029_v3 }
  0xc7   :  { %11120 = vmatmul.mubr.msk.f32.gmra.mrb[86].mxu0 %vm44_vm0, %v16217_v16  ;;  %11138 = vmatmul.mubr.msk.f32.gmra.mrb[86].mxu1 %vm44_vm0, %v16095_v47 }
  0xc8   :  { %1082 = vmatprep.mubr.f32.mxu0 %v24029_v3  ;;  %1243 = vmatprep.mubr.f32.mxu1 %v24029_v3 }
  0xcb   :  { %11121 = vmatmul.mubr.msk.f32.gmra.mrb[88].mxu0 %vm44_vm0, %v15779_v53  ;;  %11139 = vmatmul.mubr.msk.f32.gmra.mrb[88].mxu1 %vm44_vm0, %v16115_v55  ;;  %v137_v53 = vld [vmem:[%s24015_s1 + $0x20] sm:$0xff] }
  0xcc   :  { %1088 = vmatprep.mubr.f32.mxu0 %v24029_v3  ;;  %1249 = vmatprep.mubr.f32.mxu1 %v24029_v3 }
  0xcf   :  { %11122 = vmatmul.mubr.msk.f32.gmra.mrb[90].mxu0 %vm44_vm0, %v15829_v8  ;;  %11140 = vmatmul.mubr.msk.f32.gmra.mrb[90].mxu1 %vm44_vm0, %v16123_v58  ;;  %v145_v8 = vld [vmem:[%s24015_s1 + $0x60] sm:$0xff] }
  0xd0   :  { %1094 = vmatprep.mubr.f32.mxu0 %v24029_v3  ;;  %1255 = vmatprep.mubr.f32.mxu1 %v24029_v3  ;;  %v12935_v59 = vpack.c.bf16 %v145_v8, %v137_v53  ;;  %v16663_v8 = vld [vmem:[#allocation2 + $0xc0] sm:$0xff] }
  0xd3   :  { %11123 = vmatmul.mubr.msk.f32.gmra.mrb[92].mxu0 %vm44_vm0, %v15877_v25  ;;  %11141 = vmatmul.mubr.msk.f32.gmra.mrb[92].mxu1 %vm44_vm0, %v16143_v1  ;;  %v154_v25 = vld [vmem:[%s24015_s1 + $0xa8] sm:$0xff] }
  0xd4   :  { %1100 = vmatprep.mubr.f32.mxu0 %v24029_v3  ;;  %1261 = vmatprep.mubr.f32.mxu1 %v24029_v3  ;;  %v12937_v62 = vpack.c.bf16 %v162_v56, %v154_v25  ;;  %v16675_v56 = vld [vmem:[#allocation2 + $0xc8] sm:$0xff] }
  0xd7   :  { %11124 = vmatmul.mubr.msk.f32.gmra.mrb[94].mxu0 %vm44_vm0, %v15926_v43  ;;  %11142 = vmatmul.mubr.msk.f32.gmra.mrb[94].mxu1 %vm44_vm0, %v16153_v5 }
  0xd8   :  { %1106 = vmatprep.mubr.f32.mxu0 %v24029_v3  ;;  %1267 = vmatprep.mubr.f32.mxu1 %v24029_v3 }
  0xdb   :  { %11125 = vmatmul.mubr.msk.f32.gmra.mrb[96].mxu0 %vm44_vm0, %v15967_v61  ;;  %11143 = vmatmul.mubr.msk.f32.gmra.mrb[96].mxu1 %vm44_vm0, %v16161_v6 }
  0xdc   :  { %1112 = vmatprep.mubr.f32.mxu0 %v24029_v3  ;;  %1273 = vmatprep.mubr.f32.mxu1 %v24029_v3 }
  0xdf   :  { %11126 = vmatmul.mubr.msk.f32.gmra.mrb[98].mxu0 %vm44_vm0, %v15990_v9  ;;  %11144 = vmatmul.mubr.msk.f32.gmra.mrb[98].mxu1 %vm44_vm0, %v16169_v10 }
  0xe0   :  { %1279 = vmatprep.mubr.f32.mxu1 %v24029_v3  ;;  %1443 = vmatprep.mubr.f32.mxu0 %v24029_v3 }
  0xe3   :  { %11145 = vmatmul.mubr.msk.f32.gmra.mrb[100].mxu1 %vm44_vm0, %v16177_v11  ;;  %11159 = vmatmul.mubr.msk.f32.vlgmr.msra.gmra.mrb[0].mxu0 %vm44_vm0, %v16541_v57 }
  0xe4   :  { %12936 = vmatpush1.bf16.msra.mxu0 %v12935_v59  ;;  %1285 = vmatprep.mubr.f32.mxu1 %v24029_v3 }
  0xe5   :  { %1449 = vmatprep.mubr.f32.mxu0 %v24029_v3  ;;  %12938 = vmatprep.subr.bf16.mxu0 %v12937_v62  ;;  %v147_v62 = vld [vmem:[%s24015_s1 + $0x70] sm:$0xff] }
  0xe7   :  { %11146 = vmatmul.mubr.msk.f32.gmra.mrb[102].mxu1 %vm44_vm0, %v16185_v12  ;;  %11160 = vmatmul.mubr.msk.f32.gmra.mrb[2].mxu0 %vm44_vm0, %v16569_v23 }
  0xe8   :  { %1291 = vmatprep.mubr.f32.mxu1 %v24029_v3  ;;  %1455 = vmatprep.mubr.f32.mxu0 %v24029_v3 }
  0xe9   :  { %12940 = vmatpush1.bf16.msra.mxu0 %v12939_v18  ;;  %v172_v18 = vld [vmem:[%s24015_s1 + $0x138] sm:$0xff] }
  0xea   :  { %12942 = vmatprep.subr.bf16.mxu0 %v12941_v19  ;;  %v180_v19 = vld [vmem:[%s24015_s1 + $0x178] sm:$0xff] }
  0xeb   :  { %11147 = vmatmul.mubr.msk.f32.gmra.mrb[104].mxu1 %vm44_vm0, %v16193_v13  ;;  %11161 = vmatmul.mubr.msk.f32.gmra.mrb[4].mxu0 %vm44_vm0, %v15814_v2  ;;  %v201_v2 = vld [vmem:[%s24015_s1 + $0x220] sm:$0xff]  ;;  %v12961_v22 = vpack.c.bf16 %v180_v19, %v172_v18  ;;  %v11318_v19 = vld [vmem:[%s24015_s1 + $0x6c8] sm:$0xff] }
  0xec   :  { %1297 = vmatprep.mubr.f32.mxu1 %v24029_v3  ;;  %1461 = vmatprep.mubr.f32.mxu0 %v24029_v3  ;;  %v12951_v40 = vpack.c.bf16 %v209_v38, %v201_v2  ;;  %v212_v2 = vld [vmem:[%s24015_s1 + $0x278] sm:$0xff]  ;;  %v12967_v38 = vpack.c.bf16 %v195_v33, %v187_v32  ;;  %v11301_v18 = vld [vmem:[%s24015_s1 + $0x640] sm:$0xff]  ;;  %v11342_v32 = vld [vmem:[%s24015_s1 + $0x788] sm:$0xff] }
  0xed   :  { %12944 = vmatpush1.bf16.msra.mxu0 %v12943_v28  ;;  %v188_v28 = vld [vmem:[%s24015_s1 + $0x1b8] sm:$0xff]  ;;  %v11350_v33 = vld [vmem:[%s24015_s1 + $0x7c8] sm:$0xff] }
  0xee   :  { %v16599_v35 = vpop.f32.mrb[0].mxu1  ;;  %12946 = vmatprep.subr.bf16.mxu0 %v12945_v46  ;;  %v196_v46 = vld [vmem:[%s24015_s1 + $0x1f8] sm:$0xff] }
  0xef   :  { %11148 = vmatmul.mubr.msk.f32.gmra.mrb[106].mxu1 %vm44_vm0, %v16201_v14  ;;  %11162 = vmatmul.mubr.msk.f32.gmra.mrb[6].mxu0 %vm44_vm0, %v15875_v24  ;;  %v16611_v39 = vpop.f32.mrb[1].mxu1  ;;  %v218_v24 = vld [vmem:[%s24015_s1 + $0x2a8] sm:$0xf]  ;;  %v12965_v31 = vpack.c.bf16 %v196_v46, %v188_v28 }
  0xf0   :  { %1303 = vmatprep.mubr.f32.mxu1 %v24029_v3  ;;  %1467 = vmatprep.mubr.f32.mxu0 %v24029_v3  ;;  %v11334_v28 = vld [vmem:[%s24015_s1 + $0x748] sm:$0xff] }
  0xf1   :  { %12948 = vmatpush1.bf16.msra.mxu0 %v12947_v34  ;;  %v16759_v34 = vld [vmem:[#allocation2 + $0x10] sm:$0xff] }
  0xf2   :  { %v16615_v41 = vpop.f32.mrb[2].mxu1  ;;  %12950 = vmatprep.subr.bf16.mxu0 %v12949_v36  ;;  %v204_v36 = vld [vmem:[%s24015_s1 + $0x238] sm:$0xff] }
  0xf3   :  { %11149 = vmatmul.mubr.msk.f32.gmra.mrb[108].mxu1 %vm44_vm0, %v16209_v15  ;;  %11163 = vmatmul.mubr.msk.f32.gmra.mrb[8].mxu0 %vm44_vm0, %v15924_v42  ;;  %v16621_v44 = vpop.f32.mrb[3].mxu1 }
  0xf4   :  { %1309 = vmatprep.mubr.f32.mxu1 %v24029_v3  ;;  %1473 = vmatprep.mubr.f32.mxu0 %v24029_v3 }
  0xf5   :  { %12952 = vmatpush1.bf16.msra.mxu0 %v12951_v40  ;;  %v12969_v40 = vpack.c.bf16 %v212_v2, %v204_v36  ;;  %v12989_v2 = vpack.c.bf16 %v11350_v33, %v11342_v32  ;;  %v11352_v32 = vld [vmem:[%s24015_s1 + $0x7d8] sm:$0xff] }
  0xf6   :  { %v16634_v42 = vpop.f32.mrb[4].mxu1  ;;  %11217 = vmatprep.subr.msk.mxu0 %vm395_vm1, %v218_v24  ;;  %v203_v24 = vld [vmem:[%s24015_s1 + $0x230] sm:$0xff] }
  0xf7   :  { %11150 = vmatmul.mubr.msk.f32.gmra.mrb[110].mxu1 %vm44_vm0, %v16217_v16  ;;  %11164 = vmatmul.mubr.msk.f32.gmra.mrb[10].mxu0 %vm44_vm0, %v15965_v60  ;;  %v16644_v51 = vpop.f32.mrb[5].mxu1 }
  0xf8   :  { %1315 = vmatprep.mubr.f32.mxu1 %v24029_v3  ;;  %1479 = vmatprep.mubr.f32.mxu0 %v24029_v3 }
  0xf9   :  { %11218 = vmatpush1.msk.msra.mxu0 %vm395_vm1, %v217_v49  ;;  %v12971_v49 = vpack.c.bf16 %v211_v45, %v203_v24  ;;  %v11282_v24 = vld [vmem:[%s24015_s1 + $0x5a8] sm:$0xff] }
  0xfa   :  { %v16649_v52 = vpop.f32.mrb[6].mxu1  ;;  %12974 = vmatprep.subr.bf16.mxu0 %v12973_v50  ;;  %v16787_v50 = vld [vmem:[#allocation2 + $0x20] sm:$0xff]  ;;  %v11290_v45 = vld [vmem:[%s24015_s1 + $0x5e8] sm:$0xff] }
  0xfb   :  { %11151 = vmatmul.mubr.msk.f32.gmra.mrb[112].mxu1 %vm44_vm0, %v16651_v54  ;;  %11165 = vmatmul.mubr.msk.f32.gmra.mrb[12].mxu0 %vm44_vm0, %v15988_v7  ;;  %v16657_v60 = vpop.f32.mrb[7].mxu1 }
  0xfc   :  { %1321 = vmatprep.mubr.f32.mxu1 %v24029_v3  ;;  %1485 = vmatprep.mubr.f32.mxu0 %v24029_v3 }
  0xfe   :  { %v16661_v53 = vpop.f32.mrb[8].mxu1 }
  0xff   :  { %11152 = vmatmul.mubr.msk.f32.gmra.mrb[114].mxu1 %vm44_vm0, %v16663_v8  ;;  %11166 = vmatmul.mubr.msk.f32.gmra.mrb[14].mxu0 %vm44_vm0, %v16031_v20  ;;  %v16669_v25 = vpop.f32.mrb[9].mxu1 }
 0x100   :  { %1327 = vmatprep.mubr.f32.mxu1 %v24029_v3  ;;  %1491 = vmatprep.mubr.f32.mxu0 %v24029_v3 }
 0x102   :  { %v16673_v7 = vpop.f32.mrb[10].mxu1 }
 0x103   :  { %11153 = vmatmul.mubr.msk.f32.gmra.mrb[116].mxu1 %vm44_vm0, %v16675_v56  ;;  %11167 = vmatmul.mubr.msk.f32.gmra.mrb[16].mxu0 %vm44_vm0, %v16055_v30  ;;  %v16681_v59 = vpop.f32.mrb[11].mxu1 }
 0x104   :  { %1333 = vmatprep.mubr.f32.mxu1 %v24029_v3  ;;  %1497 = vmatprep.mubr.f32.mxu0 %v24029_v3 }
 0x107   :  { %11154 = vmatmul.mubr.msk.f32.gmra.mrb[118].mxu1 %vm44_vm0, %v15926_v43  ;;  %11168 = vmatmul.mubr.msk.f32.gmra.mrb[18].mxu0 %vm44_vm0, %v16075_v37  ;;  %v139_v43 = vld [vmem:[%s24015_s1 + $0x30] sm:$0xff] }
 0x108   :  { %1339 = vmatprep.mubr.f32.mxu1 %v24029_v3  ;;  %1503 = vmatprep.mubr.f32.mxu0 %v24029_v3  ;;  %v12955_v0 = vpack.c.bf16 %v147_v62, %v139_v43  ;;  %v220_v43 = vld [vmem:[%s24015_s1 + $0x2b8] sm:$0xf] }
 0x109   :  { %v11280_v62 = vld [vmem:[%s24015_s1 + $0x598] sm:$0xff] }
 0x10b   :  { %11155 = vmatmul.mubr.msk.f32.gmra.mrb[120].mxu1 %vm44_vm0, %v15967_v61  ;;  %11169 = vmatmul.mubr.msk.f32.gmra.mrb[20].mxu0 %vm44_vm0, %v16095_v47  ;;  %v156_v61 = vld [vmem:[%s24015_s1 + $0xb8] sm:$0xff] }
 0x10c   :  { %1345 = vmatprep.mubr.f32.mxu1 %v24029_v3  ;;  %1509 = vmatprep.mubr.f32.mxu0 %v24029_v3  ;;  %v12957_v4 = vpack.c.bf16 %v164_v63, %v156_v61  ;;  %v11288_v61 = vld [vmem:[%s24015_s1 + $0x5d8] sm:$0xff]  ;;  %v219_v63 = vld [vmem:[%s24015_s1 + $0x2b0] sm:$0xf] }
 0x10f   :  { %11156 = vmatmul.mubr.msk.f32.gmra.mrb[122].mxu1 %vm44_vm0, %v15990_v9  ;;  %11170 = vmatmul.mubr.msk.f32.gmra.mrb[22].mxu0 %vm44_vm0, %v16115_v55  ;;  %v155_v9 = vld [vmem:[%s24015_s1 + $0xb0] sm:$0xff] }
 0x110   :  { %1515 = vmatprep.mubr.f32.mxu0 %v24029_v3  ;;  %1676 = vmatprep.mubr.f32.mxu1 %v24029_v3  ;;  %v12959_v21 = vpack.c.bf16 %v163_v17, %v155_v9  ;;  %v16817_v9 = vld [vmem:[#allocation2 + $0x30] sm:$0xff]  ;;  %v11293_v17 = vld [vmem:[%s24015_s1 + $0x600] sm:$0xff] }
 0x113   :  { %11171 = vmatmul.mubr.msk.f32.gmra.mrb[24].mxu0 %vm44_vm0, %v16123_v58  ;;  %11189 = vmatmul.mubr.msk.f32.vlgmr.msra.gmra.mrb[12].mxu1 %vm44_vm0, %v16541_v57 }
 0x114   :  { %1521 = vmatprep.mubr.f32.mxu0 %v24029_v3  ;;  %1682 = vmatprep.mubr.f32.mxu1 %v24029_v3 }
 0x115   :  { %12956 = vmatpush1.bf16.msra.mxu1 %v12955_v0  ;;  %v12993_v0 = vpack.c.bf16 %v11288_v61, %v11280_v62  ;;  %v17017_v62 = vld [vmem:[#allocation2 + $0x50] sm:$0xff] }
 0x116   :  { %12958 = vmatprep.subr.bf16.mxu1 %v12957_v4  ;;  %v16808_v4 = vld [vmem:[#allocation2 + $0x28] sm:$0xff]  ;;  %v11279_v61 = vld [vmem:[%s24015_s1 + $0x590] sm:$0xff] }
 0x117   :  { %11172 = vmatmul.mubr.msk.f32.gmra.mrb[26].mxu0 %vm44_vm0, %v16143_v1  ;;  %11190 = vmatmul.mubr.msk.f32.gmra.mrb[14].mxu1 %vm44_vm0, %v16569_v23 }
 0x118   :  { %1527 = vmatprep.mubr.f32.mxu0 %v24029_v3  ;;  %1688 = vmatprep.mubr.f32.mxu1 %v24029_v3 }
 0x119   :  { %12960 = vmatpush1.bf16.msra.mxu1 %v12959_v21  ;;  %v12979_v21 = vpack.c.bf16 %v11301_v18, %v11293_v17  ;;  %v17049_v17 = vld [vmem:[#allocation2 + $0x60] sm:$0xff]  ;;  %v11312_v18 = vld [vmem:[%s24015_s1 + $0x698] sm:$0xff] }
 0x11a   :  { %12962 = vmatprep.subr.bf16.mxu1 %v12961_v22 }
 0x11b   :  { %11173 = vmatmul.mubr.msk.f32.gmra.mrb[28].mxu0 %vm44_vm0, %v16153_v5  ;;  %11191 = vmatmul.mubr.msk.f32.gmra.mrb[16].mxu1 %vm44_vm0, %v16759_v34 }
 0x11c   :  { %1533 = vmatprep.mubr.f32.mxu0 %v24029_v3  ;;  %1694 = vmatprep.mubr.f32.mxu1 %v24029_v3 }
 0x11d   :  { %12964 = vmatpush1.bf16.msra.mxu1 %v12963_v29  ;;  %v12985_v29 = vpack.c.bf16 %v11334_v28, %v11326_v27  ;;  %v11336_v27 = vld [vmem:[%s24015_s1 + $0x758] sm:$0xff] }
 0x11e   :  { %12966 = vmatprep.subr.bf16.mxu1 %v12965_v31  ;;  %v11333_v31 = vld [vmem:[%s24015_s1 + $0x740] sm:$0xff] }
 0x11f   :  { %11174 = vmatmul.mubr.msk.f32.gmra.mrb[30].mxu0 %vm44_vm0, %v16161_v6  ;;  %11192 = vmatmul.mubr.msk.f32.gmra.mrb[18].mxu1 %vm44_vm0, %v16779_v48 }
 0x120   :  { %1539 = vmatprep.mubr.f32.mxu0 %v24029_v3  ;;  %1700 = vmatprep.mubr.f32.mxu1 %v24029_v3 }
 0x121   :  { %12968 = vmatpush1.bf16.msra.mxu1 %v12967_v38  ;;  %v11349_v38 = vld [vmem:[%s24015_s1 + $0x7c0] sm:$0xff] }
 0x122   :  { %12970 = vmatprep.subr.bf16.mxu1 %v12969_v40 }
 0x123   :  { %11175 = vmatmul.mubr.msk.f32.gmra.mrb[32].mxu0 %vm44_vm0, %v16169_v10  ;;  %11193 = vmatmul.mubr.msk.f32.gmra.mrb[20].mxu1 %vm44_vm0, %v16787_v50 }
 0x124   :  { %1545 = vmatprep.mubr.f32.mxu0 %v24029_v3  ;;  %1706 = vmatprep.mubr.f32.mxu1 %v24029_v3 }
 0x125   :  { %12972 = vmatpush1.bf16.msra.mxu1 %v12971_v49  ;;  %v13013_v49 = vpack.c.bf16 %v11290_v45, %v11282_v24  ;;  %v11292_v24 = vld [vmem:[%s24015_s1 + $0x5f8] sm:$0xff] }
 0x126   :  { %11247 = vmatprep.subr.msk.mxu1 %vm395_vm1, %v220_v43  ;;  %v17009_v43 = vld [vmem:[#allocation2 + $0x48] sm:$0xff] }
 0x127   :  { %11176 = vmatmul.mubr.msk.f32.gmra.mrb[34].mxu0 %vm44_vm0, %v16177_v11  ;;  %11194 = vmatmul.mubr.msk.f32.gmra.mrb[22].mxu1 %vm44_vm0, %v16808_v4 }
 0x128   :  { %1551 = vmatprep.mubr.f32.mxu0 %v24029_v3  ;;  %1712 = vmatprep.mubr.f32.mxu1 %v24029_v3 }
 0x129   :  { %11248 = vmatpush1.msk.msra.mxu1 %vm395_vm1, %v219_v63  ;;  %v11287_v63 = vld [vmem:[%s24015_s1 + $0x5d0] sm:$0xff] }
 0x12a   :  { %12994 = vmatprep.subr.bf16.mxu1 %v12993_v0  ;;  %v17031_v0 = vld [vmem:[#allocation2 + $0x58] sm:$0xff] }
 0x12b   :  { %11177 = vmatmul.mubr.msk.f32.gmra.mrb[36].mxu0 %vm44_vm0, %v16185_v12  ;;  %11195 = vmatmul.mubr.msk.f32.gmra.mrb[24].mxu1 %vm44_vm0, %v16817_v9 }
 0x12c   :  { %1557 = vmatprep.mubr.f32.mxu0 %v24029_v3  ;;  %1718 = vmatprep.mubr.f32.mxu1 %v24029_v3 }
 0x12f   :  { %11178 = vmatmul.mubr.msk.f32.gmra.mrb[38].mxu0 %vm44_vm0, %v16193_v13  ;;  %11196 = vmatmul.mubr.msk.f32.gmra.mrb[26].mxu1 %vm44_vm0, %v16031_v20  ;;  %v16865_v20 = vld [vmem:[#allocation2 + $0xd0] sm:$0xff] }
 0x130   :  { %1563 = vmatprep.mubr.f32.mxu0 %v24029_v3  ;;  %1724 = vmatprep.mubr.f32.mxu1 %v24029_v3 }
 0x133   :  { %11179 = vmatmul.mubr.msk.f32.gmra.mrb[40].mxu0 %vm44_vm0, %v16201_v14  ;;  %11197 = vmatmul.mubr.msk.f32.gmra.mrb[28].mxu1 %vm44_vm0, %v16055_v30  ;;  %v11277_v30 = vld [vmem:[%s24015_s1 + $0x580] sm:$0xff] }
 0x134   :  { %1569 = vmatprep.mubr.f32.mxu0 %v24029_v3  ;;  %1730 = vmatprep.mubr.f32.mxu1 %v24029_v3 }
 0x137   :  { %11180 = vmatmul.mubr.msk.f32.gmra.mrb[42].mxu0 %vm44_vm0, %v16209_v15  ;;  %11198 = vmatmul.mubr.msk.f32.gmra.mrb[30].mxu1 %vm44_vm0, %v16075_v37  ;;  %v11285_v37 = vld [vmem:[%s24015_s1 + $0x5c0] sm:$0xff] }
 0x138   :  { %1575 = vmatprep.mubr.f32.mxu0 %v24029_v3  ;;  %1736 = vmatprep.mubr.f32.mxu1 %v24029_v3 }
 0x13b   :  { %11181 = vmatmul.mubr.msk.f32.gmra.mrb[100].mxu0 %vm44_vm0, %v16217_v16  ;;  %11199 = vmatmul.mubr.msk.f32.gmra.mrb[32].mxu1 %vm44_vm0, %v16095_v47  ;;  %v11294_v47 = vld [vmem:[%s24015_s1 + $0x608] sm:$0xff] }
 0x13c   :  { %1581 = vmatprep.mubr.f32.mxu0 %v24029_v3  ;;  %1742 = vmatprep.mubr.f32.mxu1 %v24029_v3 }
 0x13f   :  { %11182 = vmatmul.mubr.msk.f32.gmra.mrb[102].mxu0 %vm44_vm0, %v16651_v54  ;;  %11200 = vmatmul.mubr.msk.f32.gmra.mrb[34].mxu1 %vm44_vm0, %v16115_v55  ;;  %v11302_v55 = vld [vmem:[%s24015_s1 + $0x648] sm:$0xff] }
 0x140   :  { %1587 = vmatprep.mubr.f32.mxu0 %v24029_v3  ;;  %1748 = vmatprep.mubr.f32.mxu1 %v24029_v3 }
 0x143   :  { %11183 = vmatmul.mubr.msk.f32.gmra.mrb[104].mxu0 %vm44_vm0, %v16663_v8  ;;  %11201 = vmatmul.mubr.msk.f32.gmra.mrb[36].mxu1 %vm44_vm0, %v16123_v58  ;;  %v16885_v58 = vld [vmem:[#allocation2 + $0xd8] sm:$0xff] }
 0x144   :  { %1593 = vmatprep.mubr.f32.mxu0 %v24029_v3  ;;  %1754 = vmatprep.mubr.f32.mxu1 %v24029_v3 }
 0x147   :  { %11184 = vmatmul.mubr.msk.f32.gmra.mrb[106].mxu0 %vm44_vm0, %v16675_v56  ;;  %11202 = vmatmul.mubr.msk.f32.gmra.mrb[38].mxu1 %vm44_vm0, %v16143_v1  ;;  %v12975_v1 = vpack.c.bf16 %v11285_v37, %v11277_v30  ;;  %v11296_v30 = vld [vmem:[%s24015_s1 + $0x618] sm:$0xff] }
 0x148   :  { %1599 = vmatprep.mubr.f32.mxu0 %v24029_v3  ;;  %1760 = vmatprep.mubr.f32.mxu1 %v24029_v3  ;;  %v11304_v37 = vld [vmem:[%s24015_s1 + $0x658] sm:$0xff] }
 0x14b   :  { %11185 = vmatmul.mubr.msk.f32.gmra.mrb[108].mxu0 %vm44_vm0, %v16865_v20  ;;  %11203 = vmatmul.mubr.msk.f32.gmra.mrb[40].mxu1 %vm44_vm0, %v16153_v5  ;;  %v12977_v5 = vpack.c.bf16 %v11302_v55, %v11294_v47  ;;  %v12995_v47 = vpack.c.bf16 %v11287_v63, %v11279_v61  ;;  %v12997_v55 = vpack.c.bf16 %v11304_v37, %v11296_v30  ;;  %v17163_v61 = vld [vmem:[#allocation2 + $0xa0] sm:$0xff]  ;;  %v11298_v63 = vld [vmem:[%s24015_s1 + $0x628] sm:$0xff]  ;;  %v17233_v30 = vld [vmem:[#allocation2 + $0x10] sm:$0xff] }
 0x14c   :  { %1605 = vmatprep.mubr.f32.mxu0 %v24029_v3  ;;  %1766 = vmatprep.mubr.f32.mxu1 %v24029_v3 }
 0x14f   :  { %11186 = vmatmul.mubr.msk.f32.gmra.mrb[110].mxu0 %vm44_vm0, %v16885_v58  ;;  %11204 = vmatmul.mubr.msk.f32.gmra.mrb[42].mxu1 %vm44_vm0, %v16161_v6  ;;  %v11310_v6 = vld [vmem:[%s24015_s1 + $0x688] sm:$0xff] }
 0x150   :  { %1772 = vmatprep.mubr.f32.mxu1 %v24029_v3  ;;  %1909 = vmatprep.mubr.f32.mxu0 %v24029_v3  ;;  %v12981_v22 = vpack.c.bf16 %v11318_v19, %v11310_v6  ;;  %v11320_v6 = vld [vmem:[%s24015_s1 + $0x6d8] sm:$0xff] }
 0x153   :  { %11205 = vmatmul.mubr.msk.f32.gmra.mrb[44].mxu1 %vm44_vm0, %v16169_v10  ;;  %11219 = vmatmul.mubr.msk.f32.vlgmr.msra.gmra.mrb[44].mxu0 %vm44_vm0, %v16541_v57  ;;  %v11309_v10 = vld [vmem:[%s24015_s1 + $0x680] sm:$0xff] }
 0x154   :  { %12976 = vmatpush1.bf16.msra.mxu0 %v12975_v1  ;;  %1778 = vmatprep.mubr.f32.mxu1 %v24029_v3  ;;  %v12983_v46 = vpack.c.bf16 %v11317_v26, %v11309_v10  ;;  %v11295_v1 = vld [vmem:[%s24015_s1 + $0x610] sm:$0xff]  ;;  %v17069_v10 = vld [vmem:[#allocation2 + $0x68] sm:$0xff]  ;;  %v11328_v26 = vld [vmem:[%s24015_s1 + $0x718] sm:$0xff] }
 0x155   :  { %1915 = vmatprep.mubr.f32.mxu0 %v24029_v3  ;;  %12978 = vmatprep.subr.bf16.mxu0 %v12977_v5  ;;  %v11303_v5 = vld [vmem:[%s24015_s1 + $0x650] sm:$0xff] }
 0x156   :  { %v12999_v19 = vpack.c.bf16 %v11303_v5, %v11295_v1  ;;  %v11305_v1 = vld [vmem:[%s24015_s1 + $0x660] sm:$0xff]  ;;  %v11314_v5 = vld [vmem:[%s24015_s1 + $0x6a8] sm:$0xff] }
 0x157   :  { %11206 = vmatmul.mubr.msk.f32.gmra.mrb[46].mxu1 %vm44_vm0, %v16177_v11  ;;  %11220 = vmatmul.mubr.msk.f32.gmra.mrb[46].mxu0 %vm44_vm0, %v16569_v23  ;;  %v11325_v11 = vld [vmem:[%s24015_s1 + $0x700] sm:$0xff] }
 0x158   :  { %1784 = vmatprep.mubr.f32.mxu1 %v24029_v3  ;;  %1921 = vmatprep.mubr.f32.mxu0 %v24029_v3  ;;  %v12987_v36 = vpack.c.bf16 %v11333_v31, %v11325_v11  ;;  %v17089_v11 = vld [vmem:[#allocation2 + $0x70] sm:$0xff]  ;;  %v11344_v31 = vld [vmem:[%s24015_s1 + $0x798] sm:$0xff] }
 0x159   :  { %12980 = vmatpush1.bf16.msra.mxu0 %v12979_v21  ;;  %v13001_v21 = vpack.c.bf16 %v11320_v6, %v11312_v18  ;;  %v17252_v18 = vld [vmem:[#allocation2 + $0x18] sm:$0xff] }
 0x15a   :  { %12982 = vmatprep.subr.bf16.mxu0 %v12981_v22  ;;  %v11319_v22 = vld [vmem:[%s24015_s1 + $0x6d0] sm:$0xff] }
 0x15b   :  { %11207 = vmatmul.mubr.msk.f32.gmra.mrb[48].mxu1 %vm44_vm0, %v16185_v12  ;;  %11221 = vmatmul.mubr.msk.f32.gmra.mrb[48].mxu0 %vm44_vm0, %v16759_v34  ;;  %v11341_v12 = vld [vmem:[%s24015_s1 + $0x780] sm:$0xff] }
 0x15c   :  { %1790 = vmatprep.mubr.f32.mxu1 %v24029_v3  ;;  %1927 = vmatprep.mubr.f32.mxu0 %v24029_v3  ;;  %v12991_v40 = vpack.c.bf16 %v11349_v38, %v11341_v12  ;;  %v17109_v12 = vld [vmem:[#allocation2 + $0x78] sm:$0xff] }
 0x15d   :  { %12984 = vmatpush1.bf16.msra.mxu0 %v12983_v46  ;;  %v13005_v46 = vpack.c.bf16 %v11336_v27, %v11328_v26  ;;  %v17273_v26 = vld [vmem:[#allocation2 + $0x20] sm:$0xff] }
 0x15e   :  { %12986 = vmatprep.subr.bf16.mxu0 %v12985_v29  ;;  %v11335_v29 = vld [vmem:[%s24015_s1 + $0x750] sm:$0xff] }
 0x15f   :  { %11208 = vmatmul.mubr.msk.f32.gmra.mrb[50].mxu1 %vm44_vm0, %v16193_v13  ;;  %11222 = vmatmul.mubr.msk.f32.gmra.mrb[50].mxu0 %vm44_vm0, %v16779_v48  ;;  %v11358_v13 = vld [vmem:[%s24015_s1 + $0x808] sm:$0xf] }
 0x160   :  { %1796 = vmatprep.mubr.f32.mxu1 %v24029_v3  ;;  %1933 = vmatprep.mubr.f32.mxu0 %v24029_v3 }
 0x161   :  { %12988 = vmatpush1.bf16.msra.mxu0 %v12987_v36  ;;  %v13009_v36 = vpack.c.bf16 %v11352_v32, %v11344_v31  ;;  %v17293_v31 = vld [vmem:[#allocation2 + $0x28] sm:$0xff] }
 0x162   :  { %12990 = vmatprep.subr.bf16.mxu0 %v12989_v2  ;;  %v11351_v2 = vld [vmem:[%s24015_s1 + $0x7d0] sm:$0xff] }
 0x163   :  { %11209 = vmatmul.mubr.msk.f32.gmra.mrb[52].mxu1 %vm44_vm0, %v16201_v14  ;;  %11223 = vmatmul.mubr.msk.f32.gmra.mrb[52].mxu0 %vm44_vm0, %v16787_v50  ;;  %v11357_v14 = vld [vmem:[%s24015_s1 + $0x800] sm:$0xf] }
 0x164   :  { %1802 = vmatprep.mubr.f32.mxu1 %v24029_v3  ;;  %1939 = vmatprep.mubr.f32.mxu0 %v24029_v3 }
 0x165   :  { %12992 = vmatpush1.bf16.msra.mxu0 %v12991_v40  ;;  %v17117_v40 = vld [vmem:[#allocation2 + $0x80] sm:$0xff] }
 0x166   :  { %11365 = vmatprep.subr.msk.mxu0 %vm395_vm1, %v11358_v13  ;;  %v11360_v13 = vld [vmem:[%s24015_s1 + $0x818] sm:$0xf] }
 0x167   :  { %11210 = vmatmul.mubr.msk.f32.gmra.mrb[54].mxu1 %vm44_vm0, %v16209_v15  ;;  %11224 = vmatmul.mubr.msk.f32.gmra.mrb[54].mxu0 %vm44_vm0, %v16808_v4  ;;  %v16993_v15 = vld [vmem:[#allocation2 + $0x38] sm:$0xff] }
 0x168   :  { %1808 = vmatprep.mubr.f32.mxu1 %v24029_v3  ;;  %1945 = vmatprep.mubr.f32.mxu0 %v24029_v3 }
 0x169   :  { %11366 = vmatpush1.msk.msra.mxu0 %vm395_vm1, %v11357_v14  ;;  %v17138_v14 = vld [vmem:[#allocation2 + $0x88] sm:$0xff] }
 0x16a   :  { %13014 = vmatprep.subr.bf16.mxu0 %v13013_v49  ;;  %v17147_v49 = vld [vmem:[#allocation2 + $0x90] sm:$0xff] }
 0x16b   :  { %11211 = vmatmul.mubr.msk.f32.gmra.mrb[56].mxu1 %vm44_vm0, %v16217_v16  ;;  %11225 = vmatmul.mubr.msk.f32.gmra.mrb[56].mxu0 %vm44_vm0, %v16817_v9  ;;  %v17001_v16 = vld [vmem:[#allocation2 + $0x40] sm:$0xff] }
 0x16c   :  { %1814 = vmatprep.mubr.f32.mxu1 %v24029_v3  ;;  %1951 = vmatprep.mubr.f32.mxu0 %v24029_v3 }
 0x16f   :  { %11212 = vmatmul.mubr.msk.f32.gmra.mrb[58].mxu1 %vm44_vm0, %v16651_v54  ;;  %11226 = vmatmul.mubr.msk.f32.gmra.mrb[58].mxu0 %vm44_vm0, %v16993_v15 }
 0x170   :  { %1820 = vmatprep.mubr.f32.mxu1 %v24029_v3  ;;  %1957 = vmatprep.mubr.f32.mxu0 %v24029_v3 }
 0x173   :  { %11213 = vmatmul.mubr.msk.f32.gmra.mrb[60].mxu1 %vm44_vm0, %v16663_v8  ;;  %11227 = vmatmul.mubr.msk.f32.gmra.mrb[60].mxu0 %vm44_vm0, %v17001_v16 }
 0x174   :  { %1826 = vmatprep.mubr.f32.mxu1 %v24029_v3  ;;  %1963 = vmatprep.mubr.f32.mxu0 %v24029_v3 }
 0x177   :  { %11214 = vmatmul.mubr.msk.f32.gmra.mrb[62].mxu1 %vm44_vm0, %v16675_v56  ;;  %11228 = vmatmul.mubr.msk.f32.gmra.mrb[62].mxu0 %vm44_vm0, %v17009_v43 }
 0x178   :  { %1832 = vmatprep.mubr.f32.mxu1 %v24029_v3  ;;  %1969 = vmatprep.mubr.f32.mxu0 %v24029_v3 }
 0x17b   :  { %11215 = vmatmul.mubr.msk.f32.gmra.mrb[64].mxu1 %vm44_vm0, %v16865_v20  ;;  %11229 = vmatmul.mubr.msk.f32.gmra.mrb[64].mxu0 %vm44_vm0, %v17017_v62 }
 0x17c   :  { %1838 = vmatprep.mubr.f32.mxu1 %v24029_v3  ;;  %1975 = vmatprep.mubr.f32.mxu0 %v24029_v3 }
 0x17f   :  { %11216 = vmatmul.mubr.msk.f32.gmra.mrb[66].mxu1 %vm44_vm0, %v16885_v58  ;;  %11230 = vmatmul.mubr.msk.f32.gmra.mrb[66].mxu0 %vm44_vm0, %v17031_v0 }
 0x180   :  { %1981 = vmatprep.mubr.f32.mxu0 %v24029_v3  ;;  %2142 = vmatprep.mubr.f32.mxu1 %v24029_v3 }
 0x183   :  { %11231 = vmatmul.mubr.msk.f32.gmra.mrb[68].mxu0 %vm44_vm0, %v17049_v17  ;;  %11249 = vmatmul.mubr.msk.f32.vlgmr.msra.gmra.mrb[68].mxu1 %vm44_vm0, %v16541_v57  ;;  %v11311_v57 = vld [vmem:[%s24015_s1 + $0x690] sm:$0xff] }
 0x184   :  { %1987 = vmatprep.mubr.f32.mxu0 %v24029_v3  ;;  %2148 = vmatprep.mubr.f32.mxu1 %v24029_v3  ;;  %v13003_v28 = vpack.c.bf16 %v11319_v22, %v11311_v57  ;;  %v11321_v57 = vld [vmem:[%s24015_s1 + $0x6e0] sm:$0xff]  ;;  %v11330_v22 = vld [vmem:[%s24015_s1 + $0x728] sm:$0xff] }
 0x185   :  { %12996 = vmatpush1.bf16.msra.mxu1 %v12995_v47 }
 0x186   :  { %12998 = vmatprep.subr.bf16.mxu1 %v12997_v55  ;;  %v11297_v55 = vld [vmem:[%s24015_s1 + $0x620] sm:$0xff] }
 0x187   :  { %11232 = vmatmul.mubr.msk.f32.gmra.mrb[70].mxu0 %vm44_vm0, %v17069_v10  ;;  %11250 = vmatmul.mubr.msk.f32.gmra.mrb[70].mxu1 %vm44_vm0, %v16569_v23  ;;  %v11327_v23 = vld [vmem:[%s24015_s1 + $0x710] sm:$0xff]  ;;  %v13019_v6 = vpack.c.bf16 %v11305_v1, %v11297_v55 }
 0x188   :  { %1993 = vmatprep.mubr.f32.mxu0 %v24029_v3  ;;  %2154 = vmatprep.mubr.f32.mxu1 %v24029_v3  ;;  %v13007_v33 = vpack.c.bf16 %v11335_v29, %v11327_v23  ;;  %v11337_v23 = vld [vmem:[%s24015_s1 + $0x760] sm:$0xff]  ;;  %v11346_v29 = vld [vmem:[%s24015_s1 + $0x7a8] sm:$0xff]  ;;  %v11315_v1 = vld [vmem:[%s24015_s1 + $0x6b0] sm:$0xff] }
 0x189   :  { %13000 = vmatpush1.bf16.msra.mxu1 %v12999_v19 }
 0x18a   :  { %13002 = vmatprep.subr.bf16.mxu1 %v13001_v21  ;;  %v11313_v21 = vld [vmem:[%s24015_s1 + $0x6a0] sm:$0xff] }
 0x18b   :  { %11233 = vmatmul.mubr.msk.f32.gmra.mrb[72].mxu0 %vm44_vm0, %v17089_v11  ;;  %11251 = vmatmul.mubr.msk.f32.gmra.mrb[72].mxu1 %vm44_vm0, %v16759_v34  ;;  %v11343_v34 = vld [vmem:[%s24015_s1 + $0x790] sm:$0xff]  ;;  %v13023_v27 = vpack.c.bf16 %v11321_v57, %v11313_v21 }
 0x18c   :  { %1999 = vmatprep.mubr.f32.mxu0 %v24029_v3  ;;  %2160 = vmatprep.mubr.f32.mxu1 %v24029_v3  ;;  %v13011_v38 = vpack.c.bf16 %v11351_v2, %v11343_v34  ;;  %v11353_v34 = vld [vmem:[%s24015_s1 + $0x7e0] sm:$0xff]  ;;  %v17307_v2 = vld [vmem:[#allocation2 + $0x30] sm:$0xff] }
 0x18d   :  { %13004 = vmatpush1.bf16.msra.mxu1 %v13003_v28 }
 0x18e   :  { %13006 = vmatprep.subr.bf16.mxu1 %v13005_v46  ;;  %v11329_v46 = vld [vmem:[%s24015_s1 + $0x720] sm:$0xff] }
 0x18f   :  { %11234 = vmatmul.mubr.msk.f32.gmra.mrb[74].mxu0 %vm44_vm0, %v17109_v12  ;;  %11252 = vmatmul.mubr.msk.f32.gmra.mrb[74].mxu1 %vm44_vm0, %v16779_v48  ;;  %v11284_v48 = vld [vmem:[%s24015_s1 + $0x5b8] sm:$0xff]  ;;  %v13027_v32 = vpack.c.bf16 %v11337_v23, %v11329_v46  ;;  %v17457_v46 = vld [vmem:[#allocation2 + $0x88] sm:$0xff] }
 0x190   :  { %2005 = vmatprep.mubr.f32.mxu0 %v24029_v3  ;;  %2166 = vmatprep.mubr.f32.mxu1 %v24029_v3  ;;  %v13033_v45 = vpack.c.bf16 %v11292_v24, %v11284_v48  ;;  %v17324_v48 = vld [vmem:[#allocation2 + $0x38] sm:$0xff]  ;;  %v11361_v24 = vld [vmem:[%s24015_s1 + $0x820] sm:$0xf] }
 0x191   :  { %13008 = vmatpush1.bf16.msra.mxu1 %v13007_v33 }
 0x192   :  { %13010 = vmatprep.subr.bf16.mxu1 %v13009_v36  ;;  %v11345_v36 = vld [vmem:[%s24015_s1 + $0x7a0] sm:$0xff] }
 0x193   :  { %11235 = vmatmul.mubr.msk.f32.gmra.mrb[76].mxu0 %vm44_vm0, %v17117_v40  ;;  %11253 = vmatmul.mubr.msk.f32.gmra.mrb[76].mxu1 %vm44_vm0, %v16787_v50  ;;  %v11359_v50 = vld [vmem:[%s24015_s1 + $0x810] sm:$0xf] }
 0x194   :  { %2011 = vmatprep.mubr.f32.mxu0 %v24029_v3  ;;  %2172 = vmatprep.mubr.f32.mxu1 %v24029_v3 }
 0x195   :  { %13012 = vmatpush1.bf16.msra.mxu1 %v13011_v38  ;;  %v11362_v38 = vld [vmem:[%s24015_s1 + $0x828] sm:$0xf] }
 0x196   :  { %11395 = vmatprep.subr.msk.mxu1 %vm395_vm1, %v11360_v13  ;;  %v11494_v13 = vld [vmem:[%s24015_s1 + $0x888] sm:$0xff] }
 0x197   :  { %11236 = vmatmul.mubr.msk.f32.gmra.mrb[78].mxu0 %vm44_vm0, %v17138_v14  ;;  %11254 = vmatmul.mubr.msk.f32.gmra.mrb[78].mxu1 %vm44_vm0, %v16808_v4  ;;  %v17155_v4 = vld [vmem:[#allocation2 + $0x98] sm:$0xff] }
 0x198   :  { %2017 = vmatprep.mubr.f32.mxu0 %v24029_v3  ;;  %2178 = vmatprep.mubr.f32.mxu1 %v24029_v3 }
 0x199   :  { %11396 = vmatpush1.msk.msra.mxu1 %vm395_vm1, %v11359_v50 }
 0x19a   :  { %13034 = vmatprep.subr.bf16.mxu1 %v13033_v45  ;;  %v17336_v45 = vld [vmem:[#allocation2 + $0x40] sm:$0xff] }
 0x19b   :  { %11237 = vmatmul.mubr.msk.f32.gmra.mrb[80].mxu0 %vm44_vm0, %v17147_v49  ;;  %11255 = vmatmul.mubr.msk.f32.gmra.mrb[80].mxu1 %vm44_vm0, %v16817_v9  ;;  %v76_v9 = vld [vmem:[%s24016_s0 + $0xd8] sm:$0xff] }
 0x19c   :  { %2023 = vmatprep.mubr.f32.mxu0 %v24029_v3  ;;  %2184 = vmatprep.mubr.f32.mxu1 %v24029_v3  ;;  %104 = vst.msk [vmem:[#allocation2 + $0xe8] sm:$0xff] %vm44_vm0, %v76_v9  ;;  %v11308_v9 = vld [vmem:[%s24015_s1 + $0x678] sm:$0xff] }
 0x19f   :  { %11238 = vmatmul.mubr.msk.f32.gmra.mrb[82].mxu0 %vm44_vm0, %v17155_v4  ;;  %11256 = vmatmul.mubr.msk.f32.gmra.mrb[82].mxu1 %vm44_vm0, %v16993_v15  ;;  %v17174_v15 = vld [vmem:[#allocation2 + $0xa8] sm:$0xff] }
 0x1a0   :  { %2029 = vmatprep.mubr.f32.mxu0 %v24029_v3  ;;  %2190 = vmatprep.mubr.f32.mxu1 %v24029_v3 }
 0x1a3   :  { %11239 = vmatmul.mubr.msk.f32.gmra.mrb[84].mxu0 %vm44_vm0, %v17163_v61  ;;  %11257 = vmatmul.mubr.msk.f32.gmra.mrb[84].mxu1 %vm44_vm0, %v17001_v16  ;;  %v17183_v16 = vld [vmem:[#allocation2 + $0xb0] sm:$0xff] }
 0x1a4   :  { %2035 = vmatprep.mubr.f32.mxu0 %v24029_v3  ;;  %2196 = vmatprep.mubr.f32.mxu1 %v24029_v3 }
 0x1a7   :  { %11240 = vmatmul.mubr.msk.f32.gmra.mrb[86].mxu0 %vm44_vm0, %v17174_v15  ;;  %11258 = vmatmul.mubr.msk.f32.gmra.mrb[86].mxu1 %vm44_vm0, %v17009_v43  ;;  %v11281_v43 = vld [vmem:[%s24015_s1 + $0x5a0] sm:$0xff] }
 0x1a8   :  { %2041 = vmatprep.mubr.f32.mxu0 %v24029_v3  ;;  %2202 = vmatprep.mubr.f32.mxu1 %v24029_v3 }
 0x1ab   :  { %11241 = vmatmul.mubr.msk.f32.gmra.mrb[88].mxu0 %vm44_vm0, %v17183_v16  ;;  %11259 = vmatmul.mubr.msk.f32.gmra.mrb[88].mxu1 %vm44_vm0, %v17017_v62  ;;  %v11289_v62 = vld [vmem:[%s24015_s1 + $0x5e0] sm:$0xff] }
 0x1ac   :  { %2047 = vmatprep.mubr.f32.mxu0 %v24029_v3  ;;  %2208 = vmatprep.mubr.f32.mxu1 %v24029_v3  ;;  %v13015_v37 = vpack.c.bf16 %v11289_v62, %v11281_v43  ;;  %v11307_v62 = vld [vmem:[%s24015_s1 + $0x670] sm:$0xff] }
 0x1af   :  { %11242 = vmatmul.mubr.msk.f32.gmra.mrb[90].mxu0 %vm44_vm0, %v16651_v54  ;;  %11260 = vmatmul.mubr.msk.f32.gmra.mrb[90].mxu1 %vm44_vm0, %v17031_v0  ;;  %v11306_v0 = vld [vmem:[%s24015_s1 + $0x668] sm:$0xff] }
 0x1b0   :  { %2053 = vmatprep.mubr.f32.mxu0 %v24029_v3  ;;  %2214 = vmatprep.mubr.f32.mxu1 %v24029_v3  ;;  %v13017_v47 = vpack.c.bf16 %v11306_v0, %v11298_v63  ;;  %v11316_v63 = vld [vmem:[%s24015_s1 + $0x6b8] sm:$0xff] }
 0x1b1   :  { %v11324_v0 = vld [vmem:[%s24015_s1 + $0x6f8] sm:$0xff] }
 0x1b2   :  { %v13041_v55 = vpack.c.bf16 %v11324_v0, %v11316_v63  ;;  %v17573_v63 = vld [vmem:[#allocation2 + $0xe8] sm:$0xff]  ;;  %v11485_v0 = vld [vmem:[%s24015_s1 + $0x840] sm:$0xff] }
 0x1b3   :  { %11243 = vmatmul.mubr.msk.f32.gmra.mrb[92].mxu0 %vm44_vm0, %v16663_v8  ;;  %11261 = vmatmul.mubr.msk.f32.gmra.mrb[92].mxu1 %vm44_vm0, %v17049_v17  ;;  %v11322_v17 = vld [vmem:[%s24015_s1 + $0x6e8] sm:$0xff] }
 0x1b4   :  { %2059 = vmatprep.mubr.f32.mxu0 %v24029_v3  ;;  %2220 = vmatprep.mubr.f32.mxu1 %v24029_v3  ;;  %v13021_v19 = vpack.c.bf16 %v11322_v17, %v11314_v5  ;;  %v11323_v5 = vld [vmem:[%s24015_s1 + $0x6f0] sm:$0xff]  ;;  %v11332_v17 = vld [vmem:[%s24015_s1 + $0x738] sm:$0xff] }
 0x1b5   :  { %v13043_v21 = vpack.c.bf16 %v11323_v5, %v11315_v1  ;;  %v11510_v1 = vld [vmem:[%s24015_s1 + $0x908] sm:$0xff] }
 0x1b7   :  { %11244 = vmatmul.mubr.msk.f32.gmra.mrb[94].mxu0 %vm44_vm0, %v16675_v56  ;;  %11262 = vmatmul.mubr.msk.f32.gmra.mrb[94].mxu1 %vm44_vm0, %v17069_v10  ;;  %v11338_v10 = vld [vmem:[%s24015_s1 + $0x768] sm:$0xff] }
 0x1b8   :  { %2065 = vmatprep.mubr.f32.mxu0 %v24029_v3  ;;  %2226 = vmatprep.mubr.f32.mxu1 %v24029_v3  ;;  %v13025_v28 = vpack.c.bf16 %v11338_v10, %v11330_v22  ;;  %v11331_v22 = vld [vmem:[%s24015_s1 + $0x730] sm:$0xff] }
 0x1b9   :  { %v11339_v10 = vld [vmem:[%s24015_s1 + $0x770] sm:$0xff] }
 0x1ba   :  { %v13047_v23 = vpack.c.bf16 %v11339_v10, %v11331_v22  ;;  %v11526_v22 = vld [vmem:[%s24015_s1 + $0x988] sm:$0xff] }
 0x1bb   :  { %11245 = vmatmul.mubr.msk.f32.gmra.mrb[96].mxu0 %vm44_vm0, %v16865_v20  ;;  %11263 = vmatmul.mubr.msk.f32.gmra.mrb[96].mxu1 %vm44_vm0, %v17089_v11  ;;  %v11354_v11 = vld [vmem:[%s24015_s1 + $0x7e8] sm:$0xff] }
 0x1bc   :  { %2071 = vmatprep.mubr.f32.mxu0 %v24029_v3  ;;  %2232 = vmatprep.mubr.f32.mxu1 %v24029_v3  ;;  %v13029_v33 = vpack.c.bf16 %v11354_v11, %v11346_v29  ;;  %v11347_v11 = vld [vmem:[%s24015_s1 + $0x7b0] sm:$0xff] }
 0x1bf   :  { %11246 = vmatmul.mubr.msk.f32.gmra.mrb[98].mxu0 %vm44_vm0, %v16885_v58  ;;  %11264 = vmatmul.mubr.msk.f32.gmra.mrb[98].mxu1 %vm44_vm0, %v17109_v12  ;;  %v13031_v12 = vpack.c.bf16 %v11353_v34, %v11345_v36  ;;  %v11364_v34 = vld [vmem:[%s24015_s1 + $0x838] sm:$0xf] }
 0x1c0   :  { %2238 = vmatprep.mubr.f32.mxu1 %v24029_v3  ;;  %2600 = vmatprep.mubr.f32.mxu0 %v24029_v3 }
 0x1c3   :  { %11265 = vmatmul.mubr.msk.f32.gmra.mrb[100].mxu1 %vm44_vm0, %v17117_v40  ;;  %11367 = vmatmul.mubr.msk.f32.vlgmr.msra.gmra.mrb[0].mxu0 %vm44_vm0, %v17233_v30  ;;  %v11486_v40 = vld [vmem:[%s24015_s1 + $0x848] sm:$0xff] }
 0x1c4   :  { %13016 = vmatpush1.bf16.msra.mxu0 %v13015_v37  ;;  %2244 = vmatprep.mubr.f32.mxu1 %v24029_v3  ;;  %v13053_v50 = vpack.c.bf16 %v11494_v13, %v11486_v40  ;;  %v17417_v37 = vld [vmem:[#allocation2 + $0x78] sm:$0xff]  ;;  %v11363_v13 = vld [vmem:[%s24015_s1 + $0x830] sm:$0xf] }
 0x1c5   :  { %2606 = vmatprep.mubr.f32.mxu0 %v24029_v3  ;;  %13018 = vmatprep.subr.bf16.mxu0 %v13017_v47  ;;  %v17488_v40 = vld [vmem:[#allocation2 + $0x98] sm:$0xff] }
 0x1c7   :  { %11266 = vmatmul.mubr.msk.f32.gmra.mrb[102].mxu1 %vm44_vm0, %v17138_v14  ;;  %11368 = vmatmul.mubr.msk.f32.gmra.mrb[2].mxu0 %vm44_vm0, %v17252_v18  ;;  %v17345_v14 = vld [vmem:[#allocation2 + $0x48] sm:$0xff] }
 0x1c8   :  { %2250 = vmatprep.mubr.f32.mxu1 %v24029_v3  ;;  %2612 = vmatprep.mubr.f32.mxu0 %v24029_v3 }
 0x1c9   :  { %13020 = vmatpush1.bf16.msra.mxu0 %v13019_v6  ;;  %v11340_v6 = vld [vmem:[%s24015_s1 + $0x778] sm:$0xff] }
 0x1ca   :  { %13022 = vmatprep.subr.bf16.mxu0 %v13021_v19  ;;  %v17437_v19 = vld [vmem:[#allocation2 + $0x80] sm:$0xff]  ;;  %v13045_v57 = vpack.c.bf16 %v11340_v6, %v11332_v17 }
 0x1cb   :  { %11267 = vmatmul.mubr.msk.f32.gmra.mrb[104].mxu1 %vm44_vm0, %v17147_v49  ;;  %11369 = vmatmul.mubr.msk.f32.gmra.mrb[4].mxu0 %vm44_vm0, %v17273_v26  ;;  %v17353_v49 = vld [vmem:[#allocation2 + $0x50] sm:$0xff]  ;;  %v11501_v6 = vld [vmem:[%s24015_s1 + $0x8c0] sm:$0xff] }
 0x1cc   :  { %2256 = vmatprep.mubr.f32.mxu1 %v24029_v3  ;;  %2618 = vmatprep.mubr.f32.mxu0 %v24029_v3 }
 0x1cd   :  { %13024 = vmatpush1.bf16.msra.mxu0 %v13023_v27  ;;  %v11348_v27 = vld [vmem:[%s24015_s1 + $0x7b8] sm:$0xff] }
 0x1ce   :  { %13026 = vmatprep.subr.bf16.mxu0 %v13025_v28  ;;  %v11356_v28 = vld [vmem:[%s24015_s1 + $0x7f8] sm:$0xff] }
 0x1cf   :  { %11268 = vmatmul.mubr.msk.f32.gmra.mrb[106].mxu1 %vm44_vm0, %v17155_v4  ;;  %11370 = vmatmul.mubr.msk.f32.gmra.mrb[6].mxu0 %vm44_vm0, %v17293_v31  ;;  %v11283_v4 = vld [vmem:[%s24015_s1 + $0x5b0] sm:$0xff]  ;;  %v13049_v29 = vpack.c.bf16 %v11356_v28, %v11348_v27  ;;  %v11517_v28 = vld [vmem:[%s24015_s1 + $0x940] sm:$0xff] }
 0x1d0   :  { %2262 = vmatprep.mubr.f32.mxu1 %v24029_v3  ;;  %2624 = vmatprep.mubr.f32.mxu0 %v24029_v3 }
 0x1d1   :  { %13028 = vmatpush1.bf16.msra.mxu0 %v13027_v32  ;;  %v11355_v32 = vld [vmem:[%s24015_s1 + $0x7f0] sm:$0xff] }
 0x1d2   :  { %13030 = vmatprep.subr.bf16.mxu0 %v13029_v33  ;;  %v17471_v33 = vld [vmem:[#allocation2 + $0x90] sm:$0xff]  ;;  %v13051_v36 = vpack.c.bf16 %v11355_v32, %v11347_v11  ;;  %v11542_v11 = vld [vmem:[%s24015_s1 + $0xa08] sm:$0xff] }
 0x1d3   :  { %11269 = vmatmul.mubr.msk.f32.gmra.mrb[108].mxu1 %vm44_vm0, %v17163_v61  ;;  %11371 = vmatmul.mubr.msk.f32.gmra.mrb[8].mxu0 %vm44_vm0, %v17307_v2  ;;  %v11291_v61 = vld [vmem:[%s24015_s1 + $0x5f0] sm:$0xff] }
 0x1d4   :  { %2268 = vmatprep.mubr.f32.mxu1 %v24029_v3  ;;  %2630 = vmatprep.mubr.f32.mxu0 %v24029_v3 }
 0x1d5   :  { %13032 = vmatpush1.bf16.msra.mxu0 %v13031_v12  ;;  %v11488_v12 = vld [vmem:[%s24015_s1 + $0x858] sm:$0xff] }
 0x1d6   :  { %11425 = vmatprep.subr.msk.mxu0 %vm395_vm1, %v11362_v38  ;;  %v11496_v38 = vld [vmem:[%s24015_s1 + $0x898] sm:$0xff] }
 0x1d7   :  { %11270 = vmatmul.mubr.msk.f32.gmra.mrb[110].mxu1 %vm44_vm0, %v17174_v15  ;;  %11372 = vmatmul.mubr.msk.f32.gmra.mrb[10].mxu0 %vm44_vm0, %v17324_v48  ;;  %v17397_v15 = vld [vmem:[#allocation2 + $0x70] sm:$0xff] }
 0x1d8   :  { %2274 = vmatprep.mubr.f32.mxu1 %v24029_v3  ;;  %2636 = vmatprep.mubr.f32.mxu0 %v24029_v3 }
 0x1d9   :  { %11426 = vmatpush1.msk.msra.mxu0 %vm395_vm1, %v11361_v24  ;;  %v13073_v24 = vpack.c.bf16 %v11496_v38, %v11488_v12  ;;  %v11541_v12 = vld [vmem:[%s24015_s1 + $0xa00] sm:$0xff]  ;;  %v11550_v38 = vld [vmem:[%s24015_s1 + $0xa48] sm:$0xff] }
 0x1da   :  { %13054 = vmatprep.subr.bf16.mxu0 %v13053_v50  ;;  %v17500_v50 = vld [vmem:[#allocation2 + $0xa0] sm:$0xff] }
 0x1db   :  { %11271 = vmatmul.mubr.msk.f32.gmra.mrb[112].mxu1 %vm44_vm0, %v17183_v16  ;;  %11373 = vmatmul.mubr.msk.f32.gmra.mrb[12].mxu0 %vm44_vm0, %v17336_v45  ;;  %v13035_v16 = vpack.c.bf16 %v11291_v61, %v11283_v4  ;;  %v17509_v4 = vld [vmem:[#allocation2 + $0xa8] sm:$0xff]  ;;  %v17517_v61 = vld [vmem:[#allocation2 + $0xb0] sm:$0xff] }
 0x1dc   :  { %2280 = vmatprep.mubr.f32.mxu1 %v24029_v3  ;;  %2642 = vmatprep.mubr.f32.mxu0 %v24029_v3 }
 0x1df   :  { %11272 = vmatmul.mubr.msk.f32.gmra.mrb[114].mxu1 %vm44_vm0, %v16651_v54  ;;  %11374 = vmatmul.mubr.msk.f32.gmra.mrb[14].mxu0 %vm44_vm0, %v17345_v14  ;;  %v17361_v54 = vld [vmem:[#allocation2 + $0x58] sm:$0xff] }
 0x1e0   :  { %2286 = vmatprep.mubr.f32.mxu1 %v24029_v3  ;;  %2648 = vmatprep.mubr.f32.mxu0 %v24029_v3 }
 0x1e3   :  { %11273 = vmatmul.mubr.msk.f32.gmra.mrb[116].mxu1 %vm44_vm0, %v16663_v8  ;;  %11375 = vmatmul.mubr.msk.f32.gmra.mrb[16].mxu0 %vm44_vm0, %v17353_v49  ;;  %v17369_v8 = vld [vmem:[#allocation2 + $0x60] sm:$0xff] }
 0x1e4   :  { %2292 = vmatprep.mubr.f32.mxu1 %v24029_v3  ;;  %2654 = vmatprep.mubr.f32.mxu0 %v24029_v3 }
 0x1e7   :  { %11274 = vmatmul.mubr.msk.f32.gmra.mrb[118].mxu1 %vm44_vm0, %v16675_v56  ;;  %11376 = vmatmul.mubr.msk.f32.gmra.mrb[18].mxu0 %vm44_vm0, %v17361_v54  ;;  %v17377_v56 = vld [vmem:[#allocation2 + $0x68] sm:$0xff] }
 0x1e8   :  { %2298 = vmatprep.mubr.f32.mxu1 %v24029_v3  ;;  %2660 = vmatprep.mubr.f32.mxu0 %v24029_v3 }
 0x1eb   :  { %11275 = vmatmul.mubr.msk.f32.gmra.mrb[120].mxu1 %vm44_vm0, %v16865_v20  ;;  %11377 = vmatmul.mubr.msk.f32.gmra.mrb[20].mxu0 %vm44_vm0, %v17369_v8  ;;  %v11300_v20 = vld [vmem:[%s24015_s1 + $0x638] sm:$0xff] }
 0x1ec   :  { %2304 = vmatprep.mubr.f32.mxu1 %v24029_v3  ;;  %2666 = vmatprep.mubr.f32.mxu0 %v24029_v3  ;;  %v13037_v43 = vpack.c.bf16 %v11308_v9, %v11300_v20  ;;  %v17525_v20 = vld [vmem:[#allocation2 + $0xb8] sm:$0xff]  ;;  %v17533_v9 = vld [vmem:[#allocation2 + $0xc0] sm:$0xff] }
 0x1ef   :  { %11276 = vmatmul.mubr.msk.f32.gmra.mrb[122].mxu1 %vm44_vm0, %v16885_v58  ;;  %11378 = vmatmul.mubr.msk.f32.gmra.mrb[22].mxu0 %vm44_vm0, %v17377_v56  ;;  %v11299_v58 = vld [vmem:[%s24015_s1 + $0x630] sm:$0xff] }
 0x1f0   :  { %2672 = vmatprep.mubr.f32.mxu0 %v24029_v3  ;;  %2833 = vmatprep.mubr.f32.mxu1 %v24029_v3  ;;  %v13039_v47 = vpack.c.bf16 %v11307_v62, %v11299_v58  ;;  %v17557_v58 = vld [vmem:[#allocation2 + $0xd8] sm:$0xff]  ;;  %v17565_v62 = vld [vmem:[#allocation2 + $0xe0] sm:$0xff] }
 0x1f3   :  { %11379 = vmatmul.mubr.msk.f32.gmra.mrb[24].mxu0 %vm44_vm0, %v17397_v15  ;;  %11397 = vmatmul.mubr.msk.f32.vlgmr.msra.gmra.mrb[12].mxu1 %vm44_vm0, %v17233_v30 }
 0x1f4   :  { %2678 = vmatprep.mubr.f32.mxu0 %v24029_v3  ;;  %2839 = vmatprep.mubr.f32.mxu1 %v24029_v3 }
 0x1f5   :  { %13036 = vmatpush1.bf16.msra.mxu1 %v13035_v16  ;;  %v17541_v16 = vld [vmem:[#allocation2 + $0xc8] sm:$0xff] }
 0x1f6   :  { %13038 = vmatprep.subr.bf16.mxu1 %v13037_v43  ;;  %v17549_v43 = vld [vmem:[#allocation2 + $0xd0] sm:$0xff] }
 0x1f7   :  { %11380 = vmatmul.mubr.msk.f32.gmra.mrb[26].mxu0 %vm44_vm0, %v17417_v37  ;;  %11398 = vmatmul.mubr.msk.f32.gmra.mrb[14].mxu1 %vm44_vm0, %v17252_v18 }
 0x1f8   :  { %2684 = vmatprep.mubr.f32.mxu0 %v24029_v3  ;;  %2845 = vmatprep.mubr.f32.mxu1 %v24029_v3 }
 0x1f9   :  { %13040 = vmatpush1.bf16.msra.mxu1 %v13039_v47  ;;  %v11493_v47 = vld [vmem:[%s24015_s1 + $0x880] sm:$0xff] }
 0x1fa   :  { %13042 = vmatprep.subr.bf16.mxu1 %v13041_v55  ;;  %v11502_v55 = vld [vmem:[%s24015_s1 + $0x8c8] sm:$0xff]  ;;  %v13055_v5 = vpack.c.bf16 %v11493_v47, %v11485_v0  ;;  %v11549_v47 = vld [vmem:[%s24015_s1 + $0xa40] sm:$0xff] }
 0x1fb   :  { %11381 = vmatmul.mubr.msk.f32.gmra.mrb[28].mxu0 %vm44_vm0, %v17437_v19  ;;  %11399 = vmatmul.mubr.msk.f32.gmra.mrb[16].mxu1 %vm44_vm0, %v17273_v26  ;;  %v13057_v17 = vpack.c.bf16 %v11510_v1, %v11502_v55  ;;  %v11557_v55 = vld [vmem:[%s24015_s1 + $0xa80] sm:$0xff] }
 0x1fc   :  { %2690 = vmatprep.mubr.f32.mxu0 %v24029_v3  ;;  %2851 = vmatprep.mubr.f32.mxu1 %v24029_v3  ;;  %v13071_v1 = vpack.c.bf16 %v11557_v55, %v11549_v47 }
 0x1fd   :  { %13044 = vmatpush1.bf16.msra.mxu1 %v13043_v21  ;;  %v11509_v21 = vld [vmem:[%s24015_s1 + $0x900] sm:$0xff] }
 0x1fe   :  { %13046 = vmatprep.subr.bf16.mxu1 %v13045_v57  ;;  %v11518_v57 = vld [vmem:[%s24015_s1 + $0x948] sm:$0xff]  ;;  %v13059_v10 = vpack.c.bf16 %v11509_v21, %v11501_v6  ;;  %v11565_v21 = vld [vmem:[%s24015_s1 + $0xac0] sm:$0xf] }
 0x1ff   :  { %11382 = vmatmul.mubr.msk.f32.gmra.mrb[30].mxu0 %vm44_vm0, %v17457_v46  ;;  %11400 = vmatmul.mubr.msk.f32.gmra.mrb[18].mxu1 %vm44_vm0, %v17293_v31  ;;  %v13061_v27 = vpack.c.bf16 %v11526_v22, %v11518_v57  ;;  %v11498_v6 = vld [vmem:[%s24015_s1 + $0x8a8] sm:$0xff]  ;;  %v11487_v22 = vld [vmem:[%s24015_s1 + $0x850] sm:$0xff] }
 0x200   :  { %2696 = vmatprep.mubr.f32.mxu0 %v24029_v3  ;;  %2857 = vmatprep.mubr.f32.mxu1 %v24029_v3 }
 0x201   :  { %13048 = vmatpush1.bf16.msra.mxu1 %v13047_v23  ;;  %v11525_v23 = vld [vmem:[%s24015_s1 + $0x980] sm:$0xff] }
 0x202   :  { %13050 = vmatprep.subr.bf16.mxu1 %v13049_v29  ;;  %v11534_v29 = vld [vmem:[%s24015_s1 + $0x9c8] sm:$0xff]  ;;  %v13063_v32 = vpack.c.bf16 %v11525_v23, %v11517_v28  ;;  %v11512_v28 = vld [vmem:[%s24015_s1 + $0x918] sm:$0xff] }
 0x203   :  { %11383 = vmatmul.mubr.msk.f32.gmra.mrb[32].mxu0 %vm44_vm0, %v17471_v33  ;;  %11401 = vmatmul.mubr.msk.f32.gmra.mrb[20].mxu1 %vm44_vm0, %v17307_v2 }
 0x204   :  { %2702 = vmatprep.mubr.f32.mxu0 %v24029_v3  ;;  %2863 = vmatprep.mubr.f32.mxu1 %v24029_v3 }
 0x205   :  { %13052 = vmatpush1.bf16.msra.mxu1 %v13051_v36  ;;  %v13065_v36 = vpack.c.bf16 %v11542_v11, %v11534_v29  ;;  %v11503_v11 = vld [vmem:[%s24015_s1 + $0x8d0] sm:$0xff] }
 0x206   :  { %11455 = vmatprep.subr.msk.mxu1 %vm395_vm1, %v11364_v34  ;;  %v11533_v34 = vld [vmem:[%s24015_s1 + $0x9c0] sm:$0xff] }
 0x207   :  { %11384 = vmatmul.mubr.msk.f32.gmra.mrb[34].mxu0 %vm44_vm0, %v17488_v40  ;;  %11402 = vmatmul.mubr.msk.f32.gmra.mrb[22].mxu1 %vm44_vm0, %v17324_v48 }
 0x208   :  { %2708 = vmatprep.mubr.f32.mxu0 %v24029_v3  ;;  %2869 = vmatprep.mubr.f32.mxu1 %v24029_v3 }
 0x209   :  { %11456 = vmatpush1.msk.msra.mxu1 %vm395_vm1, %v11363_v13  ;;  %v11558_v13 = vld [vmem:[%s24015_s1 + $0xa88] sm:$0xff] }
 0x20a   :  { %13074 = vmatprep.subr.bf16.mxu1 %v13073_v24  ;;  %v13067_v24 = vpack.c.bf16 %v11541_v12, %v11533_v34  ;;  %v13069_v0 = vpack.c.bf16 %v11558_v13, %v11550_v38  ;;  %v11528_v34 = vld [vmem:[%s24015_s1 + $0x998] sm:$0xff]  ;;  %v11527_v13 = vld [vmem:[%s24015_s1 + $0x990] sm:$0xff] }
 0x20b   :  { %11385 = vmatmul.mubr.msk.f32.gmra.mrb[36].mxu0 %vm44_vm0, %v17500_v50  ;;  %11403 = vmatmul.mubr.msk.f32.gmra.mrb[24].mxu1 %vm44_vm0, %v17336_v45 }
 0x20c   :  { %2714 = vmatprep.mubr.f32.mxu0 %v24029_v3  ;;  %2875 = vmatprep.mubr.f32.mxu1 %v24029_v3 }
 0x20f   :  { %11386 = vmatmul.mubr.msk.f32.gmra.mrb[38].mxu0 %vm44_vm0, %v17509_v4  ;;  %11404 = vmatmul.mubr.msk.f32.gmra.mrb[26].mxu1 %vm44_vm0, %v17345_v14 }
 0x210   :  { %2720 = vmatprep.mubr.f32.mxu0 %v24029_v3  ;;  %2881 = vmatprep.mubr.f32.mxu1 %v24029_v3 }
 0x213   :  { %11387 = vmatmul.mubr.msk.f32.gmra.mrb[40].mxu0 %vm44_vm0, %v17517_v61  ;;  %11405 = vmatmul.mubr.msk.f32.gmra.mrb[28].mxu1 %vm44_vm0, %v17353_v49 }
 0x214   :  { %2726 = vmatprep.mubr.f32.mxu0 %v24029_v3  ;;  %2887 = vmatprep.mubr.f32.mxu1 %v24029_v3 }
 0x217   :  { %11388 = vmatmul.mubr.msk.f32.gmra.mrb[42].mxu0 %vm44_vm0, %v17525_v20  ;;  %11406 = vmatmul.mubr.msk.f32.gmra.mrb[30].mxu1 %vm44_vm0, %v17361_v54 }
 0x218   :  { %2732 = vmatprep.mubr.f32.mxu0 %v24029_v3  ;;  %2893 = vmatprep.mubr.f32.mxu1 %v24029_v3 }
 0x21b   :  { %11389 = vmatmul.mubr.msk.f32.gmra.mrb[100].mxu0 %vm44_vm0, %v17533_v9  ;;  %11407 = vmatmul.mubr.msk.f32.gmra.mrb[32].mxu1 %vm44_vm0, %v17369_v8 }
 0x21c   :  { %2738 = vmatprep.mubr.f32.mxu0 %v24029_v3  ;;  %2899 = vmatprep.mubr.f32.mxu1 %v24029_v3 }
 0x21f   :  { %11390 = vmatmul.mubr.msk.f32.gmra.mrb[102].mxu0 %vm44_vm0, %v17541_v16  ;;  %11408 = vmatmul.mubr.msk.f32.gmra.mrb[34].mxu1 %vm44_vm0, %v17377_v56 }
 0x220   :  { %2744 = vmatprep.mubr.f32.mxu0 %v24029_v3  ;;  %2905 = vmatprep.mubr.f32.mxu1 %v24029_v3 }
 0x223   :  { %11391 = vmatmul.mubr.msk.f32.gmra.mrb[104].mxu0 %vm44_vm0, %v17549_v43  ;;  %11409 = vmatmul.mubr.msk.f32.gmra.mrb[36].mxu1 %vm44_vm0, %v17397_v15 }
 0x224   :  { %2750 = vmatprep.mubr.f32.mxu0 %v24029_v3  ;;  %2911 = vmatprep.mubr.f32.mxu1 %v24029_v3 }
 0x227   :  { %11392 = vmatmul.mubr.msk.f32.gmra.mrb[106].mxu0 %vm44_vm0, %v17557_v58  ;;  %11410 = vmatmul.mubr.msk.f32.gmra.mrb[38].mxu1 %vm44_vm0, %v17417_v37 }
 0x228   :  { %2756 = vmatprep.mubr.f32.mxu0 %v24029_v3  ;;  %2917 = vmatprep.mubr.f32.mxu1 %v24029_v3 }
 0x22b   :  { %11393 = vmatmul.mubr.msk.f32.gmra.mrb[108].mxu0 %vm44_vm0, %v17565_v62  ;;  %11411 = vmatmul.mubr.msk.f32.gmra.mrb[40].mxu1 %vm44_vm0, %v17437_v19 }
 0x22c   :  { %2762 = vmatprep.mubr.f32.mxu0 %v24029_v3  ;;  %2923 = vmatprep.mubr.f32.mxu1 %v24029_v3 }
 0x22f   :  { %11394 = vmatmul.mubr.msk.f32.gmra.mrb[110].mxu0 %vm44_vm0, %v17573_v63  ;;  %11412 = vmatmul.mubr.msk.f32.gmra.mrb[42].mxu1 %vm44_vm0, %v17457_v46 }
 0x230   :  { %2929 = vmatprep.mubr.f32.mxu1 %v24029_v3  ;;  %3066 = vmatprep.mubr.f32.mxu0 %v24029_v3 }
 0x233   :  { %11413 = vmatmul.mubr.msk.f32.gmra.mrb[44].mxu1 %vm44_vm0, %v17471_v33  ;;  %11427 = vmatmul.mubr.msk.f32.vlgmr.msra.gmra.mrb[44].mxu0 %vm44_vm0, %v17233_v30 }
 0x234   :  { %13056 = vmatpush1.bf16.msra.mxu0 %v13055_v5  ;;  %2935 = vmatprep.mubr.f32.mxu1 %v24029_v3  ;;  %v11566_v5 = vld [vmem:[%s24015_s1 + $0xac8] sm:$0xf] }
 0x235   :  { %3072 = vmatprep.mubr.f32.mxu0 %v24029_v3  ;;  %13058 = vmatprep.subr.bf16.mxu0 %v13057_v17  ;;  %v11490_v17 = vld [vmem:[%s24015_s1 + $0x868] sm:$0xff] }
 0x236   :  { %v13093_v57 = vpack.c.bf16 %v11498_v6, %v11490_v17  ;;  %v11552_v17 = vld [vmem:[%s24015_s1 + $0xa58] sm:$0xff] }
 0x237   :  { %11414 = vmatmul.mubr.msk.f32.gmra.mrb[46].mxu1 %vm44_vm0, %v17488_v40  ;;  %11428 = vmatmul.mubr.msk.f32.gmra.mrb[46].mxu0 %vm44_vm0, %v17252_v18  ;;  %v11560_v6 = vld [vmem:[%s24015_s1 + $0xa98] sm:$0xff] }
 0x238   :  { %2941 = vmatprep.mubr.f32.mxu1 %v24029_v3  ;;  %3078 = vmatprep.mubr.f32.mxu0 %v24029_v3 }
 0x239   :  { %13060 = vmatpush1.bf16.msra.mxu0 %v13059_v10  ;;  %v11495_v10 = vld [vmem:[%s24015_s1 + $0x890] sm:$0xff] }
 0x23a   :  { %13062 = vmatprep.subr.bf16.mxu0 %v13061_v27  ;;  %v11504_v27 = vld [vmem:[%s24015_s1 + $0x8d8] sm:$0xff]  ;;  %v13075_v23 = vpack.c.bf16 %v11495_v10, %v11487_v22  ;;  %v11551_v22 = vld [vmem:[%s24015_s1 + $0xa50] sm:$0xff] }
 0x23b   :  { %11415 = vmatmul.mubr.msk.f32.gmra.mrb[48].mxu1 %vm44_vm0, %v17500_v50  ;;  %11429 = vmatmul.mubr.msk.f32.gmra.mrb[48].mxu0 %vm44_vm0, %v17273_v26  ;;  %v13077_v29 = vpack.c.bf16 %v11512_v28, %v11504_v27  ;;  %v11559_v10 = vld [vmem:[%s24015_s1 + $0xa90] sm:$0xff]  ;;  %v11568_v28 = vld [vmem:[%s24015_s1 + $0xad8] sm:$0xf] }
 0x23c   :  { %2947 = vmatprep.mubr.f32.mxu1 %v24029_v3  ;;  %3084 = vmatprep.mubr.f32.mxu0 %v24029_v3  ;;  %v13091_v27 = vpack.c.bf16 %v11559_v10, %v11551_v22  ;;  %v11545_v10 = vld [vmem:[%s24015_s1 + $0xa20] sm:$0xff] }
 0x23d   :  { %13064 = vmatpush1.bf16.msra.mxu0 %v13063_v32  ;;  %v11511_v32 = vld [vmem:[%s24015_s1 + $0x910] sm:$0xff] }
 0x23e   :  { %13066 = vmatprep.subr.bf16.mxu0 %v13065_v36  ;;  %v11520_v36 = vld [vmem:[%s24015_s1 + $0x958] sm:$0xff]  ;;  %v13079_v12 = vpack.c.bf16 %v11511_v32, %v11503_v11  ;;  %v11567_v11 = vld [vmem:[%s24015_s1 + $0xad0] sm:$0xf] }
 0x23f   :  { %11416 = vmatmul.mubr.msk.f32.gmra.mrb[50].mxu1 %vm44_vm0, %v17509_v4  ;;  %11430 = vmatmul.mubr.msk.f32.gmra.mrb[50].mxu0 %vm44_vm0, %v17293_v31  ;;  %v13081_v38 = vpack.c.bf16 %v11528_v34, %v11520_v36  ;;  %v11489_v36 = vld [vmem:[%s24015_s1 + $0x860] sm:$0xff] }
 0x240   :  { %2953 = vmatprep.mubr.f32.mxu1 %v24029_v3  ;;  %3090 = vmatprep.mubr.f32.mxu0 %v24029_v3  ;;  %v11497_v34 = vld [vmem:[%s24015_s1 + $0x8a0] sm:$0xff] }
 0x241   :  { %13068 = vmatpush1.bf16.msra.mxu0 %v13067_v24  ;;  %v11536_v24 = vld [vmem:[%s24015_s1 + $0x9d8] sm:$0xff] }
 0x242   :  { %13070 = vmatprep.subr.bf16.mxu0 %v13069_v0  ;;  %v11544_v0 = vld [vmem:[%s24015_s1 + $0xa18] sm:$0xff] }
 0x243   :  { %11417 = vmatmul.mubr.msk.f32.gmra.mrb[52].mxu1 %vm44_vm0, %v17517_v61  ;;  %11431 = vmatmul.mubr.msk.f32.gmra.mrb[52].mxu0 %vm44_vm0, %v17307_v2  ;;  %v13085_v55 = vpack.c.bf16 %v11544_v0, %v11536_v24  ;;  %v11505_v24 = vld [vmem:[%s24015_s1 + $0x8e0] sm:$0xff] }
 0x244   :  { %2959 = vmatprep.mubr.f32.mxu1 %v24029_v3  ;;  %3096 = vmatprep.mubr.f32.mxu0 %v24029_v3  ;;  %v11513_v0 = vld [vmem:[%s24015_s1 + $0x920] sm:$0xff] }
 0x245   :  { %13072 = vmatpush1.bf16.msra.mxu0 %v13071_v1  ;;  %v11535_v1 = vld [vmem:[%s24015_s1 + $0x9d0] sm:$0xff] }
 0x246   :  { %11573 = vmatprep.subr.msk.mxu0 %vm395_vm1, %v11566_v5  ;;  %v11543_v5 = vld [vmem:[%s24015_s1 + $0xa10] sm:$0xff] }
 0x247   :  { %11418 = vmatmul.mubr.msk.f32.gmra.mrb[54].mxu1 %vm44_vm0, %v17525_v20  ;;  %11432 = vmatmul.mubr.msk.f32.gmra.mrb[54].mxu0 %vm44_vm0, %v17324_v48 }
 0x248   :  { %2965 = vmatprep.mubr.f32.mxu1 %v24029_v3  ;;  %3102 = vmatprep.mubr.f32.mxu0 %v24029_v3 }
 0x249   :  { %11574 = vmatpush1.msk.msra.mxu0 %vm395_vm1, %v11565_v21  ;;  %v13087_v21 = vpack.c.bf16 %v11543_v5, %v11535_v1  ;;  %v13099_v1 = vpack.c.bf16 %v11513_v0, %v11505_v24  ;;  %v11508_v24 = vld [vmem:[%s24015_s1 + $0x8f8] sm:$0xff] }
 0x24a   :  { %13094 = vmatprep.subr.bf16.mxu0 %v13093_v57  ;;  %v13089_v57 = vpack.c.bf16 %v11560_v6, %v11552_v17  ;;  %v11529_v17 = vld [vmem:[%s24015_s1 + $0x9a0] sm:$0xff]  ;;  %v11538_v6 = vld [vmem:[%s24015_s1 + $0x9e8] sm:$0xff]  ;;  %v11516_v0 = vld [vmem:[%s24015_s1 + $0x938] sm:$0xff] }
 0x24b   :  { %11419 = vmatmul.mubr.msk.f32.gmra.mrb[56].mxu1 %vm44_vm0, %v17533_v9  ;;  %11433 = vmatmul.mubr.msk.f32.gmra.mrb[56].mxu0 %vm44_vm0, %v17336_v45 }
 0x24c   :  { %2971 = vmatprep.mubr.f32.mxu1 %v24029_v3  ;;  %3108 = vmatprep.mubr.f32.mxu0 %v24029_v3 }
 0x24f   :  { %11420 = vmatmul.mubr.msk.f32.gmra.mrb[58].mxu1 %vm44_vm0, %v17541_v16  ;;  %11434 = vmatmul.mubr.msk.f32.gmra.mrb[58].mxu0 %vm44_vm0, %v17345_v14 }
 0x250   :  { %2977 = vmatprep.mubr.f32.mxu1 %v24029_v3  ;;  %3114 = vmatprep.mubr.f32.mxu0 %v24029_v3 }
 0x253   :  { %11421 = vmatmul.mubr.msk.f32.gmra.mrb[60].mxu1 %vm44_vm0, %v17549_v43  ;;  %11435 = vmatmul.mubr.msk.f32.gmra.mrb[60].mxu0 %vm44_vm0, %v17353_v49 }
 0x254   :  { %2983 = vmatprep.mubr.f32.mxu1 %v24029_v3  ;;  %3120 = vmatprep.mubr.f32.mxu0 %v24029_v3 }
 0x257   :  { %11422 = vmatmul.mubr.msk.f32.gmra.mrb[62].mxu1 %vm44_vm0, %v17557_v58  ;;  %11436 = vmatmul.mubr.msk.f32.gmra.mrb[62].mxu0 %vm44_vm0, %v17361_v54 }
 0x258   :  { %2989 = vmatprep.mubr.f32.mxu1 %v24029_v3  ;;  %3126 = vmatprep.mubr.f32.mxu0 %v24029_v3 }
 0x25b   :  { %11423 = vmatmul.mubr.msk.f32.gmra.mrb[64].mxu1 %vm44_vm0, %v17565_v62  ;;  %11437 = vmatmul.mubr.msk.f32.gmra.mrb[64].mxu0 %vm44_vm0, %v17369_v8 }
 0x25c   :  { %2995 = vmatprep.mubr.f32.mxu1 %v24029_v3  ;;  %3132 = vmatprep.mubr.f32.mxu0 %v24029_v3 }
 0x25f   :  { %11424 = vmatmul.mubr.msk.f32.gmra.mrb[66].mxu1 %vm44_vm0, %v17573_v63  ;;  %11438 = vmatmul.mubr.msk.f32.gmra.mrb[66].mxu0 %vm44_vm0, %v17377_v56 }
 0x260   :  { %3138 = vmatprep.mubr.f32.mxu0 %v24029_v3  ;;  %3299 = vmatprep.mubr.f32.mxu1 %v24029_v3 }
 0x263   :  { %11439 = vmatmul.mubr.msk.f32.gmra.mrb[68].mxu0 %vm44_vm0, %v17397_v15  ;;  %11457 = vmatmul.mubr.msk.f32.vlgmr.msra.gmra.mrb[68].mxu1 %vm44_vm0, %v17233_v30  ;;  %v11519_v30 = vld [vmem:[%s24015_s1 + $0x950] sm:$0xff] }
 0x264   :  { %3144 = vmatprep.mubr.f32.mxu0 %v24029_v3  ;;  %3305 = vmatprep.mubr.f32.mxu1 %v24029_v3  ;;  %v13083_v47 = vpack.c.bf16 %v11527_v13, %v11519_v30  ;;  %v13095_v30 = vpack.c.bf16 %v11497_v34, %v11489_v36  ;;  %v11570_v36 = vld [vmem:[%s24015_s1 + $0xae8] sm:$0xf] }
 0x265   :  { %13076 = vmatpush1.bf16.msra.mxu1 %v13075_v23  ;;  %v11492_v23 = vld [vmem:[%s24015_s1 + $0x878] sm:$0xff]  ;;  %v11702_v34 = vld [vmem:[%s24015_s1 + $0xb48] sm:$0xff] }
 0x266   :  { %13078 = vmatprep.subr.bf16.mxu1 %v13077_v29  ;;  %v11500_v29 = vld [vmem:[%s24015_s1 + $0x8b8] sm:$0xff] }
 0x267   :  { %11440 = vmatmul.mubr.msk.f32.gmra.mrb[70].mxu0 %vm44_vm0, %v17417_v37  ;;  %11458 = vmatmul.mubr.msk.f32.gmra.mrb[70].mxu1 %vm44_vm0, %v17252_v18  ;;  %v13113_v32 = vpack.c.bf16 %v11500_v29, %v11492_v23 }
 0x268   :  { %3150 = vmatprep.mubr.f32.mxu0 %v24029_v3  ;;  %3311 = vmatprep.mubr.f32.mxu1 %v24029_v3 }
 0x269   :  { %13080 = vmatpush1.bf16.msra.mxu1 %v13079_v12  ;;  %v11506_v12 = vld [vmem:[%s24015_s1 + $0x8e8] sm:$0xff] }
 0x26a   :  { %13082 = vmatprep.subr.bf16.mxu1 %v13081_v38  ;;  %v11514_v38 = vld [vmem:[%s24015_s1 + $0x928] sm:$0xff] }
 0x26b   :  { %11441 = vmatmul.mubr.msk.f32.gmra.mrb[72].mxu0 %vm44_vm0, %v17437_v19  ;;  %11459 = vmatmul.mubr.msk.f32.gmra.mrb[72].mxu1 %vm44_vm0, %v17273_v26  ;;  %v13097_v13 = vpack.c.bf16 %v11514_v38, %v11506_v12  ;;  %v11569_v12 = vld [vmem:[%s24015_s1 + $0xae0] sm:$0xf] }
 0x26c   :  { %3156 = vmatprep.mubr.f32.mxu0 %v24029_v3  ;;  %3317 = vmatprep.mubr.f32.mxu1 %v24029_v3 }
 0x26d   :  { %13084 = vmatpush1.bf16.msra.mxu1 %v13083_v47  ;;  %v11522_v47 = vld [vmem:[%s24015_s1 + $0x968] sm:$0xff] }
 0x26e   :  { %13086 = vmatprep.subr.bf16.mxu1 %v13085_v55  ;;  %v11530_v55 = vld [vmem:[%s24015_s1 + $0x9a8] sm:$0xff] }
 0x26f   :  { %11442 = vmatmul.mubr.msk.f32.gmra.mrb[74].mxu0 %vm44_vm0, %v17457_v46  ;;  %11460 = vmatmul.mubr.msk.f32.gmra.mrb[74].mxu1 %vm44_vm0, %v17293_v31  ;;  %v13101_v5 = vpack.c.bf16 %v11530_v55, %v11522_v47  ;;  %v13117_v55 = vpack.c.bf16 %v11516_v0, %v11508_v24  ;;  %v11572_v0 = vld [vmem:[%s24015_s1 + $0xaf8] sm:$0xf] }
 0x270   :  { %3162 = vmatprep.mubr.f32.mxu0 %v24029_v3  ;;  %3323 = vmatprep.mubr.f32.mxu1 %v24029_v3 }
 0x271   :  { %13088 = vmatpush1.bf16.msra.mxu1 %v13087_v21  ;;  %v11546_v21 = vld [vmem:[%s24015_s1 + $0xa28] sm:$0xff] }
 0x272   :  { %13090 = vmatprep.subr.bf16.mxu1 %v13089_v57  ;;  %v13105_v22 = vpack.c.bf16 %v11546_v21, %v11538_v6  ;;  %v11532_v6 = vld [vmem:[%s24015_s1 + $0x9b8] sm:$0xff] }
 0x273   :  { %11443 = vmatmul.mubr.msk.f32.gmra.mrb[76].mxu0 %vm44_vm0, %v17471_v33  ;;  %11461 = vmatmul.mubr.msk.f32.gmra.mrb[76].mxu1 %vm44_vm0, %v17307_v2 }
 0x274   :  { %3168 = vmatprep.mubr.f32.mxu0 %v24029_v3  ;;  %3329 = vmatprep.mubr.f32.mxu1 %v24029_v3 }
 0x275   :  { %13092 = vmatpush1.bf16.msra.mxu1 %v13091_v27  ;;  %v11554_v27 = vld [vmem:[%s24015_s1 + $0xa68] sm:$0xff] }
 0x276   :  { %11603 = vmatprep.subr.msk.mxu1 %vm395_vm1, %v11568_v28  ;;  %v11562_v28 = vld [vmem:[%s24015_s1 + $0xaa8] sm:$0xff] }
 0x277   :  { %11444 = vmatmul.mubr.msk.f32.gmra.mrb[78].mxu0 %vm44_vm0, %v17488_v40  ;;  %11462 = vmatmul.mubr.msk.f32.gmra.mrb[78].mxu1 %vm44_vm0, %v17324_v48  ;;  %v13109_v29 = vpack.c.bf16 %v11562_v28, %v11554_v27  ;;  %v11540_v27 = vld [vmem:[%s24015_s1 + $0x9f8] sm:$0xff] }
 0x278   :  { %3174 = vmatprep.mubr.f32.mxu0 %v24029_v3  ;;  %3335 = vmatprep.mubr.f32.mxu1 %v24029_v3  ;;  %v11548_v28 = vld [vmem:[%s24015_s1 + $0xa38] sm:$0xff] }
 0x279   :  { %11604 = vmatpush1.msk.msra.mxu1 %vm395_vm1, %v11567_v11  ;;  %v11561_v11 = vld [vmem:[%s24015_s1 + $0xaa0] sm:$0xff] }
 0x27a   :  { %13114 = vmatprep.subr.bf16.mxu1 %v13113_v32 }
 0x27b   :  { %11445 = vmatmul.mubr.msk.f32.gmra.mrb[80].mxu0 %vm44_vm0, %v17500_v50  ;;  %11463 = vmatmul.mubr.msk.f32.gmra.mrb[80].mxu1 %vm44_vm0, %v17336_v45 }
 0x27c   :  { %3180 = vmatprep.mubr.f32.mxu0 %v24029_v3  ;;  %3341 = vmatprep.mubr.f32.mxu1 %v24029_v3 }
 0x27f   :  { %11446 = vmatmul.mubr.msk.f32.gmra.mrb[82].mxu0 %vm44_vm0, %v17509_v4  ;;  %11464 = vmatmul.mubr.msk.f32.gmra.mrb[82].mxu1 %vm44_vm0, %v17345_v14 }
 0x280   :  { %3186 = vmatprep.mubr.f32.mxu0 %v24029_v3  ;;  %3347 = vmatprep.mubr.f32.mxu1 %v24029_v3 }
 0x283   :  { %11447 = vmatmul.mubr.msk.f32.gmra.mrb[84].mxu0 %vm44_vm0, %v17517_v61  ;;  %11465 = vmatmul.mubr.msk.f32.gmra.mrb[84].mxu1 %vm44_vm0, %v17353_v49 }
 0x284   :  { %3192 = vmatprep.mubr.f32.mxu0 %v24029_v3  ;;  %3353 = vmatprep.mubr.f32.mxu1 %v24029_v3 }
 0x287   :  { %11448 = vmatmul.mubr.msk.f32.gmra.mrb[86].mxu0 %vm44_vm0, %v17525_v20  ;;  %11466 = vmatmul.mubr.msk.f32.gmra.mrb[86].mxu1 %vm44_vm0, %v17361_v54 }
 0x288   :  { %3198 = vmatprep.mubr.f32.mxu0 %v24029_v3  ;;  %3359 = vmatprep.mubr.f32.mxu1 %v24029_v3 }
 0x28b   :  { %11449 = vmatmul.mubr.msk.f32.gmra.mrb[88].mxu0 %vm44_vm0, %v17533_v9  ;;  %11467 = vmatmul.mubr.msk.f32.gmra.mrb[88].mxu1 %vm44_vm0, %v17369_v8 }
 0x28c   :  { %3204 = vmatprep.mubr.f32.mxu0 %v24029_v3  ;;  %3365 = vmatprep.mubr.f32.mxu1 %v24029_v3 }
 0x28f   :  { %11450 = vmatmul.mubr.msk.f32.gmra.mrb[90].mxu0 %vm44_vm0, %v17541_v16  ;;  %11468 = vmatmul.mubr.msk.f32.gmra.mrb[90].mxu1 %vm44_vm0, %v17377_v56 }
 0x290   :  { %3210 = vmatprep.mubr.f32.mxu0 %v24029_v3  ;;  %3371 = vmatprep.mubr.f32.mxu1 %v24029_v3 }
 0x293   :  { %11451 = vmatmul.mubr.msk.f32.gmra.mrb[92].mxu0 %vm44_vm0, %v17549_v43  ;;  %11469 = vmatmul.mubr.msk.f32.gmra.mrb[92].mxu1 %vm44_vm0, %v17397_v15 }
 0x294   :  { %3216 = vmatprep.mubr.f32.mxu0 %v24029_v3  ;;  %3377 = vmatprep.mubr.f32.mxu1 %v24029_v3 }
 0x297   :  { %11452 = vmatmul.mubr.msk.f32.gmra.mrb[94].mxu0 %vm44_vm0, %v17557_v58  ;;  %11470 = vmatmul.mubr.msk.f32.gmra.mrb[94].mxu1 %vm44_vm0, %v17417_v37 }
 0x298   :  { %3222 = vmatprep.mubr.f32.mxu0 %v24029_v3  ;;  %3383 = vmatprep.mubr.f32.mxu1 %v24029_v3 }
 0x29b   :  { %11453 = vmatmul.mubr.msk.f32.gmra.mrb[96].mxu0 %vm44_vm0, %v17565_v62  ;;  %11471 = vmatmul.mubr.msk.f32.gmra.mrb[96].mxu1 %vm44_vm0, %v17437_v19 }
 0x29c   :  { %3228 = vmatprep.mubr.f32.mxu0 %v24029_v3  ;;  %3389 = vmatprep.mubr.f32.mxu1 %v24029_v3 }
 0x29f   :  { %11454 = vmatmul.mubr.msk.f32.gmra.mrb[98].mxu0 %vm44_vm0, %v17573_v63  ;;  %11472 = vmatmul.mubr.msk.f32.gmra.mrb[98].mxu1 %vm44_vm0, %v17457_v46 }
 0x2a0   :  { %3395 = vmatprep.mubr.f32.mxu1 %v24029_v3  ;;  %3981 = vmatprep.mubr.f32.mxu0 %v24029_v3 }
 0x2a3   :  { %11473 = vmatmul.mubr.msk.f32.gmra.mrb[100].mxu1 %vm44_vm0, %v17471_v33  ;;  %11575 = vmatmul.mubr.msk.f32.vlgmr.msra.gmra.mrb[0].mxu0 %vm44_vm0, %v17252_v18  ;;  %v11521_v18 = vld [vmem:[%s24015_s1 + $0x960] sm:$0xff] }
 0x2a4   :  { %13096 = vmatpush1.bf16.msra.mxu0 %v13095_v30  ;;  %3401 = vmatprep.mubr.f32.mxu1 %v24029_v3  ;;  %v13103_v57 = vpack.c.bf16 %v11529_v17, %v11521_v18  ;;  %v11491_v30 = vld [vmem:[%s24015_s1 + $0x870] sm:$0xff]  ;;  %v18045_v18 = vld [vmem:[#allocation2 + $0x18] sm:$0xff] }
 0x2a5   :  { %3987 = vmatprep.mubr.f32.mxu0 %v24029_v3  ;;  %13098 = vmatprep.subr.bf16.mxu0 %v13097_v13  ;;  %v11499_v13 = vld [vmem:[%s24015_s1 + $0x8b0] sm:$0xff]  ;;  %v11524_v17 = vld [vmem:[%s24015_s1 + $0x978] sm:$0xff] }
 0x2a6   :  { %v13115_v47 = vpack.c.bf16 %v11499_v13, %v11491_v30  ;;  %v11563_v30 = vld [vmem:[%s24015_s1 + $0xab0] sm:$0xff] }
 0x2a7   :  { %11474 = vmatmul.mubr.msk.f32.gmra.mrb[102].mxu1 %vm44_vm0, %v17488_v40  ;;  %11576 = vmatmul.mubr.msk.f32.gmra.mrb[2].mxu0 %vm44_vm0, %v17273_v26  ;;  %v11537_v26 = vld [vmem:[%s24015_s1 + $0x9e0] sm:$0xff]  ;;  %v18105_v13 = vld [vmem:[#allocation2 + $0x30] sm:$0xff] }
 0x2a8   :  { %3407 = vmatprep.mubr.f32.mxu1 %v24029_v3  ;;  %3993 = vmatprep.mubr.f32.mxu0 %v24029_v3  ;;  %v13107_v23 = vpack.c.bf16 %v11545_v10, %v11537_v26  ;;  %v11531_v26 = vld [vmem:[%s24015_s1 + $0x9b0] sm:$0xff]  ;;  %v18065_v10 = vld [vmem:[#allocation2 + $0x20] sm:$0xff] }
 0x2a9   :  { %13100 = vmatpush1.bf16.msra.mxu0 %v13099_v1  ;;  %v11507_v1 = vld [vmem:[%s24015_s1 + $0x8f0] sm:$0xff] }
 0x2aa   :  { %13102 = vmatprep.subr.bf16.mxu0 %v13101_v5  ;;  %v11515_v5 = vld [vmem:[%s24015_s1 + $0x930] sm:$0xff] }
 0x2ab   :  { %11475 = vmatmul.mubr.msk.f32.gmra.mrb[104].mxu1 %vm44_vm0, %v17500_v50  ;;  %11577 = vmatmul.mubr.msk.f32.gmra.mrb[4].mxu0 %vm44_vm0, %v17293_v31  ;;  %v11553_v31 = vld [vmem:[%s24015_s1 + $0xa60] sm:$0xff]  ;;  %v13119_v21 = vpack.c.bf16 %v11515_v5, %v11507_v1 }
 0x2ac   :  { %3413 = vmatprep.mubr.f32.mxu1 %v24029_v3  ;;  %3999 = vmatprep.mubr.f32.mxu0 %v24029_v3  ;;  %v13111_v32 = vpack.c.bf16 %v11561_v11, %v11553_v31  ;;  %v11539_v31 = vld [vmem:[%s24015_s1 + $0x9f0] sm:$0xff] }
 0x2ad   :  { %13104 = vmatpush1.bf16.msra.mxu0 %v13103_v57  ;;  %v13121_v57 = vpack.c.bf16 %v11532_v6, %v11524_v17  ;;  %v11547_v11 = vld [vmem:[%s24015_s1 + $0xa30] sm:$0xff]  ;;  %v11733_v6 = vld [vmem:[%s24015_s1 + $0xc40] sm:$0xff] }
 0x2ae   :  { %13106 = vmatprep.subr.bf16.mxu0 %v13105_v22  ;;  %v11523_v22 = vld [vmem:[%s24015_s1 + $0x970] sm:$0xff] }
 0x2af   :  { %11476 = vmatmul.mubr.msk.f32.gmra.mrb[106].mxu1 %vm44_vm0, %v17509_v4  ;;  %11578 = vmatmul.mubr.msk.f32.gmra.mrb[6].mxu0 %vm44_vm0, %v17307_v2  ;;  %v11694_v2 = vld [vmem:[%s24015_s1 + $0xb08] sm:$0xff] }
 0x2b0   :  { %3419 = vmatprep.mubr.f32.mxu1 %v24029_v3  ;;  %4005 = vmatprep.mubr.f32.mxu0 %v24029_v3  ;;  %v13133_v38 = vpack.c.bf16 %v11702_v34, %v11694_v2  ;;  %v11564_v2 = vld [vmem:[%s24015_s1 + $0xab8] sm:$0xff]  ;;  %v13127_v34 = vpack.c.bf16 %v11547_v11, %v11539_v31  ;;  %v11765_v11 = vld [vmem:[%s24015_s1 + $0xd40] sm:$0xff] }
 0x2b1   :  { %13108 = vmatpush1.bf16.msra.mxu0 %v13107_v23  ;;  %v13123_v23 = vpack.c.bf16 %v11531_v26, %v11523_v22 }
 0x2b2   :  { %13110 = vmatprep.subr.bf16.mxu0 %v13109_v29  ;;  %v13125_v29 = vpack.c.bf16 %v11548_v28, %v11540_v27  ;;  %v11749_v27 = vld [vmem:[%s24015_s1 + $0xcc0] sm:$0xff]  ;;  %v11758_v28 = vld [vmem:[%s24015_s1 + $0xd08] sm:$0xff] }
 0x2b3   :  { %11477 = vmatmul.mubr.msk.f32.gmra.mrb[108].mxu1 %vm44_vm0, %v17517_v61  ;;  %11579 = vmatmul.mubr.msk.f32.gmra.mrb[8].mxu0 %vm44_vm0, %v17324_v48 }
 0x2b4   :  { %3425 = vmatprep.mubr.f32.mxu1 %v24029_v3  ;;  %4011 = vmatprep.mubr.f32.mxu0 %v24029_v3 }
 0x2b5   :  { %13112 = vmatpush1.bf16.msra.mxu0 %v13111_v32  ;;  %v18085_v32 = vld [vmem:[#allocation2 + $0x28] sm:$0xff] }
 0x2b6   :  { %11633 = vmatprep.subr.msk.mxu0 %vm395_vm1, %v11570_v36  ;;  %v11556_v36 = vld [vmem:[%s24015_s1 + $0xa78] sm:$0xff] }
 0x2b7   :  { %11478 = vmatmul.mubr.msk.f32.gmra.mrb[110].mxu1 %vm44_vm0, %v17525_v20  ;;  %11580 = vmatmul.mubr.msk.f32.gmra.mrb[10].mxu0 %vm44_vm0, %v17336_v45 }
 0x2b8   :  { %3431 = vmatprep.mubr.f32.mxu1 %v24029_v3  ;;  %4017 = vmatprep.mubr.f32.mxu0 %v24029_v3 }
 0x2b9   :  { %11634 = vmatpush1.msk.msra.mxu0 %vm395_vm1, %v11569_v12  ;;  %v13129_v12 = vpack.c.bf16 %v11564_v2, %v11556_v36  ;;  %v18279_v2 = vld [vmem:[#allocation2 + $0x38] sm:$0xff] }
 0x2ba   :  { %13134 = vmatprep.subr.bf16.mxu0 %v13133_v38  ;;  %v11555_v38 = vld [vmem:[%s24015_s1 + $0xa70] sm:$0xff] }
 0x2bb   :  { %11479 = vmatmul.mubr.msk.f32.gmra.mrb[112].mxu1 %vm44_vm0, %v17533_v9  ;;  %11581 = vmatmul.mubr.msk.f32.gmra.mrb[12].mxu0 %vm44_vm0, %v17345_v14  ;;  %v13131_v24 = vpack.c.bf16 %v11563_v30, %v11555_v38  ;;  %v18300_v30 = vld [vmem:[#allocation2 + $0x40] sm:$0xff] }
 0x2bc   :  { %3437 = vmatprep.mubr.f32.mxu1 %v24029_v3  ;;  %4023 = vmatprep.mubr.f32.mxu0 %v24029_v3 }
 0x2bf   :  { %11480 = vmatmul.mubr.msk.f32.gmra.mrb[114].mxu1 %vm44_vm0, %v17541_v16  ;;  %11582 = vmatmul.mubr.msk.f32.gmra.mrb[14].mxu0 %vm44_vm0, %v17353_v49 }
 0x2c0   :  { %3443 = vmatprep.mubr.f32.mxu1 %v24029_v3  ;;  %4029 = vmatprep.mubr.f32.mxu0 %v24029_v3 }
 0x2c3   :  { %11481 = vmatmul.mubr.msk.f32.gmra.mrb[116].mxu1 %vm44_vm0, %v17549_v43  ;;  %11583 = vmatmul.mubr.msk.f32.gmra.mrb[16].mxu0 %vm44_vm0, %v17361_v54 }
 0x2c4   :  { %3449 = vmatprep.mubr.f32.mxu1 %v24029_v3  ;;  %4035 = vmatprep.mubr.f32.mxu0 %v24029_v3 }
 0x2c7   :  { %11482 = vmatmul.mubr.msk.f32.gmra.mrb[118].mxu1 %vm44_vm0, %v17557_v58  ;;  %11584 = vmatmul.mubr.msk.f32.gmra.mrb[18].mxu0 %vm44_vm0, %v17369_v8 }
 0x2c8   :  { %3455 = vmatprep.mubr.f32.mxu1 %v24029_v3  ;;  %4041 = vmatprep.mubr.f32.mxu0 %v24029_v3 }
 0x2cb   :  { %11483 = vmatmul.mubr.msk.f32.gmra.mrb[120].mxu1 %vm44_vm0, %v17565_v62  ;;  %11585 = vmatmul.mubr.msk.f32.gmra.mrb[20].mxu0 %vm44_vm0, %v17377_v56 }
 0x2cc   :  { %3461 = vmatprep.mubr.f32.mxu1 %v24029_v3  ;;  %4047 = vmatprep.mubr.f32.mxu0 %v24029_v3 }
 0x2cf   :  { %11484 = vmatmul.mubr.msk.f32.gmra.mrb[122].mxu1 %vm44_vm0, %v17573_v63  ;;  %11586 = vmatmul.mubr.msk.f32.gmra.mrb[22].mxu0 %vm44_vm0, %v17397_v15 }
 0x2d0   :  { %4053 = vmatprep.mubr.f32.mxu0 %v24029_v3  ;;  %4214 = vmatprep.mubr.f32.mxu1 %v24029_v3 }
 0x2d3   :  { %11587 = vmatmul.mubr.msk.f32.gmra.mrb[24].mxu0 %vm44_vm0, %v17417_v37  ;;  %11605 = vmatmul.mubr.msk.f32.vlgmr.msra.gmra.mrb[12].mxu1 %vm44_vm0, %v18045_v18 }
 0x2d4   :  { %4059 = vmatprep.mubr.f32.mxu0 %v24029_v3  ;;  %4220 = vmatprep.mubr.f32.mxu1 %v24029_v3 }
 0x2d5   :  { %13116 = vmatpush1.bf16.msra.mxu1 %v13115_v47  ;;  %v11696_v47 = vld [vmem:[%s24015_s1 + $0xb18] sm:$0xff] }
 0x2d6   :  { %13118 = vmatprep.subr.bf16.mxu1 %v13117_v55  ;;  %v11704_v55 = vld [vmem:[%s24015_s1 + $0xb58] sm:$0xff] }
 0x2d7   :  { %11588 = vmatmul.mubr.msk.f32.gmra.mrb[26].mxu0 %vm44_vm0, %v17437_v19  ;;  %11606 = vmatmul.mubr.msk.f32.gmra.mrb[14].mxu1 %vm44_vm0, %v18065_v10  ;;  %v13153_v1 = vpack.c.bf16 %v11704_v55, %v11696_v47  ;;  %v11712_v47 = vld [vmem:[%s24015_s1 + $0xb98] sm:$0xff] }
 0x2d8   :  { %4065 = vmatprep.mubr.f32.mxu0 %v24029_v3  ;;  %4226 = vmatprep.mubr.f32.mxu1 %v24029_v3  ;;  %v11720_v55 = vld [vmem:[%s24015_s1 + $0xbd8] sm:$0xff] }
 0x2d9   :  { %13120 = vmatpush1.bf16.msra.mxu1 %v13119_v21  ;;  %v11742_v21 = vld [vmem:[%s24015_s1 + $0xc88] sm:$0xff] }
 0x2da   :  { %13122 = vmatprep.subr.bf16.mxu1 %v13121_v57  ;;  %v11750_v57 = vld [vmem:[%s24015_s1 + $0xcc8] sm:$0xff] }
 0x2db   :  { %11589 = vmatmul.mubr.msk.f32.gmra.mrb[28].mxu0 %vm44_vm0, %v17457_v46  ;;  %11607 = vmatmul.mubr.msk.f32.gmra.mrb[16].mxu1 %vm44_vm0, %v18085_v32  ;;  %v13145_v26 = vpack.c.bf16 %v11750_v57, %v11742_v21  ;;  %v18413_v21 = vld [vmem:[#allocation2 + $0x88] sm:$0xff]  ;;  %v11760_v57 = vld [vmem:[%s24015_s1 + $0xd18] sm:$0xff] }
 0x2dc   :  { %4071 = vmatprep.mubr.f32.mxu0 %v24029_v3  ;;  %4232 = vmatprep.mubr.f32.mxu1 %v24029_v3 }
 0x2dd   :  { %13124 = vmatpush1.bf16.msra.mxu1 %v13123_v23  ;;  %v11766_v23 = vld [vmem:[%s24015_s1 + $0xd48] sm:$0xff] }
 0x2de   :  { %13126 = vmatprep.subr.bf16.mxu1 %v13125_v29  ;;  %v13149_v31 = vpack.c.bf16 %v11766_v23, %v11758_v28  ;;  %v18433_v28 = vld [vmem:[#allocation2 + $0x90] sm:$0xff] }
 0x2df   :  { %11590 = vmatmul.mubr.msk.f32.gmra.mrb[30].mxu0 %vm44_vm0, %v17471_v33  ;;  %11608 = vmatmul.mubr.msk.f32.gmra.mrb[18].mxu1 %vm44_vm0, %v18105_v13 }
 0x2e0   :  { %4077 = vmatprep.mubr.f32.mxu0 %v24029_v3  ;;  %4238 = vmatprep.mubr.f32.mxu1 %v24029_v3 }
 0x2e1   :  { %13128 = vmatpush1.bf16.msra.mxu1 %v13127_v34  ;;  %v11698_v34 = vld [vmem:[%s24015_s1 + $0xb28] sm:$0xff] }
 0x2e2   :  { %13130 = vmatprep.subr.bf16.mxu1 %v13129_v12  ;;  %v11706_v12 = vld [vmem:[%s24015_s1 + $0xb68] sm:$0xff] }
 0x2e3   :  { %11591 = vmatmul.mubr.msk.f32.gmra.mrb[32].mxu0 %vm44_vm0, %v17488_v40  ;;  %11609 = vmatmul.mubr.msk.f32.gmra.mrb[20].mxu1 %vm44_vm0, %v17324_v48  ;;  %v11571_v48 = vld [vmem:[%s24015_s1 + $0xaf0] sm:$0xf]  ;;  %v13173_v38 = vpack.c.bf16 %v11706_v12, %v11698_v34  ;;  %v18487_v12 = vld [vmem:[#allocation2 + $0xb8] sm:$0xff] }
 0x2e4   :  { %4083 = vmatprep.mubr.f32.mxu0 %v24029_v3  ;;  %4244 = vmatprep.mubr.f32.mxu1 %v24029_v3  ;;  %v18479_v34 = vld [vmem:[#allocation2 + $0xb0] sm:$0xff] }
 0x2e5   :  { %13132 = vmatpush1.bf16.msra.mxu1 %v13131_v24  ;;  %v18309_v24 = vld [vmem:[#allocation2 + $0x48] sm:$0xff] }
 0x2e6   :  { %11663 = vmatprep.subr.msk.mxu1 %vm395_vm1, %v11572_v0  ;;  %v11703_v0 = vld [vmem:[%s24015_s1 + $0xb50] sm:$0xff] }
 0x2e7   :  { %11592 = vmatmul.mubr.msk.f32.gmra.mrb[34].mxu0 %vm44_vm0, %v17500_v50  ;;  %11610 = vmatmul.mubr.msk.f32.gmra.mrb[22].mxu1 %vm44_vm0, %v17336_v45  ;;  %v18191_v45 = vld [vmem:[#allocation2 + $0xf0] sm:$0xff] }
 0x2e8   :  { %4089 = vmatprep.mubr.f32.mxu0 %v24029_v3  ;;  %4250 = vmatprep.mubr.f32.mxu1 %v24029_v3 }
 0x2e9   :  { %11664 = vmatpush1.msk.msra.mxu1 %vm395_vm1, %v11571_v48 }
 0x2ea   :  { %13154 = vmatprep.subr.bf16.mxu1 %v13153_v1  ;;  %v13157_v1 = vpack.c.bf16 %v11720_v55, %v11712_v47 }
 0x2eb   :  { %11593 = vmatmul.mubr.msk.f32.gmra.mrb[36].mxu0 %vm44_vm0, %v17509_v4  ;;  %11611 = vmatmul.mubr.msk.f32.gmra.mrb[24].mxu1 %vm44_vm0, %v17345_v14  ;;  %v11693_v14 = vld [vmem:[%s24015_s1 + $0xb00] sm:$0xff] }
 0x2ec   :  { %4095 = vmatprep.mubr.f32.mxu0 %v24029_v3  ;;  %4256 = vmatprep.mubr.f32.mxu1 %v24029_v3 }
 0x2ef   :  { %11594 = vmatmul.mubr.msk.f32.gmra.mrb[38].mxu0 %vm44_vm0, %v17517_v61  ;;  %11612 = vmatmul.mubr.msk.f32.gmra.mrb[26].mxu1 %vm44_vm0, %v17353_v49  ;;  %v11701_v49 = vld [vmem:[%s24015_s1 + $0xb40] sm:$0xff] }
 0x2f0   :  { %4101 = vmatprep.mubr.f32.mxu0 %v24029_v3  ;;  %4262 = vmatprep.mubr.f32.mxu1 %v24029_v3 }
 0x2f3   :  { %11595 = vmatmul.mubr.msk.f32.gmra.mrb[40].mxu0 %vm44_vm0, %v17525_v20  ;;  %11613 = vmatmul.mubr.msk.f32.gmra.mrb[28].mxu1 %vm44_vm0, %v17361_v54  ;;  %v11710_v54 = vld [vmem:[%s24015_s1 + $0xb88] sm:$0xff] }
 0x2f4   :  { %4107 = vmatprep.mubr.f32.mxu0 %v24029_v3  ;;  %4268 = vmatprep.mubr.f32.mxu1 %v24029_v3 }
 0x2f7   :  { %11596 = vmatmul.mubr.msk.f32.gmra.mrb[42].mxu0 %vm44_vm0, %v17533_v9  ;;  %11614 = vmatmul.mubr.msk.f32.gmra.mrb[30].mxu1 %vm44_vm0, %v17369_v8  ;;  %v11718_v8 = vld [vmem:[%s24015_s1 + $0xbc8] sm:$0xff] }
 0x2f8   :  { %4113 = vmatprep.mubr.f32.mxu0 %v24029_v3  ;;  %4274 = vmatprep.mubr.f32.mxu1 %v24029_v3 }
 0x2fb   :  { %11597 = vmatmul.mubr.msk.f32.gmra.mrb[100].mxu0 %vm44_vm0, %v17541_v16  ;;  %11615 = vmatmul.mubr.msk.f32.gmra.mrb[32].mxu1 %vm44_vm0, %v17377_v56  ;;  %v13135_v56 = vpack.c.bf16 %v11701_v49, %v11693_v14  ;;  %v11711_v14 = vld [vmem:[%s24015_s1 + $0xb90] sm:$0xff] }
 0x2fc   :  { %4119 = vmatprep.mubr.f32.mxu0 %v24029_v3  ;;  %4280 = vmatprep.mubr.f32.mxu1 %v24029_v3  ;;  %v11719_v49 = vld [vmem:[%s24015_s1 + $0xbd0] sm:$0xff] }
 0x2ff   :  { %11598 = vmatmul.mubr.msk.f32.gmra.mrb[102].mxu0 %vm44_vm0, %v17549_v43  ;;  %11616 = vmatmul.mubr.msk.f32.gmra.mrb[34].mxu1 %vm44_vm0, %v17397_v15  ;;  %v13137_v15 = vpack.c.bf16 %v11718_v8, %v11710_v54  ;;  %v18373_v54 = vld [vmem:[#allocation2 + $0x78] sm:$0xff] }
 0x300   :  { %4125 = vmatprep.mubr.f32.mxu0 %v24029_v3  ;;  %4286 = vmatprep.mubr.f32.mxu1 %v24029_v3  ;;  %v11728_v8 = vld [vmem:[%s24015_s1 + $0xc18] sm:$0xff] }
 0x303   :  { %11599 = vmatmul.mubr.msk.f32.gmra.mrb[104].mxu0 %vm44_vm0, %v17557_v58  ;;  %11617 = vmatmul.mubr.msk.f32.gmra.mrb[36].mxu1 %vm44_vm0, %v17417_v37  ;;  %v11709_v37 = vld [vmem:[%s24015_s1 + $0xb80] sm:$0xff] }
 0x304   :  { %4131 = vmatprep.mubr.f32.mxu0 %v24029_v3  ;;  %4292 = vmatprep.mubr.f32.mxu1 %v24029_v3 }
 0x307   :  { %11600 = vmatmul.mubr.msk.f32.gmra.mrb[106].mxu0 %vm44_vm0, %v17565_v62  ;;  %11618 = vmatmul.mubr.msk.f32.gmra.mrb[38].mxu1 %vm44_vm0, %v17437_v19  ;;  %v11717_v19 = vld [vmem:[%s24015_s1 + $0xbc0] sm:$0xff] }
 0x308   :  { %4137 = vmatprep.mubr.f32.mxu0 %v24029_v3  ;;  %4298 = vmatprep.mubr.f32.mxu1 %v24029_v3  ;;  %v13139_v5 = vpack.c.bf16 %v11717_v19, %v11709_v37  ;;  %v11735_v19 = vld [vmem:[%s24015_s1 + $0xc50] sm:$0xff] }
 0x30b   :  { %11601 = vmatmul.mubr.msk.f32.gmra.mrb[108].mxu0 %vm44_vm0, %v17573_v63  ;;  %11619 = vmatmul.mubr.msk.f32.gmra.mrb[40].mxu1 %vm44_vm0, %v17457_v46  ;;  %v11726_v46 = vld [vmem:[%s24015_s1 + $0xc08] sm:$0xff] }
 0x30c   :  { %4143 = vmatprep.mubr.f32.mxu0 %v24029_v3  ;;  %4304 = vmatprep.mubr.f32.mxu1 %v24029_v3 }
 0x30f   :  { %11602 = vmatmul.mubr.msk.f32.gmra.mrb[110].mxu0 %vm44_vm0, %v18191_v45  ;;  %11620 = vmatmul.mubr.msk.f32.gmra.mrb[42].mxu1 %vm44_vm0, %v17471_v33  ;;  %v11734_v33 = vld [vmem:[%s24015_s1 + $0xc48] sm:$0xff] }
 0x310   :  { %4310 = vmatprep.mubr.f32.mxu1 %v24029_v3  ;;  %4447 = vmatprep.mubr.f32.mxu0 %v24029_v3  ;;  %v13141_v17 = vpack.c.bf16 %v11734_v33, %v11726_v46  ;;  %v18393_v46 = vld [vmem:[#allocation2 + $0x80] sm:$0xff]  ;;  %v11744_v33 = vld [vmem:[%s24015_s1 + $0xc98] sm:$0xff] }
 0x313   :  { %11621 = vmatmul.mubr.msk.f32.gmra.mrb[44].mxu1 %vm44_vm0, %v17488_v40  ;;  %11635 = vmatmul.mubr.msk.f32.vlgmr.msra.gmra.mrb[44].mxu0 %vm44_vm0, %v18045_v18  ;;  %v11725_v40 = vld [vmem:[%s24015_s1 + $0xc00] sm:$0xff] }
 0x314   :  { %13136 = vmatpush1.bf16.msra.mxu0 %v13135_v56  ;;  %4316 = vmatprep.mubr.f32.mxu1 %v24029_v3  ;;  %v13143_v22 = vpack.c.bf16 %v11733_v6, %v11725_v40  ;;  %v11736_v56 = vld [vmem:[%s24015_s1 + $0xc58] sm:$0xff]  ;;  %v11751_v6 = vld [vmem:[%s24015_s1 + $0xcd0] sm:$0xff] }
 0x315   :  { %4453 = vmatprep.mubr.f32.mxu0 %v24029_v3  ;;  %13138 = vmatprep.subr.bf16.mxu0 %v13137_v15  ;;  %v13159_v15 = vpack.c.bf16 %v11719_v49, %v11711_v14  ;;  %v13161_v37 = vpack.c.bf16 %v11736_v56, %v11728_v8  ;;  %v11730_v14 = vld [vmem:[%s24015_s1 + $0xc28] sm:$0xff] }
 0x316   :  { %v11738_v49 = vld [vmem:[%s24015_s1 + $0xc68] sm:$0xff] }
 0x317   :  { %11622 = vmatmul.mubr.msk.f32.gmra.mrb[46].mxu1 %vm44_vm0, %v17500_v50  ;;  %11636 = vmatmul.mubr.msk.f32.gmra.mrb[46].mxu0 %vm44_vm0, %v18065_v10  ;;  %v11741_v50 = vld [vmem:[%s24015_s1 + $0xc80] sm:$0xff]  ;;  %v13181_v56 = vpack.c.bf16 %v11738_v49, %v11730_v14  ;;  %v11756_v14 = vld [vmem:[%s24015_s1 + $0xcf8] sm:$0xff]  ;;  %v18759_v49 = vld [vmem:[#allocation2 + $0x90] sm:$0xff] }
 0x318   :  { %4322 = vmatprep.mubr.f32.mxu1 %v24029_v3  ;;  %4459 = vmatprep.mubr.f32.mxu0 %v24029_v3  ;;  %v13147_v29 = vpack.c.bf16 %v11749_v27, %v11741_v50  ;;  %v11767_v27 = vld [vmem:[%s24015_s1 + $0xd50] sm:$0xff] }
 0x319   :  { %13140 = vmatpush1.bf16.msra.mxu0 %v13139_v5  ;;  %v11752_v5 = vld [vmem:[%s24015_s1 + $0xcd8] sm:$0xff] }
 0x31a   :  { %13142 = vmatprep.subr.bf16.mxu0 %v13141_v17  ;;  %v13165_v40 = vpack.c.bf16 %v11752_v5, %v11744_v33 }
 0x31b   :  { %11623 = vmatmul.mubr.msk.f32.gmra.mrb[48].mxu1 %vm44_vm0, %v17509_v4  ;;  %11637 = vmatmul.mubr.msk.f32.gmra.mrb[48].mxu0 %vm44_vm0, %v18085_v32  ;;  %v11757_v4 = vld [vmem:[%s24015_s1 + $0xd00] sm:$0xff] }
 0x31c   :  { %4328 = vmatprep.mubr.f32.mxu1 %v24029_v3  ;;  %4465 = vmatprep.mubr.f32.mxu0 %v24029_v3  ;;  %v13151_v36 = vpack.c.bf16 %v11765_v11, %v11757_v4  ;;  %v11708_v4 = vld [vmem:[%s24015_s1 + $0xb78] sm:$0xff]  ;;  %v11775_v11 = vld [vmem:[%s24015_s1 + $0xd90] sm:$0xf] }
 0x31d   :  { %13144 = vmatpush1.bf16.msra.mxu0 %v13143_v22  ;;  %v11768_v22 = vld [vmem:[%s24015_s1 + $0xd58] sm:$0xff] }
 0x31e   :  { %13146 = vmatprep.subr.bf16.mxu0 %v13145_v26  ;;  %v13169_v50 = vpack.c.bf16 %v11768_v22, %v11760_v57 }
 0x31f   :  { %11624 = vmatmul.mubr.msk.f32.gmra.mrb[50].mxu1 %vm44_vm0, %v17517_v61  ;;  %11638 = vmatmul.mubr.msk.f32.gmra.mrb[50].mxu0 %vm44_vm0, %v18105_v13  ;;  %v11774_v61 = vld [vmem:[%s24015_s1 + $0xd88] sm:$0xf] }
 0x320   :  { %4334 = vmatprep.mubr.f32.mxu1 %v24029_v3  ;;  %4471 = vmatprep.mubr.f32.mxu0 %v24029_v3 }
 0x321   :  { %13148 = vmatpush1.bf16.msra.mxu0 %v13147_v29  ;;  %v18441_v29 = vld [vmem:[#allocation2 + $0x98] sm:$0xff] }
 0x322   :  { %13150 = vmatprep.subr.bf16.mxu0 %v13149_v31  ;;  %v11776_v31 = vld [vmem:[%s24015_s1 + $0xd98] sm:$0xf] }
 0x323   :  { %11625 = vmatmul.mubr.msk.f32.gmra.mrb[52].mxu1 %vm44_vm0, %v17525_v20  ;;  %11639 = vmatmul.mubr.msk.f32.gmra.mrb[52].mxu0 %vm44_vm0, %v18279_v2  ;;  %v11773_v20 = vld [vmem:[%s24015_s1 + $0xd80] sm:$0xf] }
 0x324   :  { %4340 = vmatprep.mubr.f32.mxu1 %v24029_v3  ;;  %4477 = vmatprep.mubr.f32.mxu0 %v24029_v3 }
 0x325   :  { %13152 = vmatpush1.bf16.msra.mxu0 %v13151_v36 }
 0x326   :  { %11781 = vmatprep.subr.msk.mxu0 %vm395_vm1, %v11774_v61  ;;  %v18471_v61 = vld [vmem:[#allocation2 + $0xa8] sm:$0xff] }
 0x327   :  { %11626 = vmatmul.mubr.msk.f32.gmra.mrb[54].mxu1 %vm44_vm0, %v17533_v9  ;;  %11640 = vmatmul.mubr.msk.f32.gmra.mrb[54].mxu0 %vm44_vm0, %v18300_v30  ;;  %v18317_v9 = vld [vmem:[#allocation2 + $0x50] sm:$0xff] }
 0x328   :  { %4346 = vmatprep.mubr.f32.mxu1 %v24029_v3  ;;  %4483 = vmatprep.mubr.f32.mxu0 %v24029_v3 }
 0x329   :  { %11782 = vmatpush1.msk.msra.mxu0 %vm395_vm1, %v11773_v20  ;;  %v18495_v20 = vld [vmem:[#allocation2 + $0xc0] sm:$0xff] }
 0x32a   :  { %13174 = vmatprep.subr.bf16.mxu0 %v13173_v38  ;;  %v18503_v38 = vld [vmem:[#allocation2 + $0xc8] sm:$0xff] }
 0x32b   :  { %11627 = vmatmul.mubr.msk.f32.gmra.mrb[56].mxu1 %vm44_vm0, %v17541_v16  ;;  %11641 = vmatmul.mubr.msk.f32.gmra.mrb[56].mxu0 %vm44_vm0, %v18309_v24  ;;  %v18325_v16 = vld [vmem:[#allocation2 + $0x58] sm:$0xff] }
 0x32c   :  { %4352 = vmatprep.mubr.f32.mxu1 %v24029_v3  ;;  %4489 = vmatprep.mubr.f32.mxu0 %v24029_v3 }
 0x32f   :  { %11628 = vmatmul.mubr.msk.f32.gmra.mrb[58].mxu1 %vm44_vm0, %v17549_v43  ;;  %11642 = vmatmul.mubr.msk.f32.gmra.mrb[58].mxu0 %vm44_vm0, %v18317_v9  ;;  %v18333_v43 = vld [vmem:[#allocation2 + $0x60] sm:$0xff] }
 0x330   :  { %4358 = vmatprep.mubr.f32.mxu1 %v24029_v3  ;;  %4495 = vmatprep.mubr.f32.mxu0 %v24029_v3 }
 0x333   :  { %11629 = vmatmul.mubr.msk.f32.gmra.mrb[60].mxu1 %vm44_vm0, %v17557_v58  ;;  %11643 = vmatmul.mubr.msk.f32.gmra.mrb[60].mxu0 %vm44_vm0, %v18325_v16  ;;  %v18341_v58 = vld [vmem:[#allocation2 + $0x68] sm:$0xff] }
 0x334   :  { %4364 = vmatprep.mubr.f32.mxu1 %v24029_v3  ;;  %4501 = vmatprep.mubr.f32.mxu0 %v24029_v3 }
 0x337   :  { %11630 = vmatmul.mubr.msk.f32.gmra.mrb[62].mxu1 %vm44_vm0, %v17565_v62  ;;  %11644 = vmatmul.mubr.msk.f32.gmra.mrb[62].mxu0 %vm44_vm0, %v18333_v43  ;;  %v11695_v62 = vld [vmem:[%s24015_s1 + $0xb10] sm:$0xff] }
 0x338   :  { %4370 = vmatprep.mubr.f32.mxu1 %v24029_v3  ;;  %4507 = vmatprep.mubr.f32.mxu0 %v24029_v3  ;;  %v13155_v48 = vpack.c.bf16 %v11703_v0, %v11695_v62  ;;  %v11714_v62 = vld [vmem:[%s24015_s1 + $0xba8] sm:$0xff] }
 0x339   :  { %v11722_v0 = vld [vmem:[%s24015_s1 + $0xbe8] sm:$0xff] }
 0x33a   :  { %v13177_v55 = vpack.c.bf16 %v11722_v0, %v11714_v62  ;;  %v18739_v62 = vld [vmem:[#allocation2 + $0x88] sm:$0xff] }
 0x33b   :  { %11631 = vmatmul.mubr.msk.f32.gmra.mrb[64].mxu1 %vm44_vm0, %v17573_v63  ;;  %11645 = vmatmul.mubr.msk.f32.gmra.mrb[64].mxu0 %vm44_vm0, %v18341_v58  ;;  %v18355_v63 = vld [vmem:[#allocation2 + $0x70] sm:$0xff] }
 0x33c   :  { %4376 = vmatprep.mubr.f32.mxu1 %v24029_v3  ;;  %4513 = vmatprep.mubr.f32.mxu0 %v24029_v3 }
 0x33f   :  { %11632 = vmatmul.mubr.msk.f32.gmra.mrb[66].mxu1 %vm44_vm0, %v18191_v45  ;;  %11646 = vmatmul.mubr.msk.f32.gmra.mrb[66].mxu0 %vm44_vm0, %v18355_v63 }
 0x340   :  { %4519 = vmatprep.mubr.f32.mxu0 %v24029_v3  ;;  %4680 = vmatprep.mubr.f32.mxu1 %v24029_v3 }
 0x343   :  { %11647 = vmatmul.mubr.msk.f32.gmra.mrb[68].mxu0 %vm44_vm0, %v18373_v54  ;;  %11665 = vmatmul.mubr.msk.f32.vlgmr.msra.gmra.mrb[68].mxu1 %vm44_vm0, %v18045_v18  ;;  %v11727_v18 = vld [vmem:[%s24015_s1 + $0xc10] sm:$0xff] }
 0x344   :  { %4525 = vmatprep.mubr.f32.mxu0 %v24029_v3  ;;  %4686 = vmatprep.mubr.f32.mxu1 %v24029_v3  ;;  %v13163_v17 = vpack.c.bf16 %v11735_v19, %v11727_v18  ;;  %v11746_v18 = vld [vmem:[%s24015_s1 + $0xca8] sm:$0xff] }
 0x345   :  { %13156 = vmatpush1.bf16.msra.mxu1 %v13155_v48  ;;  %v11713_v48 = vld [vmem:[%s24015_s1 + $0xba0] sm:$0xff]  ;;  %v11754_v19 = vld [vmem:[%s24015_s1 + $0xce8] sm:$0xff] }
 0x346   :  { %13158 = vmatprep.subr.bf16.mxu1 %v13157_v1  ;;  %v11721_v1 = vld [vmem:[%s24015_s1 + $0xbe0] sm:$0xff]  ;;  %v13185_v5 = vpack.c.bf16 %v11754_v19, %v11746_v18  ;;  %v11764_v18 = vld [vmem:[%s24015_s1 + $0xd38] sm:$0xff] }
 0x347   :  { %11648 = vmatmul.mubr.msk.f32.gmra.mrb[70].mxu0 %vm44_vm0, %v18393_v46  ;;  %11666 = vmatmul.mubr.msk.f32.gmra.mrb[70].mxu1 %vm44_vm0, %v18065_v10  ;;  %v11743_v10 = vld [vmem:[%s24015_s1 + $0xc90] sm:$0xff]  ;;  %v13179_v8 = vpack.c.bf16 %v11721_v1, %v11713_v48  ;;  %v11748_v1 = vld [vmem:[%s24015_s1 + $0xcb8] sm:$0xff] }
 0x348   :  { %4531 = vmatprep.mubr.f32.mxu0 %v24029_v3  ;;  %4692 = vmatprep.mubr.f32.mxu1 %v24029_v3  ;;  %v13167_v26 = vpack.c.bf16 %v11751_v6, %v11743_v10  ;;  %v11762_v10 = vld [vmem:[%s24015_s1 + $0xd28] sm:$0xff]  ;;  %v11739_v48 = vld [vmem:[%s24015_s1 + $0xc70] sm:$0xff]  ;;  %v11772_v19 = vld [vmem:[%s24015_s1 + $0xd78] sm:$0xff] }
 0x349   :  { %13160 = vmatpush1.bf16.msra.mxu1 %v13159_v15  ;;  %v11729_v15 = vld [vmem:[%s24015_s1 + $0xc20] sm:$0xff]  ;;  %v11770_v6 = vld [vmem:[%s24015_s1 + $0xd68] sm:$0xff] }
 0x34a   :  { %13162 = vmatprep.subr.bf16.mxu1 %v13161_v37  ;;  %v11737_v37 = vld [vmem:[%s24015_s1 + $0xc60] sm:$0xff]  ;;  %v13189_v22 = vpack.c.bf16 %v11770_v6, %v11762_v10  ;;  %v11771_v10 = vld [vmem:[%s24015_s1 + $0xd70] sm:$0xff] }
 0x34b   :  { %11649 = vmatmul.mubr.msk.f32.gmra.mrb[72].mxu0 %vm44_vm0, %v18413_v21  ;;  %11667 = vmatmul.mubr.msk.f32.gmra.mrb[72].mxu1 %vm44_vm0, %v18085_v32  ;;  %v11759_v32 = vld [vmem:[%s24015_s1 + $0xd10] sm:$0xff]  ;;  %v13183_v33 = vpack.c.bf16 %v11737_v37, %v11729_v15  ;;  %v18793_v6 = vld [vmem:[#allocation2 + $0xa0] sm:$0xff] }
 0x34c   :  { %4537 = vmatprep.mubr.f32.mxu0 %v24029_v3  ;;  %4698 = vmatprep.mubr.f32.mxu1 %v24029_v3  ;;  %v13171_v23 = vpack.c.bf16 %v11767_v27, %v11759_v32  ;;  %v18635_v32 = vld [vmem:[#allocation2 + $0x40] sm:$0xff]  ;;  %v11747_v15 = vld [vmem:[%s24015_s1 + $0xcb0] sm:$0xff] }
 0x34d   :  { %13164 = vmatpush1.bf16.msra.mxu1 %v13163_v17  ;;  %v11745_v17 = vld [vmem:[%s24015_s1 + $0xca0] sm:$0xff]  ;;  %v11755_v37 = vld [vmem:[%s24015_s1 + $0xcf0] sm:$0xff] }
 0x34e   :  { %13166 = vmatprep.subr.bf16.mxu1 %v13165_v40  ;;  %v11753_v40 = vld [vmem:[%s24015_s1 + $0xce0] sm:$0xff] }
 0x34f   :  { %11650 = vmatmul.mubr.msk.f32.gmra.mrb[74].mxu0 %vm44_vm0, %v18433_v28  ;;  %11668 = vmatmul.mubr.msk.f32.gmra.mrb[74].mxu1 %vm44_vm0, %v18105_v13  ;;  %v11700_v13 = vld [vmem:[%s24015_s1 + $0xb38] sm:$0xff]  ;;  %v13187_v57 = vpack.c.bf16 %v11753_v40, %v11745_v17  ;;  %v13209_v17 = vpack.c.bf16 %v11772_v19, %v11764_v18  ;;  %v11763_v40 = vld [vmem:[%s24015_s1 + $0xd30] sm:$0xff]  ;;  %v11918_v19 = vld [vmem:[%s24017_s3 + $0x888] sm:$0xff] }
 0x350   :  { %4543 = vmatprep.mubr.f32.mxu0 %v24029_v3  ;;  %4704 = vmatprep.mubr.f32.mxu1 %v24029_v3  ;;  %v13193_v36 = vpack.c.bf16 %v11708_v4, %v11700_v13  ;;  %v18667_v13 = vld [vmem:[#allocation2 + $0x58] sm:$0xff]  ;;  %v18675_v4 = vld [vmem:[#allocation2 + $0x60] sm:$0xff] }
 0x351   :  { %13168 = vmatpush1.bf16.msra.mxu1 %v13167_v26  ;;  %v11761_v26 = vld [vmem:[%s24015_s1 + $0xd20] sm:$0xff] }
 0x352   :  { %13170 = vmatprep.subr.bf16.mxu1 %v13169_v50  ;;  %v11769_v50 = vld [vmem:[%s24015_s1 + $0xd60] sm:$0xff] }
 0x353   :  { %11651 = vmatmul.mubr.msk.f32.gmra.mrb[76].mxu0 %vm44_vm0, %v18441_v29  ;;  %11669 = vmatmul.mubr.msk.f32.gmra.mrb[76].mxu1 %vm44_vm0, %v18279_v2  ;;  %v18462_v2 = vld [vmem:[#allocation2 + $0xa0] sm:$0xff]  ;;  %v13191_v27 = vpack.c.bf16 %v11769_v50, %v11761_v26  ;;  %v18804_v26 = vld [vmem:[#allocation2 + $0xa8] sm:$0xff]  ;;  %v11779_v50 = vld [vmem:[%s24015_s1 + $0xdb0] sm:$0xf] }
 0x354   :  { %4549 = vmatprep.mubr.f32.mxu0 %v24029_v3  ;;  %4710 = vmatprep.mubr.f32.mxu1 %v24029_v3 }
 0x355   :  { %13172 = vmatpush1.bf16.msra.mxu1 %v13171_v23  ;;  %v18646_v23 = vld [vmem:[#allocation2 + $0x48] sm:$0xff] }
 0x356   :  { %11811 = vmatprep.subr.msk.mxu1 %vm395_vm1, %v11776_v31  ;;  %v18658_v31 = vld [vmem:[#allocation2 + $0x50] sm:$0xff] }
 0x357   :  { %11652 = vmatmul.mubr.msk.f32.gmra.mrb[78].mxu0 %vm44_vm0, %v18462_v2  ;;  %11670 = vmatmul.mubr.msk.f32.gmra.mrb[78].mxu1 %vm44_vm0, %v18300_v30  ;;  %v18511_v30 = vld [vmem:[#allocation2 + $0xd0] sm:$0xff] }
 0x358   :  { %4555 = vmatprep.mubr.f32.mxu0 %v24029_v3  ;;  %4716 = vmatprep.mubr.f32.mxu1 %v24029_v3 }
 0x359   :  { %11812 = vmatpush1.msk.msra.mxu1 %vm395_vm1, %v11775_v11  ;;  %v18683_v11 = vld [vmem:[#allocation2 + $0x68] sm:$0xff] }
 0x35a   :  { %13194 = vmatprep.subr.bf16.mxu1 %v13193_v36  ;;  %v18691_v36 = vld [vmem:[#allocation2 + $0x70] sm:$0xff] }
 0x35b   :  { %11653 = vmatmul.mubr.msk.f32.gmra.mrb[80].mxu0 %vm44_vm0, %v18471_v61  ;;  %11671 = vmatmul.mubr.msk.f32.gmra.mrb[80].mxu1 %vm44_vm0, %v18309_v24  ;;  %v18519_v24 = vld [vmem:[#allocation2 + $0xd8] sm:$0xff] }
 0x35c   :  { %4561 = vmatprep.mubr.f32.mxu0 %v24029_v3  ;;  %4722 = vmatprep.mubr.f32.mxu1 %v24029_v3 }
 0x35f   :  { %11654 = vmatmul.mubr.msk.f32.gmra.mrb[82].mxu0 %vm44_vm0, %v18479_v34  ;;  %11672 = vmatmul.mubr.msk.f32.gmra.mrb[82].mxu1 %vm44_vm0, %v18317_v9  ;;  %v18527_v9 = vld [vmem:[#allocation2 + $0xe0] sm:$0xff] }
 0x360   :  { %4567 = vmatprep.mubr.f32.mxu0 %v24029_v3  ;;  %4728 = vmatprep.mubr.f32.mxu1 %v24029_v3 }
 0x363   :  { %11655 = vmatmul.mubr.msk.f32.gmra.mrb[84].mxu0 %vm44_vm0, %v18487_v12  ;;  %11673 = vmatmul.mubr.msk.f32.gmra.mrb[84].mxu1 %vm44_vm0, %v18325_v16  ;;  %v18535_v16 = vld [vmem:[#allocation2 + $0xe8] sm:$0xff] }
 0x364   :  { %4573 = vmatprep.mubr.f32.mxu0 %v24029_v3  ;;  %4734 = vmatprep.mubr.f32.mxu1 %v24029_v3 }
 0x367   :  { %11656 = vmatmul.mubr.msk.f32.gmra.mrb[86].mxu0 %vm44_vm0, %v18495_v20  ;;  %11674 = vmatmul.mubr.msk.f32.gmra.mrb[86].mxu1 %vm44_vm0, %v18333_v43  ;;  %v11697_v43 = vld [vmem:[%s24015_s1 + $0xb20] sm:$0xff] }
 0x368   :  { %4579 = vmatprep.mubr.f32.mxu0 %v24029_v3  ;;  %4740 = vmatprep.mubr.f32.mxu1 %v24029_v3 }
 0x36b   :  { %11657 = vmatmul.mubr.msk.f32.gmra.mrb[88].mxu0 %vm44_vm0, %v18503_v38  ;;  %11675 = vmatmul.mubr.msk.f32.gmra.mrb[88].mxu1 %vm44_vm0, %v18341_v58  ;;  %v11705_v58 = vld [vmem:[%s24015_s1 + $0xb60] sm:$0xff] }
 0x36c   :  { %4585 = vmatprep.mubr.f32.mxu0 %v24029_v3  ;;  %4746 = vmatprep.mubr.f32.mxu1 %v24029_v3  ;;  %v13175_v47 = vpack.c.bf16 %v11705_v58, %v11697_v43  ;;  %v11732_v43 = vld [vmem:[%s24015_s1 + $0xc38] sm:$0xff] }
 0x36d   :  { %v11740_v58 = vld [vmem:[%s24015_s1 + $0xc78] sm:$0xff] }
 0x36f   :  { %11658 = vmatmul.mubr.msk.f32.gmra.mrb[90].mxu0 %vm44_vm0, %v18511_v30  ;;  %11676 = vmatmul.mubr.msk.f32.gmra.mrb[90].mxu1 %vm44_vm0, %v18355_v63  ;;  %v18561_v63 = vld [vmem:[#allocation2 + $0x20] sm:$0xff] }
 0x370   :  { %4591 = vmatprep.mubr.f32.mxu0 %v24029_v3  ;;  %4752 = vmatprep.mubr.f32.mxu1 %v24029_v3 }
 0x373   :  { %11659 = vmatmul.mubr.msk.f32.gmra.mrb[92].mxu0 %vm44_vm0, %v18519_v24  ;;  %11677 = vmatmul.mubr.msk.f32.gmra.mrb[92].mxu1 %vm44_vm0, %v18373_v54  ;;  %v18580_v54 = vld [vmem:[#allocation2 + $0x28] sm:$0xff] }
 0x374   :  { %4597 = vmatprep.mubr.f32.mxu0 %v24029_v3  ;;  %4758 = vmatprep.mubr.f32.mxu1 %v24029_v3 }
 0x377   :  { %11660 = vmatmul.mubr.msk.f32.gmra.mrb[94].mxu0 %vm44_vm0, %v18527_v9  ;;  %11678 = vmatmul.mubr.msk.f32.gmra.mrb[94].mxu1 %vm44_vm0, %v18393_v46  ;;  %v18601_v46 = vld [vmem:[#allocation2 + $0x30] sm:$0xff] }
 0x378   :  { %4603 = vmatprep.mubr.f32.mxu0 %v24029_v3  ;;  %4764 = vmatprep.mubr.f32.mxu1 %v24029_v3 }
 0x37b   :  { %11661 = vmatmul.mubr.msk.f32.gmra.mrb[96].mxu0 %vm44_vm0, %v18535_v16  ;;  %11679 = vmatmul.mubr.msk.f32.gmra.mrb[96].mxu1 %vm44_vm0, %v18413_v21  ;;  %v18621_v21 = vld [vmem:[#allocation2 + $0x38] sm:$0xff] }
 0x37c   :  { %4609 = vmatprep.mubr.f32.mxu0 %v24029_v3  ;;  %4770 = vmatprep.mubr.f32.mxu1 %v24029_v3 }
 0x37f   :  { %11662 = vmatmul.mubr.msk.f32.gmra.mrb[98].mxu0 %vm44_vm0, %v18191_v45  ;;  %11680 = vmatmul.mubr.msk.f32.gmra.mrb[98].mxu1 %vm44_vm0, %v18433_v28  ;;  %v11778_v28 = vld [vmem:[%s24015_s1 + $0xda8] sm:$0xf] }
 0x380   :  { %4776 = vmatprep.mubr.f32.mxu1 %v24029_v3  ;;  %5362 = vmatprep.mubr.f32.mxu0 %v24029_v3 }
 0x383   :  { %11681 = vmatmul.mubr.msk.f32.gmra.mrb[100].mxu1 %vm44_vm0, %v18441_v29  ;;  %11783 = vmatmul.mubr.msk.f32.vlgmr.msra.gmra.mrb[0].mxu0 %vm44_vm0, %v18561_v63  ;;  %v11777_v29 = vld [vmem:[%s24015_s1 + $0xda0] sm:$0xf] }
 0x384   :  { %13176 = vmatpush1.bf16.msra.mxu0 %v13175_v47  ;;  %4782 = vmatprep.mubr.f32.mxu1 %v24029_v3  ;;  %v13201_v47 = vpack.c.bf16 %v11740_v58, %v11732_v43  ;;  %v11904_v43 = vld [vmem:[%s24017_s3 + $0x818] sm:$0xff] }
 0x385   :  { %5368 = vmatprep.mubr.f32.mxu0 %v24029_v3  ;;  %13178 = vmatprep.subr.bf16.mxu0 %v13177_v55  ;;  %v11731_v55 = vld [vmem:[%s24015_s1 + $0xc30] sm:$0xff] }
 0x387   :  { %11682 = vmatmul.mubr.msk.f32.gmra.mrb[102].mxu1 %vm44_vm0, %v18462_v2  ;;  %11784 = vmatmul.mubr.msk.f32.gmra.mrb[2].mxu0 %vm44_vm0, %v18580_v54  ;;  %v18699_v2 = vld [vmem:[#allocation2 + $0x78] sm:$0xff] }
 0x388   :  { %4788 = vmatprep.mubr.f32.mxu1 %v24029_v3  ;;  %5374 = vmatprep.mubr.f32.mxu0 %v24029_v3 }
 0x389   :  { %13180 = vmatpush1.bf16.msra.mxu0 %v13179_v8  ;;  %v13203_v8 = vpack.c.bf16 %v11739_v48, %v11731_v55  ;;  %v11901_v55 = vld [vmem:[%s24017_s3 + $0x800] sm:$0xff] }
 0x38a   :  { %13182 = vmatprep.subr.bf16.mxu0 %v13181_v56  ;;  %v13205_v56 = vpack.c.bf16 %v11756_v14, %v11748_v1  ;;  %v11905_v48 = vld [vmem:[%s24017_s3 + $0x820] sm:$0xff]  ;;  %v11910_v14 = vld [vmem:[%s24017_s3 + $0x848] sm:$0xff] }
 0x38b   :  { %11683 = vmatmul.mubr.msk.f32.gmra.mrb[104].mxu1 %vm44_vm0, %v18471_v61  ;;  %11785 = vmatmul.mubr.msk.f32.gmra.mrb[4].mxu0 %vm44_vm0, %v18601_v46  ;;  %v11699_v61 = vld [vmem:[%s24015_s1 + $0xb30] sm:$0xff]  ;;  %v13215_v1 = vpack.c.bf16 %v11905_v48, %v11901_v55 }
 0x38c   :  { %4794 = vmatprep.mubr.f32.mxu1 %v24029_v3  ;;  %5380 = vmatprep.mubr.f32.mxu0 %v24029_v3 }
 0x38d   :  { %13184 = vmatpush1.bf16.msra.mxu0 %v13183_v33  ;;  %v18779_v33 = vld [vmem:[#allocation2 + $0x98] sm:$0xff] }
 0x38e   :  { %13186 = vmatprep.subr.bf16.mxu0 %v13185_v5  ;;  %v13207_v5 = vpack.c.bf16 %v11755_v37, %v11747_v15  ;;  %v11909_v15 = vld [vmem:[%s24017_s3 + $0x840] sm:$0xff] }
 0x38f   :  { %11684 = vmatmul.mubr.msk.f32.gmra.mrb[106].mxu1 %vm44_vm0, %v18479_v34  ;;  %11786 = vmatmul.mubr.msk.f32.gmra.mrb[6].mxu0 %vm44_vm0, %v18621_v21  ;;  %v11707_v34 = vld [vmem:[%s24015_s1 + $0xb70] sm:$0xff]  ;;  %v11913_v37 = vld [vmem:[%s24017_s3 + $0x860] sm:$0xff] }
 0x390   :  { %4800 = vmatprep.mubr.f32.mxu1 %v24029_v3  ;;  %5386 = vmatprep.mubr.f32.mxu0 %v24029_v3  ;;  %v13219_v18 = vpack.c.bf16 %v11913_v37, %v11909_v15  ;;  %v11934_v15 = vld [vmem:[%s24017_s3 + $0x908] sm:$0xff] }
 0x391   :  { %13188 = vmatpush1.bf16.msra.mxu0 %v13187_v57  ;;  %v13211_v57 = vpack.c.bf16 %v11771_v10, %v11763_v40  ;;  %v11917_v40 = vld [vmem:[%s24017_s3 + $0x880] sm:$0xff]  ;;  %v11938_v37 = vld [vmem:[%s24017_s3 + $0x928] sm:$0xff] }
 0x392   :  { %13190 = vmatprep.subr.bf16.mxu0 %v13189_v22  ;;  %v11780_v22 = vld [vmem:[%s24015_s1 + $0xdb8] sm:$0xf]  ;;  %v11921_v10 = vld [vmem:[%s24017_s3 + $0x8a0] sm:$0xff] }
 0x393   :  { %11685 = vmatmul.mubr.msk.f32.gmra.mrb[108].mxu1 %vm44_vm0, %v18487_v12  ;;  %11787 = vmatmul.mubr.msk.f32.gmra.mrb[8].mxu0 %vm44_vm0, %v18635_v32  ;;  %v11716_v12 = vld [vmem:[%s24015_s1 + $0xbb8] sm:$0xff] }
 0x394   :  { %4806 = vmatprep.mubr.f32.mxu1 %v24029_v3  ;;  %5392 = vmatprep.mubr.f32.mxu0 %v24029_v3 }
 0x395   :  { %13192 = vmatpush1.bf16.msra.mxu0 %v13191_v27  ;;  %v18816_v27 = vld [vmem:[#allocation2 + $0xb0] sm:$0xff] }
 0x396   :  { %11841 = vmatprep.subr.msk.mxu0 %vm395_vm1, %v11778_v28  ;;  %v18825_v28 = vld [vmem:[#allocation2 + $0xb8] sm:$0xff] }
 0x397   :  { %11686 = vmatmul.mubr.msk.f32.gmra.mrb[110].mxu1 %vm44_vm0, %v18495_v20  ;;  %11788 = vmatmul.mubr.msk.f32.gmra.mrb[10].mxu0 %vm44_vm0, %v18646_v23  ;;  %v11724_v20 = vld [vmem:[%s24015_s1 + $0xbf8] sm:$0xff] }
 0x398   :  { %4812 = vmatprep.mubr.f32.mxu1 %v24029_v3  ;;  %5398 = vmatprep.mubr.f32.mxu0 %v24029_v3 }
 0x399   :  { %11842 = vmatpush1.msk.msra.mxu0 %vm395_vm1, %v11777_v29  ;;  %v18833_v29 = vld [vmem:[#allocation2 + $0xc0] sm:$0xff] }
 0x39b   :  { %11687 = vmatmul.mubr.msk.f32.gmra.mrb[112].mxu1 %vm44_vm0, %v18503_v38  ;;  %11789 = vmatmul.mubr.msk.f32.gmra.mrb[12].mxu0 %vm44_vm0, %v18658_v31  ;;  %v18719_v38 = vld [vmem:[#allocation2 + $0x80] sm:$0xff] }
 0x39c   :  { %4818 = vmatprep.mubr.f32.mxu1 %v24029_v3  ;;  %5404 = vmatprep.mubr.f32.mxu0 %v24029_v3 }
 0x39f   :  { %11688 = vmatmul.mubr.msk.f32.gmra.mrb[114].mxu1 %vm44_vm0, %v18511_v30  ;;  %11790 = vmatmul.mubr.msk.f32.gmra.mrb[14].mxu0 %vm44_vm0, %v18667_v13  ;;  %v13195_v30 = vpack.c.bf16 %v11707_v34, %v11699_v61  ;;  %v18841_v61 = vld [vmem:[#allocation2 + $0xc8] sm:$0xff]  ;;  %v18849_v34 = vld [vmem:[#allocation2 + $0xd0] sm:$0xff] }
 0x3a0   :  { %4824 = vmatprep.mubr.f32.mxu1 %v24029_v3  ;;  %5410 = vmatprep.mubr.f32.mxu0 %v24029_v3 }
 0x3a3   :  { %11689 = vmatmul.mubr.msk.f32.gmra.mrb[116].mxu1 %vm44_vm0, %v18519_v24  ;;  %11791 = vmatmul.mubr.msk.f32.gmra.mrb[16].mxu0 %vm44_vm0, %v18675_v4  ;;  %v13197_v24 = vpack.c.bf16 %v11724_v20, %v11716_v12  ;;  %v18857_v12 = vld [vmem:[#allocation2 + $0xd8] sm:$0xff]  ;;  %v18865_v20 = vld [vmem:[#allocation2 + $0xe0] sm:$0xff] }
 0x3a4   :  { %4830 = vmatprep.mubr.f32.mxu1 %v24029_v3  ;;  %5416 = vmatprep.mubr.f32.mxu0 %v24029_v3 }
 0x3a7   :  { %11690 = vmatmul.mubr.msk.f32.gmra.mrb[118].mxu1 %vm44_vm0, %v18527_v9  ;;  %11792 = vmatmul.mubr.msk.f32.gmra.mrb[18].mxu0 %vm44_vm0, %v18683_v11  ;;  %v11715_v9 = vld [vmem:[%s24015_s1 + $0xbb0] sm:$0xff] }
 0x3a8   :  { %4836 = vmatprep.mubr.f32.mxu1 %v24029_v3  ;;  %5422 = vmatprep.mubr.f32.mxu0 %v24029_v3 }
 0x3ab   :  { %11691 = vmatmul.mubr.msk.f32.gmra.mrb[120].mxu1 %vm44_vm0, %v18535_v16  ;;  %11793 = vmatmul.mubr.msk.f32.gmra.mrb[20].mxu0 %vm44_vm0, %v18691_v36  ;;  %v11723_v16 = vld [vmem:[%s24015_s1 + $0xbf0] sm:$0xff] }
 0x3ac   :  { %4842 = vmatprep.mubr.f32.mxu1 %v24029_v3  ;;  %5428 = vmatprep.mubr.f32.mxu0 %v24029_v3  ;;  %v13199_v0 = vpack.c.bf16 %v11723_v16, %v11715_v9  ;;  %v11902_v9 = vld [vmem:[%s24017_s3 + $0x808] sm:$0xff] }
 0x3ad   :  { %v11906_v16 = vld [vmem:[%s24017_s3 + $0x828] sm:$0xff] }
 0x3ae   :  { %v13213_v58 = vpack.c.bf16 %v11906_v16, %v11902_v9  ;;  %v11926_v9 = vld [vmem:[%s24017_s3 + $0x8c8] sm:$0xff] }
 0x3af   :  { %11692 = vmatmul.mubr.msk.f32.gmra.mrb[122].mxu1 %vm44_vm0, %v18191_v45  ;;  %11794 = vmatmul.mubr.msk.f32.gmra.mrb[22].mxu0 %vm44_vm0, %v18699_v2  ;;  %v11930_v16 = vld [vmem:[%s24017_s3 + $0x8e8] sm:$0xff] }
 0x3b0   :  { %5434 = vmatprep.mubr.f32.mxu0 %v24029_v3  ;;  %5595 = vmatprep.mubr.f32.mxu1 %v24029_v3 }
 0x3b1   :  { %13214 = vmatprep.subr.bf16.mxu0 %v13213_v58  ;;  %v13225_v58 = vpack.c.bf16 %v11930_v16, %v11926_v9  ;;  %v11946_v9 = vld [vmem:[%s24017_s3 + $0x968] sm:$0xff]  ;;  %v11932_v16 = vld [vmem:[%s24017_s3 + $0x8f8] sm:$0xff] }
 0x3b3   :  { %11795 = vmatmul.mubr.msk.f32.gmra.mrb[24].mxu0 %vm44_vm0, %v18719_v38  ;;  %11813 = vmatmul.mubr.msk.f32.vlgmr.msra.gmra.mrb[12].mxu1 %vm44_vm0, %v18561_v63 }
 0x3b4   :  { %5440 = vmatprep.mubr.f32.mxu0 %v24029_v3  ;;  %5601 = vmatprep.mubr.f32.mxu1 %v24029_v3 }
 0x3b5   :  { %13196 = vmatpush1.bf16.msra.mxu1 %v13195_v30  ;;  %v18873_v30 = vld [vmem:[#allocation2 + $0xe8] sm:$0xff] }
 0x3b6   :  { %13198 = vmatprep.subr.bf16.mxu1 %v13197_v24  ;;  %v18887_v24 = vld [vmem:[#allocation2 + $0xf8] sm:$0xff] }
 0x3b7   :  { %11796 = vmatmul.mubr.msk.f32.gmra.mrb[26].mxu0 %vm44_vm0, %v18739_v62  ;;  %11814 = vmatmul.mubr.msk.f32.gmra.mrb[14].mxu1 %vm44_vm0, %v18580_v54 }
 0x3b8   :  { %5446 = vmatprep.mubr.f32.mxu0 %v24029_v3  ;;  %5607 = vmatprep.mubr.f32.mxu1 %v24029_v3 }
 0x3b9   :  { %13200 = vmatpush1.bf16.msra.mxu1 %v13199_v0  ;;  %v11908_v0 = vld [vmem:[%s24017_s3 + $0x838] sm:$0xff] }
 0x3ba   :  { %13202 = vmatprep.subr.bf16.mxu1 %v13201_v47  ;;  %v13341_v47 = vpack.c.bf16 %v11908_v0, %v11904_v43  ;;  %v11916_v43 = vld [vmem:[%s24017_s3 + $0x878] sm:$0xff]  ;;  %v11925_v0 = vld [vmem:[%s24017_s3 + $0x8c0] sm:$0xff] }
 0x3bb   :  { %11797 = vmatmul.mubr.msk.f32.gmra.mrb[28].mxu0 %vm44_vm0, %v18759_v49  ;;  %11815 = vmatmul.mubr.msk.f32.gmra.mrb[16].mxu1 %vm44_vm0, %v18601_v46 }
 0x3bc   :  { %5452 = vmatprep.mubr.f32.mxu0 %v24029_v3  ;;  %5613 = vmatprep.mubr.f32.mxu1 %v24029_v3 }
 0x3bd   :  { %13204 = vmatpush1.bf16.msra.mxu1 %v13203_v8  ;;  %v11914_v8 = vld [vmem:[%s24017_s3 + $0x868] sm:$0xff] }
 0x3be   :  { %13206 = vmatprep.subr.bf16.mxu1 %v13205_v56  ;;  %v13217_v56 = vpack.c.bf16 %v11914_v8, %v11910_v14  ;;  %v11915_v14 = vld [vmem:[%s24017_s3 + $0x870] sm:$0xff] }
 0x3bf   :  { %11798 = vmatmul.mubr.msk.f32.gmra.mrb[30].mxu0 %vm44_vm0, %v18779_v33  ;;  %11816 = vmatmul.mubr.msk.f32.gmra.mrb[18].mxu1 %vm44_vm0, %v18621_v21 }
 0x3c0   :  { %5458 = vmatprep.mubr.f32.mxu0 %v24029_v3  ;;  %5619 = vmatprep.mubr.f32.mxu1 %v24029_v3 }
 0x3c1   :  { %13208 = vmatpush1.bf16.msra.mxu1 %v13207_v5  ;;  %v11922_v5 = vld [vmem:[%s24017_s3 + $0x8a8] sm:$0xff] }
 0x3c2   :  { %13210 = vmatprep.subr.bf16.mxu1 %v13209_v17  ;;  %v13221_v17 = vpack.c.bf16 %v11922_v5, %v11918_v19  ;;  %v13229_v19 = vpack.c.bf16 %v11938_v37, %v11934_v15  ;;  %v11933_v5 = vld [vmem:[%s24017_s3 + $0x900] sm:$0xff]  ;;  %v11940_v15 = vld [vmem:[%s24017_s3 + $0x938] sm:$0xff] }
 0x3c3   :  { %11799 = vmatmul.mubr.msk.f32.gmra.mrb[32].mxu0 %vm44_vm0, %v18793_v6  ;;  %11817 = vmatmul.mubr.msk.f32.gmra.mrb[20].mxu1 %vm44_vm0, %v18635_v32 }
 0x3c4   :  { %5464 = vmatprep.mubr.f32.mxu0 %v24029_v3  ;;  %5625 = vmatprep.mubr.f32.mxu1 %v24029_v3 }
 0x3c5   :  { %13212 = vmatpush1.bf16.msra.mxu1 %v13211_v57  ;;  %v13223_v57 = vpack.c.bf16 %v11921_v10, %v11917_v40  ;;  %v11919_v10 = vld [vmem:[%s24017_s3 + $0x890] sm:$0xff] }
 0x3c6   :  { %11871 = vmatprep.subr.msk.mxu1 %vm395_vm1, %v11780_v22  ;;  %v11907_v22 = vld [vmem:[%s24017_s3 + $0x830] sm:$0xff] }
 0x3c7   :  { %11800 = vmatmul.mubr.msk.f32.gmra.mrb[34].mxu0 %vm44_vm0, %v18804_v26  ;;  %11818 = vmatmul.mubr.msk.f32.gmra.mrb[22].mxu1 %vm44_vm0, %v18646_v23 }
 0x3c8   :  { %5470 = vmatprep.mubr.f32.mxu0 %v24029_v3  ;;  %5631 = vmatprep.mubr.f32.mxu1 %v24029_v3 }
 0x3c9   :  { %11872 = vmatpush1.msk.msra.mxu1 %vm395_vm1, %v11779_v50  ;;  %v11912_v50 = vld [vmem:[%s24017_s3 + $0x858] sm:$0xff] }
 0x3ca   :  { %13342 = vmatprep.subr.bf16.mxu1 %v13341_v47  ;;  %v11929_v47 = vld [vmem:[%s24017_s3 + $0x8e0] sm:$0xff]  ;;  %v13345_v8 = vpack.c.bf16 %v11916_v43, %v11912_v50  ;;  %v11942_v50 = vld [vmem:[%s24017_s3 + $0x948] sm:$0xff] }
 0x3cb   :  { %11801 = vmatmul.mubr.msk.f32.gmra.mrb[36].mxu0 %vm44_vm0, %v18816_v27  ;;  %11819 = vmatmul.mubr.msk.f32.gmra.mrb[24].mxu1 %vm44_vm0, %v18658_v31  ;;  %v13227_v55 = vpack.c.bf16 %v11929_v47, %v11925_v0  ;;  %v13233_v43 = vpack.c.bf16 %v11946_v9, %v11942_v50  ;;  %v11945_v0 = vld [vmem:[%s24017_s3 + $0x960] sm:$0xff] }
 0x3cc   :  { %5476 = vmatprep.mubr.f32.mxu0 %v24029_v3  ;;  %5637 = vmatprep.mubr.f32.mxu1 %v24029_v3  ;;  %v11957_v9 = vld [vmem:[%s24017_s3 + $0x9c0] sm:$0xff] }
 0x3cf   :  { %11802 = vmatmul.mubr.msk.f32.gmra.mrb[38].mxu0 %vm44_vm0, %v18825_v28  ;;  %11820 = vmatmul.mubr.msk.f32.gmra.mrb[26].mxu1 %vm44_vm0, %v18667_v13 }
 0x3d0   :  { %5482 = vmatprep.mubr.f32.mxu0 %v24029_v3  ;;  %5643 = vmatprep.mubr.f32.mxu1 %v24029_v3 }
 0x3d3   :  { %11803 = vmatmul.mubr.msk.f32.gmra.mrb[40].mxu0 %vm44_vm0, %v18833_v29  ;;  %11821 = vmatmul.mubr.msk.f32.gmra.mrb[28].mxu1 %vm44_vm0, %v18675_v4 }
 0x3d4   :  { %5488 = vmatprep.mubr.f32.mxu0 %v24029_v3  ;;  %5649 = vmatprep.mubr.f32.mxu1 %v24029_v3 }
 0x3d7   :  { %11804 = vmatmul.mubr.msk.f32.gmra.mrb[42].mxu0 %vm44_vm0, %v18841_v61  ;;  %11822 = vmatmul.mubr.msk.f32.gmra.mrb[30].mxu1 %vm44_vm0, %v18683_v11 }
 0x3d8   :  { %5494 = vmatprep.mubr.f32.mxu0 %v24029_v3  ;;  %5655 = vmatprep.mubr.f32.mxu1 %v24029_v3 }
 0x3db   :  { %11805 = vmatmul.mubr.msk.f32.gmra.mrb[100].mxu0 %vm44_vm0, %v18849_v34  ;;  %11823 = vmatmul.mubr.msk.f32.gmra.mrb[32].mxu1 %vm44_vm0, %v18691_v36 }
 0x3dc   :  { %5500 = vmatprep.mubr.f32.mxu0 %v24029_v3  ;;  %5661 = vmatprep.mubr.f32.mxu1 %v24029_v3 }
 0x3df   :  { %11806 = vmatmul.mubr.msk.f32.gmra.mrb[102].mxu0 %vm44_vm0, %v18857_v12  ;;  %11824 = vmatmul.mubr.msk.f32.gmra.mrb[34].mxu1 %vm44_vm0, %v18699_v2 }
 0x3e0   :  { %5506 = vmatprep.mubr.f32.mxu0 %v24029_v3  ;;  %5667 = vmatprep.mubr.f32.mxu1 %v24029_v3 }
 0x3e3   :  { %11807 = vmatmul.mubr.msk.f32.gmra.mrb[104].mxu0 %vm44_vm0, %v18865_v20  ;;  %11825 = vmatmul.mubr.msk.f32.gmra.mrb[36].mxu1 %vm44_vm0, %v18719_v38 }
 0x3e4   :  { %5512 = vmatprep.mubr.f32.mxu0 %v24029_v3  ;;  %5673 = vmatprep.mubr.f32.mxu1 %v24029_v3 }
 0x3e7   :  { %11808 = vmatmul.mubr.msk.f32.gmra.mrb[106].mxu0 %vm44_vm0, %v18873_v30  ;;  %11826 = vmatmul.mubr.msk.f32.gmra.mrb[38].mxu1 %vm44_vm0, %v18739_v62 }
 0x3e8   :  { %5518 = vmatprep.mubr.f32.mxu0 %v24029_v3  ;;  %5679 = vmatprep.mubr.f32.mxu1 %v24029_v3 }
 0x3eb   :  { %11809 = vmatmul.mubr.msk.f32.gmra.mrb[108].mxu0 %vm44_vm0, %v18191_v45  ;;  %11827 = vmatmul.mubr.msk.f32.gmra.mrb[40].mxu1 %vm44_vm0, %v18759_v49 }
 0x3ec   :  { %5524 = vmatprep.mubr.f32.mxu0 %v24029_v3  ;;  %5685 = vmatprep.mubr.f32.mxu1 %v24029_v3 }
 0x3ef   :  { %11810 = vmatmul.mubr.msk.f32.gmra.mrb[110].mxu0 %vm44_vm0, %v18887_v24  ;;  %11828 = vmatmul.mubr.msk.f32.gmra.mrb[42].mxu1 %vm44_vm0, %v18779_v33 }
 0x3f0   :  { %5691 = vmatprep.mubr.f32.mxu1 %v24029_v3  ;;  %5828 = vmatprep.mubr.f32.mxu0 %v24029_v3 }
 0x3f3   :  { %11829 = vmatmul.mubr.msk.f32.gmra.mrb[44].mxu1 %vm44_vm0, %v18793_v6  ;;  %11843 = vmatmul.mubr.msk.f32.vlgmr.msra.gmra.mrb[44].mxu0 %vm44_vm0, %v18561_v63 }
 0x3f4   :  { %5697 = vmatprep.mubr.f32.mxu1 %v24029_v3  ;;  %5834 = vmatprep.mubr.f32.mxu0 %v24029_v3 }
 0x3f5   :  { %13216 = vmatpush1.bf16.msra.mxu0 %v13215_v1  ;;  %v11911_v1 = vld [vmem:[%s24017_s3 + $0x850] sm:$0xff] }
 0x3f6   :  { %13218 = vmatprep.subr.bf16.mxu0 %v13217_v56  ;;  %v11920_v56 = vld [vmem:[%s24017_s3 + $0x898] sm:$0xff] }
 0x3f7   :  { %11830 = vmatmul.mubr.msk.f32.gmra.mrb[46].mxu1 %vm44_vm0, %v18804_v26  ;;  %11844 = vmatmul.mubr.msk.f32.gmra.mrb[46].mxu0 %vm44_vm0, %v18580_v54 }
 0x3f8   :  { %5703 = vmatprep.mubr.f32.mxu1 %v24029_v3  ;;  %5840 = vmatprep.mubr.f32.mxu0 %v24029_v3 }
 0x3f9   :  { %13220 = vmatpush1.bf16.msra.mxu0 %v13219_v18  ;;  %v11924_v18 = vld [vmem:[%s24017_s3 + $0x8b8] sm:$0xff] }
 0x3fa   :  { %13222 = vmatprep.subr.bf16.mxu0 %v13221_v17  ;;  %v11937_v17 = vld [vmem:[%s24017_s3 + $0x920] sm:$0xff] }
 0x3fb   :  { %11831 = vmatmul.mubr.msk.f32.gmra.mrb[48].mxu1 %vm44_vm0, %v18816_v27  ;;  %11845 = vmatmul.mubr.msk.f32.gmra.mrb[48].mxu0 %vm44_vm0, %v18601_v46  ;;  %v13231_v40 = vpack.c.bf16 %v11937_v17, %v11933_v5  ;;  %v11935_v17 = vld [vmem:[%s24017_s3 + $0x910] sm:$0xff] }
 0x3fc   :  { %5709 = vmatprep.mubr.f32.mxu1 %v24029_v3  ;;  %5846 = vmatprep.mubr.f32.mxu0 %v24029_v3 }
 0x3fd   :  { %13224 = vmatpush1.bf16.msra.mxu0 %v13223_v57  ;;  %v11923_v57 = vld [vmem:[%s24017_s3 + $0x8b0] sm:$0xff] }
 0x3fe   :  { %13226 = vmatprep.subr.bf16.mxu0 %v13225_v58  ;;  %v11941_v58 = vld [vmem:[%s24017_s3 + $0x940] sm:$0xff] }
 0x3ff   :  { %11832 = vmatmul.mubr.msk.f32.gmra.mrb[50].mxu1 %vm44_vm0, %v18825_v28  ;;  %11846 = vmatmul.mubr.msk.f32.gmra.mrb[50].mxu0 %vm44_vm0, %v18621_v21  ;;  %v13235_v47 = vpack.c.bf16 %v11945_v0, %v11941_v58  ;;  %v11943_v58 = vld [vmem:[%s24017_s3 + $0x950] sm:$0xff] }
 0x400   :  { %5715 = vmatprep.mubr.f32.mxu1 %v24029_v3  ;;  %5852 = vmatprep.mubr.f32.mxu0 %v24029_v3  ;;  %v11947_v0 = vld [vmem:[%s24017_s3 + $0x970] sm:$0xff] }
 0x401   :  { %13228 = vmatpush1.bf16.msra.mxu0 %v13227_v55  ;;  %v11927_v55 = vld [vmem:[%s24017_s3 + $0x8d0] sm:$0xff] }
 0x402   :  { %13230 = vmatprep.subr.bf16.mxu0 %v13229_v19  ;;  %v11953_v19 = vld [vmem:[%s24017_s3 + $0x9a0] sm:$0xff] }
 0x403   :  { %11833 = vmatmul.mubr.msk.f32.gmra.mrb[52].mxu1 %vm44_vm0, %v18833_v29  ;;  %11847 = vmatmul.mubr.msk.f32.gmra.mrb[52].mxu0 %vm44_vm0, %v18635_v32 }
 0x404   :  { %5721 = vmatprep.mubr.f32.mxu1 %v24029_v3  ;;  %5858 = vmatprep.mubr.f32.mxu0 %v24029_v3 }
 0x405   :  { %13232 = vmatpush1.bf16.msra.mxu0 %v13231_v40  ;;  %v11939_v40 = vld [vmem:[%s24017_s3 + $0x930] sm:$0xff] }
 0x406   :  { %13234 = vmatprep.subr.bf16.mxu0 %v13233_v43 }
 0x407   :  { %11834 = vmatmul.mubr.msk.f32.gmra.mrb[54].mxu1 %vm44_vm0, %v18841_v61  ;;  %11848 = vmatmul.mubr.msk.f32.gmra.mrb[54].mxu0 %vm44_vm0, %v18646_v23 }
 0x408   :  { %5727 = vmatprep.mubr.f32.mxu1 %v24029_v3  ;;  %5864 = vmatprep.mubr.f32.mxu0 %v24029_v3 }
 0x409   :  { %13236 = vmatpush1.bf16.msra.mxu0 %v13235_v47 }
 0x40b   :  { %11835 = vmatmul.mubr.msk.f32.gmra.mrb[56].mxu1 %vm44_vm0, %v18849_v34  ;;  %11849 = vmatmul.mubr.msk.f32.gmra.mrb[56].mxu0 %vm44_vm0, %v18658_v31 }
 0x40c   :  { %5733 = vmatprep.mubr.f32.mxu1 %v24029_v3  ;;  %5870 = vmatprep.mubr.f32.mxu0 %v24029_v3 }
 0x40f   :  { %11836 = vmatmul.mubr.msk.f32.gmra.mrb[58].mxu1 %vm44_vm0, %v18857_v12  ;;  %11850 = vmatmul.mubr.msk.f32.gmra.mrb[58].mxu0 %vm44_vm0, %v18667_v13 }
 0x410   :  { %5739 = vmatprep.mubr.f32.mxu1 %v24029_v3  ;;  %5876 = vmatprep.mubr.f32.mxu0 %v24029_v3 }
 0x413   :  { %11837 = vmatmul.mubr.msk.f32.gmra.mrb[60].mxu1 %vm44_vm0, %v18865_v20  ;;  %11851 = vmatmul.mubr.msk.f32.gmra.mrb[60].mxu0 %vm44_vm0, %v18675_v4 }
 0x414   :  { %5745 = vmatprep.mubr.f32.mxu1 %v24029_v3  ;;  %5882 = vmatprep.mubr.f32.mxu0 %v24029_v3 }
 0x417   :  { %11838 = vmatmul.mubr.msk.f32.gmra.mrb[62].mxu1 %vm44_vm0, %v18873_v30  ;;  %11852 = vmatmul.mubr.msk.f32.gmra.mrb[62].mxu0 %vm44_vm0, %v18683_v11 }
 0x418   :  { %5751 = vmatprep.mubr.f32.mxu1 %v24029_v3  ;;  %5888 = vmatprep.mubr.f32.mxu0 %v24029_v3 }
 0x41b   :  { %11839 = vmatmul.mubr.msk.f32.gmra.mrb[64].mxu1 %vm44_vm0, %v18191_v45  ;;  %11853 = vmatmul.mubr.msk.f32.gmra.mrb[64].mxu0 %vm44_vm0, %v18691_v36  ;;  %v11903_v45 = vld [vmem:[%s24017_s3 + $0x810] sm:$0xff] }
 0x41c   :  { %5757 = vmatprep.mubr.f32.mxu1 %v24029_v3  ;;  %5894 = vmatprep.mubr.f32.mxu0 %v24029_v3  ;;  %v13343_v48 = vpack.c.bf16 %v11907_v22, %v11903_v45  ;;  %v13349_v45 = vpack.c.bf16 %v11924_v18, %v11920_v56  ;;  %v11928_v22 = vld [vmem:[%s24017_s3 + $0x8d8] sm:$0xff]  ;;  %v11954_v56 = vld [vmem:[%s24017_s3 + $0x9a8] sm:$0xff]  ;;  %v11949_v18 = vld [vmem:[%s24017_s3 + $0x980] sm:$0xff] }
 0x41d   :  { %v13239_v5 = vpack.c.bf16 %v11953_v19, %v11949_v18  ;;  %v11955_v18 = vld [vmem:[%s24017_s3 + $0x9b0] sm:$0xff] }
 0x41f   :  { %11840 = vmatmul.mubr.msk.f32.gmra.mrb[66].mxu1 %vm44_vm0, %v18887_v24  ;;  %11854 = vmatmul.mubr.msk.f32.gmra.mrb[66].mxu0 %vm44_vm0, %v18699_v2 }
 0x420   :  { %5900 = vmatprep.mubr.f32.mxu0 %v24029_v3  ;;  %6061 = vmatprep.mubr.f32.mxu1 %v24029_v3 }
 0x423   :  { %11855 = vmatmul.mubr.msk.f32.gmra.mrb[68].mxu0 %vm44_vm0, %v18719_v38  ;;  %11873 = vmatmul.mubr.msk.f32.vlgmr.msra.gmra.mrb[68].mxu1 %vm44_vm0, %v18561_v63  ;;  %v13347_v63 = vpack.c.bf16 %v11915_v14, %v11911_v1  ;;  %v13353_v1 = vpack.c.bf16 %v11932_v16, %v11928_v22  ;;  %v11936_v14 = vld [vmem:[%s24017_s3 + $0x918] sm:$0xff]  ;;  %v11961_v16 = vld [vmem:[%s24017_s3 + $0x9e0] sm:$0xff] }
 0x424   :  { %5906 = vmatprep.mubr.f32.mxu0 %v24029_v3  ;;  %6067 = vmatprep.mubr.f32.mxu1 %v24029_v3  ;;  %v11948_v22 = vld [vmem:[%s24017_s3 + $0x978] sm:$0xff]  ;;  %v13243_v43 = vpack.c.bf16 %v11961_v16, %v11957_v9 }
 0x425   :  { %13344 = vmatpush1.bf16.msra.mxu1 %v13343_v48  ;;  %v11931_v48 = vld [vmem:[%s24017_s3 + $0x8f0] sm:$0xff]  ;;  %v11968_v16 = vld [vmem:[%s24017_s3 + $0xa18] sm:$0xff] }
 0x426   :  { %13346 = vmatprep.subr.bf16.mxu1 %v13345_v8  ;;  %v11950_v8 = vld [vmem:[%s24017_s3 + $0x988] sm:$0xff] }
 0x427   :  { %11856 = vmatmul.mubr.msk.f32.gmra.mrb[70].mxu0 %vm44_vm0, %v18739_v62  ;;  %11874 = vmatmul.mubr.msk.f32.gmra.mrb[70].mxu1 %vm44_vm0, %v18580_v54  ;;  %v13351_v54 = vpack.c.bf16 %v11923_v57, %v11919_v10  ;;  %v13237_v37 = vpack.c.bf16 %v11954_v56, %v11950_v8  ;;  %v11944_v10 = vld [vmem:[%s24017_s3 + $0x958] sm:$0xff]  ;;  %v11958_v57 = vld [vmem:[%s24017_s3 + $0x9c8] sm:$0xff]  ;;  %v11965_v8 = vld [vmem:[%s24017_s3 + $0xa00] sm:$0xff] }
 0x428   :  { %5912 = vmatprep.mubr.f32.mxu0 %v24029_v3  ;;  %6073 = vmatprep.mubr.f32.mxu1 %v24029_v3  ;;  %v13361_v47 = vpack.c.bf16 %v11948_v22, %v11944_v10  ;;  %v11969_v56 = vld [vmem:[%s24017_s3 + $0xa20] sm:$0xff]  ;;  %v11959_v22 = vld [vmem:[%s24017_s3 + $0x9d0] sm:$0xff] }
 0x429   :  { %13348 = vmatpush1.bf16.msra.mxu1 %v13347_v63  ;;  %13238 = vmatprep.subr.bf16.mxu0 %v13237_v37  ;;  %v13357_v63 = vpack.c.bf16 %v11940_v15, %v11936_v14  ;;  %v13247_v15 = vpack.c.bf16 %v11969_v56, %v11965_v8  ;;  %v11951_v37 = vld [vmem:[%s24017_s3 + $0x990] sm:$0xff]  ;;  %v11973_v10 = vld [vmem:[%s24017_s3 + $0xa40] sm:$0xff]  ;;  %v11976_v8 = vld [vmem:[%s24017_s3 + $0xa58] sm:$0xff] }
 0x42a   :  { %13350 = vmatprep.subr.bf16.mxu1 %v13349_v45  ;;  %13240 = vmatpush1.bf16.msra.mxu0 %v13239_v5  ;;  %v11962_v45 = vld [vmem:[%s24017_s3 + $0x9e8] sm:$0xff]  ;;  %v11960_v5 = vld [vmem:[%s24017_s3 + $0x9d8] sm:$0xff] }
 0x42b   :  { %11857 = vmatmul.mubr.msk.f32.gmra.mrb[72].mxu0 %vm44_vm0, %v18759_v49  ;;  %11875 = vmatmul.mubr.msk.f32.gmra.mrb[72].mxu1 %vm44_vm0, %v18601_v46  ;;  %v13355_v46 = vpack.c.bf16 %v11931_v48, %v11927_v55  ;;  %v13241_v50 = vpack.c.bf16 %v11962_v45, %v11958_v57  ;;  %v11966_v55 = vld [vmem:[%s24017_s3 + $0xa08] sm:$0xff]  ;;  %v11977_v57 = vld [vmem:[%s24017_s3 + $0xa60] sm:$0xff] }
 0x42c   :  { %5918 = vmatprep.mubr.f32.mxu0 %v24029_v3  ;;  %6079 = vmatprep.mubr.f32.mxu1 %v24029_v3  ;;  %v11970_v48 = vld [vmem:[%s24017_s3 + $0xa28] sm:$0xff]  ;;  %v13251_v45 = vpack.c.bf16 %v11977_v57, %v11973_v10 }
 0x42d   :  { %13352 = vmatpush1.bf16.msra.mxu1 %v13351_v54  ;;  %13242 = vmatprep.subr.bf16.mxu0 %v13241_v50  ;;  %v11952_v54 = vld [vmem:[%s24017_s3 + $0x998] sm:$0xff]  ;;  %v13245_v14 = vpack.c.bf16 %v11970_v48, %v11966_v55  ;;  %v11963_v50 = vld [vmem:[%s24017_s3 + $0x9f0] sm:$0xff]  ;;  %v11990_v56 = vld [vmem:[%s24017_s3 + $0xac8] sm:$0xff] }
 0x42e   :  { %13354 = vmatprep.subr.bf16.mxu1 %v13353_v1  ;;  %13244 = vmatpush1.bf16.msra.mxu0 %v13243_v43  ;;  %v11956_v1 = vld [vmem:[%s24017_s3 + $0x9b8] sm:$0xff]  ;;  %v11982_v43 = vld [vmem:[%s24017_s3 + $0xa88] sm:$0xff]  ;;  %v11967_v48 = vld [vmem:[%s24017_s3 + $0xa10] sm:$0xff] }
 0x42f   :  { %11858 = vmatmul.mubr.msk.f32.gmra.mrb[74].mxu0 %vm44_vm0, %v18779_v33  ;;  %11876 = vmatmul.mubr.msk.f32.gmra.mrb[74].mxu1 %vm44_vm0, %v18621_v21  ;;  %v13359_v21 = vpack.c.bf16 %v11939_v40, %v11935_v17  ;;  %v13365_v19 = vpack.c.bf16 %v11956_v1, %v11952_v54  ;;  %v11978_v17 = vld [vmem:[%s24017_s3 + $0xa68] sm:$0xff]  ;;  %v11964_v40 = vld [vmem:[%s24017_s3 + $0x9f8] sm:$0xff]  ;;  %v11985_v54 = vld [vmem:[%s24017_s3 + $0xaa0] sm:$0xff] }
 0x430   :  { %5924 = vmatprep.mubr.f32.mxu0 %v24029_v3  ;;  %6085 = vmatprep.mubr.f32.mxu1 %v24029_v3  ;;  %v13369_v9 = vpack.c.bf16 %v11964_v40, %v11960_v5  ;;  %v11971_v1 = vld [vmem:[%s24017_s3 + $0xa30] sm:$0xff]  ;;  %v11998_v10 = vld [vmem:[%s24017_s3 + $0xb08] sm:$0xff] }
 0x431   :  { %13356 = vmatpush1.bf16.msra.mxu1 %v13355_v46  ;;  %13246 = vmatprep.subr.bf16.mxu0 %v13245_v14  ;;  %v11974_v46 = vld [vmem:[%s24017_s3 + $0xa48] sm:$0xff] }
 0x432   :  { %13358 = vmatprep.subr.bf16.mxu1 %v13357_v63  ;;  %13248 = vmatpush1.bf16.msra.mxu0 %v13247_v15  ;;  %v13249_v63 = vpack.c.bf16 %v11978_v17, %v11974_v46  ;;  %v11994_v15 = vld [vmem:[%s24017_s3 + $0xae8] sm:$0xff]  ;;  %v11975_v46 = vld [vmem:[%s24017_s3 + $0xa50] sm:$0xff] }
 0x433   :  { %11859 = vmatmul.mubr.msk.f32.gmra.mrb[76].mxu0 %vm44_vm0, %v18793_v6  ;;  %11877 = vmatmul.mubr.msk.f32.gmra.mrb[76].mxu1 %vm44_vm0, %v18635_v32  ;;  %v13363_v32 = vpack.c.bf16 %v11947_v0, %v11943_v58  ;;  %v11972_v58 = vld [vmem:[%s24017_s3 + $0xa38] sm:$0xff]  ;;  %v11979_v17 = vld [vmem:[%s24017_s3 + $0xa70] sm:$0xff]  ;;  %v12002_v57 = vld [vmem:[%s24017_s3 + $0xb28] sm:$0xff] }
 0x434   :  { %5930 = vmatprep.mubr.f32.mxu0 %v24029_v3  ;;  %6091 = vmatprep.mubr.f32.mxu1 %v24029_v3  ;;  %v13373_v14 = vpack.c.bf16 %v11972_v58, %v11968_v16  ;;  %v11983_v16 = vld [vmem:[%s24017_s3 + $0xa90] sm:$0xff]  ;;  %v11992_v58 = vld [vmem:[%s24017_s3 + $0xad8] sm:$0xff] }
 0x435   :  { %13360 = vmatpush1.bf16.msra.mxu1 %v13359_v21  ;;  %13250 = vmatprep.subr.bf16.mxu0 %v13249_v63  ;;  %v11986_v21 = vld [vmem:[%s24017_s3 + $0xaa8] sm:$0xff]  ;;  %v11984_v63 = vld [vmem:[%s24017_s3 + $0xa98] sm:$0xff] }
 0x436   :  { %13362 = vmatprep.subr.bf16.mxu1 %v13361_v47  ;;  %13252 = vmatpush1.bf16.msra.mxu0 %v13251_v45  ;;  %v13253_v0 = vpack.c.bf16 %v11986_v21, %v11982_v43  ;;  %v11981_v47 = vld [vmem:[%s24017_s3 + $0xa80] sm:$0xff]  ;;  %v11988_v45 = vld [vmem:[%s24017_s3 + $0xab8] sm:$0xff]  ;;  %v11987_v43 = vld [vmem:[%s24017_s3 + $0xab0] sm:$0xff] }
 0x437   :  { %11860 = vmatmul.mubr.msk.f32.gmra.mrb[78].mxu0 %vm44_vm0, %v18804_v26  ;;  %11878 = vmatmul.mubr.msk.f32.gmra.mrb[78].mxu1 %vm44_vm0, %v18646_v23  ;;  %v13367_v23 = vpack.c.bf16 %v11955_v18, %v11951_v37  ;;  %v13255_v55 = vpack.c.bf16 %v11985_v54, %v11981_v47  ;;  %v13257_v37 = vpack.c.bf16 %v11994_v15, %v11990_v56  ;;  %v11989_v18 = vld [vmem:[%s24017_s3 + $0xac0] sm:$0xff]  ;;  %v12010_v47 = vld [vmem:[%s24017_s3 + $0xb68] sm:$0xff]  ;;  %v11996_v54 = vld [vmem:[%s24017_s3 + $0xaf8] sm:$0xff] }
 0x438   :  { %5936 = vmatprep.mubr.f32.mxu0 %v24029_v3  ;;  %6097 = vmatprep.mubr.f32.mxu1 %v24029_v3  ;;  %v13381_v21 = vpack.c.bf16 %v11988_v45, %v11984_v63  ;;  %v13385_v56 = vpack.c.bf16 %v11996_v54, %v11992_v58  ;;  %v12000_v15 = vld [vmem:[%s24017_s3 + $0xb18] sm:$0xff]  ;;  %v12026_v45 = vld [vmem:[%s24017_s3 + $0xbe8] sm:$0xff] }
 0x439   :  { %13364 = vmatpush1.bf16.msra.mxu1 %v13363_v32  ;;  %13254 = vmatprep.subr.bf16.mxu0 %v13253_v0  ;;  %v11980_v32 = vld [vmem:[%s24017_s3 + $0xa78] sm:$0xff]  ;;  %v12006_v0 = vld [vmem:[%s24017_s3 + $0xb48] sm:$0xff] }
 0x43a   :  { %13366 = vmatprep.subr.bf16.mxu1 %v13365_v19  ;;  %13256 = vmatpush1.bf16.msra.mxu0 %v13255_v55  ;;  %v11993_v19 = vld [vmem:[%s24017_s3 + $0xae0] sm:$0xff]  ;;  %v13377_v40 = vpack.c.bf16 %v11980_v32, %v11976_v8  ;;  %v13265_v55 = vpack.c.bf16 %v12010_v47, %v12006_v0  ;;  %v11995_v8 = vld [vmem:[%s24017_s3 + $0xaf0] sm:$0xff]  ;;  %v12014_v32 = vld [vmem:[%s24017_s3 + $0xb88] sm:$0xff] }
 0x43b   :  { %11861 = vmatmul.mubr.msk.f32.gmra.mrb[80].mxu0 %vm44_vm0, %v18816_v27  ;;  %11879 = vmatmul.mubr.msk.f32.gmra.mrb[80].mxu1 %vm44_vm0, %v18658_v31  ;;  %v13371_v31 = vpack.c.bf16 %v11963_v50, %v11959_v22  ;;  %v13259_v5 = vpack.c.bf16 %v11993_v19, %v11989_v18  ;;  %v11997_v22 = vld [vmem:[%s24017_s3 + $0xb00] sm:$0xff]  ;;  %v12004_v18 = vld [vmem:[%s24017_s3 + $0xb38] sm:$0xff] }
 0x43c   :  { %5942 = vmatprep.mubr.f32.mxu0 %v24029_v3  ;;  %6103 = vmatprep.mubr.f32.mxu1 %v24029_v3  ;;  %v12001_v50 = vld [vmem:[%s24017_s3 + $0xb20] sm:$0xff]  ;;  %v13389_v63 = vpack.c.bf16 %v12004_v18, %v12000_v15  ;;  %v12016_v58 = vld [vmem:[%s24017_s3 + $0xb98] sm:$0xff]  ;;  %v12027_v15 = vld [vmem:[%s24017_s3 + $0xbf0] sm:$0xff] }
 0x43d   :  { %13368 = vmatpush1.bf16.msra.mxu1 %v13367_v23  ;;  %13258 = vmatprep.subr.bf16.mxu0 %v13257_v37  ;;  %v13261_v23 = vpack.c.bf16 %v12002_v57, %v11998_v10  ;;  %v12018_v37 = vld [vmem:[%s24017_s3 + $0xba8] sm:$0xff]  ;;  %v12008_v10 = vld [vmem:[%s24017_s3 + $0xb58] sm:$0xff] }
 0x43e   :  { %13370 = vmatprep.subr.bf16.mxu1 %v13369_v9  ;;  %13260 = vmatpush1.bf16.msra.mxu0 %v13259_v5  ;;  %v13263_v9 = vpack.c.bf16 %v12001_v50, %v11997_v22  ;;  %v13269_v19 = vpack.c.bf16 %v12018_v37, %v12014_v32  ;;  %v12013_v5 = vld [vmem:[%s24017_s3 + $0xb80] sm:$0xff]  ;;  %v12022_v57 = vld [vmem:[%s24017_s3 + $0xbc8] sm:$0xff]  ;;  %v12020_v0 = vld [vmem:[%s24017_s3 + $0xbb8] sm:$0xff] }
 0x43f   :  { %11862 = vmatmul.mubr.msk.f32.gmra.mrb[82].mxu0 %vm44_vm0, %v18825_v28  ;;  %11880 = vmatmul.mubr.msk.f32.gmra.mrb[82].mxu1 %vm44_vm0, %v18667_v13  ;;  %v13375_v13 = vpack.c.bf16 %v11971_v1, %v11967_v48  ;;  %v12009_v48 = vld [vmem:[%s24017_s3 + $0xb60] sm:$0xff]  ;;  %v13273_v22 = vpack.c.bf16 %v12026_v45, %v12022_v57  ;;  %v19443_v37 = vld [vmem:[#allocation2 + $0xf0] sm:$0xff]  ;;  %v12034_v45 = vld [vmem:[%s24017_s3 + $0xc28] sm:$0xff] }
 0x440   :  { %5948 = vmatprep.mubr.f32.mxu0 %v24029_v3  ;;  %6109 = vmatprep.mubr.f32.mxu1 %v24029_v3  ;;  %v12021_v50 = vld [vmem:[%s24017_s3 + $0xbc0] sm:$0xff] }
 0x441   :  { %13372 = vmatpush1.bf16.msra.mxu1 %v13371_v31  ;;  %13262 = vmatprep.subr.bf16.mxu0 %v13261_v23  ;;  %v12005_v31 = vld [vmem:[%s24017_s3 + $0xb40] sm:$0xff]  ;;  %v12012_v23 = vld [vmem:[%s24017_s3 + $0xb78] sm:$0xff] }
 0x442   :  { %13374 = vmatprep.subr.bf16.mxu1 %v13373_v14  ;;  %13264 = vmatpush1.bf16.msra.mxu0 %v13263_v9  ;;  %v13267_v1 = vpack.c.bf16 %v12009_v48, %v12005_v31  ;;  %v11991_v14 = vld [vmem:[%s24017_s3 + $0xad0] sm:$0xff]  ;;  %v12025_v9 = vld [vmem:[%s24017_s3 + $0xbe0] sm:$0xff] }
 0x443   :  { %11863 = vmatmul.mubr.msk.f32.gmra.mrb[84].mxu0 %vm44_vm0, %v18833_v29  ;;  %11881 = vmatmul.mubr.msk.f32.gmra.mrb[84].mxu1 %vm44_vm0, %v18675_v4  ;;  %v13379_v4 = vpack.c.bf16 %v11979_v17, %v11975_v46  ;;  %v11999_v17 = vld [vmem:[%s24017_s3 + $0xb10] sm:$0xff] }
 0x444   :  { %5954 = vmatprep.mubr.f32.mxu0 %v24029_v3  ;;  %6115 = vmatprep.mubr.f32.mxu1 %v24029_v3  ;;  %v12019_v31 = vld [vmem:[%s24017_s3 + $0xbb0] sm:$0xff] }
 0x445   :  { %13376 = vmatpush1.bf16.msra.mxu1 %v13375_v13  ;;  %13266 = vmatprep.subr.bf16.mxu0 %v13265_v55  ;;  %v12017_v13 = vld [vmem:[%s24017_s3 + $0xba0] sm:$0xff]  ;;  %v13397_v55 = vpack.c.bf16 %v12020_v0, %v12016_v58 }
 0x446   :  { %13378 = vmatprep.subr.bf16.mxu1 %v13377_v40  ;;  %13268 = vmatpush1.bf16.msra.mxu0 %v13267_v1  ;;  %v13271_v46 = vpack.c.bf16 %v12017_v13, %v12013_v5  ;;  %v12003_v40 = vld [vmem:[%s24017_s3 + $0xb30] sm:$0xff]  ;;  %v12024_v1 = vld [vmem:[%s24017_s3 + $0xbd8] sm:$0xff] }
 0x447   :  { %11864 = vmatmul.mubr.msk.f32.gmra.mrb[86].mxu0 %vm44_vm0, %v18841_v61  ;;  %11882 = vmatmul.mubr.msk.f32.gmra.mrb[86].mxu1 %vm44_vm0, %v18683_v11  ;;  %v13383_v11 = vpack.c.bf16 %v11987_v43, %v11983_v16  ;;  %v13393_v16 = vpack.c.bf16 %v12012_v23, %v12008_v10  ;;  %v12007_v43 = vld [vmem:[%s24017_s3 + $0xb50] sm:$0xff] }
 0x448   :  { %5960 = vmatprep.mubr.f32.mxu0 %v24029_v3  ;;  %6121 = vmatprep.mubr.f32.mxu1 %v24029_v3 }
 0x449   :  { %13380 = vmatpush1.bf16.msra.mxu1 %v13379_v4  ;;  %13270 = vmatprep.subr.bf16.mxu0 %v13269_v19  ;;  %v13275_v4 = vpack.c.bf16 %v12025_v9, %v12021_v50 }
 0x44a   :  { %13382 = vmatprep.subr.bf16.mxu1 %v13381_v21  ;;  %13272 = vmatpush1.bf16.msra.mxu0 %v13271_v46  ;;  %v12011_v21 = vld [vmem:[%s24017_s3 + $0xb70] sm:$0xff] }
 0x44b   :  { %11865 = vmatmul.mubr.msk.f32.gmra.mrb[88].mxu0 %vm44_vm0, %v18849_v34  ;;  %11883 = vmatmul.mubr.msk.f32.gmra.mrb[88].mxu1 %vm44_vm0, %v18691_v36  ;;  %v13387_v36 = vpack.c.bf16 %v11995_v8, %v11991_v14  ;;  %v13395_v47 = vpack.c.bf16 %v12011_v21, %v12007_v43 }
 0x44c   :  { %5966 = vmatprep.mubr.f32.mxu0 %v24029_v3  ;;  %6127 = vmatprep.mubr.f32.mxu1 %v24029_v3 }
 0x44d   :  { %13384 = vmatpush1.bf16.msra.mxu1 %v13383_v11  ;;  %13274 = vmatprep.subr.bf16.mxu0 %v13273_v22  ;;  %v12028_v11 = vld [vmem:[%s24017_s3 + $0xbf8] sm:$0xff] }
 0x44e   :  { %13386 = vmatprep.subr.bf16.mxu1 %v13385_v56  ;;  %13276 = vmatpush1.bf16.msra.mxu0 %v13275_v4  ;;  %v13401_v56 = vpack.c.bf16 %v12028_v11, %v12024_v1 }
 0x44f   :  { %11866 = vmatmul.mubr.msk.f32.gmra.mrb[90].mxu0 %vm44_vm0, %v18857_v12  ;;  %11884 = vmatmul.mubr.msk.f32.gmra.mrb[90].mxu1 %vm44_vm0, %v18699_v2  ;;  %v13391_v2 = vpack.c.bf16 %v12003_v40, %v11999_v17 }
 0x450   :  { %5972 = vmatprep.mubr.f32.mxu0 %v24029_v3  ;;  %6133 = vmatprep.mubr.f32.mxu1 %v24029_v3 }
 0x451   :  { %13388 = vmatpush1.bf16.msra.mxu1 %v13387_v36 }
 0x452   :  { %13390 = vmatprep.subr.bf16.mxu1 %v13389_v63 }
 0x453   :  { %11867 = vmatmul.mubr.msk.f32.gmra.mrb[92].mxu0 %vm44_vm0, %v18865_v20  ;;  %11885 = vmatmul.mubr.msk.f32.gmra.mrb[92].mxu1 %vm44_vm0, %v18719_v38  ;;  %v12015_v38 = vld [vmem:[%s24017_s3 + $0xb90] sm:$0xff] }
 0x454   :  { %5978 = vmatprep.mubr.f32.mxu0 %v24029_v3  ;;  %6139 = vmatprep.mubr.f32.mxu1 %v24029_v3  ;;  %v13399_v14 = vpack.c.bf16 %v12019_v31, %v12015_v38 }
 0x455   :  { %13392 = vmatpush1.bf16.msra.mxu1 %v13391_v2 }
 0x456   :  { %v19411_v54 = vpop.f32.mrb[0].mxu0  ;;  %13394 = vmatprep.subr.bf16.mxu1 %v13393_v16 }
 0x457   :  { %v19419_v48 = vpop.f32.mrb[1].mxu0  ;;  %11868 = vmatmul.mubr.msk.f32.gmra.mrb[94].mxu0 %vm44_vm0, %v18873_v30  ;;  %11886 = vmatmul.mubr.msk.f32.gmra.mrb[94].mxu1 %vm44_vm0, %v18739_v62  ;;  %v12023_v62 = vld [vmem:[%s24017_s3 + $0xbd0] sm:$0xff] }
 0x458   :  { %5984 = vmatprep.mubr.f32.mxu0 %v24029_v3  ;;  %6145 = vmatprep.mubr.f32.mxu1 %v24029_v3  ;;  %v13403_v18 = vpack.c.bf16 %v12027_v15, %v12023_v62 }
 0x459   :  { %13396 = vmatpush1.bf16.msra.mxu1 %v13395_v47 }
 0x45a   :  { %v19433_v8 = vpop.f32.mrb[2].mxu0  ;;  %13398 = vmatprep.subr.bf16.mxu1 %v13397_v55 }
 0x45b   :  { %v19441_v32 = vpop.f32.mrb[3].mxu0  ;;  %11869 = vmatmul.mubr.msk.f32.gmra.mrb[96].mxu0 %vm44_vm0, %v19443_v37  ;;  %11887 = vmatmul.mubr.msk.f32.gmra.mrb[96].mxu1 %vm44_vm0, %v18759_v49 }
 0x45c   :  { %5990 = vmatprep.mubr.f32.mxu0 %v24029_v3  ;;  %6151 = vmatprep.mubr.f32.mxu1 %v24029_v3 }
 0x45d   :  { %13400 = vmatpush1.bf16.msra.mxu1 %v13399_v14 }
 0x45e   :  { %v19451_v19 = vpop.f32.mrb[4].mxu0  ;;  %13402 = vmatprep.subr.bf16.mxu1 %v13401_v56 }
 0x45f   :  { %v19453_v5 = vpop.f32.mrb[5].mxu0  ;;  %11870 = vmatmul.mubr.msk.f32.gmra.mrb[98].mxu0 %vm44_vm0, %v18887_v24  ;;  %11888 = vmatmul.mubr.msk.f32.gmra.mrb[98].mxu1 %vm44_vm0, %v18779_v33 }
 0x460   :  { %6157 = vmatprep.mubr.f32.mxu1 %v24029_v3 }
 0x461   :  { %13404 = vmatpush1.bf16.msra.mxu1 %v13403_v18 }
 0x462   :  { %v19460_v49 = vpop.f32.mrb[6].mxu0 }
 0x463   :  { %v19462_v13 = vpop.f32.mrb[7].mxu0  ;;  %11889 = vmatmul.mubr.msk.f32.gmra.mrb[100].mxu1 %vm44_vm0, %v18793_v6 }
 0x464   :  { %6163 = vmatprep.mubr.f32.mxu1 %v24029_v3 }
 0x466   :  { %v19467_v46 = vpop.f32.mrb[8].mxu0 }
 0x467   :  { %v19469_v36 = vpop.f32.mrb[9].mxu0  ;;  %11890 = vmatmul.mubr.msk.f32.gmra.mrb[102].mxu1 %vm44_vm0, %v18804_v26 }
 0x468   :  { %6169 = vmatprep.mubr.f32.mxu1 %v24029_v3 }
 0x46a   :  { %v19474_v33 = vpop.f32.mrb[10].mxu0 }
 0x46b   :  { %v19476_v17 = vpop.f32.mrb[11].mxu0  ;;  %11891 = vmatmul.mubr.msk.f32.gmra.mrb[104].mxu1 %vm44_vm0, %v18816_v27 }
 0x46c   :  { %6175 = vmatprep.mubr.f32.mxu1 %v24029_v3 }
 0x46e   :  { %v19481_v6 = vpop.f32.mrb[12].mxu0 }
 0x46f   :  { %v19483_v40 = vpop.f32.mrb[13].mxu0  ;;  %11892 = vmatmul.mubr.msk.f32.gmra.mrb[106].mxu1 %vm44_vm0, %v18825_v28 }
 0x470   :  { %6181 = vmatprep.mubr.f32.mxu1 %v24029_v3 }
 0x472   :  { %v19488_v26 = vpop.f32.mrb[14].mxu0 }
 0x473   :  { %v19490_v63 = vpop.f32.mrb[15].mxu0  ;;  %11893 = vmatmul.mubr.msk.f32.gmra.mrb[108].mxu1 %vm44_vm0, %v18833_v29  ;;  %v12030_v29 = vld [vmem:[%s24017_s3 + $0xc08] sm:$0xff] }
 0x474   :  { %6187 = vmatprep.mubr.f32.mxu1 %v24029_v3  ;;  %v13277_v22 = vpack.c.bf16 %v12034_v45, %v12030_v29 }
 0x476   :  { %v19495_v27 = vpop.f32.mrb[16].mxu0  ;;  %13278 = vmatprep.subr.bf16.mxu0 %v13277_v22 }
 0x477   :  { %v19497_v10 = vpop.f32.mrb[17].mxu0  ;;  %11894 = vmatmul.mubr.msk.f32.gmra.mrb[110].mxu1 %vm44_vm0, %v18841_v61  ;;  %v12032_v61 = vld [vmem:[%s24017_s3 + $0xc18] sm:$0xff] }
 0x478   :  { %6193 = vmatprep.mubr.f32.mxu1 %v24029_v3 }
 0x47a   :  { %v19502_v28 = vpop.f32.mrb[18].mxu0 }
 0x47b   :  { %v19504_v57 = vpop.f32.mrb[19].mxu0  ;;  %11895 = vmatmul.mubr.msk.f32.gmra.mrb[112].mxu1 %vm44_vm0, %v18849_v34  ;;  %v12036_v34 = vld [vmem:[%s24017_s3 + $0xc38] sm:$0xff] }
 0x47c   :  { %6199 = vmatprep.mubr.f32.mxu1 %v24029_v3  ;;  %v13405_v9 = vpack.c.bf16 %v12036_v34, %v12032_v61 }
 0x47e   :  { %v19518_v23 = vpop.f32.mrb[20].mxu0  ;;  %13406 = vmatprep.subr.bf16.mxu1 %v13405_v9 }
 0x47f   :  { %v19523_v50 = vpop.f32.mrb[21].mxu0  ;;  %11896 = vmatmul.mubr.msk.f32.gmra.mrb[114].mxu1 %vm44_vm0, %v18857_v12 }
 0x480   :  { %6205 = vmatprep.mubr.f32.mxu1 %v24029_v3 }
 0x482   :  { %v19528_v4 = vpop.f32.mrb[22].mxu0 }
 0x483   :  { %v19530_v2 = vpop.f32.mrb[23].mxu0  ;;  %11897 = vmatmul.mubr.msk.f32.gmra.mrb[116].mxu1 %vm44_vm0, %v18865_v20 }
 0x484   :  { %6211 = vmatprep.mubr.f32.mxu1 %v24029_v3 }
 0x486   :  { %v19535_v16 = vpop.f32.mrb[24].mxu0  ;;  %v19537_v43 = vpop.f32.mrb[12].mxu1 }
 0x487   :  { %v19539_v21 = vpop.f32.mrb[25].mxu0  ;;  %v19541_v12 = vpop.f32.mrb[13].mxu1  ;;  %11898 = vmatmul.mubr.msk.f32.gmra.mrb[118].mxu1 %vm44_vm0, %v18873_v30 }
 0x488   :  { %6217 = vmatprep.mubr.f32.mxu1 %v24029_v3 }
 0x48a   :  { %v19546_v58 = vpop.f32.mrb[26].mxu0  ;;  %v19548_v0 = vpop.f32.mrb[14].mxu1 }
 0x48b   :  { %v19550_v20 = vpop.f32.mrb[27].mxu0  ;;  %v19552_v47 = vpop.f32.mrb[15].mxu1  ;;  %11899 = vmatmul.mubr.msk.f32.gmra.mrb[120].mxu1 %vm44_vm0, %v19443_v37 }
 0x48c   :  { %6223 = vmatprep.mubr.f32.mxu1 %v24029_v3 }
 0x48e   :  { %v19557_v55 = vpop.f32.mrb[28].mxu0  ;;  %v19559_v38 = vpop.f32.mrb[16].mxu1 }
 0x48f   :  { %v19561_v30 = vpop.f32.mrb[29].mxu0  ;;  %v19563_v31 = vpop.f32.mrb[17].mxu1  ;;  %11900 = vmatmul.mubr.msk.f32.gmra.mrb[122].mxu1 %vm44_vm0, %v18887_v24 }
 0x492   :  { %v19567_v1 = vpop.f32.mrb[30].mxu0  ;;  %v19569_v11 = vpop.f32.mrb[18].mxu1 }
 0x493   :  { %v19571_v14 = vpop.f32.mrb[31].mxu0  ;;  %v19573_v56 = vpop.f32.mrb[19].mxu1 }
 0x496   :  { %v19575_v62 = vpop.f32.mrb[32].mxu0  ;;  %v19577_v15 = vpop.f32.mrb[20].mxu1 }
 0x497   :  { %24094 = vst [vmem:[#allocation5_spill] sm:$0xff] %v19577_v15  ;;  %v19579_v37 = vpop.f32.mrb[33].mxu0  ;;  %v19581_v18 = vpop.f32.mrb[21].mxu1 }
 0x498   :  { %24095 = vst [vmem:[#allocation6_spill] sm:$0xff] %v19579_v37  ;;  %24096 = vst [vmem:[#allocation7_spill] sm:$0xff] %v19581_v18 }
 0x49a   :  { %v19583_v29 = vpop.f32.mrb[34].mxu0  ;;  %v19585_v45 = vpop.f32.mrb[22].mxu1 }
 0x49b   :  { %24097 = vst [vmem:[#allocation8_spill] sm:$0xff] %v19583_v29  ;;  %24098 = vst [vmem:[#allocation9_spill] sm:$0xff] %v19585_v45  ;;  %v19587_v24 = vpop.f32.mrb[35].mxu0  ;;  %v19589_v61 = vpop.f32.mrb[23].mxu1 }
 0x49c   :  { %24099 = vst [vmem:[#allocation10_spill] sm:$0xff] %v19587_v24  ;;  %24100 = vst [vmem:[#allocation11_spill] sm:$0xff] %v19589_v61 }
 0x49e   :  { %v19591_v22 = vpop.f32.mrb[36].mxu0  ;;  %v19593_v34 = vpop.f32.mrb[24].mxu1 }
 0x49f   :  { %24101 = vst [vmem:[#allocation12_spill] sm:$0xff] %v19591_v22  ;;  %24102 = vst [vmem:[#allocation13_spill] sm:$0xff] %v19593_v34  ;;  %v19595_v9 = vpop.f32.mrb[37].mxu0  ;;  %v19597_v3 = vpop.f32.mrb[25].mxu1 }
 0x4a0   :  { %24103 = vst [vmem:[#allocation14_spill] sm:$0xff] %v19595_v9  ;;  %24104 = vst [vmem:[#allocation15_spill] sm:$0xff] %v19597_v3 }
 0x4a2   :  { %v19599_v15 = vpop.f32.mrb[38].mxu0  ;;  %v19601_v37 = vpop.f32.mrb[26].mxu1 }
 0x4a3   :  { %24105 = vst [vmem:[#allocation16_spill] sm:$0xff] %v19599_v15  ;;  %24106 = vst [vmem:[#allocation17_spill] sm:$0xff] %v19601_v37  ;;  %v19603_v18 = vpop.f32.mrb[39].mxu0  ;;  %v19605_v29 = vpop.f32.mrb[27].mxu1 }
 0x4a4   :  { %24107 = vst [vmem:[#allocation18_spill] sm:$0xff] %v19603_v18  ;;  %24108 = vst [vmem:[#allocation19_spill] sm:$0xff] %v19605_v29 }
 0x4a6   :  { %v19607_v45 = vpop.f32.mrb[40].mxu0  ;;  %v19609_v24 = vpop.f32.mrb[28].mxu1 }
 0x4a7   :  { %24109 = vst [vmem:[#allocation20_spill] sm:$0xff] %v19607_v45  ;;  %24110 = vst [vmem:[#allocation21_spill] sm:$0xff] %v19609_v24  ;;  %v19611_v61 = vpop.f32.mrb[41].mxu0  ;;  %v19613_v22 = vpop.f32.mrb[29].mxu1 }
 0x4a8   :  { %24111 = vst [vmem:[#allocation22_spill] sm:$0xff] %v19611_v61  ;;  %24112 = vst [vmem:[#allocation23_spill] sm:$0xff] %v19613_v22 }
 0x4aa   :  { %v19615_v34 = vpop.f32.mrb[42].mxu0  ;;  %v19617_v9 = vpop.f32.mrb[30].mxu1 }
 0x4ab   :  { %24113 = vst [vmem:[#allocation24_spill] sm:$0xff] %v19615_v34  ;;  %24114 = vst [vmem:[#allocation25_spill] sm:$0xff] %v19617_v9  ;;  %v19619_v3 = vpop.f32.mrb[43].mxu0  ;;  %v19621_v15 = vpop.f32.mrb[31].mxu1 }
 0x4ac   :  { %24115 = vst [vmem:[#allocation26_spill] sm:$0xff] %v19619_v3  ;;  %24116 = vst [vmem:[#allocation27_spill] sm:$0xff] %v19621_v15 }
 0x4ae   :  { %v5496_v37 = vpop.f32.mrb[100].mxu0  ;;  %v19623_v18 = vpop.f32.mrb[32].mxu1 }
 0x4af   :  { %24117 = vst [vmem:[#allocation28_spill] sm:$0xff] %v19623_v18  ;;  %v19626_v29 = vadd.f32 %v5496_v37, %v16599_v35  ;;  %v5498_v45 = vpop.f32.mrb[101].mxu0  ;;  %v19628_v24 = vpop.f32.mrb[33].mxu1 }
 0x4b0   :  { %24119 = vst [vmem:[#allocation30_spill] sm:$0xff] %v19628_v24  ;;  %v19631_v61 = vadd.f32 %v5498_v45, %v16611_v39 }
 0x4b1   :  { %24118 = vst [vmem:[#allocation29_spill] sm:$0xff] %v19626_v29  ;;  %v24031_v29 = vlaneseq }
 0x4b2   :  { %24120 = vst [vmem:[#allocation31_spill] sm:$0xff] %v19631_v61  ;;  %v5502_v22 = vpop.f32.mrb[102].mxu0  ;;  %v19633_v34 = vpop.f32.mrb[34].mxu1 }
 0x4b3   :  { %24121 = vst [vmem:[#allocation32_spill] sm:$0xff] %v19633_v34  ;;  %v19636_v9 = vadd.f32 %v5502_v22, %v16615_v41  ;;  %v5504_v3 = vpop.f32.mrb[103].mxu0  ;;  %v19638_v15 = vpop.f32.mrb[35].mxu1 }
 0x4b4   :  { %24123 = vst [vmem:[#allocation34_spill] sm:$0xff] %v19638_v15  ;;  %v19641_v18 = vadd.f32 %v5504_v3, %v16621_v44  ;;  %v12044_v15 = vld [vmem:[%s24017_s3 + $0xc78] sm:$0xff] }
 0x4b5   :  { %24122 = vst [vmem:[#allocation33_spill] sm:$0xff] %v19636_v9  ;;  %v19656_v9 = vshrl.u32 %v24031_v29, 7 }
 0x4b6   :  { %24124 = vst [vmem:[#allocation35_spill] sm:$0xff] %v19641_v18  ;;  %v5508_v35 = vpop.f32.mrb[104].mxu0  ;;  %v19643_v37 = vpop.f32.mrb[36].mxu1  ;;  %v12040_v18 = vld [vmem:[%s24017_s3 + $0xc58] sm:$0xff] }
 0x4b7   :  { %24125 = vst [vmem:[#allocation36_spill] sm:$0xff] %v19643_v37  ;;  %v19646_v24 = vadd.f32 %v5508_v35, %v16634_v42  ;;  %v5510_v39 = vpop.f32.mrb[105].mxu0  ;;  %v19648_v45 = vpop.f32.mrb[37].mxu1  ;;  %24130 = vst [vmem:[#allocation41_spill] sm:$0xff] %v19656_v9 }
 0x4b8   :  { %24127 = vst [vmem:[#allocation38_spill] sm:$0xff] %v19648_v45  ;;  %v19651_v34 = vadd.f32 %v5510_v39, %v16644_v51  ;;  %v19669_v51 = vsub.s32 0, %v19656_v9  ;;  %v12035_v45 = vld [vmem:[%s24017_s3 + $0xc30] sm:$0xff] }
 0x4b9   :  { %24126 = vst [vmem:[#allocation37_spill] sm:$0xff] %v19646_v24 }
 0x4ba   :  { %24128 = vst [vmem:[#allocation39_spill] sm:$0xff] %v19651_v34  ;;  %v5514_v41 = vpop.f32.mrb[106].mxu0  ;;  %v19653_v22 = vpop.f32.mrb[38].mxu1  ;;  %24135 = vst [vmem:[#allocation46_spill] sm:$0xff] %v19669_v51 }
 0x4bb   :  { %24129 = vst [vmem:[#allocation40_spill] sm:$0xff] %v19653_v22  ;;  %v19659_v3 = vadd.f32 %v5514_v41, %v16649_v52  ;;  %v5516_v44 = vpop.f32.mrb[107].mxu0  ;;  %v19661_v37 = vpop.f32.mrb[39].mxu1  ;;  %v6474_v52 = vsub.s32 4, %v19656_v9  ;;  %v19680_v41 = vld [vmem:[%s24018_s2] sm:$0xff] }
 0x4bc   :  { %24132 = vst [vmem:[#allocation43_spill] sm:$0xff] %v19661_v37  ;;  %v19664_v42 = vadd.f32 %v5516_v44, %v16657_v60  ;;  %v19683_v60 = vsub.s32 1, %v19656_v9 }
 0x4bd   :  { %24131 = vst [vmem:[#allocation42_spill] sm:$0xff] %v19659_v3  ;;  %v19701_v37 = vrot.slane %v19680_v41, %v6474_v52 }
 0x4be   :  { %24133 = vst [vmem:[#allocation44_spill] sm:$0xff] %v19664_v42  ;;  %v5520_v35 = vpop.f32.mrb[108].mxu0  ;;  %v19666_v24 = vpop.f32.mrb[40].mxu1  ;;  %24138 = vst [vmem:[#allocation49_spill] sm:$0xff] %v19683_v60 }
 0x4bf   :  { %24134 = vst [vmem:[#allocation45_spill] sm:$0xff] %v19666_v24  ;;  %v19672_v39 = vadd.f32 %v5520_v35, %v16661_v53  ;;  %v5522_v29 = vpop.f32.mrb[109].mxu0  ;;  %v19674_v22 = vpop.f32.mrb[41].mxu1  ;;  %v6478_v24 = vsub.s32 5, %v19656_v9 }
 0x4c0   :  { %24137 = vst [vmem:[#allocation48_spill] sm:$0xff] %v19674_v22  ;;  %v19686_v44 = vadd.f32 %v5522_v29, %v16669_v25  ;;  %v19705_v25 = vrot.slane %v19680_v41, %v19683_v60 }
 0x4c1   :  { %24136 = vst [vmem:[#allocation47_spill] sm:$0xff] %v19672_v39  ;;  %v19693_v39 = vrot.slane %v19680_v41, %v19669_v51  ;;  %v24036_v51 = vsub.s32 2, %v19656_v9 }
 0x4c2   :  { %24139 = vst [vmem:[#allocation50_spill] sm:$0xff] %v19686_v44  ;;  %v5526_v53 = vpop.f32.mrb[110].mxu0  ;;  %v19689_v35 = vpop.f32.mrb[42].mxu1  ;;  %v19747_v34 = vadd.f32 %v19705_v25, %v19453_v5 }
 0x4c3   :  { %24140 = vst [vmem:[#allocation51_spill] sm:$0xff] %v19689_v35  ;;  %v19696_v22 = vadd.f32 %v5526_v53, %v16673_v7  ;;  %v5528_v42 = vpop.f32.mrb[111].mxu0  ;;  %v19698_v3 = vpop.f32.mrb[43].mxu1  ;;  %v19711_v35 = vrot.slane %v19680_v41, %v6478_v24  ;;  %v24037_v7 = vsub.s32 3, %v19656_v9  ;;  %v6496_v52 = vadd.f32 %v19693_v39, %v19411_v54 }
 0x4c4   :  { %24142 = vst [vmem:[#allocation53_spill] sm:$0xff] %v19698_v3  ;;  %v19708_v29 = vadd.f32 %v5528_v42, %v16681_v59  ;;  %v6497_v59 = vadd.f32 %v19705_v25, %v19419_v48  ;;  %v19728_v42 = vrot.slane %v19680_v41, %v24036_v51  ;;  %v19741_v48 = vadd.f32 %v19693_v39, %v19451_v19 }
 0x4c5   :  { %24141 = vst [vmem:[#allocation52_spill] sm:$0xff] %v19696_v22  ;;  %v6482_v19 = vsub.s32 6, %v19656_v9 }
 0x4c6   :  { %24143 = vst [vmem:[#allocation54_spill] sm:$0xff] %v19708_v29  ;;  %v19715_v53 = vpop.f32.mrb[44].mxu1  ;;  %v5830_v22 = vpop.f32.mrb[44].mxu0 }
 0x4c7   :  { %24144 = vst [vmem:[#allocation55_spill] sm:$0xff] %v19715_v53  ;;  %v6500_v3 = vadd.f32 %v19701_v37, %v5830_v22  ;;  %v19720_v60 = vpop.f32.mrb[45].mxu1  ;;  %v5832_v44 = vpop.f32.mrb[45].mxu0  ;;  %v19733_v53 = vrot.slane %v19680_v41, %v24037_v7  ;;  %v6504_v22 = vadd.f32 %v19693_v39, %v19433_v8  ;;  %v19773_v7 = vadd.f32 %v19693_v39, %v19474_v33 }
 0x4c8   :  { %24145 = vst [vmem:[#allocation56_spill] sm:$0xff] %v19720_v60  ;;  %v6501_v24 = vadd.f32 %v19711_v35, %v5832_v44  ;;  %v6505_v60 = vadd.f32 %v19705_v25, %v19441_v32 }
 0x4c9   :  { %v6720_v54 = vmax.f32 %v6496_v52, %v6500_v3  ;;  %v19751_v3 = vadd.f32 %v19693_v39, %v19460_v49  ;;  %v6486_v49 = vsub.s32 7, %v19656_v9 }
 0x4ca   :  { %v6721_v44 = vmax.f32 %v6497_v59, %v6501_v24  ;;  %v19743_v29 = vpop.f32.mrb[46].mxu1  ;;  %v5836_v51 = vpop.f32.mrb[46].mxu0  ;;  %v19759_v59 = vadd.f32 %v19705_v25, %v19462_v13  ;;  %v19763_v24 = vadd.f32 %v19693_v39, %v19467_v46  ;;  %v19777_v13 = vadd.f32 %v19705_v25, %v19476_v17  ;;  %v12029_v17 = vld [vmem:[%s24017_s3 + $0xc00] sm:$0xff] }
 0x4cb   :  { %24146 = vst [vmem:[#allocation57_spill] sm:$0xff] %v19743_v29  ;;  %v6508_v8 = vadd.f32 %v19701_v37, %v5836_v51  ;;  %v19754_v52 = vpop.f32.mrb[47].mxu1  ;;  %v5838_v32 = vpop.f32.mrb[47].mxu0  ;;  %v19769_v51 = vadd.f32 %v19705_v25, %v19469_v36  ;;  %v19781_v46 = vadd.f32 %v19693_v39, %v19481_v6  ;;  %v19789_v36 = vadd.f32 %v19693_v39, %v19488_v26  ;;  %v12033_v6 = vld [vmem:[%s24017_s3 + $0xc20] sm:$0xff] }
 0x4cc   :  { %24147 = vst [vmem:[#allocation58_spill] sm:$0xff] %v19754_v52  ;;  %v6509_v5 = vadd.f32 %v19711_v35, %v5838_v32  ;;  %v19785_v32 = vadd.f32 %v19705_v25, %v19483_v40  ;;  %v19801_v40 = vadd.f32 %v19705_v25, %v19490_v63  ;;  %v12038_v63 = vld [vmem:[%s24017_s3 + $0xc48] sm:$0xff] }
 0x4cd   :  { %v6724_v52 = vmax.f32 %v6504_v22, %v6508_v8 }
 0x4ce   :  { %v6725_v9 = vmax.f32 %v6505_v60, %v6509_v5  ;;  %v19791_v33 = vpop.f32.mrb[48].mxu1  ;;  %v5842_v29 = vpop.f32.mrb[48].mxu0  ;;  %v19807_v5 = vrot.slane %v19680_v41, %v6482_v19  ;;  %v19824_v19 = vrot.slane %v19680_v41, %v6486_v49  ;;  %v19845_v41 = vadd.f32 %v19705_v25, %v19504_v57  ;;  %v12041_v57 = vld [vmem:[%s24017_s3 + $0xc60] sm:$0xff] }
 0x4cf   :  { %24148 = vst [vmem:[#allocation59_spill] sm:$0xff] %v19791_v33  ;;  %v6840_v22 = vmax.f32 %v6720_v54, %v6724_v52  ;;  %v6516_v26 = vadd.f32 %v19701_v37, %v5842_v29  ;;  %v19804_v8 = vpop.f32.mrb[49].mxu1  ;;  %v5844_v60 = vpop.f32.mrb[49].mxu0  ;;  %v12031_v33 = vld [vmem:[%s24017_s3 + $0xc10] sm:$0xff]  ;;  %v19820_v29 = vadd.f32 %v19693_v39, %v19495_v27  ;;  %v19837_v27 = vadd.f32 %v19705_v25, %v19497_v10 }
 0x4d0   :  { %24149 = vst [vmem:[#allocation60_spill] sm:$0xff] %v19804_v8  ;;  %24150 = vst [vmem:[#allocation61_spill] sm:$0xff] %v19807_v5  ;;  %v6841_v54 = vmax.f32 %v6721_v44, %v6725_v9  ;;  %v6517_v52 = vadd.f32 %v19711_v35, %v5844_v60  ;;  %v12042_v8 = vld [vmem:[%s24017_s3 + $0xc68] sm:$0xff]  ;;  %v19841_v9 = vadd.f32 %v19693_v39, %v19502_v28  ;;  %v12037_v28 = vld [vmem:[%s24017_s3 + $0xc40] sm:$0xff] }
 0x4d1   :  { %24151 = vst [vmem:[#allocation62_spill] sm:$0xff] %v19824_v19  ;;  %v6728_v44 = vmax.f32 %v19741_v48, %v6516_v26  ;;  %v13279_v5 = vpack.c.bf16 %v12033_v6, %v12029_v17  ;;  %v13407_v10 = vpack.c.bf16 %v12035_v45, %v12031_v33  ;;  %v12039_v48 = vld [vmem:[%s24017_s3 + $0xc50] sm:$0xff]  ;;  %v19862_v26 = vmax.f32 %v6840_v22, 0.0  ;;  %v12050_v22 = vld [vmem:[%s24017_s3 + $0xca8] sm:$0xff] }
 0x4d2   :  { %v19848_v49 = vmax.f32 %v6841_v54, 0.0  ;;  %v6729_v60 = vmax.f32 %v19747_v34, %v6517_v52  ;;  %v19851_v61 = vpop.f32.mrb[50].mxu1  ;;  %v5848_v19 = vpop.f32.mrb[50].mxu0  ;;  %v13281_v45 = vpack.c.bf16 %v12042_v8, %v12038_v63  ;;  %v13409_v33 = vpack.c.bf16 %v12044_v15, %v12040_v18  ;;  %v12043_v6 = vld [vmem:[%s24017_s3 + $0xc70] sm:$0xff]  ;;  %v12046_v52 = vld [vmem:[%s24017_s3 + $0xc88] sm:$0xff]  ;;  %v12048_v18 = vld [vmem:[%s24017_s3 + $0xc98] sm:$0xff] }
 0x4d3   :  { %24153 = vst [vmem:[#allocation64_spill] sm:$0xff] %v19851_v61  ;;  %24154 = vst [vmem:[#allocation65_spill] sm:$0xff] %v19862_v26  ;;  %v6524_v34 = vadd.f32 %v19701_v37, %v5848_v19  ;;  %v19865_v54 = vpop.f32.mrb[51].mxu1  ;;  %v5850_v17 = vpop.f32.mrb[51].mxu0  ;;  %v19878_v19 = vadd.f32 %v19693_v39, %v19518_v23  ;;  %v19882_v8 = vadd.f32 %v19705_v25, %v19523_v50  ;;  %v12052_v63 = vld [vmem:[%s24017_s3 + $0xcb8] sm:$0xff] }
 0x4d4   :  { %24152 = vst [vmem:[#allocation63_spill] sm:$0xff] %v19848_v49  ;;  %24155 = vst [vmem:[#allocation66_spill] sm:$0xff] %v19865_v54  ;;  %v6525_v15 = vadd.f32 %v19711_v35, %v5850_v17  ;;  %7645 = vmatprep.mubr.f32.mxu0 %v19848_v49  ;;  %7943 = vmatprep.mubr.f32.mxu1 %v19848_v49  ;;  %v19895_v23 = vadd.f32 %v19693_v39, %v19528_v4  ;;  %v12045_v4 = vld [vmem:[%s24017_s3 + $0xc80] sm:$0xff] }
 0x4d5   :  { %24156 = vst [vmem:[#allocation67_spill] sm:$0xff] %v19878_v19  ;;  %24157 = vst [vmem:[#allocation68_spill] sm:$0xff] %v19882_v8  ;;  %v6732_v50 = vmax.f32 %v19751_v3, %v6524_v34  ;;  %7646 = vmatmul.mubr.f32.vlgmr.msra.gmra.mrb[112].mxu0 %v19862_v26  ;;  %7944 = vmatmul.mubr.f32.vlgmr.msra.gmra.mrb[124].mxu1 %v19862_v26  ;;  %v13283_v17 = vpack.c.bf16 %v12041_v57, %v12037_v28  ;;  %v12049_v3 = vld [vmem:[%s24017_s3 + $0xca0] sm:$0xff] }
 0x4d6   :  { %v6733_v49 = vmax.f32 %v19759_v59, %v6525_v15  ;;  %v19901_v54 = vpop.f32.mrb[52].mxu1  ;;  %v5854_v61 = vpop.f32.mrb[52].mxu0  ;;  %13280 = vmatpush1.bf16.msra.mxu0 %v13279_v5  ;;  %13408 = vmatpush1.bf16.msra.mxu1 %v13407_v10  ;;  %v13411_v8 = vpack.c.bf16 %v12043_v6, %v12039_v48  ;;  %v13285_v19 = vpack.c.bf16 %v12050_v22, %v12046_v52  ;;  %v12047_v10 = vld [vmem:[%s24017_s3 + $0xc90] sm:$0xff]  ;;  %v12058_v52 = vld [vmem:[%s24017_s3 + $0xce8] sm:$0xff]  ;;  %v12056_v22 = vld [vmem:[%s24017_s3 + $0xcd8] sm:$0xff] }
 0x4d7   :  { %24158 = vst [vmem:[#allocation69_spill] sm:$0xff] %v19901_v54  ;;  %v6852_v34 = vmax.f32 %v6728_v44, %v6732_v50  ;;  %v19910_v28 = vadd.f32 %v19701_v37, %v5854_v61  ;;  %v19912_v59 = vpop.f32.mrb[53].mxu1  ;;  %v5856_v57 = vpop.f32.mrb[53].mxu0  ;;  %13282 = vmatprep.subr.bf16.mxu0 %v13281_v45  ;;  %13410 = vmatprep.subr.bf16.mxu1 %v13409_v33  ;;  %v12051_v48 = vld [vmem:[%s24017_s3 + $0xcb0] sm:$0xff]  ;;  %v12054_v44 = vld [vmem:[%s24017_s3 + $0xcc8] sm:$0xff] }
 0x4d8   :  { %24159 = vst [vmem:[#allocation70_spill] sm:$0xff] %v19912_v59  ;;  %v13413_v5 = vpack.c.bf16 %v12052_v63, %v12048_v18  ;;  %v19925_v61 = vadd.f32 %v19705_v25, %v19530_v2  ;;  %v19929_v45 = vadd.f32 %v19693_v39, %v19535_v16  ;;  %v6853_v33 = vmax.f32 %v6729_v60, %v6733_v49  ;;  %v12060_v2 = vld [vmem:[%s24017_s3 + $0xcf8] sm:$0xff] }
 0x4d9   :  { %v19932_v6 = vadd.f32 %v19711_v35, %v5856_v57  ;;  %v19945_v16 = vadd.f32 %v19728_v42, %v19537_v43  ;;  %v19949_v49 = vadd.f32 %v19705_v25, %v19539_v21  ;;  %v6736_v60 = vmax.f32 %v19763_v24, %v19910_v28  ;;  %v12053_v24 = vld [vmem:[%s24017_s3 + $0xcc0] sm:$0xff] }
 0x4da   :  { %v13287_v15 = vpack.c.bf16 %v12049_v3, %v12045_v4  ;;  %v19955_v18 = vadd.f32 %v19733_v53, %v19541_v12  ;;  %v19957_v63 = vmax.f32 %v6853_v33, 0.0  ;;  %v19961_v57 = vpop.f32.mrb[54].mxu1  ;;  %v5860_v43 = vpop.f32.mrb[54].mxu0  ;;  %13284 = vmatpush1.bf16.msra.mxu0 %v13283_v17  ;;  %13412 = vmatpush1.bf16.msra.mxu1 %v13411_v8  ;;  %v13415_v21 = vpack.c.bf16 %v12051_v48, %v12047_v10  ;;  %v12057_v12 = vld [vmem:[%s24017_s3 + $0xce0] sm:$0xff]  ;;  %v12055_v4 = vld [vmem:[%s24017_s3 + $0xcd0] sm:$0xff]  ;;  %v12062_v33 = vld [vmem:[%s24017_s3 + $0xd08] sm:$0xff] }
 0x4db   :  { %v6737_v50 = vmax.f32 %v19769_v51, %v19932_v6  ;;  %24161 = vst [vmem:[#allocation72_spill] sm:$0xff] %v19961_v57  ;;  %v19972_v3 = vmax.f32 %v6852_v34, 0.0  ;;  %v6540_v51 = vadd.f32 %v19701_v37, %v5860_v43  ;;  %v19975_v28 = vpop.f32.mrb[55].mxu1  ;;  %v5862_v8 = vpop.f32.mrb[55].mxu0  ;;  %13286 = vmatprep.subr.bf16.mxu0 %v13285_v19  ;;  %13414 = vmatprep.subr.bf16.mxu1 %v13413_v5  ;;  %v12059_v48 = vld [vmem:[%s24017_s3 + $0xcf0] sm:$0xff]  ;;  %v12066_v34 = vld [vmem:[%s24017_s3 + $0xd28] sm:$0xff] }
 0x4dc   :  { %24160 = vst [vmem:[#allocation71_spill] sm:$0xff] %v19957_v63  ;;  %24163 = vst [vmem:[#allocation74_spill] sm:$0xff] %v19975_v28  ;;  %v13289_v17 = vpack.c.bf16 %v12058_v52, %v12054_v44  ;;  %v13417_v10 = vpack.c.bf16 %v12060_v2, %v12056_v22  ;;  %v19988_v6 = vadd.f32 %v19693_v39, %v19546_v58  ;;  %7651 = vmatprep.mubr.f32.mxu0 %v19957_v63  ;;  %v12064_v44 = vld [vmem:[%s24017_s3 + $0xd18] sm:$0xff]  ;;  %v24190_v28 = vld [vmem:[#allocation15_spill] sm:$0xff] }
 0x4dd   :  { %24162 = vst [vmem:[#allocation73_spill] sm:$0xff] %v19972_v3  ;;  %v19992_v19 = vadd.f32 %v19728_v42, %v19548_v0  ;;  %v6541_v5 = vadd.f32 %v19711_v35, %v5862_v8  ;;  %7949 = vmatprep.mubr.f32.mxu1 %v19957_v63  ;;  %v12068_v52 = vld [vmem:[%s24017_s3 + $0xd38] sm:$0xff]  ;;  %v20005_v58 = vadd.f32 %v19705_v25, %v19550_v20  ;;  %v12061_v20 = vld [vmem:[%s24017_s3 + $0xd00] sm:$0xff] }
 0x4de   :  { %v6740_v0 = vmax.f32 %v19773_v7, %v6540_v51  ;;  %7652 = vmatmul.mubr.f32.gmra.mrb[114].mxu0 %v19972_v3  ;;  %7950 = vmatmul.mubr.f32.gmra.mrb[126].mxu1 %v19972_v3  ;;  %v13291_v22 = vpack.c.bf16 %v12057_v12, %v12053_v24  ;;  %v20011_v43 = vpop.f32.mrb[56].mxu1  ;;  %v5866_v8 = vpop.f32.mrb[56].mxu0  ;;  %v13419_v63 = vpack.c.bf16 %v12059_v48, %v12055_v4  ;;  %v12065_v7 = vld [vmem:[%s24017_s3 + $0xd20] sm:$0xff]  ;;  %v12067_v4 = vld [vmem:[%s24017_s3 + $0xd30] sm:$0xff] }
 0x4df   :  { %v6741_v2 = vmax.f32 %v19777_v13, %v6541_v5  ;;  %24164 = vst [vmem:[#allocation75_spill] sm:$0xff] %v20011_v43  ;;  %13288 = vmatpush1.bf16.msra.mxu0 %v13287_v15  ;;  %13416 = vmatpush1.bf16.msra.mxu1 %v13415_v21  ;;  %v13293_v26 = vpack.c.bf16 %v12066_v34, %v12062_v33  ;;  %v20022_v13 = vpop.f32.mrb[57].mxu1  ;;  %v5868_v12 = vpop.f32.mrb[57].mxu0  ;;  %v12063_v21 = vld [vmem:[%s24017_s3 + $0xd10] sm:$0xff]  ;;  %v12074_v34 = vld [vmem:[%s24017_s3 + $0xd68] sm:$0xff]  ;;  %v12072_v5 = vld [vmem:[%s24017_s3 + $0xd58] sm:$0xff] }
 0x4e0   :  { %v6864_v51 = vmax.f32 %v6736_v60, %v6740_v0  ;;  %v20020_v24 = vadd.f32 %v19701_v37, %v5866_v8  ;;  %24165 = vst [vmem:[#allocation76_spill] sm:$0xff] %v20022_v13  ;;  %13290 = vmatprep.subr.bf16.mxu0 %v13289_v17  ;;  %13418 = vmatprep.subr.bf16.mxu1 %v13417_v10  ;;  %v12070_v60 = vld [vmem:[%s24017_s3 + $0xd48] sm:$0xff]  ;;  %v20334_v43 = vld [vmem:[%s24017_s3 + $0xe70] sm:$0xff] }
 0x4e1   :  { %v13421_v15 = vpack.c.bf16 %v12068_v52, %v12064_v44  ;;  %v20035_v48 = vadd.f32 %v19733_v53, %v19552_v47  ;;  %v20039_v17 = vadd.f32 %v19693_v39, %v19557_v55  ;;  %v6865_v10 = vmax.f32 %v6737_v50, %v6741_v2  ;;  %v12076_v47 = vld [vmem:[%s24017_s3 + $0xd78] sm:$0xff] }
 0x4e2   :  { %v20042_v33 = vadd.f32 %v19711_v35, %v5868_v12  ;;  %v20055_v55 = vadd.f32 %v19728_v42, %v19559_v38  ;;  %v20059_v50 = vadd.f32 %v19705_v25, %v19561_v30  ;;  %v6744_v44 = vmax.f32 %v19781_v46, %v20020_v24  ;;  %v20071_v12 = vpop.f32.mrb[58].mxu1  ;;  %v5872_v38 = vpop.f32.mrb[58].mxu0  ;;  %v12069_v46 = vld [vmem:[%s24017_s3 + $0xd40] sm:$0xff] }
 0x4e3   :  { %v13295_v52 = vpack.c.bf16 %v12065_v7, %v12061_v20  ;;  %v20065_v0 = vadd.f32 %v19733_v53, %v19563_v31  ;;  %v20067_v2 = vmax.f32 %v6865_v10, 0.0  ;;  %24167 = vst [vmem:[#allocation78_spill] sm:$0xff] %v20071_v12  ;;  %13292 = vmatpush1.bf16.msra.mxu0 %v13291_v22  ;;  %13420 = vmatpush1.bf16.msra.mxu1 %v13419_v63  ;;  %v12073_v31 = vld [vmem:[%s24017_s3 + $0xd60] sm:$0xff]  ;;  %v12071_v20 = vld [vmem:[%s24017_s3 + $0xd50] sm:$0xff]  ;;  %v20082_v7 = vmax.f32 %v6864_v51, 0.0  ;;  %v20085_v24 = vpop.f32.mrb[59].mxu1 }
 0x4e4   :  { %v6745_v8 = vmax.f32 %v19785_v32, %v20042_v33  ;;  %v13423_v30 = vpack.c.bf16 %v12067_v4, %v12063_v21  ;;  %v6556_v32 = vadd.f32 %v19701_v37, %v5872_v38  ;;  %24169 = vst [vmem:[#allocation80_spill] sm:$0xff] %v20085_v24  ;;  %v5874_v63 = vpop.f32.mrb[59].mxu0  ;;  %13294 = vmatprep.subr.bf16.mxu0 %v13293_v26  ;;  %v12075_v4 = vld [vmem:[%s24017_s3 + $0xd70] sm:$0xff]  ;;  %v12078_v10 = vld [vmem:[%s24017_s3 + $0xd88] sm:$0xff] }
 0x4e5   :  { %24166 = vst [vmem:[#allocation77_spill] sm:$0xff] %v20067_v2  ;;  %24168 = vst [vmem:[#allocation79_spill] sm:$0xff] %v20082_v7  ;;  %13422 = vmatprep.subr.bf16.mxu1 %v13421_v15  ;;  %v13297_v22 = vpack.c.bf16 %v12074_v34, %v12070_v60  ;;  %v13425_v21 = vpack.c.bf16 %v12076_v47, %v12072_v5  ;;  %v12082_v51 = vld [vmem:[%s24017_s3 + $0xda8] sm:$0xff]  ;;  %v20098_v33 = vadd.f32 %v19693_v39, %v19567_v1  ;;  %v12080_v60 = vld [vmem:[%s24017_s3 + $0xd98] sm:$0xff] }
 0x4e6   :  { %v20102_v26 = vadd.f32 %v19728_v42, %v19569_v11  ;;  %v6557_v15 = vadd.f32 %v19711_v35, %v5874_v63  ;;  %7657 = vmatprep.mubr.f32.mxu0 %v20067_v2  ;;  %7955 = vmatprep.mubr.f32.mxu1 %v20067_v2  ;;  %v12084_v34 = vld [vmem:[%s24017_s3 + $0xdb8] sm:$0xff]  ;;  %v20115_v1 = vadd.f32 %v19705_v25, %v19571_v14  ;;  %v20121_v38 = vpop.f32.mrb[60].mxu1  ;;  %v5878_v63 = vpop.f32.mrb[60].mxu0  ;;  %v12077_v14 = vld [vmem:[%s24017_s3 + $0xd80] sm:$0xff]  ;;  %v24189_v24 = vld [vmem:[#allocation67_spill] sm:$0xff] }
 0x4e7   :  { %v6748_v11 = vmax.f32 %v19789_v36, %v6556_v32  ;;  %7658 = vmatmul.mubr.f32.gmra.mrb[116].mxu0 %v20082_v7  ;;  %7956 = vmatmul.mubr.f32.gmra.mrb[128].mxu1 %v20082_v7  ;;  %v13299_v5 = vpack.c.bf16 %v12073_v31, %v12069_v46  ;;  %24170 = vst [vmem:[#allocation81_spill] sm:$0xff] %v20121_v38  ;;  %v12081_v36 = vld [vmem:[%s24017_s3 + $0xda0] sm:$0xff]  ;;  %v5880_v31 = vpop.f32.mrb[61].mxu0 }
 0x4e8   :  { %v6749_v47 = vmax.f32 %v19801_v40, %v6557_v15  ;;  %13296 = vmatpush1.bf16.msra.mxu0 %v13295_v52  ;;  %13424 = vmatpush1.bf16.msra.mxu1 %v13423_v30  ;;  %v13427_v2 = vpack.c.bf16 %v12075_v4, %v12071_v20  ;;  %v13301_v3 = vpack.c.bf16 %v12082_v51, %v12078_v10  ;;  %v20132_v40 = vpop.f32.mrb[61].mxu1  ;;  %v12079_v30 = vld [vmem:[%s24017_s3 + $0xd90] sm:$0xff]  ;;  %v12090_v51 = vld [vmem:[%s24017_s3 + $0xde8] sm:$0xff]  ;;  %v12088_v15 = vld [vmem:[%s24017_s3 + $0xdd8] sm:$0xff] }
 0x4e9   :  { %v6876_v32 = vmax.f32 %v6744_v44, %v6748_v11  ;;  %v20130_v46 = vadd.f32 %v19701_v37, %v5878_v63  ;;  %24171 = vst [vmem:[#allocation82_spill] sm:$0xff] %v20132_v40  ;;  %13298 = vmatprep.subr.bf16.mxu0 %v13297_v22  ;;  %13426 = vmatprep.subr.bf16.mxu1 %v13425_v21  ;;  %v12083_v20 = vld [vmem:[%s24017_s3 + $0xdb0] sm:$0xff]  ;;  %v12086_v44 = vld [vmem:[%s24017_s3 + $0xdc8] sm:$0xff] }
 0x4ea   :  { %v13429_v52 = vpack.c.bf16 %v12084_v34, %v12080_v60  ;;  %v20145_v4 = vadd.f32 %v19733_v53, %v19573_v56  ;;  %v20149_v22 = vadd.f32 %v19693_v39, %v19575_v62  ;;  %v6877_v21 = vmax.f32 %v6745_v8, %v6749_v47  ;;  %v12092_v56 = vld [vmem:[%s24017_s3 + $0xdf8] sm:$0xff]  ;;  %v24172_v60 = vld [vmem:[#allocation5_spill] sm:$0xff]  ;;  %v24173_v8 = vld [vmem:[#allocation6_spill] sm:$0xff]  ;;  %v20181_v38 = vpop.f32.mrb[62].mxu1 }
 0x4eb   :  { %v20152_v10 = vadd.f32 %v19711_v35, %v5880_v31  ;;  %v20165_v62 = vadd.f32 %v19728_v42, %v24172_v60  ;;  %v20169_v34 = vadd.f32 %v19705_v25, %v24173_v8  ;;  %v6752_v11 = vmax.f32 %v19820_v29, %v20130_v46  ;;  %v24174_v63 = vld [vmem:[#allocation7_spill] sm:$0xff]  ;;  %24176 = vst [vmem:[#allocation6_spill] sm:$0xff] %v20181_v38  ;;  %v5884_v60 = vpop.f32.mrb[62].mxu0  ;;  %v20186_v29 = vld [vmem:[%s24017_s3 + $0xdc0] sm:$0xff] }
 0x4ec   :  { %v13303_v47 = vpack.c.bf16 %v12081_v36, %v12077_v14  ;;  %v20175_v31 = vadd.f32 %v19733_v53, %v24174_v63  ;;  %v20177_v7 = vmax.f32 %v6877_v21, 0.0  ;;  %13300 = vmatpush1.bf16.msra.mxu0 %v13299_v5  ;;  %13428 = vmatpush1.bf16.msra.mxu1 %v13427_v2  ;;  %v13431_v8 = vpack.c.bf16 %v12083_v20, %v12079_v30  ;;  %v20191_v14 = vld [vmem:[%s24017_s3 + $0xde0] sm:$0xff]  ;;  %v20201_v5 = vpop.f32.mrb[63].mxu1  ;;  %v5886_v46 = vpop.f32.mrb[63].mxu0  ;;  %v12091_v21 = vld [vmem:[%s24017_s3 + $0xdf0] sm:$0xff]  ;;  %v24179_v63 = vld [vmem:[#allocation8_spill] sm:$0xff] }
 0x4ed   :  { %v6753_v40 = vmax.f32 %v19837_v27, %v20152_v10  ;;  %v20196_v27 = vld [vmem:[%s24017_s3 + $0xdd0] sm:$0xff]  ;;  %v20198_v36 = vmax.f32 %v6876_v32, 0.0  ;;  %v6572_v2 = vadd.f32 %v19701_v37, %v5884_v60  ;;  %24178 = vst [vmem:[#allocation83_spill] sm:$0xff] %v20201_v5  ;;  %13302 = vmatprep.subr.bf16.mxu0 %v13301_v3  ;;  %13430 = vmatprep.subr.bf16.mxu1 %v13429_v52  ;;  %v20209_v10 = vld [vmem:[%s24017_s3 + $0xe08] sm:$0xff]  ;;  %v24180_v52 = vld [vmem:[#allocation9_spill] sm:$0xff] }
 0x4ee   :  { %24175 = vst [vmem:[#allocation5_spill] sm:$0xff] %v20177_v7  ;;  %v13305_v30 = vpack.c.bf16 %v12090_v51, %v12086_v44  ;;  %v13433_v20 = vpack.c.bf16 %v12092_v56, %v12088_v15  ;;  %v20214_v32 = vld [vmem:[%s24017_s3 + $0xe28] sm:$0xff]  ;;  %v20218_v3 = vadd.f32 %v19693_v39, %v24179_v63  ;;  %v20222_v44 = vadd.f32 %v19728_v42, %v24180_v52  ;;  %v12096_v15 = vld [vmem:[%s24017_s3 + $0xe18] sm:$0xff]  ;;  %v20250_v5 = vld [vmem:[%s24017_s3 + $0xe20] sm:$0xff] }
 0x4ef   :  { %24177 = vst [vmem:[#allocation7_spill] sm:$0xff] %v20198_v36  ;;  %v6573_v51 = vadd.f32 %v19711_v35, %v5886_v46  ;;  %7663 = vmatprep.mubr.f32.mxu0 %v20177_v7  ;;  %7961 = vmatprep.mubr.f32.mxu1 %v20177_v7  ;;  %v12100_v56 = vld [vmem:[%s24017_s3 + $0xe38] sm:$0xff]  ;;  %v24181_v60 = vld [vmem:[#allocation10_spill] sm:$0xff]  ;;  %v6756_v52 = vmax.f32 %v19841_v9, %v6572_v2  ;;  %v20245_v7 = vld [vmem:[%s24017_s3 + $0xe00] sm:$0xff]  ;;  %v20253_v9 = vpop.f32.mrb[64].mxu1  ;;  %v5890_v2 = vpop.f32.mrb[64].mxu0 }
 0x4f0   :  { %v20235_v63 = vadd.f32 %v19705_v25, %v24181_v60  ;;  %7664 = vmatmul.mubr.f32.gmra.mrb[118].mxu0 %v20198_v36  ;;  %7962 = vmatmul.mubr.f32.gmra.mrb[130].mxu1 %v20198_v36  ;;  %v13307_v46 = vpack.c.bf16 %v20191_v14, %v20186_v29  ;;  %24182 = vst [vmem:[#allocation8_spill] sm:$0xff] %v20253_v9  ;;  %v20261_v14 = vld [vmem:[%s24017_s3 + $0xe10] sm:$0xff]  ;;  %v20312_v9 = vld [vmem:[%s24017_s3 + $0xe60] sm:$0xff] }
 0x4f1   :  { %v6757_v60 = vmax.f32 %v19845_v41, %v6573_v51  ;;  %13304 = vmatpush1.bf16.msra.mxu0 %v13303_v47  ;;  %13432 = vmatpush1.bf16.msra.mxu1 %v13431_v8  ;;  %v13435_v36 = vpack.c.bf16 %v12091_v21, %v20196_v27  ;;  %v13309_v29 = vpack.c.bf16 %v20214_v32, %v20209_v10  ;;  %v20266_v38 = vld [vmem:[%s24017_s3 + $0xe30] sm:$0xff]  ;;  %v20271_v41 = vld [vmem:[%s24017_s3 + $0xe48] sm:$0xff]  ;;  %v20276_v27 = vpop.f32.mrb[65].mxu1  ;;  %v5892_v21 = vpop.f32.mrb[65].mxu0  ;;  %v20286_v51 = vld [vmem:[%s24017_s3 + $0xe58] sm:$0xff] }
 0x4f2   :  { %v6888_v47 = vmax.f32 %v6752_v11, %v6756_v52  ;;  %v20274_v8 = vadd.f32 %v19701_v37, %v5890_v2  ;;  %24183 = vst [vmem:[#allocation9_spill] sm:$0xff] %v20276_v27  ;;  %13306 = vmatprep.subr.bf16.mxu0 %v13305_v30  ;;  %13434 = vmatprep.subr.bf16.mxu1 %v13433_v20  ;;  %v20281_v32 = vld [vmem:[%s24017_s3 + $0xe68] sm:$0xff]  ;;  %v20291_v11 = vld [vmem:[%s24017_s3 + $0xe78] sm:$0xff]  ;;  %v24184_v52 = vld [vmem:[#allocation11_spill] sm:$0xff]  ;;  %v20354_v57 = vpop.f32.mrb[66].mxu1  ;;  %v5896_v59 = vpop.f32.mrb[66].mxu0 }
 0x4f3   :  { %v13437_v10 = vpack.c.bf16 %v12100_v56, %v12096_v15  ;;  %v20295_v30 = vadd.f32 %v19733_v53, %v24184_v52  ;;  %v24185_v20 = vld [vmem:[#allocation12_spill] sm:$0xff]  ;;  %v6889_v56 = vmax.f32 %v6753_v40, %v6757_v60  ;;  %v20302_v2 = vadd.f32 %v19711_v35, %v5892_v21  ;;  %v20307_v27 = vld [vmem:[%s24017_s3 + $0xe40] sm:$0xff]  ;;  %v20317_v52 = vld [vmem:[%s24017_s3 + $0xe50] sm:$0xff] }
 0x4f4   :  { %v20299_v15 = vadd.f32 %v19693_v39, %v24185_v20  ;;  %v24186_v20 = vld [vmem:[#allocation13_spill] sm:$0xff]  ;;  %v24187_v60 = vld [vmem:[#allocation14_spill] sm:$0xff]  ;;  %v6760_v12 = vmax.f32 %v24189_v24, %v20274_v8  ;;  %v13311_v13 = vpack.c.bf16 %v20250_v5, %v20245_v7  ;;  %v20348_v24 = vadd.f32 %v19733_v53, %v24190_v28  ;;  %v24192_v5 = vld [vmem:[#allocation68_spill] sm:$0xff]  ;;  %24193 = vst [vmem:[#allocation12_spill] sm:$0xff] %v20354_v57 }
 0x4f5   :  { %v20321_v40 = vadd.f32 %v19728_v42, %v24186_v20  ;;  %v20325_v21 = vadd.f32 %v19705_v25, %v24187_v60  ;;  %v20339_v20 = vld [vmem:[%s24017_s3 + $0xe88] sm:$0xff]  ;;  %v20350_v7 = vmax.f32 %v6889_v56, 0.0  ;;  %v6761_v8 = vmax.f32 %v24192_v5, %v20302_v2  ;;  %13308 = vmatpush1.bf16.msra.mxu0 %v13307_v46  ;;  %13436 = vmatpush1.bf16.msra.mxu1 %v13435_v36  ;;  %v20366_v28 = vld [vmem:[%s24017_s3 + $0xeb8] sm:$0xff]  ;;  %v20371_v56 = vld [vmem:[%s24017_s3 + $0xe80] sm:$0xff] }
 0x4f6   :  { %v20344_v60 = vld [vmem:[%s24017_s3 + $0xea8] sm:$0xff]  ;;  %v13439_v54 = vpack.c.bf16 %v20266_v38, %v20261_v14  ;;  %v20373_v46 = vmax.f32 %v6888_v47, 0.0  ;;  %v6588_v36 = vadd.f32 %v19701_v37, %v5896_v59  ;;  %v20376_v38 = vpop.f32.mrb[67].mxu1  ;;  %v5898_v14 = vpop.f32.mrb[67].mxu0  ;;  %13310 = vmatprep.subr.bf16.mxu0 %v13309_v29  ;;  %13438 = vmatprep.subr.bf16.mxu1 %v13437_v10  ;;  %v13313_v2 = vpack.c.bf16 %v20281_v32, %v20271_v41  ;;  %v20385_v57 = vld [vmem:[%s24017_s3 + $0xea0] sm:$0xff]  ;;  %v20390_v59 = vld [vmem:[%s24017_s3 + $0xe90] sm:$0xff] }
 0x4f7   :  { %24188 = vst [vmem:[#allocation10_spill] sm:$0xff] %v20325_v21  ;;  %24191 = vst [vmem:[#allocation11_spill] sm:$0xff] %v20350_v7  ;;  %v20361_v21 = vld [vmem:[%s24017_s3 + $0xe98] sm:$0xff]  ;;  %v13441_v5 = vpack.c.bf16 %v20291_v11, %v20286_v51  ;;  %v20395_v29 = vld [vmem:[%s24017_s3 + $0xeb0] sm:$0xff]  ;;  %v6589_v41 = vadd.f32 %v19711_v35, %v5898_v14  ;;  %7669 = vmatprep.mubr.f32.mxu0 %v20350_v7  ;;  %7967 = vmatprep.mubr.f32.mxu1 %v20350_v7 }
 0x4f8   :  { %24194 = vst [vmem:[#allocation13_spill] sm:$0xff] %v20373_v46  ;;  %v13315_v47 = vpack.c.bf16 %v20312_v9, %v20307_v27  ;;  %v13443_v10 = vpack.c.bf16 %v20334_v43, %v20317_v52  ;;  %v6764_v32 = vmax.f32 %v19895_v23, %v6588_v36  ;;  %7670 = vmatmul.mubr.f32.gmra.mrb[120].mxu0 %v20373_v46  ;;  %v20414_v14 = vld [vmem:[%s24017_s3 + $0xec8] sm:$0xff]  ;;  %v20424_v23 = vld [vmem:[%s24017_s3 + $0xed8] sm:$0xff]  ;;  %v5902_v27 = vpop.f32.mrb[68].mxu0  ;;  %v6063_v52 = vpop.f32.mrb[68].mxu1 }
 0x4f9   :  { %7968 = vmatmul.mubr.f32.gmra.mrb[132].mxu1 %v20373_v46  ;;  %v13317_v51 = vpack.c.bf16 %v20344_v60, %v20339_v20  ;;  %v13445_v11 = vpack.c.bf16 %v20366_v28, %v20361_v21  ;;  %v20419_v43 = vld [vmem:[%s24017_s3 + $0xee8] sm:$0xff]  ;;  %v6765_v9 = vmax.f32 %v19925_v61, %v6589_v41  ;;  %13312 = vmatpush1.bf16.msra.mxu0 %v13311_v13  ;;  %v20434_v60 = vld [vmem:[%s24017_s3 + $0xef8] sm:$0xff]  ;;  %v20439_v28 = vld [vmem:[%s24017_s3 + $0xec0] sm:$0xff]  ;;  %v5904_v36 = vpop.f32.mrb[69].mxu0 }
 0x4fa   :  { %13440 = vmatpush1.bf16.msra.mxu1 %v13439_v54  ;;  %v13319_v21 = vpack.c.bf16 %v20385_v57, %v20371_v56  ;;  %v13447_v20 = vpack.c.bf16 %v20395_v29, %v20390_v59  ;;  %v20444_v54 = vld [vmem:[%s24017_s3 + $0xee0] sm:$0xff]  ;;  %v6900_v61 = vmax.f32 %v6760_v12, %v6764_v32  ;;  %v6596_v57 = vadd.f32 %v19701_v37, %v5902_v27  ;;  %v6065_v59 = vpop.f32.mrb[69].mxu1  ;;  %v20451_v29 = vld [vmem:[%s24017_s3 + $0xed0] sm:$0xff]  ;;  %v24196_v32 = vld [vmem:[#allocation62_spill] sm:$0xff] }
 0x4fb   :  { %v24195_v13 = vld [vmem:[#allocation61_spill] sm:$0xff]  ;;  %13314 = vmatprep.subr.bf16.mxu0 %v13313_v2  ;;  %13442 = vmatprep.subr.bf16.mxu1 %v13441_v5  ;;  %v20456_v41 = vld [vmem:[%s24017_s3 + $0xef0] sm:$0xff]  ;;  %v6901_v46 = vmax.f32 %v6761_v8, %v6765_v9  ;;  %v6597_v12 = vadd.f32 %v19711_v35, %v5904_v36  ;;  %v6503_v27 = vadd.f32 %v24196_v32, %v6065_v59  ;;  %v20465_v2 = vld [vmem:[%s24017_s3 + $0xf08] sm:$0xff] }
 0x4fc   :  { %v6502_v56 = vadd.f32 %v24195_v13, %v6063_v52  ;;  %v13321_v52 = vpack.c.bf16 %v20419_v43, %v20414_v14  ;;  %v20470_v5 = vld [vmem:[%s24017_s3 + $0xf28] sm:$0xff]  ;;  %v6768_v7 = vmax.f32 %v19929_v45, %v6596_v57  ;;  %v13449_v9 = vpack.c.bf16 %v20434_v60, %v20424_v23  ;;  %v20481_v43 = vld [vmem:[%s24017_s3 + $0xf18] sm:$0xff]  ;;  %v5908_v23 = vpop.f32.mrb[70].mxu0  ;;  %v6069_v60 = vpop.f32.mrb[70].mxu1 }
 0x4fd   :  { %v13323_v14 = vpack.c.bf16 %v20444_v54, %v20439_v28  ;;  %v20486_v36 = vld [vmem:[%s24017_s3 + $0xf38] sm:$0xff]  ;;  %v20488_v59 = vmax.f32 %v6901_v46, 0.0  ;;  %v6769_v45 = vmax.f32 %v19949_v49, %v6597_v12  ;;  %13316 = vmatpush1.bf16.msra.mxu0 %v13315_v47  ;;  %v13451_v57 = vpack.c.bf16 %v20456_v41, %v20451_v29  ;;  %v20502_v46 = vld [vmem:[%s24017_s3 + $0xf20] sm:$0xff]  ;;  %v6071_v12 = vpop.f32.mrb[71].mxu1  ;;  %v20513_v41 = vld [vmem:[%s24017_s3 + $0xf10] sm:$0xff] }
 0x4fe   :  { %v6722_v8 = vmax.f32 %v19945_v16, %v6502_v56  ;;  %v6723_v16 = vmax.f32 %v19955_v18, %v6503_v27  ;;  %13444 = vmatpush1.bf16.msra.mxu1 %v13443_v10  ;;  %v20497_v56 = vld [vmem:[%s24017_s3 + $0xf00] sm:$0xff]  ;;  %v20504_v49 = vmax.f32 %v6900_v61, 0.0  ;;  %v6604_v18 = vadd.f32 %v19701_v37, %v5908_v23  ;;  %v5910_v10 = vpop.f32.mrb[71].mxu0  ;;  %13318 = vmatprep.subr.bf16.mxu0 %v13317_v51  ;;  %v20518_v61 = vld [vmem:[%s24017_s3 + $0xf30] sm:$0xff] }
 0x4ff   :  { %v6510_v47 = vadd.f32 %v24195_v13, %v6069_v60  ;;  %13446 = vmatprep.subr.bf16.mxu1 %v13445_v11  ;;  %v13325_v29 = vpack.c.bf16 %v20470_v5, %v20465_v2  ;;  %v6605_v27 = vadd.f32 %v19711_v35, %v5910_v10  ;;  %v6511_v23 = vadd.f32 %v24196_v32, %v6071_v12  ;;  %v20535_v60 = vld [vmem:[%s24017_s3 + $0xf48] sm:$0xff] }
 0x500   :  { %7675 = vmatprep.mubr.f32.mxu0 %v20488_v59  ;;  %7973 = vmatprep.mubr.f32.mxu1 %v20488_v59  ;;  %v13453_v51 = vpack.c.bf16 %v20486_v36, %v20481_v43  ;;  %v6772_v11 = vmax.f32 %v19988_v6, %v6604_v18  ;;  %v13327_v5 = vpack.c.bf16 %v20502_v46, %v20497_v56  ;;  %v5914_v36 = vpop.f32.mrb[72].mxu0  ;;  %v6075_v6 = vpop.f32.mrb[72].mxu1  ;;  %v20544_v18 = vld [vmem:[%s24017_s3 + $0xf68] sm:$0xff] }
 0x501   :  { %v6726_v2 = vmax.f32 %v19992_v19, %v6510_v47  ;;  %7676 = vmatmul.mubr.f32.gmra.mrb[122].mxu0 %v20504_v49  ;;  %7974 = vmatmul.mubr.f32.gmra.mrb[134].mxu1 %v20504_v49  ;;  %v6773_v10 = vmax.f32 %v20005_v58, %v6605_v27  ;;  %v6727_v43 = vmax.f32 %v20035_v48, %v6511_v23  ;;  %v20549_v47 = vld [vmem:[%s24017_s3 + $0xf58] sm:$0xff]  ;;  %v20563_v27 = vld [vmem:[%s24017_s3 + $0xf40] sm:$0xff] }
 0x502   :  { %13320 = vmatpush1.bf16.msra.mxu0 %v13319_v21  ;;  %13448 = vmatpush1.bf16.msra.mxu1 %v13447_v20  ;;  %v13455_v19 = vpack.c.bf16 %v20518_v61, %v20513_v41  ;;  %v20554_v58 = vld [vmem:[%s24017_s3 + $0xf78] sm:$0xff]  ;;  %v6912_v48 = vmax.f32 %v6768_v7, %v6772_v11  ;;  %v6612_v20 = vadd.f32 %v19701_v37, %v5914_v36  ;;  %v5916_v41 = vpop.f32.mrb[73].mxu0  ;;  %v6077_v61 = vpop.f32.mrb[73].mxu1  ;;  %v20568_v23 = vld [vmem:[%s24017_s3 + $0xf60] sm:$0xff]  ;;  %v20582_v36 = vld [vmem:[%s24017_s3 + $0xf70] sm:$0xff] }
 0x503   :  { %v20556_v21 = vmax.f32 %v6722_v8, %v6726_v2  ;;  %v6518_v12 = vadd.f32 %v24195_v13, %v6075_v6  ;;  %13322 = vmatprep.subr.bf16.mxu0 %v13321_v52  ;;  %v6913_v7 = vmax.f32 %v6769_v45, %v6773_v10  ;;  %v20570_v8 = vmax.f32 %v6723_v16, %v6727_v43  ;;  %v20577_v52 = vld [vmem:[%s24017_s3 + $0xf50] sm:$0xff]  ;;  %v20593_v10 = vld [vmem:[%s24017_s3 + $0xf88] sm:$0xff] }
 0x504   :  { %v6613_v11 = vadd.f32 %v19711_v35, %v5916_v41  ;;  %v6519_v2 = vadd.f32 %v24196_v32, %v6077_v61  ;;  %13450 = vmatprep.subr.bf16.mxu1 %v13449_v9  ;;  %v6776_v6 = vmax.f32 %v20039_v17, %v6612_v20  ;;  %v13329_v16 = vpack.c.bf16 %v20544_v18, %v20535_v60  ;;  %v20598_v43 = vld [vmem:[%s24017_s3 + $0xfa8] sm:$0xff]  ;;  %v5920_v60 = vpop.f32.mrb[74].mxu0  ;;  %v6081_v18 = vpop.f32.mrb[74].mxu1 }
 0x505   :  { %v6730_v45 = vmax.f32 %v20055_v55, %v6518_v12  ;;  %v13457_v9 = vpack.c.bf16 %v20554_v58, %v20549_v47  ;;  %v20600_v41 = vmax.f32 %v6913_v7, 0.0  ;;  %v13331_v47 = vpack.c.bf16 %v20568_v23, %v20563_v27  ;;  %v20612_v58 = vld [vmem:[%s24017_s3 + $0xf98] sm:$0xff]  ;;  %v5922_v54 = vpop.f32.mrb[75].mxu0  ;;  %v20628_v12 = vld [vmem:[%s24017_s3 + $0xf80] sm:$0xff] }
 0x506   :  { %v6777_v17 = vmax.f32 %v20059_v50, %v6613_v11  ;;  %v6731_v55 = vmax.f32 %v20065_v0, %v6519_v2  ;;  %13324 = vmatpush1.bf16.msra.mxu0 %v13323_v14  ;;  %13452 = vmatpush1.bf16.msra.mxu1 %v13451_v57  ;;  %v20617_v50 = vld [vmem:[%s24017_s3 + $0xfb8] sm:$0xff]  ;;  %v20619_v0 = vmax.f32 %v6912_v48, 0.0  ;;  %v6620_v20 = vadd.f32 %v19701_v37, %v5920_v60  ;;  %v6083_v14 = vpop.f32.mrb[75].mxu1  ;;  %v20633_v48 = vld [vmem:[%s24017_s3 + $0xfa0] sm:$0xff]  ;;  %v20650_v11 = vld [vmem:[%s24017_s3 + $0xf90] sm:$0xff] }
 0x507   :  { %v6526_v28 = vadd.f32 %v24195_v13, %v6081_v18  ;;  %13326 = vmatprep.subr.bf16.mxu0 %v13325_v29  ;;  %13454 = vmatprep.subr.bf16.mxu1 %v13453_v51  ;;  %v13459_v57 = vpack.c.bf16 %v20582_v36, %v20577_v52  ;;  %v6621_v61 = vadd.f32 %v19711_v35, %v5922_v54  ;;  %v5926_v36 = vpop.f32.mrb[76].mxu0  ;;  %v20679_v18 = vld [vmem:[%s24017_s3 + $0xfd8] sm:$0xff] }
 0x508   :  { %v6527_v27 = vadd.f32 %v24196_v32, %v6083_v14  ;;  %7681 = vmatprep.mubr.f32.mxu0 %v20600_v41  ;;  %7979 = vmatprep.mubr.f32.mxu1 %v20600_v41  ;;  %v13333_v29 = vpack.c.bf16 %v20598_v43, %v20593_v10  ;;  %v6780_v51 = vmax.f32 %v20098_v33, %v6620_v20  ;;  %v6087_v33 = vpop.f32.mrb[76].mxu1  ;;  %v12147_v10 = vld [vmem:[%s24017_s3 + $0xfb0] sm:$0xff]  ;;  %v5928_v43 = vpop.f32.mrb[77].mxu0 }
 0x509   :  { %v6734_v23 = vmax.f32 %v20102_v26, %v6526_v28  ;;  %7682 = vmatmul.mubr.f32.gmra.mrb[124].mxu0 %v20619_v0  ;;  %7980 = vmatmul.mubr.f32.gmra.mrb[136].mxu1 %v20619_v0  ;;  %v13461_v7 = vpack.c.bf16 %v20617_v50, %v20612_v58  ;;  %v6781_v2 = vmax.f32 %v20115_v1, %v6621_v61  ;;  %v20665_v1 = vld [vmem:[%s24017_s3 + $0xfc8] sm:$0xff]  ;;  %v6089_v60 = vpop.f32.mrb[77].mxu1  ;;  %v12156_v58 = vld [vmem:[%s24017_s3 + $0xff8] sm:$0xff]  ;;  %v20696_v28 = vld [vmem:[%s24017_s3 + $0xfe0] sm:$0xff] }
 0x50a   :  { %v6735_v52 = vmax.f32 %v20145_v4, %v6527_v27  ;;  %13328 = vmatpush1.bf16.msra.mxu0 %v13327_v5  ;;  %13456 = vmatpush1.bf16.msra.mxu1 %v13455_v19  ;;  %v13335_v26 = vpack.c.bf16 %v20633_v48, %v20628_v12  ;;  %v20670_v4 = vld [vmem:[%s24017_s3 + $0xfe8] sm:$0xff]  ;;  %v6924_v56 = vmax.f32 %v6776_v6, %v6780_v51  ;;  %v12155_v12 = vld [vmem:[%s24017_s3 + $0xff0] sm:$0xff]  ;;  %v6093_v27 = vpop.f32.mrb[78].mxu1 }
 0x50b   :  { %v20672_v46 = vmax.f32 %v6730_v45, %v6734_v23  ;;  %v6628_v5 = vadd.f32 %v19701_v37, %v5926_v36  ;;  %v6534_v19 = vadd.f32 %v24195_v13, %v6087_v33  ;;  %13330 = vmatprep.subr.bf16.mxu0 %v13329_v16  ;;  %v6925_v50 = vmax.f32 %v6777_v17, %v6781_v2  ;;  %v20691_v16 = vld [vmem:[%s24017_s3 + $0xfc0] sm:$0xff]  ;;  %v7065_v23 = vld [vmem:[%s24017_s3 + $0x8] sm:$0xff]  ;;  %v6095_v36 = vpop.f32.mrb[79].mxu1  ;;  %v7071_v33 = vld [vmem:[%s24017_s3 + $0x38] sm:$0xff] }
 0x50c   :  { %v20684_v6 = vmax.f32 %v6731_v55, %v6735_v52  ;;  %v6629_v45 = vadd.f32 %v19711_v35, %v5928_v43  ;;  %v6535_v20 = vadd.f32 %v24196_v32, %v6089_v60  ;;  %13458 = vmatprep.subr.bf16.mxu1 %v13457_v9  ;;  %v13463_v55 = vpack.c.bf16 %v12147_v10, %v20650_v11  ;;  %v12151_v9 = vld [vmem:[%s24017_s3 + $0xfd0] sm:$0xff]  ;;  %v7069_v11 = vld [vmem:[%s24017_s3 + $0x28] sm:$0xff] }
 0x50d   :  { %v6784_v54 = vmax.f32 %v20149_v22, %v6628_v5  ;;  %v6738_v17 = vmax.f32 %v20165_v62, %v6534_v19  ;;  %v13337_v14 = vpack.c.bf16 %v20670_v4, %v20665_v1  ;;  %v20709_v48 = vmax.f32 %v6925_v50, 0.0  ;;  %v5932_v62 = vpop.f32.mrb[78].mxu0 }
 0x50e   :  { %v6785_v61 = vmax.f32 %v20169_v34, %v6629_v45  ;;  %v6739_v22 = vmax.f32 %v20175_v31, %v6535_v20  ;;  %13332 = vmatpush1.bf16.msra.mxu0 %v13331_v47  ;;  %13460 = vmatpush1.bf16.msra.mxu1 %v13459_v57  ;;  %v13465_v51 = vpack.c.bf16 %v12156_v58, %v20679_v18  ;;  %v20720_v2 = vmax.f32 %v6924_v56, 0.0  ;;  %v5934_v52 = vpop.f32.mrb[79].mxu0  ;;  %v7067_v57 = vld [vmem:[%s24017_s3 + $0x18] sm:$0xff]  ;;  %v6099_v60 = vpop.f32.mrb[80].mxu1 }
 0x50f   :  { %v6636_v34 = vadd.f32 %v19701_v37, %v5932_v62  ;;  %v6542_v31 = vadd.f32 %v24195_v13, %v6093_v27  ;;  %13334 = vmatprep.subr.bf16.mxu0 %v13333_v29  ;;  %13462 = vmatprep.subr.bf16.mxu1 %v13461_v7  ;;  %v13339_v47 = vpack.c.bf16 %v20696_v28, %v20691_v16  ;;  %v5938_v43 = vpop.f32.mrb[80].mxu0  ;;  %v6101_v20 = vpop.f32.mrb[81].mxu1  ;;  %v24199_v62 = vld [vmem:[#allocation18_spill] sm:$0xff] }
 0x510   :  { %v6637_v10 = vadd.f32 %v19711_v35, %v5934_v52  ;;  %v6543_v1 = vadd.f32 %v24196_v32, %v6095_v36  ;;  %7687 = vmatprep.mubr.f32.mxu0 %v20709_v48  ;;  %7985 = vmatprep.mubr.f32.mxu1 %v20709_v48  ;;  %v13467_v29 = vpack.c.bf16 %v12155_v12, %v12151_v9  ;;  %v5940_v45 = vpop.f32.mrb[81].mxu0 }
 0x511   :  { %v6788_v7 = vmax.f32 %v20218_v3, %v6636_v34  ;;  %v6742_v4 = vmax.f32 %v20222_v44, %v6542_v31  ;;  %7688 = vmatmul.mubr.f32.gmra.mrb[126].mxu0 %v20720_v2  ;;  %7986 = vmatmul.mubr.f32.gmra.mrb[138].mxu1 %v20720_v2  ;;  %v13469_v56 = vpack.c.bf16 %v7069_v11, %v7065_v23  ;;  %v24201_v34 = vld [vmem:[#allocation19_spill] sm:$0xff] }
 0x512   :  { %v6789_v5 = vmax.f32 %v20235_v63, %v6637_v10  ;;  %v6743_v19 = vmax.f32 %v20295_v30, %v6543_v1  ;;  %13336 = vmatpush1.bf16.msra.mxu0 %v13335_v26  ;;  %13464 = vmatpush1.bf16.msra.mxu1 %v13463_v55  ;;  %v13597_v18 = vpack.c.bf16 %v7071_v33, %v7067_v57  ;;  %v24197_v26 = vld [vmem:[#allocation16_spill] sm:$0xff]  ;;  %v6105_v11 = vpop.f32.mrb[82].mxu1  ;;  %v24203_v1 = vld [vmem:[#allocation21_spill] sm:$0xff] }
 0x513   :  { %v6936_v58 = vmax.f32 %v6784_v54, %v6788_v7  ;;  %v20742_v50 = vmax.f32 %v6738_v17, %v6742_v4  ;;  %v6644_v3 = vadd.f32 %v19701_v37, %v5938_v43  ;;  %v6550_v44 = vadd.f32 %v24195_v13, %v6099_v60  ;;  %13338 = vmatprep.subr.bf16.mxu0 %v13337_v14  ;;  %v24198_v17 = vld [vmem:[#allocation17_spill] sm:$0xff]  ;;  %v6107_v57 = vpop.f32.mrb[83].mxu1  ;;  %v24202_v33 = vld [vmem:[#allocation20_spill] sm:$0xff] }
 0x514   :  { %v6937_v16 = vmax.f32 %v6785_v61, %v6789_v5  ;;  %v20746_v28 = vmax.f32 %v6739_v22, %v6743_v19  ;;  %v6645_v63 = vadd.f32 %v19711_v35, %v5940_v45  ;;  %v6551_v30 = vadd.f32 %v24196_v32, %v6101_v20  ;;  %13466 = vmatprep.subr.bf16.mxu1 %v13465_v51  ;;  %v24200_v22 = vld [vmem:[#allocation10_spill] sm:$0xff]  ;;  %v5944_v51 = vpop.f32.mrb[82].mxu0  ;;  %v24205_v19 = vld [vmem:[#allocation23_spill] sm:$0xff] }
 0x515   :  { %v6648_v54 = vadd.f32 %v19693_v39, %v24197_v26  ;;  %v6554_v55 = vadd.f32 %v19728_v42, %v24198_v17  ;;  %v6792_v9 = vmax.f32 %v20299_v15, %v6644_v3  ;;  %v6746_v12 = vmax.f32 %v20321_v40, %v6550_v44  ;;  %v5946_v36 = vpop.f32.mrb[83].mxu0 }
 0x516   :  { %v6649_v14 = vadd.f32 %v19705_v25, %v24199_v62  ;;  %v20758_v61 = vmax.f32 %v6937_v16, 0.0  ;;  %v6793_v27 = vmax.f32 %v24200_v22, %v6645_v63  ;;  %v6747_v23 = vmax.f32 %v20348_v24, %v6551_v30  ;;  %13340 = vmatpush1.bf16.msra.mxu0 %v13339_v47  ;;  %13468 = vmatpush1.bf16.msra.mxu1 %v13467_v29  ;;  %v6111_v3 = vpop.f32.mrb[84].mxu1  ;;  %v24206_v62 = vld [vmem:[#allocation24_spill] sm:$0xff]  ;;  %v24207_v22 = vld [vmem:[#allocation25_spill] sm:$0xff] }
 0x517   :  { %v6555_v31 = vadd.f32 %v19733_v53, %v24201_v34  ;;  %v20764_v52 = vmax.f32 %v6936_v58, 0.0  ;;  %v6652_v15 = vadd.f32 %v19701_v37, %v5944_v51  ;;  %v6558_v40 = vadd.f32 %v24195_v13, %v6105_v11  ;;  %13470 = vmatprep.subr.bf16.mxu0 %v13469_v56  ;;  %13598 = vmatprep.subr.bf16.mxu1 %v13597_v18  ;;  %v24204_v56 = vld [vmem:[#allocation22_spill] sm:$0xff]  ;;  %v5950_v58 = vpop.f32.mrb[84].mxu0  ;;  %v6113_v30 = vpop.f32.mrb[85].mxu1 }
 0x518   :  { %v6656_v24 = vadd.f32 %v19693_v39, %v24202_v33  ;;  %v6653_v10 = vadd.f32 %v19711_v35, %v5946_v36  ;;  %v6559_v47 = vadd.f32 %v24196_v32, %v6107_v57  ;;  %7693 = vmatprep.mubr.f32.mxu0 %v20758_v61  ;;  %7991 = vmatprep.mubr.f32.mxu1 %v20758_v61  ;;  %v5952_v63 = vpop.f32.mrb[85].mxu0  ;;  %v24208_v11 = vld [vmem:[#allocation26_spill] sm:$0xff]  ;;  %v24209_v36 = vld [vmem:[#allocation27_spill] sm:$0xff] }
 0x519   :  { %v6562_v29 = vadd.f32 %v19728_v42, %v24203_v1  ;;  %v6796_v7 = vmax.f32 %v6648_v54, %v6652_v15  ;;  %v6750_v4 = vmax.f32 %v6554_v55, %v6558_v40  ;;  %7694 = vmatmul.mubr.f32.gmra.mrb[128].mxu0 %v20764_v52  ;;  %7992 = vmatmul.mubr.f32.gmra.mrb[140].mxu1 %v20764_v52 }
 0x51a   :  { %v6657_v5 = vadd.f32 %v19705_v25, %v24204_v56  ;;  %v6563_v43 = vadd.f32 %v19733_v53, %v24205_v19  ;;  %v6797_v60 = vmax.f32 %v6649_v14, %v6653_v10  ;;  %v6751_v18 = vmax.f32 %v6555_v31, %v6559_v47  ;;  %v5956_v15 = vpop.f32.mrb[86].mxu0  ;;  %v6117_v40 = vpop.f32.mrb[86].mxu1 }
 0x51b   :  { %v6948_v44 = vmax.f32 %v6792_v9, %v6796_v7  ;;  %v20782_v45 = vmax.f32 %v6746_v12, %v6750_v4  ;;  %v6660_v20 = vadd.f32 %v19701_v37, %v5950_v58  ;;  %v6566_v16 = vadd.f32 %v24195_v13, %v6111_v3  ;;  %v6119_v1 = vpop.f32.mrb[87].mxu1  ;;  %v24213_v3 = vld [vmem:[#allocation31_spill] sm:$0xff] }
 0x51c   :  { %v6949_v26 = vmax.f32 %v6793_v27, %v6797_v60  ;;  %v20786_v54 = vmax.f32 %v6747_v23, %v6751_v18  ;;  %v6661_v17 = vadd.f32 %v19711_v35, %v5952_v63  ;;  %v6567_v55 = vadd.f32 %v24196_v32, %v6113_v30  ;;  %v24212_v18 = vld [vmem:[#allocation29_spill] sm:$0xff] }
 0x51d   :  { %v6664_v14 = vadd.f32 %v19693_v39, %v24206_v62  ;;  %v6570_v9 = vadd.f32 %v19728_v42, %v24207_v22  ;;  %v6800_v12 = vmax.f32 %v6656_v24, %v6660_v20  ;;  %v6754_v51 = vmax.f32 %v6562_v29, %v6566_v16  ;;  %v5958_v24 = vpop.f32.mrb[87].mxu0  ;;  %v24210_v29 = vld [vmem:[#allocation28_spill] sm:$0xff] }
 0x51e   :  { %v6665_v34 = vadd.f32 %v19705_v25, %v24208_v11  ;;  %v20796_v31 = vmax.f32 %v6949_v26, 0.0  ;;  %v6801_v27 = vmax.f32 %v6657_v5, %v6661_v17  ;;  %v6755_v23 = vmax.f32 %v6563_v43, %v6567_v55  ;;  %v24211_v5 = vld [vmem:[#allocation30_spill] sm:$0xff]  ;;  %v5962_v63 = vpop.f32.mrb[88].mxu0  ;;  %v6123_v30 = vpop.f32.mrb[88].mxu1 }
 0x51f   :  { %v6571_v57 = vadd.f32 %v19733_v53, %v24209_v36  ;;  %v20800_v33 = vmax.f32 %v6948_v44, 0.0  ;;  %v6668_v10 = vadd.f32 %v19701_v37, %v5956_v15  ;;  %v6574_v47 = vadd.f32 %v24195_v13, %v6117_v40  ;;  %v6125_v22 = vpop.f32.mrb[89].mxu1 }
 0x520   :  { %v6578_v7 = vadd.f32 %v19728_v42, %v24210_v29  ;;  %v6669_v4 = vadd.f32 %v19711_v35, %v5958_v24  ;;  %v6575_v56 = vadd.f32 %v24196_v32, %v6119_v1  ;;  %7699 = vmatprep.mubr.f32.mxu0 %v20796_v31  ;;  %7997 = vmatprep.mubr.f32.mxu1 %v20796_v31 }
 0x521   :  { %v6579_v19 = vadd.f32 %v19733_v53, %v24211_v5  ;;  %v6804_v43 = vmax.f32 %v6664_v14, %v6668_v10  ;;  %v6758_v60 = vmax.f32 %v6570_v9, %v6574_v47  ;;  %7700 = vmatmul.mubr.f32.gmra.mrb[130].mxu0 %v20800_v33  ;;  %7998 = vmatmul.mubr.f32.gmra.mrb[142].mxu1 %v20800_v33  ;;  %v5964_v14 = vpop.f32.mrb[89].mxu0  ;;  %v24216_v47 = vld [vmem:[#allocation33_spill] sm:$0xff] }
 0x522   :  { %v6672_v58 = vadd.f32 %v24212_v18, %v19693_v39  ;;  %v6673_v44 = vadd.f32 %v24213_v3, %v19705_v25  ;;  %v6805_v20 = vmax.f32 %v6665_v34, %v6669_v4  ;;  %v6759_v16 = vmax.f32 %v6571_v57, %v6575_v56  ;;  %v24214_v34 = vld [vmem:[#allocation32_spill] sm:$0xff]  ;;  %v24215_v57 = vld [vmem:[#allocation34_spill] sm:$0xff]  ;;  %v5968_v29 = vpop.f32.mrb[90].mxu0  ;;  %v6129_v4 = vpop.f32.mrb[90].mxu1  ;;  %v24217_v56 = vld [vmem:[#allocation35_spill] sm:$0xff] }
 0x523   :  { %v6960_v26 = vmax.f32 %v6800_v12, %v6804_v43  ;;  %v20818_v17 = vmax.f32 %v6754_v51, %v6758_v60  ;;  %v6676_v55 = vadd.f32 %v19701_v37, %v5962_v63  ;;  %v6582_v62 = vadd.f32 %v24195_v13, %v6123_v30  ;;  %v24218_v3 = vld [vmem:[#allocation36_spill] sm:$0xff] }
 0x524   :  { %v6961_v9 = vmax.f32 %v6801_v27, %v6805_v20  ;;  %v20822_v11 = vmax.f32 %v6755_v23, %v6759_v16  ;;  %v6677_v15 = vadd.f32 %v19711_v35, %v5964_v14  ;;  %v6583_v40 = vadd.f32 %v24196_v32, %v6125_v22  ;;  %v24221_v14 = vld [vmem:[#allocation39_spill] sm:$0xff] }
 0x525   :  { %v6586_v36 = vadd.f32 %v19728_v42, %v24214_v34  ;;  %v6587_v12 = vadd.f32 %v19733_v53, %v24215_v57  ;;  %v6808_v51 = vmax.f32 %v6672_v58, %v6676_v55  ;;  %v6762_v10 = vmax.f32 %v6578_v7, %v6582_v62  ;;  %v5970_v58 = vpop.f32.mrb[91].mxu0  ;;  %v6131_v7 = vpop.f32.mrb[91].mxu1  ;;  %v24220_v55 = vld [vmem:[#allocation37_spill] sm:$0xff] }
 0x526   :  { %v6680_v24 = vadd.f32 %v24216_v47, %v19693_v39  ;;  %v20832_v1 = vmax.f32 %v6961_v9, 0.0  ;;  %v6809_v27 = vmax.f32 %v6673_v44, %v6677_v15  ;;  %v6763_v23 = vmax.f32 %v6579_v19, %v6583_v40  ;;  %v24219_v44 = vld [vmem:[#allocation38_spill] sm:$0xff]  ;;  %v5974_v40 = vpop.f32.mrb[92].mxu0  ;;  %v6135_v34 = vpop.f32.mrb[92].mxu1 }
 0x527   :  { %v6681_v5 = vadd.f32 %v24217_v56, %v19705_v25  ;;  %v20836_v43 = vmax.f32 %v6960_v26, 0.0  ;;  %v6684_v60 = vadd.f32 %v19701_v37, %v5968_v29  ;;  %v6590_v18 = vadd.f32 %v24195_v13, %v6129_v4  ;;  %v5976_v29 = vpop.f32.mrb[93].mxu0  ;;  %v6137_v4 = vpop.f32.mrb[93].mxu1 }
 0x528   :  { %v6594_v20 = vadd.f32 %v19728_v42, %v24218_v3  ;;  %v6685_v16 = vadd.f32 %v19711_v35, %v5970_v58  ;;  %v6591_v19 = vadd.f32 %v24196_v32, %v6131_v7  ;;  %7705 = vmatprep.mubr.f32.mxu0 %v20832_v1  ;;  %8003 = vmatprep.mubr.f32.mxu1 %v20832_v1  ;;  %v24223_v7 = vld [vmem:[#allocation43_spill] sm:$0xff] }
 0x529   :  { %v6595_v63 = vadd.f32 %v19733_v53, %v24219_v44  ;;  %v6812_v30 = vmax.f32 %v6680_v24, %v6684_v60  ;;  %v6766_v26 = vmax.f32 %v6586_v36, %v6590_v18  ;;  %7706 = vmatmul.mubr.f32.gmra.mrb[132].mxu0 %v20836_v43  ;;  %8004 = vmatmul.mubr.f32.gmra.mrb[144].mxu1 %v20836_v43 }
 0x52a   :  { %v6688_v62 = vadd.f32 %v24220_v55, %v19693_v39  ;;  %v6689_v22 = vadd.f32 %v24221_v14, %v19705_v25  ;;  %v6813_v9 = vmax.f32 %v6681_v5, %v6685_v16  ;;  %v6767_v15 = vmax.f32 %v6587_v12, %v6591_v19  ;;  %v24222_v5 = vld [vmem:[#allocation40_spill] sm:$0xff]  ;;  %v24224_v16 = vld [vmem:[#allocation42_spill] sm:$0xff] }
 0x52b   :  { %v6972_v57 = vmax.f32 %v6808_v51, %v6812_v30  ;;  %v20854_v47 = vmax.f32 %v6762_v10, %v6766_v26  ;;  %v6692_v24 = vadd.f32 %v19701_v37, %v5974_v40  ;;  %v6598_v36 = vadd.f32 %v24195_v13, %v6135_v34  ;;  %v5980_v30 = vpop.f32.mrb[94].mxu0  ;;  %v6141_v26 = vpop.f32.mrb[94].mxu1  ;;  %v24225_v55 = vld [vmem:[#allocation44_spill] sm:$0xff]  ;;  %v24226_v34 = vld [vmem:[#allocation45_spill] sm:$0xff] }
 0x52c   :  { %v6973_v56 = vmax.f32 %v6809_v27, %v6813_v9  ;;  %v20858_v60 = vmax.f32 %v6763_v23, %v6767_v15  ;;  %v6693_v18 = vadd.f32 %v19711_v35, %v5976_v29  ;;  %v6599_v58 = vadd.f32 %v24196_v32, %v6137_v4 }
 0x52d   :  { %v6602_v12 = vadd.f32 %v19728_v42, %v24222_v5  ;;  %v6603_v51 = vadd.f32 %v19733_v53, %v24223_v7  ;;  %v6816_v10 = vmax.f32 %v6688_v62, %v6692_v24  ;;  %v6770_v3 = vmax.f32 %v6594_v20, %v6598_v36  ;;  %v5982_v62 = vpop.f32.mrb[95].mxu0  ;;  %v6143_v20 = vpop.f32.mrb[95].mxu1 }
 0x52e   :  { %v6696_v19 = vadd.f32 %v24224_v16, %v19693_v39  ;;  %v20868_v44 = vmax.f32 %v6973_v56, 0.0  ;;  %v6817_v27 = vmax.f32 %v6689_v22, %v6693_v18  ;;  %v6771_v23 = vmax.f32 %v6595_v63, %v6599_v58  ;;  %v24227_v22 = vld [vmem:[#allocation48_spill] sm:$0xff]  ;;  %v24228_v56 = vld [vmem:[#allocation47_spill] sm:$0xff]  ;;  %v24229_v58 = vld [vmem:[#allocation50_spill] sm:$0xff] }
 0x52f   :  { %v6697_v14 = vadd.f32 %v24225_v55, %v19705_v25  ;;  %v20872_v9 = vmax.f32 %v6972_v57, 0.0  ;;  %v6700_v15 = vadd.f32 %v19701_v37, %v5980_v30  ;;  %v6606_v40 = vadd.f32 %v24195_v13, %v6141_v26  ;;  %v5986_v30 = vpop.f32.mrb[96].mxu0  ;;  %v6147_v26 = vpop.f32.mrb[96].mxu1 }
 0x530   :  { %v6610_v24 = vadd.f32 %v19728_v42, %v24226_v34  ;;  %v6701_v36 = vadd.f32 %v19711_v35, %v5982_v62  ;;  %v6607_v63 = vadd.f32 %v24196_v32, %v6143_v20  ;;  %7711 = vmatprep.mubr.f32.mxu0 %v20868_v44  ;;  %8009 = vmatprep.mubr.f32.mxu1 %v20868_v44 }
 0x531   :  { %v6611_v57 = vadd.f32 %v19733_v53, %v24227_v22  ;;  %v6820_v29 = vmax.f32 %v6696_v19, %v6700_v15  ;;  %v6774_v4 = vmax.f32 %v6602_v12, %v6606_v40  ;;  %7712 = vmatmul.mubr.f32.gmra.mrb[134].mxu0 %v20872_v9  ;;  %8010 = vmatmul.mubr.f32.gmra.mrb[146].mxu1 %v20872_v9  ;;  %v5988_v15 = vpop.f32.mrb[97].mxu0  ;;  %v6149_v40 = vpop.f32.mrb[97].mxu1 }
 0x532   :  { %v6704_v18 = vadd.f32 %v24228_v56, %v19693_v39  ;;  %v6705_v5 = vadd.f32 %v24229_v58, %v19705_v25  ;;  %v6821_v7 = vmax.f32 %v6697_v14, %v6701_v36  ;;  %v6775_v16 = vmax.f32 %v6603_v51, %v6607_v63  ;;  %v24230_v14 = vld [vmem:[#allocation51_spill] sm:$0xff] }
 0x533   :  { %v6984_v55 = vmax.f32 %v6816_v10, %v6820_v29  ;;  %v20890_v62 = vmax.f32 %v6770_v3, %v6774_v4  ;;  %v6708_v19 = vadd.f32 %v19701_v37, %v5986_v30  ;;  %v6614_v12 = vadd.f32 %v24195_v13, %v6147_v26  ;;  %v24231_v3 = vld [vmem:[#allocation53_spill] sm:$0xff]  ;;  %v5992_v30 = vpop.f32.mrb[98].mxu0 }
 0x534   :  { %v6985_v20 = vmax.f32 %v6817_v27, %v6821_v7  ;;  %v20894_v34 = vmax.f32 %v6771_v23, %v6775_v16  ;;  %v6709_v22 = vadd.f32 %v19711_v35, %v5988_v15  ;;  %v6615_v56 = vadd.f32 %v24196_v32, %v6149_v40  ;;  %v6153_v27 = vpop.f32.mrb[98].mxu1  ;;  %v24232_v23 = vld [vmem:[#allocation52_spill] sm:$0xff] }
 0x535   :  { %v6618_v51 = vadd.f32 %v19728_v42, %v24230_v14  ;;  %v6824_v36 = vmax.f32 %v6704_v18, %v6708_v19  ;;  %v6778_v10 = vmax.f32 %v6610_v24, %v6614_v12  ;;  %v6619_v63 = vadd.f32 %v19733_v53, %v24231_v3  ;;  %v5994_v18 = vpop.f32.mrb[99].mxu0  ;;  %v6155_v24 = vpop.f32.mrb[99].mxu1  ;;  %v24234_v19 = vld [vmem:[#allocation54_spill] sm:$0xff] }
 0x536   :  { %v20902_v29 = vmax.f32 %v6985_v20, 0.0  ;;  %v6825_v4 = vmax.f32 %v6705_v5, %v6709_v22  ;;  %v6779_v58 = vmax.f32 %v6611_v57, %v6615_v56  ;;  %v6712_v7 = vadd.f32 %v24232_v23, %v19693_v39  ;;  %v6159_v20 = vpop.f32.mrb[100].mxu1  ;;  %v24235_v22 = vld [vmem:[#allocation55_spill] sm:$0xff] }
 0x537   :  { %v20906_v16 = vmax.f32 %v6984_v55, 0.0  ;;  %v6716_v26 = vadd.f32 %v19701_v37, %v5992_v30  ;;  %v6622_v15 = vadd.f32 %v24195_v13, %v6153_v27  ;;  %v6713_v12 = vadd.f32 %v24234_v19, %v19705_v25  ;;  %v6161_v3 = vpop.f32.mrb[101].mxu1  ;;  %v24236_v30 = vld [vmem:[#allocation56_spill] sm:$0xff] }
 0x538   :  { %v6717_v40 = vadd.f32 %v19711_v35, %v5994_v18  ;;  %v6623_v57 = vadd.f32 %v24196_v32, %v6155_v24  ;;  %7717 = vmatprep.mubr.f32.mxu0 %v20902_v29  ;;  %8015 = vmatprep.mubr.f32.mxu1 %v20902_v29  ;;  %v6626_v25 = vadd.f32 %v19728_v42, %v24235_v22 }
 0x539   :  { %24233 = vst [vmem:[#allocation14_spill] sm:$0xff] %v20906_v16  ;;  %v6828_v39 = vmax.f32 %v6712_v7, %v6716_v26  ;;  %v6782_v5 = vmax.f32 %v6618_v51, %v6622_v15  ;;  %7718 = vmatmul.mubr.f32.gmra.mrb[136].mxu0 %v20906_v16  ;;  %8016 = vmatmul.mubr.f32.gmra.mrb[148].mxu1 %v20906_v16 }
 0x53a   :  { %v6829_v37 = vmax.f32 %v6713_v12, %v6717_v40  ;;  %v6783_v55 = vmax.f32 %v6619_v63, %v6623_v57  ;;  %v6630_v14 = vadd.f32 %v24195_v13, %v6159_v20  ;;  %v6627_v27 = vadd.f32 %v19733_v53, %v24236_v30  ;;  %v6165_v18 = vpop.f32.mrb[102].mxu1  ;;  %v7070_v57 = vld [vmem:[%s24017_s3 + $0x30] sm:$0xff] }
 0x53b   :  { %v6996_v56 = vmax.f32 %v6824_v36, %v6828_v39  ;;  %v20920_v35 = vmax.f32 %v6778_v10, %v6782_v5  ;;  %v6631_v7 = vadd.f32 %v24196_v32, %v6161_v3  ;;  %v7064_v36 = vld [vmem:[%s24017_s3] sm:$0xff]  ;;  %v6638_v12 = vadd.f32 %v24195_v13, %v6165_v18  ;;  %v6167_v40 = vpop.f32.mrb[103].mxu1  ;;  %v20950_v39 = vld [vmem:[%s24017_s3 + $0x48] sm:$0xff]  ;;  %v24242_v18 = vld [vmem:[#allocation59_spill] sm:$0xff] }
 0x53c   :  { %v6997_v51 = vmax.f32 %v6825_v4, %v6829_v37  ;;  %v20925_v23 = vmax.f32 %v6779_v58, %v6783_v55  ;;  %v6786_v26 = vmax.f32 %v6626_v25, %v6630_v14  ;;  %v7068_v10 = vld [vmem:[%s24017_s3 + $0x20] sm:$0xff]  ;;  %v7066_v4 = vld [vmem:[%s24017_s3 + $0x10] sm:$0xff]  ;;  %v7077_v5 = vld [vmem:[%s24017_s3 + $0x68] sm:$0xff]  ;;  %v20958_v20 = vmax.f32 %v20570_v8, 0.0 }
 0x53d   :  { %v6787_v15 = vmax.f32 %v6627_v27, %v6631_v7  ;;  %v24238_v58 = vld [vmem:[#allocation57_spill] sm:$0xff]  ;;  %v20941_v19 = vmax.f32 %v6996_v56, 0.0  ;;  %v24240_v37 = vld [vmem:[#allocation58_spill] sm:$0xff]  ;;  %v6639_v22 = vadd.f32 %v24196_v32, %v6167_v40  ;;  %v13471_v56 = vpack.c.bf16 %v7068_v10, %v7064_v36  ;;  %v7075_v14 = vld [vmem:[%s24017_s3 + $0x58] sm:$0xff] }
 0x53e   :  { %v20928_v63 = vmax.f32 %v6997_v51, 0.0  ;;  %v6634_v24 = vadd.f32 %v19728_v42, %v24238_v58  ;;  %v6635_v55 = vadd.f32 %v19733_v53, %v24240_v37  ;;  %24241 = vst [vmem:[#allocation68_spill] sm:$0xff] %v20958_v20  ;;  %v7079_v8 = vld [vmem:[%s24017_s3 + $0x78] sm:$0xff]  ;;  %v6171_v30 = vpop.f32.mrb[104].mxu1  ;;  %v13599_v27 = vpack.c.bf16 %v7070_v57, %v7066_v4  ;;  %v7072_v7 = vld [vmem:[%s24017_s3 + $0x40] sm:$0xff]  ;;  %v7074_v40 = vld [vmem:[%s24017_s3 + $0x50] sm:$0xff] }
 0x53f   :  { %24239 = vst [vmem:[#allocation15_spill] sm:$0xff] %v20941_v19  ;;  %v13473_v51 = vpack.c.bf16 %v7077_v5, %v20950_v39  ;;  %v6642_v36 = vadd.f32 %v19728_v42, %v24242_v18  ;;  %v20980_v10 = vmax.f32 %v20556_v21, 0.0  ;;  %v7076_v4 = vld [vmem:[%s24017_s3 + $0x60] sm:$0xff]  ;;  %v7078_v57 = vld [vmem:[%s24017_s3 + $0x70] sm:$0xff]  ;;  %v24244_v39 = vld [vmem:[#allocation60_spill] sm:$0xff]  ;;  %v13601_v37 = vpack.c.bf16 %v7079_v8, %v7075_v14 }
 0x540   :  { %24237 = vst [vmem:[#allocation67_spill] sm:$0xff] %v20928_v63  ;;  %7723 = vmatprep.mubr.f32.mxu0 %v20928_v63  ;;  %8021 = vmatprep.mubr.f32.mxu1 %v20928_v63  ;;  %v6790_v25 = vmax.f32 %v6634_v24, %v6638_v12  ;;  %v6791_v3 = vmax.f32 %v6635_v55, %v6639_v22  ;;  %v6173_v12 = vpop.f32.mrb[105].mxu1  ;;  %v7081_v55 = vld [vmem:[%s24017_s3 + $0x88] sm:$0xff]  ;;  %v7087_v14 = vld [vmem:[%s24017_s3 + $0xb8] sm:$0xff]  ;;  %v21021_v8 = vld [vmem:[%s24017_s3 + $0x80] sm:$0xff] }
 0x541   :  { %7724 = vmatmul.mubr.f32.gmra.mrb[138].mxu0 %v20941_v19  ;;  %8022 = vmatmul.mubr.f32.gmra.mrb[150].mxu1 %v20941_v19  ;;  %24243 = vst [vmem:[#allocation61_spill] sm:$0xff] %v20980_v10  ;;  %v6646_v24 = vadd.f32 %v24195_v13, %v6171_v30  ;;  %v20996_v21 = vadd.f32 %v19733_v53, %v24244_v39  ;;  %v7085_v22 = vld [vmem:[%s24017_s3 + $0xa8] sm:$0xff]  ;;  %v21011_v30 = vmax.f32 %v20684_v6, 0.0  ;;  %v7086_v39 = vld [vmem:[%s24017_s3 + $0xb0] sm:$0xff]  ;;  %v24246_v63 = vld [vmem:[#allocation64_spill] sm:$0xff] }
 0x542   :  { %7794 = vmatprep.mubr.f32.mxu0 %v20958_v20  ;;  %8092 = vmatprep.mubr.f32.mxu1 %v20958_v20  ;;  %v20982_v58 = vmax.f32 %v6786_v26, %v6790_v25  ;;  %v20998_v26 = vmax.f32 %v6787_v15, %v6791_v3  ;;  %v6647_v5 = vadd.f32 %v24196_v32, %v6173_v12  ;;  %v7083_v25 = vld [vmem:[%s24017_s3 + $0x98] sm:$0xff]  ;;  %v21026_v3 = vld [vmem:[%s24017_s3 + $0xa0] sm:$0xff]  ;;  %v6177_v18 = vpop.f32.mrb[106].mxu1  ;;  %v7082_v12 = vld [vmem:[%s24017_s3 + $0x90] sm:$0xff] }
 0x543   :  { %24245 = vst [vmem:[#allocation62_spill] sm:$0xff] %v21011_v30  ;;  %v6794_v15 = vmax.f32 %v6642_v36, %v6646_v24  ;;  %v13475_v36 = vpack.c.bf16 %v7076_v4, %v7072_v7  ;;  %v13603_v24 = vpack.c.bf16 %v7078_v57, %v7074_v40  ;;  %v21038_v19 = vld [vmem:[%s24017_s3 + $0xc8] sm:$0xff]  ;;  %v6654_v7 = vadd.f32 %v24195_v13, %v6177_v18  ;;  %v6179_v4 = vpop.f32.mrb[107].mxu1 }
 0x544   :  { %v6795_v6 = vmax.f32 %v20996_v21, %v6647_v5  ;;  %v13477_v40 = vpack.c.bf16 %v7085_v22, %v7081_v55  ;;  %v21051_v57 = vld [vmem:[%s24017_s3 + $0xe8] sm:$0xff]  ;;  %v6655_v55 = vadd.f32 %v24196_v32, %v6179_v4  ;;  %v13605_v22 = vpack.c.bf16 %v7087_v14, %v7083_v25  ;;  %v24248_v25 = vld [vmem:[#allocation69_spill] sm:$0xff] }
 0x545   :  { %7795 = vmatmul.mubr.f32.vlgmr.msra.gmra.mrb[112].mxu0 %v20980_v10  ;;  %8093 = vmatmul.mubr.f32.vlgmr.msra.gmra.mrb[124].mxu1 %v20980_v10  ;;  %v24247_v21 = vld [vmem:[#allocation66_spill] sm:$0xff]  ;;  %v21067_v18 = vmax.f32 %v20746_v28, 0.0  ;;  %v13479_v10 = vpack.c.bf16 %v21026_v3, %v21021_v8  ;;  %v13607_v20 = vpack.c.bf16 %v7086_v39, %v7082_v12  ;;  %v21082_v14 = vadd.f32 %v19728_v42, %v24248_v25  ;;  %v7090_v12 = vld [vmem:[%s24017_s3 + $0xd0] sm:$0xff] }
 0x546   :  { %13472 = vmatpush1.bf16.msra.mxu0 %v13471_v56  ;;  %13600 = vmatpush1.bf16.msra.mxu1 %v13599_v27  ;;  %v6650_v56 = vadd.f32 %v19728_v42, %v24246_v63  ;;  %v21043_v27 = vmax.f32 %v20672_v46, 0.0  ;;  %v21056_v63 = vld [vmem:[%s24017_s3 + $0xd8] sm:$0xff]  ;;  %v6651_v5 = vadd.f32 %v19733_v53, %v24247_v21  ;;  %v6183_v21 = vpop.f32.mrb[108].mxu1  ;;  %v21085_v8 = vmax.f32 %v20742_v50, 0.0  ;;  %v7094_v50 = vld [vmem:[%s24017_s3 + $0xf0] sm:$0xff]  ;;  %v7101_v4 = vld [vmem:[%s24017_s3 + $0x128] sm:$0xff] }
 0x547   :  { %7800 = vmatprep.mubr.f32.mxu0 %v21011_v30  ;;  %8098 = vmatprep.mubr.f32.mxu1 %v21011_v30  ;;  %v21061_v46 = vld [vmem:[%s24017_s3 + $0xf8] sm:$0xff]  ;;  %v7102_v25 = vld [vmem:[%s24017_s3 + $0x130] sm:$0xff] }
 0x548   :  { %13474 = vmatprep.subr.bf16.mxu0 %v13473_v51  ;;  %13602 = vmatprep.subr.bf16.mxu1 %v13601_v37  ;;  %v6798_v30 = vmax.f32 %v6650_v56, %v6654_v7  ;;  %v6799_v16 = vmax.f32 %v6651_v5, %v6655_v55  ;;  %v13481_v51 = vpack.c.bf16 %v21051_v57, %v21038_v19  ;;  %v7088_v37 = vld [vmem:[%s24017_s3 + $0xc0] sm:$0xff]  ;;  %v6185_v19 = vpop.f32.mrb[109].mxu1  ;;  %v7097_v7 = vld [vmem:[%s24017_s3 + $0x108] sm:$0xff]  ;;  %v7099_v57 = vld [vmem:[%s24017_s3 + $0x118] sm:$0xff] }
 0x549   :  { %7801 = vmatmul.mubr.f32.gmra.mrb[114].mxu0 %v21043_v27  ;;  %8099 = vmatmul.mubr.f32.gmra.mrb[126].mxu1 %v21043_v27  ;;  %v13609_v28 = vpack.c.bf16 %v21061_v46, %v21056_v63  ;;  %24249 = vst [vmem:[#allocation16_spill] sm:$0xff] %v21085_v8  ;;  %v6663_v56 = vadd.f32 %v24196_v32, %v6185_v19  ;;  %v21118_v63 = vmax.f32 %v20786_v54, 0.0  ;;  %v21134_v54 = vld [vmem:[%s24017_s3 + $0x120] sm:$0xff] }
 0x54a   :  { %13476 = vmatpush1.bf16.msra.mxu0 %v13475_v36  ;;  %13604 = vmatpush1.bf16.msra.mxu1 %v13603_v24  ;;  %v21087_v3 = vmax.f32 %v6794_v15, %v6798_v30  ;;  %v6662_v36 = vadd.f32 %v24195_v13, %v6183_v21  ;;  %v7092_v24 = vld [vmem:[%s24017_s3 + $0xe0] sm:$0xff]  ;;  %v24250_v30 = vld [vmem:[#allocation70_spill] sm:$0xff]  ;;  %v21105_v39 = vmax.f32 %v6795_v6, %v6799_v16  ;;  %v7103_v6 = vld [vmem:[%s24017_s3 + $0x138] sm:$0xff]  ;;  %v6189_v5 = vpop.f32.mrb[110].mxu1 }
 0x54b   :  { %7806 = vmatprep.mubr.f32.mxu0 %v21067_v18  ;;  %8104 = vmatprep.mubr.f32.mxu1 %v21067_v18  ;;  %v21103_v15 = vadd.f32 %v19733_v53, %v24250_v30  ;;  %24251 = vst [vmem:[#allocation17_spill] sm:$0xff] %v21118_v63  ;;  %v13483_v55 = vpack.c.bf16 %v7092_v24, %v7088_v37  ;;  %v7098_v21 = vld [vmem:[%s24017_s3 + $0x110] sm:$0xff]  ;;  %v6191_v19 = vpop.f32.mrb[111].mxu1  ;;  %v24253_v30 = vld [vmem:[#allocation74_spill] sm:$0xff] }
 0x54c   :  { %13478 = vmatprep.subr.bf16.mxu0 %v13477_v40  ;;  %13606 = vmatprep.subr.bf16.mxu1 %v13605_v22  ;;  %v6802_v16 = vmax.f32 %v21082_v14, %v6662_v36  ;;  %v21129_v40 = vld [vmem:[%s24017_s3 + $0x100] sm:$0xff]  ;;  %v13611_v22 = vpack.c.bf16 %v7094_v50, %v7090_v12  ;;  %v21146_v14 = vld [vmem:[%s24017_s3 + $0x148] sm:$0xff]  ;;  %v24252_v36 = vld [vmem:[#allocation72_spill] sm:$0xff]  ;;  %v6670_v37 = vadd.f32 %v24195_v13, %v6189_v5 }
 0x54d   :  { %7807 = vmatmul.mubr.f32.gmra.mrb[116].mxu0 %v21085_v8  ;;  %8105 = vmatmul.mubr.f32.gmra.mrb[128].mxu1 %v21085_v8  ;;  %v6803_v46 = vmax.f32 %v21103_v15, %v6663_v56  ;;  %v13485_v24 = vpack.c.bf16 %v7101_v4, %v7097_v7  ;;  %v21159_v12 = vld [vmem:[%s24017_s3 + $0x168] sm:$0xff]  ;;  %v21164_v50 = vld [vmem:[%s24017_s3 + $0x158] sm:$0xff]  ;;  %v6667_v15 = vadd.f32 %v19733_v53, %v24253_v30  ;;  %v21175_v4 = vmax.f32 %v20822_v11, 0.0 }
 0x54e   :  { %13480 = vmatpush1.bf16.msra.mxu0 %v13479_v10  ;;  %13608 = vmatpush1.bf16.msra.mxu1 %v13607_v20  ;;  %v6666_v10 = vadd.f32 %v19728_v42, %v24252_v36  ;;  %v21151_v20 = vmax.f32 %v20782_v45, 0.0  ;;  %v21169_v45 = vld [vmem:[%s24017_s3 + $0x178] sm:$0xff]  ;;  %v6671_v56 = vadd.f32 %v24196_v32, %v6191_v19  ;;  %v13613_v7 = vpack.c.bf16 %v7103_v6, %v7099_v57  ;;  %v6195_v30 = vpop.f32.mrb[112].mxu1  ;;  %v24254_v57 = vld [vmem:[#allocation75_spill] sm:$0xff]  ;;  %v7113_v19 = vld [vmem:[%s24017_s3 + $0x188] sm:$0xff] }
 0x54f   :  { %7812 = vmatprep.mubr.f32.mxu0 %v21118_v63  ;;  %8110 = vmatprep.mubr.f32.mxu1 %v21118_v63  ;;  %v13487_v36 = vpack.c.bf16 %v21134_v54, %v21129_v40  ;;  %v13615_v63 = vpack.c.bf16 %v7102_v25, %v7098_v21  ;;  %v13617_v11 = vpack.c.bf16 %v21169_v45, %v21164_v50  ;;  %v21193_v40 = vmax.f32 %v20818_v17, 0.0  ;;  %v7108_v21 = vld [vmem:[%s24017_s3 + $0x160] sm:$0xff]  ;;  %v7106_v25 = vld [vmem:[%s24017_s3 + $0x150] sm:$0xff]  ;;  %v7115_v50 = vld [vmem:[%s24017_s3 + $0x198] sm:$0xff] }
 0x550   :  { %13482 = vmatprep.subr.bf16.mxu0 %v13481_v51  ;;  %13610 = vmatprep.subr.bf16.mxu1 %v13609_v28  ;;  %v6806_v5 = vmax.f32 %v6666_v10, %v6670_v37  ;;  %v6807_v8 = vmax.f32 %v6667_v15, %v6671_v56  ;;  %v13489_v51 = vpack.c.bf16 %v21159_v12, %v21146_v14  ;;  %v7104_v28 = vld [vmem:[%s24017_s3 + $0x140] sm:$0xff]  ;;  %v7110_v17 = vld [vmem:[%s24017_s3 + $0x170] sm:$0xff]  ;;  %v7117_v12 = vld [vmem:[%s24017_s3 + $0x1a8] sm:$0xff]  ;;  %v21226_v45 = vmax.f32 %v20858_v60, 0.0 }
 0x551   :  { %7813 = vmatmul.mubr.f32.gmra.mrb[118].mxu0 %v21151_v20  ;;  %8111 = vmatmul.mubr.f32.gmra.mrb[130].mxu1 %v21151_v20  ;;  %v21190_v6 = vadd.f32 %v19728_v42, %v24254_v57  ;;  %24255 = vst [vmem:[#allocation18_spill] sm:$0xff] %v21193_v40  ;;  %v21242_v60 = vld [vmem:[%s24017_s3 + $0x1a0] sm:$0xff]  ;;  %v7118_v57 = vld [vmem:[%s24017_s3 + $0x1b0] sm:$0xff] }
 0x552   :  { %13484 = vmatpush1.bf16.msra.mxu0 %v13483_v55  ;;  %13612 = vmatpush1.bf16.msra.mxu1 %v13611_v22  ;;  %v21195_v54 = vmax.f32 %v6802_v16, %v6806_v5  ;;  %v6678_v55 = vadd.f32 %v24195_v13, %v6195_v30  ;;  %v6197_v22 = vpop.f32.mrb[113].mxu1  ;;  %v24256_v16 = vld [vmem:[#allocation76_spill] sm:$0xff]  ;;  %v21213_v10 = vmax.f32 %v6803_v46, %v6807_v8  ;;  %v7114_v30 = vld [vmem:[%s24017_s3 + $0x190] sm:$0xff] }
 0x553   :  { %7818 = vmatprep.mubr.f32.mxu0 %v21175_v4  ;;  %8116 = vmatprep.mubr.f32.mxu1 %v21175_v4  ;;  %v21211_v14 = vadd.f32 %v19733_v53, %v24256_v16  ;;  %v6679_v37 = vadd.f32 %v24196_v32, %v6197_v22  ;;  %24257 = vst [vmem:[#allocation10_spill] sm:$0xff] %v21226_v45  ;;  %v7119_v46 = vld [vmem:[%s24017_s3 + $0x1b8] sm:$0xff]  ;;  %v6201_v56 = vpop.f32.mrb[114].mxu1 }
 0x554   :  { %13486 = vmatprep.subr.bf16.mxu0 %v13485_v24  ;;  %13614 = vmatprep.subr.bf16.mxu1 %v13613_v7  ;;  %v6810_v8 = vmax.f32 %v21190_v6, %v6678_v55  ;;  %v21237_v24 = vld [vmem:[%s24017_s3 + $0x180] sm:$0xff]  ;;  %v13491_v7 = vpack.c.bf16 %v7108_v21, %v7104_v28  ;;  %v13619_v5 = vpack.c.bf16 %v7110_v17, %v7106_v25  ;;  %v21254_v6 = vld [vmem:[%s24017_s3 + $0x1c8] sm:$0xff]  ;;  %v6203_v22 = vpop.f32.mrb[115].mxu1  ;;  %v21272_v17 = vld [vmem:[%s24017_s3 + $0x1d8] sm:$0xff] }
 0x555   :  { %7819 = vmatmul.mubr.f32.gmra.mrb[120].mxu0 %v21193_v40  ;;  %8117 = vmatmul.mubr.f32.gmra.mrb[132].mxu1 %v21193_v40  ;;  %v6811_v15 = vmax.f32 %v21211_v14, %v6679_v37  ;;  %v24258_v55 = vld [vmem:[#allocation78_spill] sm:$0xff]  ;;  %v6686_v28 = vadd.f32 %v24195_v13, %v6201_v56  ;;  %v13493_v21 = vpack.c.bf16 %v7117_v12, %v7113_v19  ;;  %v24260_v16 = vld [vmem:[#allocation80_spill] sm:$0xff]  ;;  %v21283_v12 = vmax.f32 %v20894_v34, 0.0 }
 0x556   :  { %13488 = vmatpush1.bf16.msra.mxu0 %v13487_v36  ;;  %13616 = vmatpush1.bf16.msra.mxu1 %v13615_v63  ;;  %v6682_v36 = vadd.f32 %v19728_v42, %v24258_v55  ;;  %v21259_v63 = vmax.f32 %v20854_v47, 0.0  ;;  %v21267_v25 = vld [vmem:[%s24017_s3 + $0x1e8] sm:$0xff]  ;;  %v21277_v47 = vld [vmem:[%s24017_s3 + $0x1f8] sm:$0xff]  ;;  %v6683_v14 = vadd.f32 %v19733_v53, %v24260_v16  ;;  %v6687_v37 = vadd.f32 %v24196_v32, %v6203_v22  ;;  %v6207_v16 = vpop.f32.mrb[116].mxu1 }
 0x557   :  { %7824 = vmatprep.mubr.f32.mxu0 %v21226_v45  ;;  %8122 = vmatprep.mubr.f32.mxu1 %v21226_v45  ;;  %v13621_v19 = vpack.c.bf16 %v7119_v46, %v7115_v50  ;;  %v13495_v55 = vpack.c.bf16 %v21242_v60, %v21237_v24  ;;  %v13623_v45 = vpack.c.bf16 %v7118_v57, %v7114_v30  ;;  %v24261_v50 = vld [vmem:[#allocation81_spill] sm:$0xff]  ;;  %v21301_v24 = vmax.f32 %v20890_v62, 0.0  ;;  %v7122_v57 = vld [vmem:[%s24017_s3 + $0x1d0] sm:$0xff]  ;;  %v7129_v22 = vld [vmem:[%s24017_s3 + $0x208] sm:$0xff] }
 0x558   :  { %24259 = vst [vmem:[#allocation19_spill] sm:$0xff] %v21259_v63  ;;  %13490 = vmatprep.subr.bf16.mxu0 %v13489_v51  ;;  %13618 = vmatprep.subr.bf16.mxu1 %v13617_v11  ;;  %v6814_v56 = vmax.f32 %v6682_v36, %v6686_v28  ;;  %v6815_v40 = vmax.f32 %v6683_v14, %v6687_v37  ;;  %v7120_v11 = vld [vmem:[%s24017_s3 + $0x1c0] sm:$0xff]  ;;  %v7126_v62 = vld [vmem:[%s24017_s3 + $0x1f0] sm:$0xff] }
 0x559   :  { %7825 = vmatmul.mubr.f32.gmra.mrb[122].mxu0 %v21259_v63  ;;  %8123 = vmatmul.mubr.f32.gmra.mrb[134].mxu1 %v21259_v63  ;;  %v13497_v51 = vpack.c.bf16 %v21267_v25, %v21254_v6  ;;  %v13625_v34 = vpack.c.bf16 %v21277_v47, %v21272_v17  ;;  %v21298_v46 = vadd.f32 %v19728_v42, %v24261_v50  ;;  %v7124_v30 = vld [vmem:[%s24017_s3 + $0x1e0] sm:$0xff]  ;;  %v7133_v25 = vld [vmem:[%s24017_s3 + $0x228] sm:$0xff]  ;;  %v7131_v17 = vld [vmem:[%s24017_s3 + $0x218] sm:$0xff]  ;;  %v21334_v47 = vmax.f32 %v20925_v23, 0.0 }
 0x55a   :  { %13492 = vmatpush1.bf16.msra.mxu0 %v13491_v7  ;;  %13620 = vmatpush1.bf16.msra.mxu1 %v13619_v5  ;;  %24262 = vst [vmem:[#allocation20_spill] sm:$0xff] %v21301_v24  ;;  %v21303_v60 = vmax.f32 %v6810_v8, %v6814_v56  ;;  %v6694_v7 = vadd.f32 %v24195_v13, %v6207_v16  ;;  %v6209_v5 = vpop.f32.mrb[117].mxu1  ;;  %v24263_v8 = vld [vmem:[#allocation82_spill] sm:$0xff]  ;;  %v7132_v23 = vld [vmem:[%s24017_s3 + $0x220] sm:$0xff]  ;;  %v7130_v16 = vld [vmem:[%s24017_s3 + $0x210] sm:$0xff] }
 0x55b   :  { %7830 = vmatprep.mubr.f32.mxu0 %v21283_v12  ;;  %8128 = vmatprep.mubr.f32.mxu1 %v21283_v12  ;;  %v21319_v6 = vadd.f32 %v19733_v53, %v24263_v8  ;;  %v21321_v36 = vmax.f32 %v6811_v15, %v6815_v40  ;;  %v6695_v28 = vadd.f32 %v24196_v32, %v6209_v5  ;;  %v7135_v15 = vld [vmem:[%s24017_s3 + $0x238] sm:$0xff]  ;;  %v6213_v37 = vpop.f32.mrb[118].mxu1  ;;  %v7134_v50 = vld [vmem:[%s24017_s3 + $0x230] sm:$0xff] }
 0x55c   :  { %13494 = vmatprep.subr.bf16.mxu0 %v13493_v21  ;;  %13622 = vmatprep.subr.bf16.mxu1 %v13621_v19  ;;  %24264 = vst [vmem:[#allocation21_spill] sm:$0xff] %v21334_v47  ;;  %v6818_v40 = vmax.f32 %v21298_v46, %v6694_v7  ;;  %v21345_v21 = vld [vmem:[%s24017_s3 + $0x200] sm:$0xff]  ;;  %v13499_v19 = vpack.c.bf16 %v7124_v30, %v7120_v11  ;;  %v21360_v46 = vld [vmem:[%s24017_s3 + $0x248] sm:$0xff]  ;;  %v6215_v5 = vpop.f32.mrb[119].mxu1  ;;  %v24266_v8 = vld [vmem:[#allocation83_spill] sm:$0xff] }
 0x55d   :  { %7831 = vmatmul.mubr.f32.gmra.mrb[124].mxu0 %v21301_v24  ;;  %8129 = vmatmul.mubr.f32.gmra.mrb[136].mxu1 %v21301_v24  ;;  %v6819_v14 = vmax.f32 %v21319_v6, %v6695_v28  ;;  %v13627_v56 = vpack.c.bf16 %v7126_v62, %v7122_v57  ;;  %v24265_v7 = vld [vmem:[#allocation6_spill] sm:$0xff]  ;;  %v6702_v11 = vadd.f32 %v24195_v13, %v6213_v37  ;;  %v21378_v62 = vld [vmem:[%s24017_s3 + $0x258] sm:$0xff] }
 0x55e   :  { %13496 = vmatpush1.bf16.msra.mxu0 %v13495_v55  ;;  %13624 = vmatpush1.bf16.msra.mxu1 %v13623_v45  ;;  %v6698_v55 = vadd.f32 %v19728_v42, %v24265_v7  ;;  %v21365_v45 = vmax.f32 %v20920_v35, 0.0  ;;  %v13501_v30 = vpack.c.bf16 %v7133_v25, %v7129_v22  ;;  %v21373_v57 = vld [vmem:[%s24017_s3 + $0x268] sm:$0xff]  ;;  %v7143_v35 = vld [vmem:[%s24017_s3 + $0x278] sm:$0xff]  ;;  %v6699_v6 = vadd.f32 %v19733_v53, %v24266_v8  ;;  %v6219_v8 = vpop.f32.mrb[120].mxu1 }
 0x55f   :  { %7836 = vmatprep.mubr.f32.mxu0 %v21334_v47  ;;  %8134 = vmatprep.mubr.f32.mxu1 %v21334_v47  ;;  %v6703_v28 = vadd.f32 %v24196_v32, %v6215_v5  ;;  %v13629_v22 = vpack.c.bf16 %v7135_v15, %v7131_v17  ;;  %v21387_v25 = vmax.f32 %v20998_v26, 0.0  ;;  %v13503_v7 = vpack.c.bf16 %v7132_v23, %v21345_v21  ;;  %v7136_v26 = vld [vmem:[%s24017_s3 + $0x240] sm:$0xff]  ;;  %v24267_v17 = vld [vmem:[#allocation8_spill] sm:$0xff]  ;;  %v7145_v5 = vld [vmem:[%s24017_s3 + $0x288] sm:$0xff] }
 0x560   :  { %13498 = vmatprep.subr.bf16.mxu0 %v13497_v51  ;;  %13626 = vmatprep.subr.bf16.mxu1 %v13625_v34  ;;  %v6822_v37 = vmax.f32 %v6698_v55, %v6702_v11  ;;  %v13631_v47 = vpack.c.bf16 %v7134_v50, %v7130_v16  ;;  %v13505_v51 = vpack.c.bf16 %v21373_v57, %v21360_v46  ;;  %v21401_v55 = vmax.f32 %v20982_v58, 0.0  ;;  %v7138_v16 = vld [vmem:[%s24017_s3 + $0x250] sm:$0xff]  ;;  %v7149_v57 = vld [vmem:[%s24017_s3 + $0x2a8] sm:$0xff] }
 0x561   :  { %7837 = vmatmul.mubr.f32.gmra.mrb[126].mxu0 %v21365_v45  ;;  %8135 = vmatmul.mubr.f32.gmra.mrb[138].mxu1 %v21365_v45  ;;  %v6823_v24 = vmax.f32 %v6699_v6, %v6703_v28  ;;  %v13633_v34 = vpack.c.bf16 %v7143_v35, %v21378_v62  ;;  %v6706_v15 = vadd.f32 %v19728_v42, %v24267_v17  ;;  %v7142_v58 = vld [vmem:[%s24017_s3 + $0x270] sm:$0xff]  ;;  %v21429_v62 = vmax.f32 %v21105_v39, 0.0 }
 0x562   :  { %13500 = vmatpush1.bf16.msra.mxu0 %v13499_v19  ;;  %13628 = vmatpush1.bf16.msra.mxu1 %v13627_v56  ;;  %v21403_v21 = vmax.f32 %v6818_v40, %v6822_v37  ;;  %v6710_v23 = vadd.f32 %v24195_v13, %v6219_v8  ;;  %v6221_v19 = vpop.f32.mrb[121].mxu1  ;;  %v7140_v56 = vld [vmem:[%s24017_s3 + $0x260] sm:$0xff]  ;;  %v13635_v39 = vpack.c.bf16 %v7142_v58, %v7138_v16  ;;  %v24269_v37 = vld [vmem:[#allocation12_spill] sm:$0xff]  ;;  %v21445_v17 = vmax.f32 %v21087_v3, 0.0 }
 0x563   :  { %7842 = vmatprep.mubr.f32.mxu0 %v21387_v25  ;;  %8140 = vmatprep.mubr.f32.mxu1 %v21387_v25  ;;  %v24268_v40 = vld [vmem:[#allocation9_spill] sm:$0xff]  ;;  %v21419_v46 = vmax.f32 %v6819_v14, %v6823_v24  ;;  %v6711_v11 = vadd.f32 %v24196_v32, %v6221_v19  ;;  %v7147_v24 = vld [vmem:[%s24017_s3 + $0x298] sm:$0xff]  ;;  %v6225_v6 = vpop.f32.mrb[122].mxu1  ;;  %v13507_v28 = vpack.c.bf16 %v7140_v56, %v7136_v26  ;;  %v7153_v56 = vld [vmem:[%s24017_s3 + $0x2c8] sm:$0xff]  ;;  %v21466_v16 = vmax.f32 %v21213_v10, 0.0 }
 0x564   :  { %v6707_v50 = vadd.f32 %v19733_v53, %v24268_v40  ;;  %13502 = vmatprep.subr.bf16.mxu0 %v13501_v30  ;;  %13630 = vmatprep.subr.bf16.mxu1 %v13629_v22  ;;  %v6826_v35 = vmax.f32 %v6706_v15, %v6710_v23  ;;  %v7151_v14 = vld [vmem:[%s24017_s3 + $0x2b8] sm:$0xff]  ;;  %v7144_v22 = vld [vmem:[%s24017_s3 + $0x280] sm:$0xff]  ;;  %v6714_v8 = vadd.f32 %v19728_v42, %v24269_v37  ;;  %v7146_v23 = vld [vmem:[%s24017_s3 + $0x290] sm:$0xff] }
 0x565   :  { %7843 = vmatmul.mubr.f32.gmra.mrb[128].mxu0 %v21401_v55  ;;  %8141 = vmatmul.mubr.f32.gmra.mrb[140].mxu1 %v21401_v55  ;;  %v6718_v15 = vadd.f32 %v24195_v13, %v6225_v6  ;;  %v7148_v26 = vld [vmem:[%s24017_s3 + $0x2a0] sm:$0xff]  ;;  %v7150_v42 = vld [vmem:[%s24017_s3 + $0x2b0] sm:$0xff]  ;;  %v6715_v13 = vadd.f32 %v19733_v53, %v20376_v38  ;;  %v13637_v19 = vpack.c.bf16 %v7151_v14, %v7147_v24  ;;  %v7157_v53 = vld [vmem:[%s24017_s3 + $0x2e8] sm:$0xff] }
 0x566   :  { %v6827_v30 = vmax.f32 %v6707_v50, %v6711_v11  ;;  %13504 = vmatpush1.bf16.msra.mxu0 %v13503_v7  ;;  %13632 = vmatpush1.bf16.msra.mxu1 %v13631_v47  ;;  %v6227_v47 = vpop.f32.mrb[123].mxu1  ;;  %v13509_v7 = vpack.c.bf16 %v7149_v57, %v7145_v5  ;;  %v7155_v38 = vld [vmem:[%s24017_s3 + $0x2d8] sm:$0xff]  ;;  %v13511_v10 = vpack.c.bf16 %v7148_v26, %v7144_v22  ;;  %v7152_v40 = vld [vmem:[%s24017_s3 + $0x2c0] sm:$0xff]  ;;  %v21483_v50 = vmax.f32 %v21195_v54, 0.0  ;;  %v7154_v57 = vld [vmem:[%s24017_s3 + $0x2d0] sm:$0xff] }
 0x567   :  { %7848 = vmatprep.mubr.f32.mxu0 %v21429_v62  ;;  %8146 = vmatprep.mubr.f32.mxu1 %v21429_v62  ;;  %v6719_v3 = vadd.f32 %v24196_v32, %v6227_v47  ;;  %v6830_v58 = vmax.f32 %v6714_v8, %v6718_v15  ;;  %v7159_v32 = vld [vmem:[%s24017_s3 + $0x2f8] sm:$0xff]  ;;  %v7156_v5 = vld [vmem:[%s24017_s3 + $0x2e0] sm:$0xff]  ;;  %v7158_v24 = vld [vmem:[%s24017_s3 + $0x2f0] sm:$0xff]  ;;  %v21519_v15 = vmax.f32 %v21303_v60, 0.0 }
 0x568   :  { %13506 = vmatprep.subr.bf16.mxu0 %v13505_v51  ;;  %13634 = vmatprep.subr.bf16.mxu1 %v13633_v34  ;;  %v13639_v34 = vpack.c.bf16 %v7150_v42, %v7146_v23  ;;  %v13641_v14 = vpack.c.bf16 %v7159_v32, %v7155_v38  ;;  %v7161_v6 = vld [vmem:[%s24017_s3 + $0x308] sm:$0xff]  ;;  %v7167_v22 = vld [vmem:[%s24017_s3 + $0x338] sm:$0xff]  ;;  %v13643_v37 = vpack.c.bf16 %v7158_v24, %v7154_v57  ;;  %v7160_v8 = vld [vmem:[%s24017_s3 + $0x300] sm:$0xff]  ;;  %v21556_v32 = vmax.f32 %v21403_v21, 0.0 }
 0x569   :  { %7849 = vmatmul.mubr.f32.gmra.mrb[130].mxu0 %v21445_v17  ;;  %8147 = vmatmul.mubr.f32.gmra.mrb[142].mxu1 %v21445_v17  ;;  %v6831_v51 = vmax.f32 %v6715_v13, %v6719_v3  ;;  %v21485_v11 = vmax.f32 %v6826_v35, %v6830_v58  ;;  %v13513_v35 = vpack.c.bf16 %v7157_v53, %v7153_v56  ;;  %v7164_v47 = vld [vmem:[%s24017_s3 + $0x320] sm:$0xff]  ;;  %v7166_v26 = vld [vmem:[%s24017_s3 + $0x330] sm:$0xff]  ;;  %v7169_v42 = vld [vmem:[%s24017_s3 + $0x348] sm:$0xff]  ;;  %v21536_v13 = vmax.f32 %v21419_v46, 0.0 }
 0x56a   :  { %13508 = vmatpush1.bf16.msra.mxu0 %v13507_v28  ;;  %13636 = vmatpush1.bf16.msra.mxu1 %v13635_v39  ;;  %v21502_v28 = vmax.f32 %v21321_v36, 0.0  ;;  %v7165_v39 = vld [vmem:[%s24017_s3 + $0x328] sm:$0xff]  ;;  %v13515_v36 = vpack.c.bf16 %v7156_v5, %v7152_v40  ;;  %v7175_v56 = vld [vmem:[%s24017_s3 + $0x378] sm:$0xff]  ;;  %v13519_v46 = vpack.c.bf16 %v7164_v47, %v7160_v8  ;;  %v7168_v53 = vld [vmem:[%s24017_s3 + $0x340] sm:$0xff] }
 0x56b   :  { %7854 = vmatprep.mubr.f32.mxu0 %v21466_v16  ;;  %8152 = vmatprep.mubr.f32.mxu1 %v21466_v16  ;;  %v6999_v54 = vmax.f32 %v6827_v30, %v6831_v51  ;;  %v7163_v30 = vld [vmem:[%s24017_s3 + $0x318] sm:$0xff]  ;;  %v13517_v60 = vpack.c.bf16 %v7165_v39, %v7161_v6  ;;  %v7173_v3 = vld [vmem:[%s24017_s3 + $0x368] sm:$0xff]  ;;  %v7172_v38 = vld [vmem:[%s24017_s3 + $0x360] sm:$0xff] }
 0x56c   :  { %13510 = vmatprep.subr.bf16.mxu0 %v13509_v7  ;;  %13638 = vmatprep.subr.bf16.mxu1 %v13637_v19  ;;  %v7162_v7 = vld [vmem:[%s24017_s3 + $0x310] sm:$0xff]  ;;  %v13645_v23 = vpack.c.bf16 %v7167_v22, %v7163_v30  ;;  %v7171_v19 = vld [vmem:[%s24017_s3 + $0x358] sm:$0xff]  ;;  %v13521_v21 = vpack.c.bf16 %v7173_v3, %v7169_v42  ;;  %v7181_v5 = vld [vmem:[%s24017_s3 + $0x3a8] sm:$0xff]  ;;  %v21589_v22 = vmax.f32 %v21485_v11, 0.0 }
 0x56d   :  { %7855 = vmatmul.mubr.f32.gmra.mrb[132].mxu0 %v21483_v50  ;;  %8153 = vmatmul.mubr.f32.gmra.mrb[144].mxu1 %v21483_v50  ;;  %v13647_v58 = vpack.c.bf16 %v7166_v26, %v7162_v7  ;;  %v7170_v51 = vld [vmem:[%s24017_s3 + $0x350] sm:$0xff]  ;;  %v13649_v40 = vpack.c.bf16 %v7175_v56, %v7171_v19  ;;  %v7179_v57 = vld [vmem:[%s24017_s3 + $0x398] sm:$0xff]  ;;  %v7176_v39 = vld [vmem:[%s24017_s3 + $0x380] sm:$0xff] }
 0x56e   :  { %13512 = vmatpush1.bf16.msra.mxu0 %v13511_v10  ;;  %13640 = vmatpush1.bf16.msra.mxu1 %v13639_v34  ;;  %v7174_v10 = vld [vmem:[%s24017_s3 + $0x370] sm:$0xff]  ;;  %v7177_v34 = vld [vmem:[%s24017_s3 + $0x388] sm:$0xff]  ;;  %v7183_v24 = vld [vmem:[%s24017_s3 + $0x3b8] sm:$0xff]  ;;  %24271 = vst [vmem:[#allocation23_spill] sm:$0xff] %v21589_v22 }
 0x56f   :  { %7860 = vmatprep.mubr.f32.mxu0 %v21502_v28  ;;  %8158 = vmatprep.mubr.f32.mxu1 %v21502_v28  ;;  %v13651_v6 = vpack.c.bf16 %v7174_v10, %v7170_v51  ;;  %v7180_v30 = vld [vmem:[%s24017_s3 + $0x3a0] sm:$0xff]  ;;  %v7182_v8 = vld [vmem:[%s24017_s3 + $0x3b0] sm:$0xff]  ;;  %v7185_v47 = vld [vmem:[%s24017_s3 + $0x3c8] sm:$0xff] }
 0x570   :  { %13514 = vmatprep.subr.bf16.mxu0 %v13513_v35  ;;  %13642 = vmatprep.subr.bf16.mxu1 %v13641_v14  ;;  %v21578_v35 = vmax.f32 %v6999_v54, 0.0  ;;  %v13523_v14 = vpack.c.bf16 %v7172_v38, %v7168_v53  ;;  %v13525_v54 = vpack.c.bf16 %v7181_v5, %v7177_v34  ;;  %v7189_v11 = vld [vmem:[%s24017_s3 + $0x3e8] sm:$0xff]  ;;  %v7187_v7 = vld [vmem:[%s24017_s3 + $0x3d8] sm:$0xff]  ;;  %v7184_v42 = vld [vmem:[%s24017_s3 + $0x3c0] sm:$0xff]  ;;  %v24272_v38 = vmov 0.0  }
 0x571   :  { %7861 = vmatmul.mubr.f32.gmra.mrb[134].mxu0 %v21519_v15  ;;  %8159 = vmatmul.mubr.f32.gmra.mrb[146].mxu1 %v21519_v15  ;;  %v7191_v26 = vld [vmem:[%s24017_s3 + $0x3f8] sm:$0xff]  ;;  %v7188_v3 = vld [vmem:[%s24017_s3 + $0x3e0] sm:$0xff]  ;;  %v13529_v19 = vpack.c.bf16 %v7189_v11, %v7185_v47  ;;  %v7193_v53 = vld [vmem:[%s24017_s3 + $0x408] sm:$0xff] }
 0x572   :  { %13516 = vmatpush1.bf16.msra.mxu0 %v13515_v36  ;;  %13644 = vmatpush1.bf16.msra.mxu1 %v13643_v37  ;;  %24270 = vst [vmem:[#allocation22_spill] sm:$0xff] %v21578_v35  ;;  %v13653_v36 = vpack.c.bf16 %v7183_v24, %v7179_v57  ;;  %v7178_v37 = vld [vmem:[%s24017_s3 + $0x390] sm:$0xff]  ;;  %v13657_v56 = vpack.c.bf16 %v7191_v26, %v7187_v7  ;;  %v7197_v51 = vld [vmem:[%s24017_s3 + $0x428] sm:$0xff]  ;;  %v7195_v10 = vld [vmem:[%s24017_s3 + $0x418] sm:$0xff] }
 0x573   :  { %7866 = vmatprep.mubr.f32.mxu0 %v21536_v13  ;;  %8164 = vmatprep.mubr.f32.mxu1 %v21536_v13  ;;  %v7199_v34 = vld [vmem:[%s24017_s3 + $0x438] sm:$0xff]  ;;  %v13533_v5 = vpack.c.bf16 %v7197_v51, %v7193_v53  ;;  %v7192_v24 = vld [vmem:[%s24017_s3 + $0x400] sm:$0xff] }
 0x574   :  { %13518 = vmatprep.subr.bf16.mxu0 %v13517_v60  ;;  %13646 = vmatprep.subr.bf16.mxu1 %v13645_v23  ;;  %v13527_v60 = vpack.c.bf16 %v7180_v30, %v7176_v39  ;;  %v13655_v23 = vpack.c.bf16 %v7182_v8, %v7178_v37  ;;  %v13661_v57 = vpack.c.bf16 %v7199_v34, %v7195_v10  ;;  %v7198_v39 = vld [vmem:[%s24017_s3 + $0x430] sm:$0xff]  ;;  %v7201_v30 = vld [vmem:[%s24017_s3 + $0x448] sm:$0xff]  ;;  %v7207_v37 = vld [vmem:[%s24017_s3 + $0x478] sm:$0xff] }
 0x575   :  { %7867 = vmatmul.mubr.f32.gmra.mrb[136].mxu0 %v21556_v32  ;;  %8165 = vmatmul.mubr.f32.gmra.mrb[148].mxu1 %v21556_v32  ;;  %v7200_v11 = vld [vmem:[%s24017_s3 + $0x440] sm:$0xff] }
 0x576   :  { %13520 = vmatpush1.bf16.msra.mxu0 %v13519_v46  ;;  %13648 = vmatpush1.bf16.msra.mxu1 %v13647_v58  ;;  %v7186_v46 = vld [vmem:[%s24017_s3 + $0x3d0] sm:$0xff]  ;;  %v7204_v7 = vld [vmem:[%s24017_s3 + $0x460] sm:$0xff] }
 0x577   :  { %7872 = vmatprep.mubr.f32.mxu0 %v21578_v35  ;;  %8170 = vmatprep.mubr.f32.mxu1 %v21578_v35  ;;  %v7190_v58 = vld [vmem:[%s24017_s3 + $0x3f0] sm:$0xff]  ;;  %v13539_v53 = vpack.c.bf16 %v7204_v7, %v7200_v11  ;;  %v7208_v10 = vld [vmem:[%s24017_s3 + $0x480] sm:$0xff]  ;;  %v24289_v35 = vld [vmem:[#allocation18_spill] sm:$0xff] }
 0x578   :  { %13522 = vmatprep.subr.bf16.mxu0 %v13521_v21  ;;  %13650 = vmatprep.subr.bf16.mxu1 %v13649_v40  ;;  %v13531_v21 = vpack.c.bf16 %v7188_v3, %v7184_v42  ;;  %v13659_v40 = vpack.c.bf16 %v7190_v58, %v7186_v46  ;;  %v7206_v42 = vld [vmem:[%s24017_s3 + $0x470] sm:$0xff]  ;;  %v7209_v3 = vld [vmem:[%s24017_s3 + $0x488] sm:$0xff]  ;;  %v7215_v46 = vld [vmem:[%s24017_s3 + $0x4b8] sm:$0xff] }
 0x579   :  { %7873 = vmatmul.mubr.f32.gmra.mrb[138].mxu0 %v21589_v22  ;;  %8171 = vmatmul.mubr.f32.gmra.mrb[150].mxu1 %v21589_v22  ;;  %v24273_v58 = vld [vmem:[#allocation63_spill] sm:$0xff]  ;;  %v7212_v34 = vld [vmem:[%s24017_s3 + $0x4a0] sm:$0xff] }
 0x57a   :  { %13524 = vmatpush1.bf16.msra.mxu0 %v13523_v14  ;;  %13652 = vmatpush1.bf16.msra.mxu1 %v13651_v6  ;;  %v7196_v14 = vld [vmem:[%s24017_s3 + $0x420] sm:$0xff]  ;;  %v7194_v6 = vld [vmem:[%s24017_s3 + $0x410] sm:$0xff] }
 0x57b   :  { %13526 = vmatprep.subr.bf16.mxu0 %v13525_v54  ;;  %13654 = vmatprep.subr.bf16.mxu1 %v13653_v36  ;;  %v7205_v54 = vld [vmem:[%s24017_s3 + $0x468] sm:$0xff]  ;;  %v7203_v36 = vld [vmem:[%s24017_s3 + $0x458] sm:$0xff]  ;;  %v13535_v8 = vpack.c.bf16 %v7196_v14, %v7192_v24  ;;  %v13663_v47 = vpack.c.bf16 %v7198_v39, %v7194_v6  ;;  %v24274_v14 = vld [vmem:[#allocation65_spill] sm:$0xff] }
 0x57c   :  { %8241 = vmatprep.mubr.f32.mxu0 %v24272_v38  ;;  %8539 = vmatprep.mubr.f32.mxu1 %v24272_v38  ;;  %v13537_v26 = vpack.c.bf16 %v7205_v54, %v7201_v30  ;;  %v7217_v24 = vld [vmem:[%s24017_s3 + $0x4c8] sm:$0xff]  ;;  %v7219_v39 = vld [vmem:[%s24017_s3 + $0x4d8] sm:$0xff]  ;;  %v24275_v54 = vld [vmem:[#allocation71_spill] sm:$0xff] }
 0x57d   :  { %v7221_v6 = vld [vmem:[%s24017_s3 + $0x4e8] sm:$0xff]  ;;  %v7223_v30 = vld [vmem:[%s24017_s3 + $0x4f8] sm:$0xff]  ;;  %v12199_v22 = vld [vmem:[%s24017_s3 + $0x1150] sm:$0xff] }
 0x57e   :  { %13528 = vmatpush1.bf16.msra.mxu0 %v13527_v60  ;;  %13656 = vmatpush1.bf16.msra.mxu1 %v13655_v23  ;;  %v13665_v60 = vpack.c.bf16 %v7207_v37, %v7203_v36  ;;  %v7202_v23 = vld [vmem:[%s24017_s3 + $0x450] sm:$0xff]  ;;  %v13543_v36 = vpack.c.bf16 %v7212_v34, %v7208_v10  ;;  %v13545_v11 = vpack.c.bf16 %v7221_v6, %v7217_v24  ;;  %v7228_v10 = vld [vmem:[%s24017_s3 + $0x520] sm:$0xff]  ;;  %v7235_v6 = vld [vmem:[%s24017_s3 + $0x558] sm:$0xff] }
 0x57f   :  { %13530 = vmatprep.subr.bf16.mxu0 %v13529_v19  ;;  %13658 = vmatprep.subr.bf16.mxu1 %v13657_v56  ;;  %v7213_v19 = vld [vmem:[%s24017_s3 + $0x4a8] sm:$0xff]  ;;  %v7211_v56 = vld [vmem:[%s24017_s3 + $0x498] sm:$0xff]  ;;  %v13667_v51 = vpack.c.bf16 %v7206_v42, %v7202_v23  ;;  %v13673_v7 = vpack.c.bf16 %v7223_v30, %v7219_v39  ;;  %v24276_v42 = vld [vmem:[#allocation73_spill] sm:$0xff] }
 0x580   :  { %v7225_v23 = vld [vmem:[%s24017_s3 + $0x508] sm:$0xff]  ;;  %v24278_v24 = vld [vmem:[#allocation79_spill] sm:$0xff]  ;;  %v7239_v39 = vld [vmem:[%s24017_s3 + $0x578] sm:$0xff] }
 0x581   :  { %v24279_v30 = vld [vmem:[#allocation5_spill] sm:$0xff] }
 0x582   :  { %13532 = vmatpush1.bf16.msra.mxu0 %v13531_v21  ;;  %13660 = vmatpush1.bf16.msra.mxu1 %v13659_v40  ;;  %v13541_v21 = vpack.c.bf16 %v7213_v19, %v7209_v3  ;;  %v13669_v40 = vpack.c.bf16 %v7215_v46, %v7211_v56  ;;  %v7229_v3 = vld [vmem:[%s24017_s3 + $0x528] sm:$0xff]  ;;  %v7227_v19 = vld [vmem:[%s24017_s3 + $0x518] sm:$0xff]  ;;  %v24277_v46 = vld [vmem:[#allocation77_spill] sm:$0xff] }
 0x583   :  { %13534 = vmatprep.subr.bf16.mxu0 %v13533_v5  ;;  %13662 = vmatprep.subr.bf16.mxu1 %v13661_v57  ;;  %v7210_v5 = vld [vmem:[%s24017_s3 + $0x490] sm:$0xff]  ;;  %v7231_v56 = vld [vmem:[%s24017_s3 + $0x538] sm:$0xff]  ;;  %v13549_v34 = vpack.c.bf16 %v7229_v3, %v7225_v23  ;;  %v7241_v23 = vld [vmem:[%s24017_s3 + $0x588] sm:$0xff] }
 0x584   :  { %v7214_v57 = vld [vmem:[%s24017_s3 + $0x4b0] sm:$0xff] }
 0x585   :  { %8242 = vmatmul.mubr.f32.vlgmr.msra.gmra.mrb[112].mxu0 %v24272_v38  ;;  %8540 = vmatmul.mubr.f32.vlgmr.msra.gmra.mrb[124].mxu1 %v24272_v38  ;;  %v13671_v37 = vpack.c.bf16 %v7214_v57, %v7210_v5  ;;  %v7230_v5 = vld [vmem:[%s24017_s3 + $0x530] sm:$0xff]  ;;  %v7233_v57 = vld [vmem:[%s24017_s3 + $0x548] sm:$0xff] }
 0x586   :  { %8247 = vmatprep.mubr.f32.mxu0 %v24273_v58  ;;  %13536 = vmatpush1.bf16.msra.mxu0 %v13535_v8  ;;  %v7216_v8 = vld [vmem:[%s24017_s3 + $0x4c0] sm:$0xff]  ;;  %v24280_v3 = vld [vmem:[#allocation7_spill] sm:$0xff] }
 0x587   :  { %8545 = vmatprep.mubr.f32.mxu1 %v24273_v58  ;;  %13664 = vmatpush1.bf16.msra.mxu1 %v13663_v47  ;;  %v7220_v47 = vld [vmem:[%s24017_s3 + $0x4e0] sm:$0xff] }
 0x588   :  { %13538 = vmatprep.subr.bf16.mxu0 %v13537_v26  ;;  %13666 = vmatprep.subr.bf16.mxu1 %v13665_v60  ;;  %v7218_v26 = vld [vmem:[%s24017_s3 + $0x4d0] sm:$0xff]  ;;  %v13547_v58 = vpack.c.bf16 %v7220_v47, %v7216_v8  ;;  %v7232_v8 = vld [vmem:[%s24017_s3 + $0x540] sm:$0xff] }
 0x589   :  { %8248 = vmatmul.mubr.f32.gmra.mrb[114].mxu0 %v24274_v14  ;;  %8546 = vmatmul.mubr.f32.gmra.mrb[126].mxu1 %v24274_v14  ;;  %v7222_v60 = vld [vmem:[%s24017_s3 + $0x4f0] sm:$0xff]  ;;  %v7237_v14 = vld [vmem:[%s24017_s3 + $0x568] sm:$0xff]  ;;  %v7236_v47 = vld [vmem:[%s24017_s3 + $0x560] sm:$0xff] }
 0x58a   :  { %8253 = vmatprep.mubr.f32.mxu0 %v24275_v54  ;;  %13540 = vmatpush1.bf16.msra.mxu0 %v13539_v53  ;;  %v13675_v53 = vpack.c.bf16 %v7222_v60, %v7218_v26  ;;  %v7234_v26 = vld [vmem:[%s24017_s3 + $0x550] sm:$0xff] }
 0x58b   :  { %8551 = vmatprep.mubr.f32.mxu1 %v24275_v54  ;;  %13668 = vmatpush1.bf16.msra.mxu1 %v13667_v51  ;;  %v7224_v51 = vld [vmem:[%s24017_s3 + $0x500] sm:$0xff]  ;;  %v7238_v60 = vld [vmem:[%s24017_s3 + $0x570] sm:$0xff] }
 0x58c   :  { %13542 = vmatprep.subr.bf16.mxu0 %v13541_v21  ;;  %13670 = vmatprep.subr.bf16.mxu1 %v13669_v40  ;;  %v13677_v21 = vpack.c.bf16 %v7231_v56, %v7227_v19  ;;  %v7226_v40 = vld [vmem:[%s24017_s3 + $0x510] sm:$0xff]  ;;  %v7245_v19 = vld [vmem:[%s24017_s3 + $0x5a8] sm:$0xff]  ;;  %v7243_v56 = vld [vmem:[%s24017_s3 + $0x598] sm:$0xff] }
 0x58d   :  { %8254 = vmatmul.mubr.f32.gmra.mrb[116].mxu0 %v24276_v42  ;;  %8552 = vmatmul.mubr.f32.gmra.mrb[128].mxu1 %v24276_v42 }
 0x58e   :  { %8259 = vmatprep.mubr.f32.mxu0 %v24277_v46  ;;  %13544 = vmatpush1.bf16.msra.mxu0 %v13543_v36  ;;  %v13551_v36 = vpack.c.bf16 %v7228_v10, %v7224_v51  ;;  %v13555_v51 = vpack.c.bf16 %v7236_v47, %v7232_v8  ;;  %v13683_v10 = vpack.c.bf16 %v7238_v60, %v7234_v26  ;;  %v7255_v8 = vld [vmem:[%s24017_s3 + $0x5f8] sm:$0xff]  ;;  %v7252_v26 = vld [vmem:[%s24017_s3 + $0x5e0] sm:$0xff] }
 0x58f   :  { %8557 = vmatprep.mubr.f32.mxu1 %v24277_v46  ;;  %13672 = vmatpush1.bf16.msra.mxu1 %v13671_v37  ;;  %v13679_v37 = vpack.c.bf16 %v7230_v5, %v7226_v40  ;;  %v13557_v40 = vpack.c.bf16 %v7245_v19, %v7241_v23  ;;  %v7250_v19 = vld [vmem:[%s24017_s3 + $0x5d0] sm:$0xff] }
 0x590   :  { %13546 = vmatprep.subr.bf16.mxu0 %v13545_v11  ;;  %13674 = vmatprep.subr.bf16.mxu1 %v13673_v7  ;;  %v13553_v11 = vpack.c.bf16 %v7237_v14, %v7233_v57  ;;  %v13681_v7 = vpack.c.bf16 %v7239_v39, %v7235_v6  ;;  %v7242_v57 = vld [vmem:[%s24017_s3 + $0x590] sm:$0xff]  ;;  %v7249_v6 = vld [vmem:[%s24017_s3 + $0x5c8] sm:$0xff]  ;;  %v24282_v39 = vld [vmem:[#allocation13_spill] sm:$0xff] }
 0x591   :  { %8260 = vmatmul.mubr.f32.gmra.mrb[118].mxu0 %v24278_v24  ;;  %8558 = vmatmul.mubr.f32.gmra.mrb[130].mxu1 %v24278_v24  ;;  %v7246_v14 = vld [vmem:[%s24017_s3 + $0x5b0] sm:$0xff] }
 0x592   :  { %8265 = vmatprep.mubr.f32.mxu0 %v24279_v30  ;;  %13548 = vmatpush1.bf16.msra.mxu0 %v13547_v58  ;;  %v7247_v58 = vld [vmem:[%s24017_s3 + $0x5b8] sm:$0xff] }
 0x593   :  { %8563 = vmatprep.mubr.f32.mxu1 %v24279_v30  ;;  %13676 = vmatpush1.bf16.msra.mxu1 %v13675_v53  ;;  %v24281_v53 = vld [vmem:[#allocation11_spill] sm:$0xff]  ;;  %v13685_v5 = vpack.c.bf16 %v7247_v58, %v7243_v56  ;;  %v7257_v58 = vld [vmem:[%s24017_s3 + $0x608] sm:$0xff] }
 0x594   :  { %13550 = vmatprep.subr.bf16.mxu0 %v13549_v34  ;;  %13678 = vmatprep.subr.bf16.mxu1 %v13677_v21  ;;  %v7240_v34 = vld [vmem:[%s24017_s3 + $0x580] sm:$0xff]  ;;  %v7254_v56 = vld [vmem:[%s24017_s3 + $0x5f0] sm:$0xff] }
 0x595   :  { %8266 = vmatmul.mubr.f32.gmra.mrb[120].mxu0 %v24280_v3  ;;  %8564 = vmatmul.mubr.f32.gmra.mrb[132].mxu1 %v24280_v3  ;;  %v7244_v21 = vld [vmem:[%s24017_s3 + $0x5a0] sm:$0xff] }
 0x596   :  { %8271 = vmatprep.mubr.f32.mxu0 %v24281_v53  ;;  %13552 = vmatpush1.bf16.msra.mxu0 %v13551_v36  ;;  %v7253_v36 = vld [vmem:[%s24017_s3 + $0x5e8] sm:$0xff]  ;;  %v13559_v47 = vpack.c.bf16 %v7244_v21, %v7240_v34  ;;  %v7263_v34 = vld [vmem:[%s24017_s3 + $0x638] sm:$0xff] }
 0x597   :  { %8569 = vmatprep.mubr.f32.mxu1 %v24281_v53  ;;  %13680 = vmatpush1.bf16.msra.mxu1 %v13679_v37  ;;  %v7251_v37 = vld [vmem:[%s24017_s3 + $0x5d8] sm:$0xff]  ;;  %v13561_v60 = vpack.c.bf16 %v7253_v36, %v7249_v6  ;;  %v7258_v36 = vld [vmem:[%s24017_s3 + $0x610] sm:$0xff] }
 0x598   :  { %13554 = vmatprep.subr.bf16.mxu0 %v13553_v11  ;;  %13682 = vmatprep.subr.bf16.mxu1 %v13681_v7  ;;  %v13687_v11 = vpack.c.bf16 %v7246_v14, %v7242_v57  ;;  %v7248_v7 = vld [vmem:[%s24017_s3 + $0x5c0] sm:$0xff]  ;;  %v13689_v23 = vpack.c.bf16 %v7255_v8, %v7251_v37  ;;  %v7262_v37 = vld [vmem:[%s24017_s3 + $0x630] sm:$0xff]  ;;  %v7265_v8 = vld [vmem:[%s24017_s3 + $0x648] sm:$0xff] }
 0x599   :  { %8272 = vmatmul.mubr.f32.gmra.mrb[122].mxu0 %v24282_v39  ;;  %8570 = vmatmul.mubr.f32.gmra.mrb[134].mxu1 %v24282_v39  ;;  %v13563_v21 = vpack.c.bf16 %v7252_v26, %v7248_v7  ;;  %v7260_v57 = vld [vmem:[%s24017_s3 + $0x620] sm:$0xff]  ;;  %v7271_v7 = vld [vmem:[%s24017_s3 + $0x678] sm:$0xff] }
 0x59a   :  { %8277 = vmatprep.mubr.f32.mxu0 %v20488_v59  ;;  %13556 = vmatpush1.bf16.msra.mxu0 %v13555_v51  ;;  %v7261_v51 = vld [vmem:[%s24017_s3 + $0x628] sm:$0xff] }
 0x59b   :  { %8575 = vmatprep.mubr.f32.mxu1 %v20488_v59  ;;  %13684 = vmatpush1.bf16.msra.mxu1 %v13683_v10  ;;  %v7259_v10 = vld [vmem:[%s24017_s3 + $0x618] sm:$0xff]  ;;  %v13565_v14 = vpack.c.bf16 %v7261_v51, %v7257_v58  ;;  %v7266_v51 = vld [vmem:[%s24017_s3 + $0x650] sm:$0xff] }
 0x59c   :  { %13558 = vmatprep.subr.bf16.mxu0 %v13557_v40  ;;  %13686 = vmatprep.subr.bf16.mxu1 %v13685_v5  ;;  %v13691_v40 = vpack.c.bf16 %v7254_v56, %v7250_v19  ;;  %v7256_v5 = vld [vmem:[%s24017_s3 + $0x600] sm:$0xff]  ;;  %v13693_v6 = vpack.c.bf16 %v7263_v34, %v7259_v10  ;;  %v7270_v10 = vld [vmem:[%s24017_s3 + $0x670] sm:$0xff]  ;;  %v7273_v34 = vld [vmem:[%s24017_s3 + $0x688] sm:$0xff] }
 0x59d   :  { %8278 = vmatmul.mubr.f32.gmra.mrb[124].mxu0 %v20504_v49  ;;  %8576 = vmatmul.mubr.f32.gmra.mrb[136].mxu1 %v20504_v49  ;;  %v13567_v26 = vpack.c.bf16 %v7260_v57, %v7256_v5  ;;  %v7268_v19 = vld [vmem:[%s24017_s3 + $0x660] sm:$0xff]  ;;  %v7279_v5 = vld [vmem:[%s24017_s3 + $0x6b8] sm:$0xff] }
 0x59e   :  { %8283 = vmatprep.mubr.f32.mxu0 %v20600_v41  ;;  %13560 = vmatpush1.bf16.msra.mxu0 %v13559_v47  ;;  %v7269_v47 = vld [vmem:[%s24017_s3 + $0x668] sm:$0xff] }
 0x59f   :  { %8581 = vmatprep.mubr.f32.mxu1 %v20600_v41  ;;  %13688 = vmatpush1.bf16.msra.mxu1 %v13687_v11  ;;  %v7267_v11 = vld [vmem:[%s24017_s3 + $0x658] sm:$0xff]  ;;  %v13569_v56 = vpack.c.bf16 %v7269_v47, %v7265_v8  ;;  %v7274_v47 = vld [vmem:[%s24017_s3 + $0x690] sm:$0xff] }
 0x5a0   :  { %13562 = vmatprep.subr.bf16.mxu0 %v13561_v60  ;;  %13690 = vmatprep.subr.bf16.mxu1 %v13689_v23  ;;  %v13695_v60 = vpack.c.bf16 %v7262_v37, %v7258_v36  ;;  %v7264_v23 = vld [vmem:[%s24017_s3 + $0x640] sm:$0xff]  ;;  %v13697_v58 = vpack.c.bf16 %v7271_v7, %v7267_v11  ;;  %v7278_v11 = vld [vmem:[%s24017_s3 + $0x6b0] sm:$0xff]  ;;  %v7281_v7 = vld [vmem:[%s24017_s3 + $0x6c8] sm:$0xff] }
 0x5a1   :  { %8284 = vmatmul.mubr.f32.gmra.mrb[126].mxu0 %v20619_v0  ;;  %8582 = vmatmul.mubr.f32.gmra.mrb[138].mxu1 %v20619_v0  ;;  %v13571_v57 = vpack.c.bf16 %v7268_v19, %v7264_v23  ;;  %v7276_v36 = vld [vmem:[%s24017_s3 + $0x6a0] sm:$0xff]  ;;  %v7287_v23 = vld [vmem:[%s24017_s3 + $0x6f8] sm:$0xff] }
 0x5a2   :  { %8289 = vmatprep.mubr.f32.mxu0 %v20709_v48  ;;  %13564 = vmatpush1.bf16.msra.mxu0 %v13563_v21  ;;  %v7277_v21 = vld [vmem:[%s24017_s3 + $0x6a8] sm:$0xff] }
 0x5a3   :  { %8587 = vmatprep.mubr.f32.mxu1 %v20709_v48  ;;  %13692 = vmatpush1.bf16.msra.mxu1 %v13691_v40  ;;  %v7275_v40 = vld [vmem:[%s24017_s3 + $0x698] sm:$0xff]  ;;  %v13573_v37 = vpack.c.bf16 %v7277_v21, %v7273_v34  ;;  %v7282_v21 = vld [vmem:[%s24017_s3 + $0x6d0] sm:$0xff] }
 0x5a4   :  { %13566 = vmatprep.subr.bf16.mxu0 %v13565_v14  ;;  %13694 = vmatprep.subr.bf16.mxu1 %v13693_v6  ;;  %v13699_v14 = vpack.c.bf16 %v7270_v10, %v7266_v51  ;;  %v7272_v6 = vld [vmem:[%s24017_s3 + $0x680] sm:$0xff]  ;;  %v13701_v8 = vpack.c.bf16 %v7279_v5, %v7275_v40  ;;  %v7286_v40 = vld [vmem:[%s24017_s3 + $0x6f0] sm:$0xff]  ;;  %v7289_v5 = vld [vmem:[%s24017_s3 + $0x708] sm:$0xff] }
 0x5a5   :  { %8290 = vmatmul.mubr.f32.gmra.mrb[128].mxu0 %v20720_v2  ;;  %8588 = vmatmul.mubr.f32.gmra.mrb[140].mxu1 %v20720_v2  ;;  %v13575_v19 = vpack.c.bf16 %v7276_v36, %v7272_v6  ;;  %v7284_v51 = vld [vmem:[%s24017_s3 + $0x6e0] sm:$0xff]  ;;  %v7295_v6 = vld [vmem:[%s24017_s3 + $0x738] sm:$0xff] }
 0x5a6   :  { %8295 = vmatprep.mubr.f32.mxu0 %v20758_v61  ;;  %13568 = vmatpush1.bf16.msra.mxu0 %v13567_v26  ;;  %v7285_v26 = vld [vmem:[%s24017_s3 + $0x6e8] sm:$0xff] }
 0x5a7   :  { %8593 = vmatprep.mubr.f32.mxu1 %v20758_v61  ;;  %13696 = vmatpush1.bf16.msra.mxu1 %v13695_v60  ;;  %v7283_v60 = vld [vmem:[%s24017_s3 + $0x6d8] sm:$0xff]  ;;  %v13577_v10 = vpack.c.bf16 %v7285_v26, %v7281_v7  ;;  %v7290_v26 = vld [vmem:[%s24017_s3 + $0x710] sm:$0xff] }
 0x5a8   :  { %13570 = vmatprep.subr.bf16.mxu0 %v13569_v56  ;;  %13698 = vmatprep.subr.bf16.mxu1 %v13697_v58  ;;  %v13703_v56 = vpack.c.bf16 %v7278_v11, %v7274_v47  ;;  %v7280_v58 = vld [vmem:[%s24017_s3 + $0x6c0] sm:$0xff]  ;;  %v13705_v34 = vpack.c.bf16 %v7287_v23, %v7283_v60  ;;  %v7294_v60 = vld [vmem:[%s24017_s3 + $0x730] sm:$0xff]  ;;  %v7297_v23 = vld [vmem:[%s24017_s3 + $0x748] sm:$0xff] }
 0x5a9   :  { %8296 = vmatmul.mubr.f32.gmra.mrb[130].mxu0 %v20764_v52  ;;  %8594 = vmatmul.mubr.f32.gmra.mrb[142].mxu1 %v20764_v52  ;;  %v13579_v36 = vpack.c.bf16 %v7284_v51, %v7280_v58  ;;  %v7292_v47 = vld [vmem:[%s24017_s3 + $0x720] sm:$0xff]  ;;  %v7303_v58 = vld [vmem:[%s24017_s3 + $0x778] sm:$0xff] }
 0x5aa   :  { %8301 = vmatprep.mubr.f32.mxu0 %v20796_v31  ;;  %13572 = vmatpush1.bf16.msra.mxu0 %v13571_v57  ;;  %v7293_v57 = vld [vmem:[%s24017_s3 + $0x728] sm:$0xff] }
 0x5ab   :  { %8599 = vmatprep.mubr.f32.mxu1 %v20796_v31  ;;  %13700 = vmatpush1.bf16.msra.mxu1 %v13699_v14  ;;  %v7291_v14 = vld [vmem:[%s24017_s3 + $0x718] sm:$0xff]  ;;  %v13581_v11 = vpack.c.bf16 %v7293_v57, %v7289_v5 }
 0x5ac   :  { %13574 = vmatprep.subr.bf16.mxu0 %v13573_v37  ;;  %13702 = vmatprep.subr.bf16.mxu1 %v13701_v8  ;;  %v13707_v37 = vpack.c.bf16 %v7286_v40, %v7282_v21  ;;  %v7288_v8 = vld [vmem:[%s24017_s3 + $0x700] sm:$0xff]  ;;  %v13709_v7 = vpack.c.bf16 %v7295_v6, %v7291_v14  ;;  %v7298_v40 = vld [vmem:[%s24017_s3 + $0x750] sm:$0xff]  ;;  %v7305_v6 = vld [vmem:[%s24017_s3 + $0x788] sm:$0xff] }
 0x5ad   :  { %8302 = vmatmul.mubr.f32.gmra.mrb[132].mxu0 %v20800_v33  ;;  %8600 = vmatmul.mubr.f32.gmra.mrb[144].mxu1 %v20800_v33  ;;  %v13583_v51 = vpack.c.bf16 %v7292_v47, %v7288_v8  ;;  %v7300_v21 = vld [vmem:[%s24017_s3 + $0x760] sm:$0xff]  ;;  %v7302_v14 = vld [vmem:[%s24017_s3 + $0x770] sm:$0xff]  ;;  %v7311_v8 = vld [vmem:[%s24017_s3 + $0x7b8] sm:$0xff] }
 0x5ae   :  { %8307 = vmatprep.mubr.f32.mxu0 %v20832_v1  ;;  %13576 = vmatpush1.bf16.msra.mxu0 %v13575_v19  ;;  %v7301_v19 = vld [vmem:[%s24017_s3 + $0x768] sm:$0xff] }
 0x5af   :  { %8605 = vmatprep.mubr.f32.mxu1 %v20832_v1  ;;  %13704 = vmatpush1.bf16.msra.mxu1 %v13703_v56  ;;  %v7299_v56 = vld [vmem:[%s24017_s3 + $0x758] sm:$0xff]  ;;  %v13585_v5 = vpack.c.bf16 %v7301_v19, %v7297_v23  ;;  %v7306_v23 = vld [vmem:[%s24017_s3 + $0x790] sm:$0xff] }
 0x5b0   :  { %13578 = vmatprep.subr.bf16.mxu0 %v13577_v10  ;;  %13706 = vmatprep.subr.bf16.mxu1 %v13705_v34  ;;  %v13711_v10 = vpack.c.bf16 %v7294_v60, %v7290_v26  ;;  %v7296_v34 = vld [vmem:[%s24017_s3 + $0x740] sm:$0xff]  ;;  %v13713_v57 = vpack.c.bf16 %v7303_v58, %v7299_v56  ;;  %v7310_v56 = vld [vmem:[%s24017_s3 + $0x7b0] sm:$0xff]  ;;  %v7313_v58 = vld [vmem:[%s24017_s3 + $0x7c8] sm:$0xff] }
 0x5b1   :  { %8308 = vmatmul.mubr.f32.gmra.mrb[134].mxu0 %v20836_v43  ;;  %8606 = vmatmul.mubr.f32.gmra.mrb[146].mxu1 %v20836_v43  ;;  %v13587_v47 = vpack.c.bf16 %v7300_v21, %v7296_v34  ;;  %v7304_v26 = vld [vmem:[%s24017_s3 + $0x780] sm:$0xff]  ;;  %v7315_v34 = vld [vmem:[%s24017_s3 + $0x7d8] sm:$0xff] }
 0x5b2   :  { %8313 = vmatprep.mubr.f32.mxu0 %v20868_v44  ;;  %13580 = vmatpush1.bf16.msra.mxu0 %v13579_v36  ;;  %v7309_v36 = vld [vmem:[%s24017_s3 + $0x7a8] sm:$0xff]  ;;  %v7308_v60 = vld [vmem:[%s24017_s3 + $0x7a0] sm:$0xff]  ;;  %v7319_v21 = vld [vmem:[%s24017_s3 + $0x7f8] sm:$0xff] }
 0x5b3   :  { %8611 = vmatprep.mubr.f32.mxu1 %v20868_v44  ;;  %13708 = vmatpush1.bf16.msra.mxu1 %v13707_v37  ;;  %v7307_v37 = vld [vmem:[%s24017_s3 + $0x798] sm:$0xff] }
 0x5b4   :  { %13582 = vmatprep.subr.bf16.mxu0 %v13581_v11  ;;  %13710 = vmatprep.subr.bf16.mxu1 %v13709_v7  ;;  %v13715_v11 = vpack.c.bf16 %v7302_v14, %v7298_v40  ;;  %v13589_v7 = vpack.c.bf16 %v7309_v36, %v7305_v6  ;;  %v13717_v19 = vpack.c.bf16 %v7311_v8, %v7307_v37  ;;  %v7312_v14 = vld [vmem:[%s24017_s3 + $0x7c0] sm:$0xff]  ;;  %v7314_v36 = vld [vmem:[%s24017_s3 + $0x7d0] sm:$0xff] }
 0x5b5   :  { %8314 = vmatmul.mubr.f32.gmra.mrb[136].mxu0 %v20872_v9  ;;  %8612 = vmatmul.mubr.f32.gmra.mrb[148].mxu1 %v20872_v9  ;;  %v13591_v40 = vpack.c.bf16 %v7308_v60, %v7304_v26  ;;  %v7316_v6 = vld [vmem:[%s24017_s3 + $0x7e0] sm:$0xff]  ;;  %v13721_v37 = vpack.c.bf16 %v7319_v21, %v7315_v34  ;;  %v7318_v8 = vld [vmem:[%s24017_s3 + $0x7f0] sm:$0xff]  ;;  %v12164_v26 = vld [vmem:[%s24017_s3 + $0x1038] sm:$0xff] }
 0x5b6   :  { %8319 = vmatprep.mubr.f32.mxu0 %v20902_v29  ;;  %13584 = vmatpush1.bf16.msra.mxu0 %v13583_v51  ;;  %v7317_v51 = vld [vmem:[%s24017_s3 + $0x7e8] sm:$0xff]  ;;  %v13595_v60 = vpack.c.bf16 %v7316_v6, %v7312_v14  ;;  %v12159_v34 = vld [vmem:[%s24017_s3 + $0x1010] sm:$0xff]  ;;  %v12172_v14 = vld [vmem:[%s24017_s3 + $0x1078] sm:$0xff] }
 0x5b7   :  { %8617 = vmatprep.mubr.f32.mxu1 %v20902_v29  ;;  %13712 = vmatpush1.bf16.msra.mxu1 %v13711_v10  ;;  %v24283_v10 = vld [vmem:[#allocation14_spill] sm:$0xff]  ;;  %v12163_v21 = vld [vmem:[%s24017_s3 + $0x1030] sm:$0xff] }
 0x5b8   :  { %13586 = vmatprep.subr.bf16.mxu0 %v13585_v5  ;;  %13714 = vmatprep.subr.bf16.mxu1 %v13713_v57  ;;  %v13719_v5 = vpack.c.bf16 %v7310_v56, %v7306_v23  ;;  %v13593_v57 = vpack.c.bf16 %v7317_v51, %v7313_v58  ;;  %v13723_v23 = vpack.c.bf16 %v7318_v8, %v7314_v36  ;;  %v12157_v58 = vld [vmem:[%s24017_s3 + $0x1000] sm:$0xff] }
 0x5b9   :  { %8320 = vmatmul.mubr.f32.gmra.mrb[138].mxu0 %v24283_v10  ;;  %8618 = vmatmul.mubr.f32.gmra.mrb[150].mxu1 %v24283_v10  ;;  %v12161_v51 = vld [vmem:[%s24017_s3 + $0x1020] sm:$0xff]  ;;  %v13855_v36 = vpack.c.bf16 %v12163_v21, %v12159_v34 }
 0x5ba   :  { %13588 = vmatpush1.bf16.msra.mxu0 %v13587_v47  ;;  %8390 = vmatprep.mubr.f32.mxu0 %v24272_v38  ;;  %v12158_v47 = vld [vmem:[%s24017_s3 + $0x1008] sm:$0xff]  ;;  %v13727_v6 = vpack.c.bf16 %v12161_v51, %v12157_v58  ;;  %v12165_v8 = vld [vmem:[%s24017_s3 + $0x1040] sm:$0xff]  ;;  %v12180_v58 = vld [vmem:[%s24017_s3 + $0x10b8] sm:$0xff] }
 0x5bb   :  { %13716 = vmatpush1.bf16.msra.mxu1 %v13715_v11  ;;  %13590 = vmatprep.subr.bf16.mxu0 %v13589_v7  ;;  %v12162_v11 = vld [vmem:[%s24017_s3 + $0x1028] sm:$0xff]  ;;  %v12160_v7 = vld [vmem:[%s24017_s3 + $0x1018] sm:$0xff] }
 0x5bc   :  { %13718 = vmatprep.subr.bf16.mxu1 %v13717_v19  ;;  %8688 = vmatprep.mubr.f32.mxu1 %v24272_v38  ;;  %v13725_v19 = vpack.c.bf16 %v12162_v11, %v12158_v47  ;;  %v13853_v56 = vpack.c.bf16 %v12164_v26, %v12160_v7  ;;  %v12169_v47 = vld [vmem:[%s24017_s3 + $0x1060] sm:$0xff]  ;;  %v12167_v11 = vld [vmem:[%s24017_s3 + $0x1050] sm:$0xff] }
 0x5bd   :  { %v12171_v26 = vld [vmem:[%s24017_s3 + $0x1070] sm:$0xff]  ;;  %v13731_v51 = vpack.c.bf16 %v12169_v47, %v12165_v8  ;;  %v12186_v8 = vld [vmem:[%s24017_s3 + $0x10e8] sm:$0xff] }
 0x5be   :  { %13592 = vmatpush1.bf16.msra.mxu0 %v13591_v40  ;;  %v12166_v40 = vld [vmem:[%s24017_s3 + $0x1048] sm:$0xff]  ;;  %v13859_v34 = vpack.c.bf16 %v12171_v26, %v12167_v11  ;;  %v12184_v11 = vld [vmem:[%s24017_s3 + $0x10d8] sm:$0xff] }
 0x5bf   :  { %13720 = vmatpush1.bf16.msra.mxu1 %v13719_v5  ;;  %13594 = vmatprep.subr.bf16.mxu0 %v13593_v57  ;;  %v12170_v5 = vld [vmem:[%s24017_s3 + $0x1068] sm:$0xff]  ;;  %v12168_v57 = vld [vmem:[%s24017_s3 + $0x1058] sm:$0xff] }
 0x5c0   :  { %13722 = vmatprep.subr.bf16.mxu1 %v13721_v37  ;;  %v13729_v37 = vpack.c.bf16 %v12170_v5, %v12166_v40  ;;  %v13857_v7 = vpack.c.bf16 %v12172_v14, %v12168_v57  ;;  %v12173_v40 = vld [vmem:[%s24017_s3 + $0x1080] sm:$0xff]  ;;  %v12175_v57 = vld [vmem:[%s24017_s3 + $0x1090] sm:$0xff]  ;;  %v24286_v47 = vld [vmem:[#allocation62_spill] sm:$0xff] }
 0x5c1   :  { %v12177_v5 = vld [vmem:[%s24017_s3 + $0x10a0] sm:$0xff] }
 0x5c2   :  { %13596 = vmatpush1.bf16.msra.mxu0 %v13595_v60  ;;  %v12174_v60 = vld [vmem:[%s24017_s3 + $0x1088] sm:$0xff]  ;;  %v24285_v14 = vld [vmem:[#allocation61_spill] sm:$0xff]  ;;  %v13735_v26 = vpack.c.bf16 %v12177_v5, %v12173_v40  ;;  %v12192_v5 = vld [vmem:[%s24017_s3 + $0x1118] sm:$0xff] }
 0x5c3   :  { %13724 = vmatpush1.bf16.msra.mxu1 %v13723_v23  ;;  %13726 = vmatprep.subr.bf16.mxu0 %v13725_v19  ;;  %v12178_v23 = vld [vmem:[%s24017_s3 + $0x10a8] sm:$0xff]  ;;  %v24284_v19 = vld [vmem:[#allocation68_spill] sm:$0xff] }
 0x5c4   :  { %13854 = vmatprep.subr.bf16.mxu1 %v13853_v56  ;;  %v12176_v56 = vld [vmem:[%s24017_s3 + $0x1098] sm:$0xff]  ;;  %v13733_v21 = vpack.c.bf16 %v12178_v23, %v12174_v60  ;;  %v12194_v40 = vld [vmem:[%s24017_s3 + $0x1128] sm:$0xff] }
 0x5c5   :  { %8391 = vmatmul.mubr.f32.vlgmr.msra.gmra.mrb[112].mxu0 %v24272_v38 }
 0x5c6   :  { %8689 = vmatmul.mubr.f32.vlgmr.msra.gmra.mrb[124].mxu1 %v24272_v38  ;;  %8396 = vmatprep.mubr.f32.mxu0 %v24284_v19 }
 0x5c7   :  { %8694 = vmatprep.mubr.f32.mxu1 %v24284_v19  ;;  %13728 = vmatpush1.bf16.msra.mxu0 %v13727_v6  ;;  %v13861_v6 = vpack.c.bf16 %v12180_v58, %v12176_v56  ;;  %v12181_v19 = vld [vmem:[%s24017_s3 + $0x10c0] sm:$0xff]  ;;  %v12183_v58 = vld [vmem:[%s24017_s3 + $0x10d0] sm:$0xff] }
 0x5c8   :  { %13856 = vmatpush1.bf16.msra.mxu1 %v13855_v36  ;;  %13730 = vmatprep.subr.bf16.mxu0 %v13729_v37  ;;  %v12179_v36 = vld [vmem:[%s24017_s3 + $0x10b0] sm:$0xff]  ;;  %v12182_v37 = vld [vmem:[%s24017_s3 + $0x10c8] sm:$0xff]  ;;  %v12185_v56 = vld [vmem:[%s24017_s3 + $0x10e0] sm:$0xff] }
 0x5c9   :  { %8397 = vmatmul.mubr.f32.gmra.mrb[114].mxu0 %v24285_v14  ;;  %13858 = vmatprep.subr.bf16.mxu1 %v13857_v7  ;;  %v12188_v7 = vld [vmem:[%s24017_s3 + $0x10f8] sm:$0xff]  ;;  %v13863_v60 = vpack.c.bf16 %v12179_v36, %v12175_v57  ;;  %v13737_v23 = vpack.c.bf16 %v12186_v8, %v12182_v37  ;;  %v12189_v37 = vld [vmem:[%s24017_s3 + $0x1100] sm:$0xff] }
 0x5ca   :  { %8695 = vmatmul.mubr.f32.gmra.mrb[126].mxu1 %v24285_v14  ;;  %8402 = vmatprep.mubr.f32.mxu0 %v24286_v47  ;;  %v12196_v57 = vld [vmem:[%s24017_s3 + $0x1138] sm:$0xff]  ;;  %v13739_v14 = vpack.c.bf16 %v12185_v56, %v12181_v19  ;;  %v12193_v8 = vld [vmem:[%s24017_s3 + $0x1120] sm:$0xff]  ;;  %v12202_v19 = vld [vmem:[%s24017_s3 + $0x1168] sm:$0xff] }
 0x5cb   :  { %8700 = vmatprep.mubr.f32.mxu1 %v24286_v47  ;;  %13732 = vmatpush1.bf16.msra.mxu0 %v13731_v51  ;;  %v13865_v51 = vpack.c.bf16 %v12188_v7, %v12184_v11  ;;  %v12191_v11 = vld [vmem:[%s24017_s3 + $0x1110] sm:$0xff]  ;;  %v24287_v7 = vld [vmem:[#allocation16_spill] sm:$0xff]  ;;  %v24288_v56 = vld [vmem:[#allocation17_spill] sm:$0xff] }
 0x5cc   :  { %13860 = vmatpush1.bf16.msra.mxu1 %v13859_v34  ;;  %13734 = vmatprep.subr.bf16.mxu0 %v13733_v21  ;;  %v12187_v34 = vld [vmem:[%s24017_s3 + $0x10f0] sm:$0xff]  ;;  %v12190_v21 = vld [vmem:[%s24017_s3 + $0x1108] sm:$0xff] }
 0x5cd   :  { %8403 = vmatmul.mubr.f32.gmra.mrb[116].mxu0 %v21043_v27  ;;  %13862 = vmatprep.subr.bf16.mxu1 %v13861_v6  ;;  %v13867_v6 = vpack.c.bf16 %v12187_v34, %v12183_v58  ;;  %v13741_v36 = vpack.c.bf16 %v12194_v40, %v12190_v21  ;;  %v12200_v58 = vld [vmem:[%s24017_s3 + $0x1158] sm:$0xff]  ;;  %v13743_v34 = vpack.c.bf16 %v12193_v8, %v12189_v37  ;;  %v12210_v37 = vld [vmem:[%s24017_s3 + $0x11a8] sm:$0xff] }
 0x5ce   :  { %8701 = vmatmul.mubr.f32.gmra.mrb[128].mxu1 %v21043_v27  ;;  %8408 = vmatprep.mubr.f32.mxu0 %v21067_v18  ;;  %v12208_v8 = vld [vmem:[%s24017_s3 + $0x1198] sm:$0xff] }
 0x5cf   :  { %8706 = vmatprep.mubr.f32.mxu1 %v21067_v18  ;;  %13736 = vmatpush1.bf16.msra.mxu0 %v13735_v26  ;;  %v13869_v26 = vpack.c.bf16 %v12196_v57, %v12192_v5  ;;  %v12197_v5 = vld [vmem:[%s24017_s3 + $0x1140] sm:$0xff] }
 0x5d0   :  { %13864 = vmatpush1.bf16.msra.mxu1 %v13863_v60  ;;  %13738 = vmatprep.subr.bf16.mxu0 %v13737_v23  ;;  %v12195_v60 = vld [vmem:[%s24017_s3 + $0x1130] sm:$0xff]  ;;  %v12198_v23 = vld [vmem:[%s24017_s3 + $0x1148] sm:$0xff]  ;;  %v12201_v57 = vld [vmem:[%s24017_s3 + $0x1160] sm:$0xff] }
 0x5d1   :  { %8409 = vmatmul.mubr.f32.gmra.mrb[118].mxu0 %v24287_v7  ;;  %13866 = vmatprep.subr.bf16.mxu1 %v13865_v51  ;;  %v12204_v51 = vld [vmem:[%s24017_s3 + $0x1178] sm:$0xff]  ;;  %v13871_v21 = vpack.c.bf16 %v12195_v60, %v12191_v11  ;;  %v13745_v40 = vpack.c.bf16 %v12202_v19, %v12198_v23  ;;  %v12205_v19 = vld [vmem:[%s24017_s3 + $0x1180] sm:$0xff] }
 0x5d2   :  { %8707 = vmatmul.mubr.f32.gmra.mrb[130].mxu1 %v24287_v7  ;;  %8414 = vmatprep.mubr.f32.mxu0 %v24288_v56  ;;  %v12212_v11 = vld [vmem:[%s24017_s3 + $0x11b8] sm:$0xff] }
 0x5d3   :  { %8712 = vmatprep.mubr.f32.mxu1 %v24288_v56  ;;  %13740 = vmatpush1.bf16.msra.mxu0 %v13739_v14  ;;  %v13873_v14 = vpack.c.bf16 %v12204_v51, %v12200_v58  ;;  %v12209_v58 = vld [vmem:[%s24017_s3 + $0x11a0] sm:$0xff]  ;;  %v12207_v51 = vld [vmem:[%s24017_s3 + $0x1190] sm:$0xff] }
 0x5d4   :  { %13868 = vmatpush1.bf16.msra.mxu1 %v13867_v6  ;;  %13742 = vmatprep.subr.bf16.mxu0 %v13741_v36  ;;  %v12203_v6 = vld [vmem:[%s24017_s3 + $0x1170] sm:$0xff]  ;;  %v12206_v36 = vld [vmem:[%s24017_s3 + $0x1188] sm:$0xff] }
 0x5d5   :  { %8415 = vmatmul.mubr.f32.gmra.mrb[120].mxu0 %v21151_v20  ;;  %13870 = vmatprep.subr.bf16.mxu1 %v13869_v26  ;;  %v13747_v26 = vpack.c.bf16 %v12201_v57, %v12197_v5  ;;  %v13875_v60 = vpack.c.bf16 %v12203_v6, %v12199_v22  ;;  %v13749_v23 = vpack.c.bf16 %v12210_v37, %v12206_v36  ;;  %v12211_v22 = vld [vmem:[%s24017_s3 + $0x11b0] sm:$0xff]  ;;  %v24290_v5 = vld [vmem:[#allocation10_spill] sm:$0xff]  ;;  %v12216_v57 = vld [vmem:[%s24017_s3 + $0x11d8] sm:$0xff] }
 0x5d6   :  { %8713 = vmatmul.mubr.f32.gmra.mrb[132].mxu1 %v21151_v20  ;;  %8420 = vmatprep.mubr.f32.mxu0 %v21175_v4  ;;  %v13751_v6 = vpack.c.bf16 %v12209_v58, %v12205_v19  ;;  %v13879_v36 = vpack.c.bf16 %v12211_v22, %v12207_v51  ;;  %v12226_v19 = vld [vmem:[%s24017_s3 + $0x1228] sm:$0xff]  ;;  %v12224_v58 = vld [vmem:[%s24017_s3 + $0x1218] sm:$0xff] }
 0x5d7   :  { %8718 = vmatprep.mubr.f32.mxu1 %v21175_v4  ;;  %13744 = vmatpush1.bf16.msra.mxu0 %v13743_v34  ;;  %v13877_v34 = vpack.c.bf16 %v12212_v11, %v12208_v8  ;;  %v12213_v8 = vld [vmem:[%s24017_s3 + $0x11c0] sm:$0xff]  ;;  %v12228_v51 = vld [vmem:[%s24017_s3 + $0x1238] sm:$0xff] }
 0x5d8   :  { %13872 = vmatpush1.bf16.msra.mxu1 %v13871_v21  ;;  %13746 = vmatprep.subr.bf16.mxu0 %v13745_v40  ;;  %v12214_v21 = vld [vmem:[%s24017_s3 + $0x11c8] sm:$0xff]  ;;  %v12217_v11 = vld [vmem:[%s24017_s3 + $0x11e0] sm:$0xff] }
 0x5d9   :  { %8421 = vmatmul.mubr.f32.gmra.mrb[122].mxu0 %v24289_v35  ;;  %13874 = vmatprep.subr.bf16.mxu1 %v13873_v14  ;;  %v12218_v40 = vld [vmem:[%s24017_s3 + $0x11e8] sm:$0xff]  ;;  %v12220_v14 = vld [vmem:[%s24017_s3 + $0x11f8] sm:$0xff] }
 0x5da   :  { %8719 = vmatmul.mubr.f32.gmra.mrb[134].mxu1 %v24289_v35  ;;  %8426 = vmatprep.mubr.f32.mxu0 %v24290_v5  ;;  %v13753_v37 = vpack.c.bf16 %v12218_v40, %v12214_v21  ;;  %v12215_v35 = vld [vmem:[%s24017_s3 + $0x11d0] sm:$0xff]  ;;  %v12221_v40 = vld [vmem:[%s24017_s3 + $0x1200] sm:$0xff] }
 0x5db   :  { %8724 = vmatprep.mubr.f32.mxu1 %v24290_v5  ;;  %13748 = vmatpush1.bf16.msra.mxu0 %v13747_v26  ;;  %v13881_v26 = vpack.c.bf16 %v12220_v14, %v12216_v57  ;;  %v12225_v57 = vld [vmem:[%s24017_s3 + $0x1220] sm:$0xff]  ;;  %v12223_v14 = vld [vmem:[%s24017_s3 + $0x1210] sm:$0xff] }
 0x5dc   :  { %13876 = vmatpush1.bf16.msra.mxu1 %v13875_v60  ;;  %13750 = vmatprep.subr.bf16.mxu0 %v13749_v23  ;;  %v12219_v60 = vld [vmem:[%s24017_s3 + $0x11f0] sm:$0xff]  ;;  %v12222_v23 = vld [vmem:[%s24017_s3 + $0x1208] sm:$0xff] }
 0x5dd   :  { %8427 = vmatmul.mubr.f32.gmra.mrb[124].mxu0 %v21259_v63  ;;  %13878 = vmatprep.subr.bf16.mxu1 %v13877_v34  ;;  %v13755_v34 = vpack.c.bf16 %v12217_v11, %v12213_v8  ;;  %v13883_v22 = vpack.c.bf16 %v12219_v60, %v12215_v35  ;;  %v13757_v21 = vpack.c.bf16 %v12226_v19, %v12222_v23  ;;  %v12227_v35 = vld [vmem:[%s24017_s3 + $0x1230] sm:$0xff]  ;;  %v24292_v8 = vld [vmem:[#allocation21_spill] sm:$0xff]  ;;  %v12232_v11 = vld [vmem:[%s24017_s3 + $0x1258] sm:$0xff] }
 0x5de   :  { %8725 = vmatmul.mubr.f32.gmra.mrb[136].mxu1 %v21259_v63  ;;  %8432 = vmatprep.mubr.f32.mxu0 %v21283_v12  ;;  %v24291_v63 = vld [vmem:[#allocation20_spill] sm:$0xff]  ;;  %v13759_v60 = vpack.c.bf16 %v12225_v57, %v12221_v40  ;;  %v13887_v23 = vpack.c.bf16 %v12227_v35, %v12223_v14  ;;  %v12242_v40 = vld [vmem:[%s24017_s3 + $0x12a8] sm:$0xff] }
 0x5df   :  { %8730 = vmatprep.mubr.f32.mxu1 %v21283_v12  ;;  %13752 = vmatpush1.bf16.msra.mxu0 %v13751_v6  ;;  %v13885_v6 = vpack.c.bf16 %v12228_v51, %v12224_v58  ;;  %v12229_v58 = vld [vmem:[%s24017_s3 + $0x1240] sm:$0xff]  ;;  %v12240_v57 = vld [vmem:[%s24017_s3 + $0x1298] sm:$0xff] }
 0x5e0   :  { %13880 = vmatpush1.bf16.msra.mxu1 %v13879_v36  ;;  %13754 = vmatprep.subr.bf16.mxu0 %v13753_v37  ;;  %v12230_v36 = vld [vmem:[%s24017_s3 + $0x1248] sm:$0xff]  ;;  %v12233_v51 = vld [vmem:[%s24017_s3 + $0x1260] sm:$0xff]  ;;  %v12244_v14 = vld [vmem:[%s24017_s3 + $0x12b8] sm:$0xff] }
 0x5e1   :  { %8433 = vmatmul.mubr.f32.gmra.mrb[126].mxu0 %v24291_v63  ;;  %13882 = vmatprep.subr.bf16.mxu1 %v13881_v26  ;;  %v12234_v37 = vld [vmem:[%s24017_s3 + $0x1268] sm:$0xff]  ;;  %v12236_v26 = vld [vmem:[%s24017_s3 + $0x1278] sm:$0xff] }
 0x5e2   :  { %8731 = vmatmul.mubr.f32.gmra.mrb[138].mxu1 %v24291_v63  ;;  %8438 = vmatprep.mubr.f32.mxu0 %v24292_v8  ;;  %v13761_v19 = vpack.c.bf16 %v12234_v37, %v12230_v36  ;;  %v12231_v63 = vld [vmem:[%s24017_s3 + $0x1250] sm:$0xff]  ;;  %v12237_v37 = vld [vmem:[%s24017_s3 + $0x1280] sm:$0xff] }
 0x5e3   :  { %8736 = vmatprep.mubr.f32.mxu1 %v24292_v8  ;;  %13756 = vmatpush1.bf16.msra.mxu0 %v13755_v34  ;;  %v13889_v34 = vpack.c.bf16 %v12236_v26, %v12232_v11  ;;  %v12241_v11 = vld [vmem:[%s24017_s3 + $0x12a0] sm:$0xff]  ;;  %v12239_v26 = vld [vmem:[%s24017_s3 + $0x1290] sm:$0xff] }
 0x5e4   :  { %13884 = vmatpush1.bf16.msra.mxu1 %v13883_v22  ;;  %13758 = vmatprep.subr.bf16.mxu0 %v13757_v21  ;;  %v12235_v22 = vld [vmem:[%s24017_s3 + $0x1270] sm:$0xff]  ;;  %v12238_v21 = vld [vmem:[%s24017_s3 + $0x1288] sm:$0xff] }
 0x5e5   :  { %8439 = vmatmul.mubr.f32.gmra.mrb[128].mxu0 %v21365_v45  ;;  %13886 = vmatprep.subr.bf16.mxu1 %v13885_v6  ;;  %v13763_v6 = vpack.c.bf16 %v12233_v51, %v12229_v58  ;;  %v13891_v35 = vpack.c.bf16 %v12235_v22, %v12231_v63  ;;  %v13765_v36 = vpack.c.bf16 %v12242_v40, %v12238_v21  ;;  %v12243_v63 = vld [vmem:[%s24017_s3 + $0x12b0] sm:$0xff]  ;;  %v12248_v58 = vld [vmem:[%s24017_s3 + $0x12d8] sm:$0xff]  ;;  %v12245_v40 = vld [vmem:[%s24017_s3 + $0x12c0] sm:$0xff] }
 0x5e6   :  { %8737 = vmatmul.mubr.f32.gmra.mrb[140].mxu1 %v21365_v45  ;;  %8444 = vmatprep.mubr.f32.mxu0 %v21387_v25  ;;  %v12252_v51 = vld [vmem:[%s24017_s3 + $0x12f8] sm:$0xff]  ;;  %v13895_v22 = vpack.c.bf16 %v12243_v63, %v12239_v26 }
 0x5e7   :  { %8742 = vmatprep.mubr.f32.mxu1 %v21387_v25  ;;  %13760 = vmatpush1.bf16.msra.mxu0 %v13759_v60  ;;  %v13893_v60 = vpack.c.bf16 %v12244_v14, %v12240_v57  ;;  %v12249_v57 = vld [vmem:[%s24017_s3 + $0x12e0] sm:$0xff]  ;;  %v12247_v14 = vld [vmem:[%s24017_s3 + $0x12d0] sm:$0xff]  ;;  %v12260_v26 = vld [vmem:[%s24017_s3 + $0x1338] sm:$0xff] }
 0x5e8   :  { %13888 = vmatpush1.bf16.msra.mxu1 %v13887_v23  ;;  %13762 = vmatprep.subr.bf16.mxu0 %v13761_v19  ;;  %v12246_v23 = vld [vmem:[%s24017_s3 + $0x12c8] sm:$0xff] }
 0x5e9   :  { %8445 = vmatmul.mubr.f32.gmra.mrb[130].mxu0 %v21401_v55  ;;  %13890 = vmatprep.subr.bf16.mxu1 %v13889_v34  ;;  %v12250_v19 = vld [vmem:[%s24017_s3 + $0x12e8] sm:$0xff]  ;;  %v13767_v34 = vpack.c.bf16 %v12241_v11, %v12237_v37  ;;  %v12256_v11 = vld [vmem:[%s24017_s3 + $0x1318] sm:$0xff] }
 0x5ea   :  { %8743 = vmatmul.mubr.f32.gmra.mrb[142].mxu1 %v21401_v55  ;;  %8450 = vmatprep.mubr.f32.mxu0 %v21429_v62  ;;  %v13769_v21 = vpack.c.bf16 %v12250_v19, %v12246_v23  ;;  %v12258_v37 = vld [vmem:[%s24017_s3 + $0x1328] sm:$0xff]  ;;  %v12253_v19 = vld [vmem:[%s24017_s3 + $0x1300] sm:$0xff] }
 0x5eb   :  { %8748 = vmatprep.mubr.f32.mxu1 %v21429_v62  ;;  %13764 = vmatpush1.bf16.msra.mxu0 %v13763_v6  ;;  %v13897_v6 = vpack.c.bf16 %v12252_v51, %v12248_v58  ;;  %v12257_v58 = vld [vmem:[%s24017_s3 + $0x1320] sm:$0xff]  ;;  %v12255_v51 = vld [vmem:[%s24017_s3 + $0x1310] sm:$0xff] }
 0x5ec   :  { %13892 = vmatpush1.bf16.msra.mxu1 %v13891_v35  ;;  %13766 = vmatprep.subr.bf16.mxu0 %v13765_v36  ;;  %v12251_v35 = vld [vmem:[%s24017_s3 + $0x12f0] sm:$0xff]  ;;  %v12254_v36 = vld [vmem:[%s24017_s3 + $0x1308] sm:$0xff] }
 0x5ed   :  { %8451 = vmatmul.mubr.f32.gmra.mrb[132].mxu0 %v21445_v17  ;;  %13894 = vmatprep.subr.bf16.mxu1 %v13893_v60  ;;  %v13771_v60 = vpack.c.bf16 %v12249_v57, %v12245_v40  ;;  %v13899_v63 = vpack.c.bf16 %v12251_v35, %v12247_v14  ;;  %v13773_v23 = vpack.c.bf16 %v12258_v37, %v12254_v36  ;;  %v12266_v40 = vld [vmem:[%s24017_s3 + $0x1368] sm:$0xff]  ;;  %v12264_v57 = vld [vmem:[%s24017_s3 + $0x1358] sm:$0xff]  ;;  %v12261_v37 = vld [vmem:[%s24017_s3 + $0x1340] sm:$0xff] }
 0x5ee   :  { %8749 = vmatmul.mubr.f32.gmra.mrb[144].mxu1 %v21445_v17  ;;  %8456 = vmatprep.mubr.f32.mxu0 %v21466_v16  ;;  %v12268_v14 = vld [vmem:[%s24017_s3 + $0x1378] sm:$0xff] }
 0x5ef   :  { %8754 = vmatprep.mubr.f32.mxu1 %v21466_v16  ;;  %13768 = vmatpush1.bf16.msra.mxu0 %v13767_v34  ;;  %v13901_v34 = vpack.c.bf16 %v12260_v26, %v12256_v11  ;;  %v12265_v11 = vld [vmem:[%s24017_s3 + $0x1360] sm:$0xff]  ;;  %v12263_v26 = vld [vmem:[%s24017_s3 + $0x1350] sm:$0xff] }
 0x5f0   :  { %13896 = vmatpush1.bf16.msra.mxu1 %v13895_v22  ;;  %13770 = vmatprep.subr.bf16.mxu0 %v13769_v21  ;;  %v12259_v22 = vld [vmem:[%s24017_s3 + $0x1330] sm:$0xff]  ;;  %v12262_v21 = vld [vmem:[%s24017_s3 + $0x1348] sm:$0xff] }
 0x5f1   :  { %8457 = vmatmul.mubr.f32.gmra.mrb[134].mxu0 %v21483_v50  ;;  %13898 = vmatprep.subr.bf16.mxu1 %v13897_v6  ;;  %v13775_v6 = vpack.c.bf16 %v12257_v58, %v12253_v19  ;;  %v13903_v35 = vpack.c.bf16 %v12259_v22, %v12255_v51  ;;  %v13777_v36 = vpack.c.bf16 %v12266_v40, %v12262_v21  ;;  %v12274_v19 = vld [vmem:[%s24017_s3 + $0x13a8] sm:$0xff]  ;;  %v12272_v58 = vld [vmem:[%s24017_s3 + $0x1398] sm:$0xff]  ;;  %v12269_v40 = vld [vmem:[%s24017_s3 + $0x1380] sm:$0xff] }
 0x5f2   :  { %8755 = vmatmul.mubr.f32.gmra.mrb[146].mxu1 %v21483_v50  ;;  %8462 = vmatprep.mubr.f32.mxu0 %v21502_v28  ;;  %v12276_v51 = vld [vmem:[%s24017_s3 + $0x13b8] sm:$0xff] }
 0x5f3   :  { %8760 = vmatprep.mubr.f32.mxu1 %v21502_v28  ;;  %13772 = vmatpush1.bf16.msra.mxu0 %v13771_v60  ;;  %v13905_v60 = vpack.c.bf16 %v12268_v14, %v12264_v57  ;;  %v12273_v57 = vld [vmem:[%s24017_s3 + $0x13a0] sm:$0xff]  ;;  %v12271_v14 = vld [vmem:[%s24017_s3 + $0x1390] sm:$0xff] }
 0x5f4   :  { %13900 = vmatpush1.bf16.msra.mxu1 %v13899_v63  ;;  %13774 = vmatprep.subr.bf16.mxu0 %v13773_v23  ;;  %v12267_v63 = vld [vmem:[%s24017_s3 + $0x1370] sm:$0xff]  ;;  %v12270_v23 = vld [vmem:[%s24017_s3 + $0x1388] sm:$0xff] }
 0x5f5   :  { %8463 = vmatmul.mubr.f32.gmra.mrb[136].mxu0 %v21519_v15  ;;  %13902 = vmatprep.subr.bf16.mxu1 %v13901_v34  ;;  %v13779_v34 = vpack.c.bf16 %v12265_v11, %v12261_v37  ;;  %v13907_v22 = vpack.c.bf16 %v12267_v63, %v12263_v26  ;;  %v13781_v21 = vpack.c.bf16 %v12274_v19, %v12270_v23  ;;  %v12282_v37 = vld [vmem:[%s24017_s3 + $0x13e8] sm:$0xff]  ;;  %v12280_v11 = vld [vmem:[%s24017_s3 + $0x13d8] sm:$0xff]  ;;  %v12277_v19 = vld [vmem:[%s24017_s3 + $0x13c0] sm:$0xff] }
 0x5f6   :  { %8761 = vmatmul.mubr.f32.gmra.mrb[148].mxu1 %v21519_v15  ;;  %8468 = vmatprep.mubr.f32.mxu0 %v21536_v13  ;;  %v12284_v26 = vld [vmem:[%s24017_s3 + $0x13f8] sm:$0xff] }
 0x5f7   :  { %8766 = vmatprep.mubr.f32.mxu1 %v21536_v13  ;;  %13776 = vmatpush1.bf16.msra.mxu0 %v13775_v6  ;;  %v13909_v6 = vpack.c.bf16 %v12276_v51, %v12272_v58  ;;  %v12281_v58 = vld [vmem:[%s24017_s3 + $0x13e0] sm:$0xff]  ;;  %v12279_v51 = vld [vmem:[%s24017_s3 + $0x13d0] sm:$0xff] }
 0x5f8   :  { %13904 = vmatpush1.bf16.msra.mxu1 %v13903_v35  ;;  %13778 = vmatprep.subr.bf16.mxu0 %v13777_v36  ;;  %v12275_v35 = vld [vmem:[%s24017_s3 + $0x13b0] sm:$0xff]  ;;  %v12278_v36 = vld [vmem:[%s24017_s3 + $0x13c8] sm:$0xff] }
 0x5f9   :  { %8469 = vmatmul.mubr.f32.gmra.mrb[138].mxu0 %v21556_v32  ;;  %13906 = vmatprep.subr.bf16.mxu1 %v13905_v60  ;;  %v13783_v60 = vpack.c.bf16 %v12273_v57, %v12269_v40  ;;  %v13911_v63 = vpack.c.bf16 %v12275_v35, %v12271_v14  ;;  %v13785_v23 = vpack.c.bf16 %v12282_v37, %v12278_v36  ;;  %v12288_v40 = vld [vmem:[%s24017_s3 + $0x1418] sm:$0xff]  ;;  %v12285_v37 = vld [vmem:[%s24017_s3 + $0x1400] sm:$0xff] }
 0x5fa   :  { %8767 = vmatmul.mubr.f32.gmra.mrb[150].mxu1 %v21556_v32  ;;  %9150 = vmatprep.mubr.f32.mxu0 %v24275_v54  ;;  %v12292_v57 = vld [vmem:[%s24017_s3 + $0x1438] sm:$0xff]  ;;  %v13787_v14 = vpack.c.bf16 %v12281_v58, %v12277_v19 }
 0x5fb   :  { %13780 = vmatpush1.bf16.msra.mxu0 %v13779_v34  ;;  %9448 = vmatprep.mubr.f32.mxu1 %v24275_v54  ;;  %v13913_v34 = vpack.c.bf16 %v12284_v26, %v12280_v11  ;;  %v12283_v54 = vld [vmem:[%s24017_s3 + $0x13f0] sm:$0xff]  ;;  %v13917_v36 = vpack.c.bf16 %v12292_v57, %v12288_v40  ;;  %v12289_v11 = vld [vmem:[%s24017_s3 + $0x1420] sm:$0xff]  ;;  %v12296_v19 = vld [vmem:[%s24017_s3 + $0x1458] sm:$0xff] }
 0x5fc   :  { %13908 = vmatpush1.bf16.msra.mxu1 %v13907_v22  ;;  %13782 = vmatprep.subr.bf16.mxu0 %v13781_v21  ;;  %v12286_v22 = vld [vmem:[%s24017_s3 + $0x1408] sm:$0xff]  ;;  %v12287_v26 = vld [vmem:[%s24017_s3 + $0x1410] sm:$0xff]  ;;  %v12300_v58 = vld [vmem:[%s24017_s3 + $0x1478] sm:$0xff] }
 0x5fd   :  { %13910 = vmatprep.subr.bf16.mxu1 %v13909_v6  ;;  %v12290_v21 = vld [vmem:[%s24017_s3 + $0x1428] sm:$0xff]  ;;  %v13915_v6 = vpack.c.bf16 %v12283_v54, %v12279_v51  ;;  %v13791_v51 = vpack.c.bf16 %v12289_v11, %v12285_v37  ;;  %v12295_v40 = vld [vmem:[%s24017_s3 + $0x1450] sm:$0xff]  ;;  %v13921_v57 = vpack.c.bf16 %v12300_v58, %v12296_v19  ;;  %v12308_v37 = vld [vmem:[%s24017_s3 + $0x14b8] sm:$0xff] }
 0x5fe   :  { %v13789_v35 = vpack.c.bf16 %v12290_v21, %v12286_v22  ;;  %v12293_v22 = vld [vmem:[%s24017_s3 + $0x1440] sm:$0xff]  ;;  %v12307_v19 = vld [vmem:[%s24017_s3 + $0x14b0] sm:$0xff]  ;;  %v12310_v58 = vld [vmem:[%s24017_s3 + $0x14c8] sm:$0xff] }
 0x5ff   :  { %13784 = vmatpush1.bf16.msra.mxu0 %v13783_v60  ;;  %v12291_v60 = vld [vmem:[%s24017_s3 + $0x1430] sm:$0xff]  ;;  %v12297_v21 = vld [vmem:[%s24017_s3 + $0x1460] sm:$0xff] }
 0x600   :  { %13912 = vmatpush1.bf16.msra.mxu1 %v13911_v63  ;;  %13786 = vmatprep.subr.bf16.mxu0 %v13785_v23  ;;  %v12294_v63 = vld [vmem:[%s24017_s3 + $0x1448] sm:$0xff]  ;;  %v13795_v11 = vpack.c.bf16 %v12297_v21, %v12293_v22 }
 0x601   :  { %13914 = vmatprep.subr.bf16.mxu1 %v13913_v34  ;;  %v12298_v23 = vld [vmem:[%s24017_s3 + $0x1468] sm:$0xff]  ;;  %v13919_v34 = vpack.c.bf16 %v12291_v60, %v12287_v26 }
 0x602   :  { %v13793_v54 = vpack.c.bf16 %v12298_v23, %v12294_v63  ;;  %v12305_v63 = vld [vmem:[%s24017_s3 + $0x14a0] sm:$0xff]  ;;  %v12303_v23 = vld [vmem:[%s24017_s3 + $0x1490] sm:$0xff] }
 0x603   :  { %13788 = vmatpush1.bf16.msra.mxu0 %v13787_v14  ;;  %v12299_v14 = vld [vmem:[%s24017_s3 + $0x1470] sm:$0xff]  ;;  %v13927_v21 = vpack.c.bf16 %v12307_v19, %v12303_v23  ;;  %v12326_v19 = vld [vmem:[%s24017_s3 + $0x1548] sm:$0xff] }
 0x604   :  { %13916 = vmatpush1.bf16.msra.mxu1 %v13915_v6  ;;  %13790 = vmatprep.subr.bf16.mxu0 %v13789_v35  ;;  %v12302_v6 = vld [vmem:[%s24017_s3 + $0x1488] sm:$0xff]  ;;  %v13923_v26 = vpack.c.bf16 %v12299_v14, %v12295_v40  ;;  %v12311_v14 = vld [vmem:[%s24017_s3 + $0x14d0] sm:$0xff] }
 0x605   :  { %13918 = vmatprep.subr.bf16.mxu1 %v13917_v36  ;;  %v12306_v35 = vld [vmem:[%s24017_s3 + $0x14a8] sm:$0xff]  ;;  %v12304_v36 = vld [vmem:[%s24017_s3 + $0x1498] sm:$0xff]  ;;  %v12319_v23 = vld [vmem:[%s24017_s3 + $0x1510] sm:$0xff] }
 0x606   :  { %9151 = vmatmul.mubr.f32.vlgmr.msra.gmra.mrb[112].mxu0 %v24276_v42  ;;  %v13797_v60 = vpack.c.bf16 %v12306_v35, %v12302_v6  ;;  %v12315_v6 = vld [vmem:[%s24017_s3 + $0x14f0] sm:$0xff]  ;;  %v12318_v35 = vld [vmem:[%s24017_s3 + $0x1508] sm:$0xff] }
 0x607   :  { %9449 = vmatmul.mubr.f32.vlgmr.msra.gmra.mrb[124].mxu1 %v24276_v42  ;;  %9156 = vmatprep.mubr.f32.mxu0 %v24277_v46  ;;  %v12301_v42 = vld [vmem:[%s24017_s3 + $0x1480] sm:$0xff] }
 0x608   :  { %13792 = vmatpush1.bf16.msra.mxu0 %v13791_v51  ;;  %9454 = vmatprep.mubr.f32.mxu1 %v24277_v46  ;;  %v13925_v46 = vpack.c.bf16 %v12308_v37, %v12304_v36  ;;  %v12314_v51 = vld [vmem:[%s24017_s3 + $0x14e8] sm:$0xff]  ;;  %v13799_v22 = vpack.c.bf16 %v12305_v63, %v12301_v42  ;;  %v12320_v37 = vld [vmem:[%s24017_s3 + $0x1518] sm:$0xff]  ;;  %v12321_v63 = vld [vmem:[%s24017_s3 + $0x1520] sm:$0xff] }
 0x609   :  { %13920 = vmatpush1.bf16.msra.mxu1 %v13919_v34  ;;  %13794 = vmatprep.subr.bf16.mxu0 %v13793_v54  ;;  %v12312_v34 = vld [vmem:[%s24017_s3 + $0x14d8] sm:$0xff]  ;;  %v13801_v40 = vpack.c.bf16 %v12314_v51, %v12310_v58  ;;  %v12322_v36 = vld [vmem:[%s24017_s3 + $0x1528] sm:$0xff] }
 0x60a   :  { %9157 = vmatmul.mubr.f32.gmra.mrb[114].mxu0 %v24278_v24  ;;  %13922 = vmatprep.subr.bf16.mxu1 %v13921_v57  ;;  %v12316_v54 = vld [vmem:[%s24017_s3 + $0x14f8] sm:$0xff]  ;;  %v12313_v57 = vld [vmem:[%s24017_s3 + $0x14e0] sm:$0xff]  ;;  %v13805_v42 = vpack.c.bf16 %v12322_v36, %v12318_v35  ;;  %v12330_v58 = vld [vmem:[%s24017_s3 + $0x1568] sm:$0xff] }
 0x60b   :  { %9455 = vmatmul.mubr.f32.gmra.mrb[126].mxu1 %v24278_v24  ;;  %9162 = vmatprep.mubr.f32.mxu0 %v24279_v30  ;;  %v12309_v24 = vld [vmem:[%s24017_s3 + $0x14c0] sm:$0xff]  ;;  %v12328_v51 = vld [vmem:[%s24017_s3 + $0x1558] sm:$0xff] }
 0x60c   :  { %13796 = vmatpush1.bf16.msra.mxu0 %v13795_v11  ;;  %9460 = vmatprep.mubr.f32.mxu1 %v24279_v30  ;;  %v13929_v30 = vpack.c.bf16 %v12316_v54, %v12312_v34  ;;  %v12324_v11 = vld [vmem:[%s24017_s3 + $0x1538] sm:$0xff] }
 0x60d   :  { %13924 = vmatpush1.bf16.msra.mxu1 %v13923_v26  ;;  %13798 = vmatprep.subr.bf16.mxu0 %v13797_v60  ;;  %v13803_v26 = vpack.c.bf16 %v12313_v57, %v12309_v24  ;;  %v13931_v60 = vpack.c.bf16 %v12315_v6, %v12311_v14  ;;  %v12332_v34 = vld [vmem:[%s24017_s3 + $0x1578] sm:$0xff]  ;;  %v12327_v24 = vld [vmem:[%s24017_s3 + $0x1550] sm:$0xff]  ;;  %v12334_v14 = vld [vmem:[%s24017_s3 + $0x1588] sm:$0xff] }
 0x60e   :  { %9163 = vmatmul.mubr.f32.gmra.mrb[116].mxu0 %v24280_v3  ;;  %13926 = vmatprep.subr.bf16.mxu1 %v13925_v46  ;;  %v12323_v46 = vld [vmem:[%s24017_s3 + $0x1530] sm:$0xff]  ;;  %v12336_v6 = vld [vmem:[%s24017_s3 + $0x1598] sm:$0xff] }
 0x60f   :  { %9461 = vmatmul.mubr.f32.gmra.mrb[128].mxu1 %v24280_v3  ;;  %9168 = vmatprep.mubr.f32.mxu0 %v24281_v53  ;;  %v12317_v3 = vld [vmem:[%s24017_s3 + $0x1500] sm:$0xff]  ;;  %v12331_v57 = vld [vmem:[%s24017_s3 + $0x1570] sm:$0xff]  ;;  %v12340_v35 = vld [vmem:[%s24017_s3 + $0x15b8] sm:$0xff] }
 0x610   :  { %13800 = vmatpush1.bf16.msra.mxu0 %v13799_v22  ;;  %9466 = vmatprep.mubr.f32.mxu1 %v24281_v53  ;;  %v13933_v53 = vpack.c.bf16 %v12324_v11, %v12320_v37  ;;  %v13807_v54 = vpack.c.bf16 %v12321_v63, %v12317_v3  ;;  %v13935_v22 = vpack.c.bf16 %v12323_v46, %v12319_v23  ;;  %v12342_v3 = vld [vmem:[%s24017_s3 + $0x15c8] sm:$0xff]  ;;  %v12344_v23 = vld [vmem:[%s24017_s3 + $0x15d8] sm:$0xff] }
 0x611   :  { %13928 = vmatpush1.bf16.msra.mxu1 %v13927_v21  ;;  %13802 = vmatprep.subr.bf16.mxu0 %v13801_v40  ;;  %v13809_v21 = vpack.c.bf16 %v12330_v58, %v12326_v19  ;;  %v12329_v40 = vld [vmem:[%s24017_s3 + $0x1560] sm:$0xff]  ;;  %v13939_v37 = vpack.c.bf16 %v12331_v57, %v12327_v24  ;;  %v12346_v63 = vld [vmem:[%s24017_s3 + $0x15e8] sm:$0xff] }
 0x612   :  { %9169 = vmatmul.mubr.f32.gmra.mrb[118].mxu0 %v24282_v39  ;;  %13930 = vmatprep.subr.bf16.mxu1 %v13929_v30  ;;  %v12338_v30 = vld [vmem:[%s24017_s3 + $0x15a8] sm:$0xff]  ;;  %v13817_v58 = vpack.c.bf16 %v12346_v63, %v12342_v3  ;;  %v12363_v3 = vld [vmem:[%s24017_s3 + $0x1670] sm:$0xff] }
 0x613   :  { %9467 = vmatmul.mubr.f32.gmra.mrb[130].mxu1 %v24282_v39  ;;  %9174 = vmatprep.mubr.f32.mxu0 %v20488_v59  ;;  %v12325_v39 = vld [vmem:[%s24017_s3 + $0x1540] sm:$0xff]  ;;  %v13813_v11 = vpack.c.bf16 %v12338_v30, %v12334_v14  ;;  %v12351_v30 = vld [vmem:[%s24017_s3 + $0x1610] sm:$0xff]  ;;  %v12366_v63 = vld [vmem:[%s24017_s3 + $0x1688] sm:$0xff] }
 0x614   :  { %13804 = vmatpush1.bf16.msra.mxu0 %v13803_v26  ;;  %9472 = vmatprep.mubr.f32.mxu1 %v20488_v59  ;;  %v13937_v59 = vpack.c.bf16 %v12332_v34, %v12328_v51  ;;  %v13811_v36 = vpack.c.bf16 %v12329_v40, %v12325_v39  ;;  %v12337_v26 = vld [vmem:[%s24017_s3 + $0x15a0] sm:$0xff]  ;;  %v12343_v34 = vld [vmem:[%s24017_s3 + $0x15d0] sm:$0xff]  ;;  %v12352_v39 = vld [vmem:[%s24017_s3 + $0x1618] sm:$0xff] }
 0x615   :  { %13932 = vmatpush1.bf16.msra.mxu1 %v13931_v60  ;;  %13806 = vmatprep.subr.bf16.mxu0 %v13805_v42  ;;  %v12335_v60 = vld [vmem:[%s24017_s3 + $0x1590] sm:$0xff]  ;;  %v12345_v51 = vld [vmem:[%s24017_s3 + $0x15e0] sm:$0xff]  ;;  %v12356_v40 = vld [vmem:[%s24017_s3 + $0x1638] sm:$0xff] }
 0x616   :  { %9175 = vmatmul.mubr.f32.gmra.mrb[120].mxu0 %v20504_v49  ;;  %13934 = vmatprep.subr.bf16.mxu1 %v13933_v53  ;;  %v12339_v42 = vld [vmem:[%s24017_s3 + $0x15b0] sm:$0xff]  ;;  %v12348_v53 = vld [vmem:[%s24017_s3 + $0x15f8] sm:$0xff]  ;;  %v12353_v14 = vld [vmem:[%s24017_s3 + $0x1620] sm:$0xff] }
 0x617   :  { %9473 = vmatmul.mubr.f32.gmra.mrb[132].mxu1 %v20504_v49  ;;  %9180 = vmatprep.mubr.f32.mxu0 %v20600_v41  ;;  %v12333_v49 = vld [vmem:[%s24017_s3 + $0x1580] sm:$0xff]  ;;  %v13943_v19 = vpack.c.bf16 %v12339_v42, %v12335_v60  ;;  %v12359_v42 = vld [vmem:[%s24017_s3 + $0x1650] sm:$0xff] }
 0x618   :  { %13808 = vmatpush1.bf16.msra.mxu0 %v13807_v54  ;;  %9478 = vmatprep.mubr.f32.mxu1 %v20600_v41  ;;  %v13941_v41 = vpack.c.bf16 %v12340_v35, %v12336_v6  ;;  %v13815_v46 = vpack.c.bf16 %v12337_v26, %v12333_v49  ;;  %v12347_v54 = vld [vmem:[%s24017_s3 + $0x15f0] sm:$0xff]  ;;  %v12358_v35 = vld [vmem:[%s24017_s3 + $0x1648] sm:$0xff] }
 0x619   :  { %13936 = vmatpush1.bf16.msra.mxu1 %v13935_v22  ;;  %13810 = vmatprep.subr.bf16.mxu0 %v13809_v21  ;;  %v12350_v22 = vld [vmem:[%s24017_s3 + $0x1608] sm:$0xff]  ;;  %v12355_v6 = vld [vmem:[%s24017_s3 + $0x1630] sm:$0xff] }
 0x61a   :  { %9181 = vmatmul.mubr.f32.gmra.mrb[122].mxu0 %v20619_v0  ;;  %13938 = vmatprep.subr.bf16.mxu1 %v13937_v59  ;;  %v12354_v21 = vld [vmem:[%s24017_s3 + $0x1628] sm:$0xff]  ;;  %v13947_v59 = vpack.c.bf16 %v12347_v54, %v12343_v34  ;;  %v13951_v26 = vpack.c.bf16 %v12355_v6, %v12351_v30  ;;  %v12367_v34 = vld [vmem:[%s24017_s3 + $0x1690] sm:$0xff]  ;;  %v12384_v6 = vld [vmem:[%s24017_s3 + $0x1718] sm:$0xff] }
 0x61b   :  { %9479 = vmatmul.mubr.f32.gmra.mrb[134].mxu1 %v20619_v0  ;;  %9186 = vmatprep.mubr.f32.mxu0 %v20709_v48  ;;  %v12341_v0 = vld [vmem:[%s24017_s3 + $0x15c0] sm:$0xff]  ;;  %v13821_v57 = vpack.c.bf16 %v12354_v21, %v12350_v22  ;;  %v12374_v54 = vld [vmem:[%s24017_s3 + $0x16c8] sm:$0xff]  ;;  %v12376_v21 = vld [vmem:[%s24017_s3 + $0x16d8] sm:$0xff] }
 0x61c   :  { %13812 = vmatpush1.bf16.msra.mxu0 %v13811_v36  ;;  %9484 = vmatprep.mubr.f32.mxu1 %v20709_v48  ;;  %v13945_v48 = vpack.c.bf16 %v12348_v53, %v12344_v23  ;;  %v13819_v24 = vpack.c.bf16 %v12345_v51, %v12341_v0  ;;  %v12362_v36 = vld [vmem:[%s24017_s3 + $0x1668] sm:$0xff]  ;;  %v12368_v53 = vld [vmem:[%s24017_s3 + $0x1698] sm:$0xff]  ;;  %v12369_v51 = vld [vmem:[%s24017_s3 + $0x16a0] sm:$0xff] }
 0x61d   :  { %13940 = vmatpush1.bf16.msra.mxu1 %v13939_v37  ;;  %13814 = vmatprep.subr.bf16.mxu0 %v13813_v11  ;;  %v12360_v37 = vld [vmem:[%s24017_s3 + $0x1658] sm:$0xff]  ;;  %v13825_v60 = vpack.c.bf16 %v12362_v36, %v12358_v35  ;;  %v12370_v23 = vld [vmem:[%s24017_s3 + $0x16a8] sm:$0xff] }
 0x61e   :  { %9187 = vmatmul.mubr.f32.gmra.mrb[124].mxu0 %v20720_v2  ;;  %13942 = vmatprep.subr.bf16.mxu1 %v13941_v41  ;;  %v12364_v11 = vld [vmem:[%s24017_s3 + $0x1678] sm:$0xff]  ;;  %v12361_v41 = vld [vmem:[%s24017_s3 + $0x1660] sm:$0xff]  ;;  %v13829_v0 = vpack.c.bf16 %v12370_v23, %v12366_v63  ;;  %v12378_v22 = vld [vmem:[%s24017_s3 + $0x16e8] sm:$0xff] }
 0x61f   :  { %9485 = vmatmul.mubr.f32.gmra.mrb[136].mxu1 %v20720_v2  ;;  %9192 = vmatprep.mubr.f32.mxu0 %v20758_v61  ;;  %v12349_v2 = vld [vmem:[%s24017_s3 + $0x1600] sm:$0xff]  ;;  %v12382_v30 = vld [vmem:[%s24017_s3 + $0x1708] sm:$0xff]  ;;  %v12388_v35 = vld [vmem:[%s24017_s3 + $0x1738] sm:$0xff] }
 0x620   :  { %13816 = vmatpush1.bf16.msra.mxu0 %v13815_v46  ;;  %9490 = vmatprep.mubr.f32.mxu1 %v20758_v61  ;;  %v13949_v61 = vpack.c.bf16 %v12356_v40, %v12352_v39  ;;  %v13823_v49 = vpack.c.bf16 %v12353_v14, %v12349_v2  ;;  %v12372_v46 = vld [vmem:[%s24017_s3 + $0x16b8] sm:$0xff]  ;;  %v12375_v2 = vld [vmem:[%s24017_s3 + $0x16d0] sm:$0xff] }
 0x621   :  { %13944 = vmatpush1.bf16.msra.mxu1 %v13943_v19  ;;  %13818 = vmatprep.subr.bf16.mxu0 %v13817_v58  ;;  %v13955_v58 = vpack.c.bf16 %v12363_v3, %v12359_v42  ;;  %v12380_v39 = vld [vmem:[%s24017_s3 + $0x16f8] sm:$0xff]  ;;  %v12379_v14 = vld [vmem:[%s24017_s3 + $0x16f0] sm:$0xff] }
 0x622   :  { %9193 = vmatmul.mubr.f32.gmra.mrb[126].mxu0 %v20764_v52  ;;  %13946 = vmatprep.subr.bf16.mxu1 %v13945_v48  ;;  %v12371_v48 = vld [vmem:[%s24017_s3 + $0x16b0] sm:$0xff]  ;;  %v12396_v3 = vld [vmem:[%s24017_s3 + $0x1778] sm:$0xff] }
 0x623   :  { %9491 = vmatmul.mubr.f32.gmra.mrb[138].mxu1 %v20764_v52  ;;  %9198 = vmatprep.mubr.f32.mxu0 %v20796_v31  ;;  %v12357_v52 = vld [vmem:[%s24017_s3 + $0x1640] sm:$0xff]  ;;  %v24293_v42 = vld [vmem:[#allocation67_spill] sm:$0xff] }
 0x624   :  { %13820 = vmatpush1.bf16.msra.mxu0 %v13819_v24  ;;  %9496 = vmatprep.mubr.f32.mxu1 %v20796_v31  ;;  %v13953_v31 = vpack.c.bf16 %v12364_v11, %v12360_v37  ;;  %v13827_v19 = vpack.c.bf16 %v12361_v41, %v12357_v52  ;;  %v13959_v24 = vpack.c.bf16 %v12371_v48, %v12367_v34  ;;  %v12390_v52 = vld [vmem:[%s24017_s3 + $0x1748] sm:$0xff]  ;;  %v12404_v48 = vld [vmem:[%s24017_s3 + $0x17b8] sm:$0xff] }
 0x625   :  { %13948 = vmatpush1.bf16.msra.mxu1 %v13947_v59  ;;  %13822 = vmatprep.subr.bf16.mxu0 %v13821_v57  ;;  %v13833_v59 = vpack.c.bf16 %v12378_v22, %v12374_v54  ;;  %v12377_v57 = vld [vmem:[%s24017_s3 + $0x16e0] sm:$0xff]  ;;  %v13963_v37 = vpack.c.bf16 %v12379_v14, %v12375_v2  ;;  %v12394_v41 = vld [vmem:[%s24017_s3 + $0x1768] sm:$0xff]  ;;  %v12412_v14 = vld [vmem:[%s24017_s3 + $0x17f8] sm:$0xff] }
 0x626   :  { %9199 = vmatmul.mubr.f32.gmra.mrb[128].mxu0 %v20800_v33  ;;  %13950 = vmatprep.subr.bf16.mxu1 %v13949_v61  ;;  %v12386_v61 = vld [vmem:[%s24017_s3 + $0x1728] sm:$0xff] }
 0x627   :  { %9497 = vmatmul.mubr.f32.gmra.mrb[140].mxu1 %v20800_v33  ;;  %9204 = vmatprep.mubr.f32.mxu0 %v20832_v1  ;;  %v12365_v33 = vld [vmem:[%s24017_s3 + $0x1680] sm:$0xff]  ;;  %v13837_v11 = vpack.c.bf16 %v12386_v61, %v12382_v30  ;;  %v12402_v34 = vld [vmem:[%s24017_s3 + $0x17a8] sm:$0xff] }
 0x628   :  { %13824 = vmatpush1.bf16.msra.mxu0 %v13823_v49  ;;  %9502 = vmatprep.mubr.f32.mxu1 %v20832_v1  ;;  %v13957_v1 = vpack.c.bf16 %v12372_v46, %v12368_v53  ;;  %v13831_v40 = vpack.c.bf16 %v12369_v51, %v12365_v33  ;;  %v12385_v49 = vld [vmem:[%s24017_s3 + $0x1720] sm:$0xff]  ;;  %v13841_v53 = vpack.c.bf16 %v12394_v41, %v12390_v52  ;;  %v12395_v33 = vld [vmem:[%s24017_s3 + $0x1770] sm:$0xff]  ;;  %v12398_v51 = vld [vmem:[%s24017_s3 + $0x1788] sm:$0xff] }
 0x629   :  { %13952 = vmatpush1.bf16.msra.mxu1 %v13951_v26  ;;  %13826 = vmatprep.subr.bf16.mxu0 %v13825_v60  ;;  %v12383_v26 = vld [vmem:[%s24017_s3 + $0x1710] sm:$0xff]  ;;  %v12393_v46 = vld [vmem:[%s24017_s3 + $0x1760] sm:$0xff]  ;;  %v12410_v2 = vld [vmem:[%s24017_s3 + $0x17e8] sm:$0xff] }
 0x62a   :  { %9205 = vmatmul.mubr.f32.gmra.mrb[130].mxu0 %v20836_v43  ;;  %13954 = vmatprep.subr.bf16.mxu1 %v13953_v31  ;;  %v12387_v60 = vld [vmem:[%s24017_s3 + $0x1730] sm:$0xff]  ;;  %v12392_v31 = vld [vmem:[%s24017_s3 + $0x1758] sm:$0xff]  ;;  %v12413_v52 = vld [vmem:[%s24019_s5 + $0x200] sm:$0xff] }
 0x62b   :  { %9503 = vmatmul.mubr.f32.gmra.mrb[142].mxu1 %v20836_v43  ;;  %9210 = vmatprep.mubr.f32.mxu0 %v20868_v44  ;;  %v12373_v43 = vld [vmem:[%s24017_s3 + $0x16c0] sm:$0xff]  ;;  %v13967_v23 = vpack.c.bf16 %v12387_v60, %v12383_v26  ;;  %v12415_v41 = vld [vmem:[%s24019_s5 + $0x210] sm:$0xff] }
 0x62c   :  { %13828 = vmatpush1.bf16.msra.mxu0 %v13827_v19  ;;  %9508 = vmatprep.mubr.f32.mxu1 %v20868_v44  ;;  %v13961_v44 = vpack.c.bf16 %v12380_v39, %v12376_v21  ;;  %v13835_v36 = vpack.c.bf16 %v12377_v57, %v12373_v43  ;;  %v12391_v19 = vld [vmem:[%s24017_s3 + $0x1750] sm:$0xff]  ;;  %v13845_v21 = vpack.c.bf16 %v12402_v34, %v12398_v51  ;;  %v12397_v39 = vld [vmem:[%s24017_s3 + $0x1780] sm:$0xff]  ;;  %v12406_v57 = vld [vmem:[%s24017_s3 + $0x17c8] sm:$0xff] }
 0x62d   :  { %13956 = vmatpush1.bf16.msra.mxu1 %v13955_v58  ;;  %13830 = vmatprep.subr.bf16.mxu0 %v13829_v0  ;;  %v24294_v58 = vld [vmem:[#allocation15_spill] sm:$0xff]  ;;  %v13969_v0 = vpack.c.bf16 %v12396_v3, %v12392_v31  ;;  %v13971_v22 = vpack.c.bf16 %v12395_v33, %v12391_v19  ;;  %v12420_v31 = vld [vmem:[%s24019_s5 + $0x238] sm:$0xff]  ;;  %v13983_v3 = vpack.c.bf16 %v12415_v41, %v12413_v52 }
 0x62e   :  { %9211 = vmatmul.mubr.f32.gmra.mrb[132].mxu0 %v20872_v9  ;;  %13958 = vmatprep.subr.bf16.mxu1 %v13957_v1  ;;  %v12400_v1 = vld [vmem:[%s24017_s3 + $0x1798] sm:$0xff]  ;;  %v12403_v43 = vld [vmem:[%s24017_s3 + $0x17b0] sm:$0xff] }
 0x62f   :  { %9509 = vmatmul.mubr.f32.gmra.mrb[144].mxu1 %v20872_v9  ;;  %9216 = vmatprep.mubr.f32.mxu0 %v20902_v29  ;;  %v12381_v9 = vld [vmem:[%s24017_s3 + $0x1700] sm:$0xff]  ;;  %v12423_v33 = vld [vmem:[%s24019_s5 + $0x250] sm:$0xff] }
 0x630   :  { %13832 = vmatpush1.bf16.msra.mxu0 %v13831_v40  ;;  %9514 = vmatprep.mubr.f32.mxu1 %v20902_v29  ;;  %v13965_v29 = vpack.c.bf16 %v12388_v35, %v12384_v6  ;;  %v13839_v63 = vpack.c.bf16 %v12385_v49, %v12381_v9  ;;  %v12401_v40 = vld [vmem:[%s24017_s3 + $0x17a0] sm:$0xff]  ;;  %v13849_v6 = vpack.c.bf16 %v12410_v2, %v12406_v57  ;;  %v12414_v9 = vld [vmem:[%s24019_s5 + $0x208] sm:$0xff]  ;;  %v12416_v49 = vld [vmem:[%s24019_s5 + $0x218] sm:$0xff] }
 0x631   :  { %13960 = vmatpush1.bf16.msra.mxu1 %v13959_v24  ;;  %13834 = vmatprep.subr.bf16.mxu0 %v13833_v59  ;;  %v12399_v24 = vld [vmem:[%s24017_s3 + $0x1790] sm:$0xff]  ;;  %v13973_v59 = vpack.c.bf16 %v12404_v48, %v12400_v1  ;;  %v13847_v30 = vpack.c.bf16 %v12401_v40, %v12397_v39  ;;  %v12405_v35 = vld [vmem:[%s24017_s3 + $0x17c0] sm:$0xff]  ;;  %v13981_v60 = vpack.c.bf16 %v12416_v49, %v12414_v9  ;;  %v24295_v40 = vld [vmem:[#allocation18_spill] sm:$0xff] }
 0x632   :  { %9217 = vmatmul.mubr.f32.gmra.mrb[134].mxu0 %v24283_v10  ;;  %13962 = vmatprep.subr.bf16.mxu1 %v13961_v44  ;;  %v12408_v44 = vld [vmem:[%s24017_s3 + $0x17d8] sm:$0xff]  ;;  %v13975_v61 = vpack.c.bf16 %v12403_v43, %v12399_v24  ;;  %v12425_v1 = vld [vmem:[%s24019_s5 + $0x260] sm:$0xff]  ;;  %v12427_v48 = vld [vmem:[%s24019_s5 + $0x270] sm:$0xff] }
 0x633   :  { %9515 = vmatmul.mubr.f32.gmra.mrb[146].mxu1 %v24283_v10  ;;  %9222 = vmatprep.mubr.f32.mxu0 %v24293_v42  ;;  %v12389_v10 = vld [vmem:[%s24017_s3 + $0x1740] sm:$0xff]  ;;  %v12431_v39 = vld [vmem:[%s24019_s5 + $0x290] sm:$0xff]  ;;  %v12446_v49 = vld [vmem:[%s24019_s5 + $0x308] sm:$0xff] }
 0x634   :  { %13836 = vmatpush1.bf16.msra.mxu0 %v13835_v36  ;;  %9520 = vmatprep.mubr.f32.mxu1 %v24293_v42  ;;  %v13843_v54 = vpack.c.bf16 %v12393_v46, %v12389_v10  ;;  %v12409_v36 = vld [vmem:[%s24017_s3 + $0x17e0] sm:$0xff]  ;;  %v12418_v42 = vld [vmem:[%s24019_s5 + $0x228] sm:$0xff]  ;;  %v12424_v46 = vld [vmem:[%s24019_s5 + $0x258] sm:$0xff] }
 0x635   :  { %13964 = vmatpush1.bf16.msra.mxu1 %v13963_v37  ;;  %13838 = vmatprep.subr.bf16.mxu0 %v13837_v11  ;;  %v12407_v37 = vld [vmem:[%s24017_s3 + $0x17d0] sm:$0xff]  ;;  %v13977_v11 = vpack.c.bf16 %v12412_v14, %v12408_v44  ;;  %v13851_v26 = vpack.c.bf16 %v12409_v36, %v12405_v35  ;;  %v12422_v10 = vld [vmem:[%s24019_s5 + $0x248] sm:$0xff]  ;;  %v12433_v43 = vld [vmem:[%s24019_s5 + $0x2a0] sm:$0xff] }
 0x636   :  { %9223 = vmatmul.mubr.f32.gmra.mrb[136].mxu0 %v24294_v58  ;;  %13966 = vmatprep.subr.bf16.mxu1 %v13965_v29  ;;  %v12435_v57 = vld [vmem:[%s24019_s5 + $0x2b0] sm:$0xff]  ;;  %v12438_v44 = vld [vmem:[%s24019_s5 + $0x2c8] sm:$0xff]  ;;  %v24297_v35 = vld [vmem:[#allocation20_spill] sm:$0xff] }
 0x637   :  { %9521 = vmatmul.mubr.f32.gmra.mrb[148].mxu1 %v24294_v58  ;;  %9228 = vmatprep.mubr.f32.mxu0 %v24272_v38  ;;  %v13989_v58 = vpack.c.bf16 %v12424_v46, %v12422_v10  ;;  %v24296_v2 = vld [vmem:[#allocation19_spill] sm:$0xff]  ;;  %v14003_v14 = vpack.c.bf16 %v12435_v57, %v12433_v43  ;;  %v12442_v36 = vld [vmem:[%s24019_s5 + $0x2e8] sm:$0xff]  ;;  %v12473_v57 = vld [vmem:[%s24019_s5 + $0x3e0] sm:$0xff] }
 0x638   :  { %13840 = vmatpush1.bf16.msra.mxu0 %v13839_v63  ;;  %9526 = vmatprep.mubr.f32.mxu1 %v24272_v38  ;;  %v13985_v63 = vpack.c.bf16 %v12420_v31, %v12418_v42  ;;  %v12443_v9 = vld [vmem:[%s24019_s5 + $0x2f0] sm:$0xff]  ;;  %v12449_v31 = vld [vmem:[%s24019_s5 + $0x320] sm:$0xff] }
 0x639   :  { %13968 = vmatpush1.bf16.msra.mxu1 %v13967_v23  ;;  %13842 = vmatprep.subr.bf16.mxu0 %v13841_v53  ;;  %v12417_v23 = vld [vmem:[%s24019_s5 + $0x220] sm:$0xff]  ;;  %v12419_v53 = vld [vmem:[%s24019_s5 + $0x230] sm:$0xff] }
 0x63a   :  { %9229 = vmatmul.mubr.f32.gmra.mrb[138].mxu0 %v24272_v38  ;;  %13970 = vmatprep.subr.bf16.mxu1 %v13969_v0  ;;  %v13987_v19 = vpack.c.bf16 %v12419_v53, %v12417_v23  ;;  %v12421_v0 = vld [vmem:[%s24019_s5 + $0x240] sm:$0xff]  ;;  %v12447_v52 = vld [vmem:[%s24019_s5 + $0x310] sm:$0xff] }
 0x63b   :  { %9527 = vmatmul.mubr.f32.gmra.mrb[150].mxu1 %v24272_v38  ;;  %9299 = vmatprep.mubr.f32.mxu0 %v24286_v47  ;;  %v13991_v51 = vpack.c.bf16 %v12423_v33, %v12421_v0  ;;  %v12453_v53 = vld [vmem:[%s24019_s5 + $0x340] sm:$0xff]  ;;  %v12455_v10 = vld [vmem:[%s24019_s5 + $0x350] sm:$0xff] }
 0x63c   :  { %13844 = vmatpush1.bf16.msra.mxu0 %v13843_v54  ;;  %9597 = vmatprep.mubr.f32.mxu1 %v24286_v47  ;;  %v12411_v47 = vld [vmem:[%s24017_s3 + $0x17f0] sm:$0xff]  ;;  %v13995_v54 = vpack.c.bf16 %v12427_v48, %v12425_v1  ;;  %v14023_v46 = vpack.c.bf16 %v12455_v10, %v12453_v53  ;;  %v12468_v1 = vld [vmem:[%s24019_s5 + $0x3b8] sm:$0xff] }
 0x63d   :  { %13972 = vmatpush1.bf16.msra.mxu1 %v13971_v22  ;;  %13846 = vmatprep.subr.bf16.mxu0 %v13845_v21  ;;  %v13979_v29 = vpack.c.bf16 %v12411_v47, %v12407_v37  ;;  %v12429_v21 = vld [vmem:[%s24019_s5 + $0x280] sm:$0xff]  ;;  %v12459_v0 = vld [vmem:[%s24019_s5 + $0x370] sm:$0xff] }
 0x63e   :  { %13974 = vmatprep.subr.bf16.mxu1 %v13973_v59  ;;  %v13999_v24 = vpack.c.bf16 %v12431_v39, %v12429_v21  ;;  %v12441_v47 = vld [vmem:[%s24019_s5 + $0x2e0] sm:$0xff]  ;;  %v12472_v21 = vld [vmem:[%s24019_s5 + $0x3d8] sm:$0xff] }
 0x640   :  { %13848 = vmatpush1.bf16.msra.mxu0 %v13847_v30 }
 0x641   :  { %13976 = vmatpush1.bf16.msra.mxu1 %v13975_v61  ;;  %13850 = vmatprep.subr.bf16.mxu0 %v13849_v6  ;;  %v12437_v61 = vld [vmem:[%s24019_s5 + $0x2c0] sm:$0xff]  ;;  %v12439_v6 = vld [vmem:[%s24019_s5 + $0x2d0] sm:$0xff] }
 0x642   :  { %13978 = vmatprep.subr.bf16.mxu1 %v13977_v11  ;;  %v14007_v37 = vpack.c.bf16 %v12439_v6, %v12437_v61  ;;  %v9738_v61 = vld [vmem:[%s24020_s4] sm:$0xf]  ;;  %v24300_v6 = vld [vmem:[#allocation46_spill] sm:$0xff] }
 0x644   :  { %13852 = vmatpush1.bf16.msra.mxu0 %v13851_v26  ;;  %v14011_v26 = vpack.c.bf16 %v12443_v9, %v12441_v47 }
 0x645   :  { %13980 = vmatpush1.bf16.msra.mxu1 %v13979_v29  ;;  %13982 = vmatprep.subr.bf16.mxu0 %v13981_v60  ;;  %v12445_v60 = vld [vmem:[%s24019_s5 + $0x300] sm:$0xff] }
 0x646   :  { %v14015_v41 = vpack.c.bf16 %v12447_v52, %v12445_v60 }
 0x647   :  { %9300 = vmatmul.mubr.f32.vlgmr.msra.gmra.mrb[112].mxu0 %v21043_v27 }
 0x648   :  { %9598 = vmatmul.mubr.f32.vlgmr.msra.gmra.mrb[124].mxu1 %v21043_v27  ;;  %9305 = vmatprep.mubr.f32.mxu0 %v21067_v18  ;;  %v12426_v27 = vld [vmem:[%s24019_s5 + $0x268] sm:$0xff] }
 0x649   :  { %9603 = vmatprep.mubr.f32.mxu1 %v21067_v18  ;;  %13984 = vmatpush1.bf16.msra.mxu0 %v13983_v3  ;;  %v12428_v18 = vld [vmem:[%s24019_s5 + $0x278] sm:$0xff]  ;;  %v12451_v3 = vld [vmem:[%s24019_s5 + $0x330] sm:$0xff] }
 0x64a   :  { %13986 = vmatprep.subr.bf16.mxu0 %v13985_v63  ;;  %v13993_v34 = vpack.c.bf16 %v12428_v18, %v12426_v27  ;;  %v14019_v63 = vpack.c.bf16 %v12451_v3, %v12449_v31  ;;  %v12461_v18 = vld [vmem:[%s24019_s5 + $0x380] sm:$0xff] }
 0x64b   :  { %9306 = vmatmul.mubr.f32.gmra.mrb[114].mxu0 %v24287_v7 }
 0x64c   :  { %9604 = vmatmul.mubr.f32.gmra.mrb[126].mxu1 %v24287_v7  ;;  %9311 = vmatprep.mubr.f32.mxu0 %v24288_v56  ;;  %v12430_v7 = vld [vmem:[%s24019_s5 + $0x288] sm:$0xff] }
 0x64d   :  { %9609 = vmatprep.mubr.f32.mxu1 %v24288_v56  ;;  %13988 = vmatpush1.bf16.msra.mxu0 %v13987_v19  ;;  %v12432_v56 = vld [vmem:[%s24019_s5 + $0x298] sm:$0xff] }
 0x64e   :  { %13990 = vmatprep.subr.bf16.mxu0 %v13989_v58  ;;  %v13997_v22 = vpack.c.bf16 %v12432_v56, %v12430_v7  ;;  %v12457_v58 = vld [vmem:[%s24019_s5 + $0x360] sm:$0xff]  ;;  %v12467_v56 = vld [vmem:[%s24019_s5 + $0x3b0] sm:$0xff] }
 0x64f   :  { %9312 = vmatmul.mubr.f32.gmra.mrb[116].mxu0 %v21151_v20  ;;  %v14027_v33 = vpack.c.bf16 %v12459_v0, %v12457_v58  ;;  %v12465_v7 = vld [vmem:[%s24019_s5 + $0x3a0] sm:$0xff] }
 0x650   :  { %9610 = vmatmul.mubr.f32.gmra.mrb[128].mxu1 %v21151_v20  ;;  %9317 = vmatprep.mubr.f32.mxu0 %v21175_v4  ;;  %v12434_v20 = vld [vmem:[%s24019_s5 + $0x2a8] sm:$0xff] }
 0x651   :  { %9615 = vmatprep.mubr.f32.mxu1 %v21175_v4  ;;  %13992 = vmatpush1.bf16.msra.mxu0 %v13991_v51  ;;  %v12436_v4 = vld [vmem:[%s24019_s5 + $0x2b8] sm:$0xff]  ;;  %v12463_v51 = vld [vmem:[%s24019_s5 + $0x390] sm:$0xff] }
 0x652   :  { %13994 = vmatprep.subr.bf16.mxu0 %v13993_v34  ;;  %v14001_v59 = vpack.c.bf16 %v12436_v4, %v12434_v20  ;;  %v24299_v34 = vld [vmem:[#allocation23_spill] sm:$0xff] }
 0x653   :  { %9318 = vmatmul.mubr.f32.gmra.mrb[118].mxu0 %v24295_v40  ;;  %v12471_v20 = vld [vmem:[%s24019_s5 + $0x3d0] sm:$0xff] }
 0x654   :  { %9616 = vmatmul.mubr.f32.gmra.mrb[130].mxu1 %v24295_v40  ;;  %9323 = vmatprep.mubr.f32.mxu0 %v24290_v5  ;;  %v12469_v40 = vld [vmem:[%s24019_s5 + $0x3c0] sm:$0xff] }
 0x655   :  { %9621 = vmatprep.mubr.f32.mxu1 %v24290_v5  ;;  %13996 = vmatpush1.bf16.msra.mxu0 %v13995_v54  ;;  %v12440_v5 = vld [vmem:[%s24019_s5 + $0x2d8] sm:$0xff]  ;;  %v14035_v54 = vpack.c.bf16 %v12467_v56, %v12465_v7  ;;  %v14039_v4 = vpack.c.bf16 %v12471_v20, %v12469_v40 }
 0x656   :  { %13998 = vmatprep.subr.bf16.mxu0 %v13997_v22  ;;  %v14005_v30 = vpack.c.bf16 %v12440_v5, %v12438_v44  ;;  %v12470_v22 = vld [vmem:[%s24019_s5 + $0x3c8] sm:$0xff] }
 0x657   :  { %9324 = vmatmul.mubr.f32.gmra.mrb[120].mxu0 %v24296_v2  ;;  %v14037_v39 = vpack.c.bf16 %v12472_v21, %v12470_v22  ;;  %v9905_v5 = vld [vmem:[%s24019_s5 + $0x8] sm:$0xff] }
 0x658   :  { %9622 = vmatmul.mubr.f32.gmra.mrb[132].mxu1 %v24296_v2  ;;  %9329 = vmatprep.mubr.f32.mxu0 %v21283_v12  ;;  %v12475_v2 = vld [vmem:[%s24019_s5 + $0x3f0] sm:$0xff] }
 0x659   :  { %9627 = vmatprep.mubr.f32.mxu1 %v21283_v12  ;;  %14000 = vmatpush1.bf16.msra.mxu0 %v13999_v24  ;;  %v12444_v12 = vld [vmem:[%s24019_s5 + $0x2f8] sm:$0xff]  ;;  %v12474_v24 = vld [vmem:[%s24019_s5 + $0x3e8] sm:$0xff]  ;;  %v14043_v44 = vpack.c.bf16 %v12475_v2, %v12473_v57  ;;  %v9908_v57 = vld [vmem:[%s24019_s5 + $0x20] sm:$0xff] }
 0x65a   :  { %14002 = vmatprep.subr.bf16.mxu0 %v14001_v59  ;;  %v14009_v11 = vpack.c.bf16 %v12444_v12, %v12442_v36  ;;  %v12476_v59 = vld [vmem:[%s24019_s5 + $0x3f8] sm:$0xff]  ;;  %v24301_v36 = vld [vmem:[#allocation41_spill] sm:$0xff]  ;;  %v9910_v2 = vld [vmem:[%s24019_s5 + $0x30] sm:$0xff] }
 0x65b   :  { %9330 = vmatmul.mubr.f32.gmra.mrb[122].mxu0 %v24297_v35  ;;  %v14041_v43 = vpack.c.bf16 %v12476_v59, %v12474_v24  ;;  %v24302_v12 = vsub.s32 2, %v24301_v36  ;;  %v24304_v9 = vsub.s32 3, %v24301_v36 }
 0x65c   :  { %9628 = vmatmul.mubr.f32.gmra.mrb[134].mxu1 %v24297_v35  ;;  %9335 = vmatprep.mubr.f32.mxu0 %v24292_v8  ;;  %v23203_v35 = vrot.slane %v9738_v61, %v24300_v6 }
 0x65d   :  { %9633 = vmatprep.mubr.f32.mxu1 %v24292_v8  ;;  %14004 = vmatpush1.bf16.msra.mxu0 %v14003_v14  ;;  %v12448_v8 = vld [vmem:[%s24019_s5 + $0x318] sm:$0xff] }
 0x65e   :  { %14006 = vmatprep.subr.bf16.mxu0 %v14005_v30  ;;  %v14013_v29 = vpack.c.bf16 %v12448_v8, %v12446_v49  ;;  %v9907_v14 = vld [vmem:[%s24019_s5 + $0x18] sm:$0xff]  ;;  %v23214_v49 = vrot.slane %v9738_v61, %v24304_v9 }
 0x65f   :  { %9336 = vmatmul.mubr.f32.gmra.mrb[124].mxu0 %v21365_v45  ;;  %v14045_v30 = vpack.c.bf16 %v9907_v14, %v9905_v5  ;;  %v9913_v5 = vld [vmem:[%s24019_s5 + $0x48] sm:$0xff]  ;;  %v9915_v14 = vld [vmem:[%s24019_s5 + $0x58] sm:$0xff] }
 0x660   :  { %9634 = vmatmul.mubr.f32.gmra.mrb[136].mxu1 %v21365_v45  ;;  %9341 = vmatprep.mubr.f32.mxu0 %v21387_v25  ;;  %v12450_v45 = vld [vmem:[%s24019_s5 + $0x328] sm:$0xff] }
 0x661   :  { %9639 = vmatprep.mubr.f32.mxu1 %v21387_v25  ;;  %14008 = vmatpush1.bf16.msra.mxu0 %v14007_v37  ;;  %v12452_v25 = vld [vmem:[%s24019_s5 + $0x338] sm:$0xff]  ;;  %v23207_v37 = vrot.slane %v9738_v61, %v24302_v12 }
 0x662   :  { %14010 = vmatprep.subr.bf16.mxu0 %v14009_v11  ;;  %v14017_v42 = vpack.c.bf16 %v12452_v25, %v12450_v45  ;;  %v24303_v11 = vld [vmem:[#allocation49_spill] sm:$0xff] }
 0x663   :  { %9342 = vmatmul.mubr.f32.gmra.mrb[126].mxu0 %v21401_v55  ;;  %v23210_v47 = vrot.slane %v9738_v61, %v24303_v11 }
 0x664   :  { %9640 = vmatmul.mubr.f32.gmra.mrb[138].mxu1 %v21401_v55  ;;  %9347 = vmatprep.mubr.f32.mxu0 %v21429_v62  ;;  %v12454_v55 = vld [vmem:[%s24019_s5 + $0x348] sm:$0xff] }
 0x665   :  { %9645 = vmatprep.mubr.f32.mxu1 %v21429_v62  ;;  %14012 = vmatpush1.bf16.msra.mxu0 %v14011_v26  ;;  %v12456_v62 = vld [vmem:[%s24019_s5 + $0x358] sm:$0xff] }
 0x666   :  { %14014 = vmatprep.subr.bf16.mxu0 %v14013_v29  ;;  %v14021_v23 = vpack.c.bf16 %v12456_v62, %v12454_v55 }
 0x667   :  { %9348 = vmatmul.mubr.f32.gmra.mrb[128].mxu0 %v21445_v17 }
 0x668   :  { %9646 = vmatmul.mubr.f32.gmra.mrb[140].mxu1 %v21445_v17  ;;  %9353 = vmatprep.mubr.f32.mxu0 %v21466_v16  ;;  %v12458_v17 = vld [vmem:[%s24019_s5 + $0x368] sm:$0xff] }
 0x669   :  { %9651 = vmatprep.mubr.f32.mxu1 %v21466_v16  ;;  %14016 = vmatpush1.bf16.msra.mxu0 %v14015_v41  ;;  %v12460_v16 = vld [vmem:[%s24019_s5 + $0x378] sm:$0xff] }
 0x66a   :  { %14018 = vmatprep.subr.bf16.mxu0 %v14017_v42  ;;  %v14025_v19 = vpack.c.bf16 %v12460_v16, %v12458_v17 }
 0x66b   :  { %9354 = vmatmul.mubr.f32.gmra.mrb[130].mxu0 %v21483_v50 }
 0x66c   :  { %9652 = vmatmul.mubr.f32.gmra.mrb[142].mxu1 %v21483_v50  ;;  %9359 = vmatprep.mubr.f32.mxu0 %v21502_v28  ;;  %v12462_v50 = vld [vmem:[%s24019_s5 + $0x388] sm:$0xff] }
 0x66d   :  { %9657 = vmatprep.mubr.f32.mxu1 %v21502_v28  ;;  %14020 = vmatpush1.bf16.msra.mxu0 %v14019_v63  ;;  %v12464_v28 = vld [vmem:[%s24019_s5 + $0x398] sm:$0xff] }
 0x66e   :  { %14022 = vmatprep.subr.bf16.mxu0 %v14021_v23  ;;  %v14029_v27 = vpack.c.bf16 %v12464_v28, %v12462_v50 }
 0x66f   :  { %9360 = vmatmul.mubr.f32.gmra.mrb[132].mxu0 %v21519_v15 }
 0x670   :  { %9658 = vmatmul.mubr.f32.gmra.mrb[144].mxu1 %v21519_v15  ;;  %9365 = vmatprep.mubr.f32.mxu0 %v21536_v13  ;;  %v24298_v15 = vld [vmem:[#allocation22_spill] sm:$0xff] }
 0x671   :  { %9663 = vmatprep.mubr.f32.mxu1 %v21536_v13  ;;  %14024 = vmatpush1.bf16.msra.mxu0 %v14023_v46  ;;  %v14031_v13 = vpack.c.bf16 %v12463_v51, %v12461_v18  ;;  %v9904_v51 = vld [vmem:[%s24019_s5] sm:$0xff] }
 0x672   :  { %14026 = vmatprep.subr.bf16.mxu0 %v14025_v19 }
 0x673   :  { %9366 = vmatmul.mubr.f32.gmra.mrb[134].mxu0 %v21556_v32 }
 0x674   :  { %9664 = vmatmul.mubr.f32.gmra.mrb[146].mxu1 %v21556_v32  ;;  %9371 = vmatprep.mubr.f32.mxu0 %v24298_v15  ;;  %v12466_v32 = vld [vmem:[%s24019_s5 + $0x3a8] sm:$0xff] }
 0x675   :  { %9669 = vmatprep.mubr.f32.mxu1 %v24298_v15  ;;  %14028 = vmatpush1.bf16.msra.mxu0 %v14027_v33  ;;  %v14033_v48 = vpack.c.bf16 %v12468_v1, %v12466_v32  ;;  %v9906_v15 = vld [vmem:[%s24019_s5 + $0x10] sm:$0xff]  ;;  %v9909_v32 = vld [vmem:[%s24019_s5 + $0x28] sm:$0xff]  ;;  %v9911_v1 = vld [vmem:[%s24019_s5 + $0x38] sm:$0xff] }
 0x676   :  { %14030 = vmatprep.subr.bf16.mxu0 %v14029_v27  ;;  %v14047_v40 = vpack.c.bf16 %v9906_v15, %v9904_v51  ;;  %v9918_v51 = vld [vmem:[%s24019_s5 + $0x70] sm:$0xff] }
 0x677   :  { %9372 = vmatmul.mubr.f32.gmra.mrb[136].mxu0 %v24299_v34 }
 0x678   :  { %9670 = vmatmul.mubr.f32.gmra.mrb[148].mxu1 %v24299_v34  ;;  %9377 = vmatprep.mubr.f32.mxu0 %v24272_v38 }
 0x679   :  { %9675 = vmatprep.mubr.f32.mxu1 %v24272_v38  ;;  %14032 = vmatpush1.bf16.msra.mxu0 %v14031_v13 }
 0x67a   :  { %14034 = vmatprep.subr.bf16.mxu0 %v14033_v48 }
 0x67b   :  { %9378 = vmatmul.mubr.f32.gmra.mrb[138].mxu0 %v24272_v38 }
 0x67c   :  { %9676 = vmatmul.mubr.f32.gmra.mrb[150].mxu1 %v24272_v38 }
 0x67d   :  { %14036 = vmatpush1.bf16.msra.mxu0 %v14035_v54  ;;  %12686 = vmatprep.mubr.msk.f32.mxu1 %vm15562_vm2, %v24272_v38 }
 0x67e   :  { %14038 = vmatprep.subr.bf16.mxu0 %v14037_v39 }
 0x681   :  { %14040 = vmatpush1.bf16.msra.mxu0 %v14039_v4 }
 0x682   :  { %14042 = vmatprep.subr.bf16.mxu0 %v14041_v43  ;;  %v14049_v43 = vpack.c.bf16 %v9911_v1, %v9909_v32  ;;  %v9923_v32 = vld [vmem:[%s24019_s5 + $0x98] sm:$0xff] }
 0x685   :  { %14044 = vmatpush1.bf16.msra.mxu0 %v14043_v44 }
 0x686   :  { %14046 = vmatprep.subr.bf16.mxu0 %v14045_v30 }
 0x71a   :  { %v9301_v8 = vpop.f32.mrb[112].mxu0 }
 0x71b   :  { %v9760_v26 = vadd.f32 %v23203_v35, %v9301_v8  ;;  %v9599_v29 = vpop.f32.mrb[124].mxu1  ;;  %v9303_v60 = vpop.f32.mrb[113].mxu0 }
 0x71c   :  { %v9762_v52 = vadd.f32 %v23207_v37, %v9599_v29  ;;  %v9761_v45 = vadd.f32 %v23210_v47, %v9303_v60  ;;  %v9601_v25 = vpop.f32.mrb[125].mxu1 }
 0x71d   :  { %v9763_v41 = vadd.f32 %v23214_v49, %v9601_v25 }
 0x71e   :  { %v9816_v42 = vmax.f32 %v9760_v26, %v9762_v52  ;;  %v9307_v31 = vpop.f32.mrb[114].mxu0  ;;  %v14051_v26 = vpack.c.bf16 %v9910_v2, %v9908_v57  ;;  %v9920_v57 = vld [vmem:[%s24019_s5 + $0x80] sm:$0xff]  ;;  %v9922_v2 = vld [vmem:[%s24019_s5 + $0x90] sm:$0xff] }
 0x71f   :  { %v9817_v3 = vmax.f32 %v9761_v45, %v9763_v41  ;;  %v9764_v55 = vadd.f32 %v23203_v35, %v9307_v31  ;;  %v9605_v62 = vpop.f32.mrb[126].mxu1  ;;  %v9309_v63 = vpop.f32.mrb[115].mxu0  ;;  %v14053_v45 = vpack.c.bf16 %v9915_v14, %v9913_v5  ;;  %v9912_v41 = vld [vmem:[%s24019_s5 + $0x40] sm:$0xff]  ;;  %v9925_v14 = vld [vmem:[%s24019_s5 + $0xa8] sm:$0xff] }
 0x720   :  { %v9766_v23 = vadd.f32 %v23207_v37, %v9605_v62  ;;  %v9765_v53 = vadd.f32 %v23210_v47, %v9309_v63  ;;  %v9607_v10 = vpop.f32.mrb[127].mxu1  ;;  %v9919_v62 = vld [vmem:[%s24019_s5 + $0x78] sm:$0xff] }
 0x721   :  { %v9767_v17 = vadd.f32 %v23214_v49, %v9607_v10 }
 0x722   :  { %v9818_v16 = vmax.f32 %v9764_v55, %v9766_v23  ;;  %v9313_v46 = vpop.f32.mrb[116].mxu0  ;;  %v9917_v55 = vld [vmem:[%s24019_s5 + $0x68] sm:$0xff] }
 0x723   :  { %v9819_v19 = vmax.f32 %v9765_v53, %v9767_v17  ;;  %v9768_v58 = vadd.f32 %v23203_v35, %v9313_v46  ;;  %v9611_v0 = vpop.f32.mrb[128].mxu1  ;;  %v9315_v50 = vpop.f32.mrb[117].mxu0 }
 0x724   :  { %v23225_v28 = vmax.f32 %v9816_v42, %v9818_v16  ;;  %v9770_v33 = vadd.f32 %v23207_v37, %v9611_v0  ;;  %v9769_v27 = vadd.f32 %v23210_v47, %v9315_v50  ;;  %v9613_v18 = vpop.f32.mrb[129].mxu1  ;;  %v9914_v42 = vld [vmem:[%s24019_s5 + $0x50] sm:$0xff] }
 0x725   :  { %v9771_v13 = vadd.f32 %v23214_v49, %v9613_v18  ;;  %v23236_v34 = vmax.f32 %v9817_v3, %v9819_v19  ;;  %v14055_v19 = vpack.c.bf16 %v9914_v42, %v9912_v41  ;;  %v9916_v18 = vld [vmem:[%s24019_s5 + $0x60] sm:$0xff] }
 0x726   :  { %v9820_v48 = vmax.f32 %v9768_v58, %v9770_v33  ;;  %v9319_v7 = vpop.f32.mrb[118].mxu0  ;;  %v9850_v20 = vmax.f32 %v23225_v28, 0.0  ;;  %v12496_v28 = vld [vmem:[%s24019_s5 + $0x498] sm:$0xff] }
 0x727   :  { %v9821_v56 = vmax.f32 %v9769_v27, %v9771_v13  ;;  %v9772_v54 = vadd.f32 %v23203_v35, %v9319_v7  ;;  %v9617_v22 = vpop.f32.mrb[130].mxu1  ;;  %v9321_v21 = vpop.f32.mrb[119].mxu0  ;;  %v9851_v39 = vmax.f32 %v23236_v34, 0.0  ;;  %v14057_v27 = vpack.c.bf16 %v9919_v62, %v9917_v55  ;;  %v9921_v13 = vld [vmem:[%s24019_s5 + $0x88] sm:$0xff]  ;;  %v12492_v34 = vld [vmem:[%s24019_s5 + $0x478] sm:$0xff] }
 0x728   :  { %v9774_v4 = vadd.f32 %v23207_v37, %v9617_v22  ;;  %v9773_v24 = vadd.f32 %v23210_v47, %v9321_v21  ;;  %v9619_v59 = vpop.f32.mrb[131].mxu1  ;;  %v14059_v21 = vpack.c.bf16 %v9918_v51, %v9916_v18  ;;  %v9929_v62 = vld [vmem:[%s24019_s5 + $0xc8] sm:$0xff] }
 0x729   :  { %v9775_v44 = vadd.f32 %v23214_v49, %v9619_v59  ;;  %10099 = vmatprep.mubr.f32.mxu0 %v9851_v39  ;;  %v14061_v59 = vpack.c.bf16 %v9923_v32, %v9921_v13  ;;  %v9930_v13 = vld [vmem:[%s24019_s5 + $0xd0] sm:$0xff] }
 0x72a   :  { %v9822_v30 = vmax.f32 %v9772_v54, %v9774_v4  ;;  %10100 = vmatmul.mubr.f32.vlgmr.msra.gmra.mrb[140].mxu0 %v9850_v20  ;;  %v9325_v61 = vpop.f32.mrb[120].mxu0 }
 0x72b   :  { %v9823_v36 = vmax.f32 %v9773_v24, %v9775_v44  ;;  %14048 = vmatpush1.bf16.msra.mxu0 %v14047_v40  ;;  %v9776_v12 = vadd.f32 %v23203_v35, %v9325_v61  ;;  %v9623_v9 = vpop.f32.mrb[132].mxu1  ;;  %v9327_v8 = vpop.f32.mrb[121].mxu0 }
 0x72c   :  { %v9778_v29 = vadd.f32 %v23207_v37, %v9623_v9  ;;  %v9777_v60 = vadd.f32 %v23210_v47, %v9327_v8  ;;  %v9625_v52 = vpop.f32.mrb[133].mxu1  ;;  %14050 = vmatprep.subr.bf16.mxu0 %v14049_v43  ;;  %v9854_v25 = vmax.f32 %v9820_v48, %v9822_v30  ;;  %v9927_v30 = vld [vmem:[%s24019_s5 + $0xb8] sm:$0xff] }
 0x72d   :  { %v9779_v31 = vadd.f32 %v23214_v49, %v9625_v52  ;;  %v9855_v3 = vmax.f32 %v9821_v56, %v9823_v36  ;;  %v14065_v42 = vpack.c.bf16 %v9927_v30, %v9925_v14  ;;  %v9932_v14 = vld [vmem:[%s24019_s5 + $0xe0] sm:$0xff]  ;;  %v9934_v30 = vld [vmem:[%s24019_s5 + $0xf0] sm:$0xff] }
 0x72e   :  { %v9824_v63 = vmax.f32 %v9776_v12, %v9778_v29  ;;  %v9331_v23 = vpop.f32.mrb[122].mxu0  ;;  %v23287_v33 = vmax.f32 %v9854_v25, 0.0 }
 0x72f   :  { %v9825_v53 = vmax.f32 %v9777_v60, %v9779_v31  ;;  %14052 = vmatpush1.bf16.msra.mxu0 %v14051_v26  ;;  %v9780_v10 = vadd.f32 %v23203_v35, %v9331_v23  ;;  %v9629_v17 = vpop.f32.mrb[134].mxu1  ;;  %v9333_v16 = vpop.f32.mrb[123].mxu0  ;;  %v23283_v46 = vmax.f32 %v9855_v3, 0.0  ;;  %v14063_v60 = vpack.c.bf16 %v9922_v2, %v9920_v57  ;;  %v9924_v31 = vld [vmem:[%s24019_s5 + $0xa0] sm:$0xff]  ;;  %v9926_v3 = vld [vmem:[%s24019_s5 + $0xb0] sm:$0xff] }
 0x730   :  { %v9782_v58 = vadd.f32 %v23207_v37, %v9629_v17  ;;  %v9781_v0 = vadd.f32 %v23210_v47, %v9333_v16  ;;  %v9631_v50 = vpop.f32.mrb[135].mxu1  ;;  %14054 = vmatprep.subr.bf16.mxu0 %v14053_v45 }
 0x731   :  { %v9783_v15 = vadd.f32 %v23214_v49, %v9631_v50  ;;  %10105 = vmatprep.mubr.f32.mxu0 %v23283_v46 }
 0x732   :  { %v9826_v1 = vmax.f32 %v9780_v10, %v9782_v58  ;;  %10106 = vmatmul.mubr.f32.gmra.mrb[142].mxu0 %v23287_v33  ;;  %v9337_v48 = vpop.f32.mrb[124].mxu0  ;;  %v14067_v58 = vpack.c.bf16 %v9926_v3, %v9924_v31 }
 0x733   :  { %v9827_v7 = vmax.f32 %v9781_v0, %v9783_v15  ;;  %14056 = vmatpush1.bf16.msra.mxu0 %v14055_v19  ;;  %v9784_v56 = vadd.f32 %v23203_v35, %v9337_v48  ;;  %v9635_v54 = vpop.f32.mrb[136].mxu1  ;;  %v9339_v22 = vpop.f32.mrb[125].mxu0  ;;  %v9928_v15 = vld [vmem:[%s24019_s5 + $0xc0] sm:$0xff]  ;;  %v9933_v48 = vld [vmem:[%s24019_s5 + $0xe8] sm:$0xff] }
 0x734   :  { %v9786_v40 = vadd.f32 %v23207_v37, %v9635_v54  ;;  %v9785_v4 = vadd.f32 %v23210_v47, %v9339_v22  ;;  %v9637_v24 = vpop.f32.mrb[137].mxu1  ;;  %14058 = vmatprep.subr.bf16.mxu0 %v14057_v27  ;;  %v9860_v43 = vmax.f32 %v9824_v63, %v9826_v1  ;;  %v9931_v63 = vld [vmem:[%s24019_s5 + $0xd8] sm:$0xff] }
 0x735   :  { %v9787_v44 = vadd.f32 %v23214_v49, %v9637_v24  ;;  %v9861_v5 = vmax.f32 %v9825_v53, %v9827_v7  ;;  %v14069_v18 = vpack.c.bf16 %v9931_v63, %v9929_v62  ;;  %v9935_v7 = vld [vmem:[%s24019_s5 + $0xf8] sm:$0xff]  ;;  %v9936_v63 = vld [vmem:[%s24019_s5 + $0x100] sm:$0xff] }
 0x736   :  { %v9828_v61 = vmax.f32 %v9784_v56, %v9786_v40  ;;  %v9343_v36 = vpop.f32.mrb[126].mxu0  ;;  %v23325_v41 = vmax.f32 %v9860_v43, 0.0 }
 0x737   :  { %v9829_v12 = vmax.f32 %v9785_v4, %v9787_v44  ;;  %14060 = vmatpush1.bf16.msra.mxu0 %v14059_v21  ;;  %v9788_v9 = vadd.f32 %v23203_v35, %v9343_v36  ;;  %v9641_v8 = vpop.f32.mrb[138].mxu1  ;;  %v9345_v26 = vpop.f32.mrb[127].mxu0  ;;  %v23321_v29 = vmax.f32 %v9861_v5, 0.0  ;;  %v14073_v5 = vpack.c.bf16 %v9935_v7, %v9933_v48  ;;  %v9937_v36 = vld [vmem:[%s24019_s5 + $0x108] sm:$0xff] }
 0x738   :  { %v9790_v52 = vadd.f32 %v23207_v37, %v9641_v8  ;;  %v9789_v45 = vadd.f32 %v23210_v47, %v9345_v26  ;;  %v9643_v25 = vpop.f32.mrb[139].mxu1  ;;  %14062 = vmatprep.subr.bf16.mxu0 %v14061_v59  ;;  %v14071_v59 = vpack.c.bf16 %v9930_v13, %v9928_v15 }
 0x739   :  { %v9791_v55 = vadd.f32 %v23214_v49, %v9643_v25  ;;  %10111 = vmatprep.mubr.f32.mxu0 %v23321_v29  ;;  %v14075_v25 = vpack.c.bf16 %v9934_v30, %v9932_v14 }
 0x73a   :  { %v9830_v23 = vmax.f32 %v9788_v9, %v9790_v52  ;;  %10112 = vmatmul.mubr.f32.gmra.mrb[144].mxu0 %v23325_v41  ;;  %v9349_v53 = vpop.f32.mrb[128].mxu0 }
 0x73b   :  { %v9831_v10 = vmax.f32 %v9789_v45, %v9791_v55  ;;  %14064 = vmatpush1.bf16.msra.mxu0 %v14063_v60  ;;  %v9792_v17 = vadd.f32 %v23203_v35, %v9349_v53  ;;  %v9647_v16 = vpop.f32.mrb[140].mxu1  ;;  %v9351_v19 = vpop.f32.mrb[129].mxu0 }
 0x73c   :  { %v9794_v0 = vadd.f32 %v23207_v37, %v9647_v16  ;;  %v9793_v50 = vadd.f32 %v23210_v47, %v9351_v19  ;;  %v9649_v27 = vpop.f32.mrb[141].mxu1  ;;  %14066 = vmatprep.subr.bf16.mxu0 %v14065_v42  ;;  %v9866_v51 = vmax.f32 %v9828_v61, %v9830_v23  ;;  %v9938_v23 = vld [vmem:[%s24019_s5 + $0x110] sm:$0xff]  ;;  %v9943_v16 = vld [vmem:[%s24019_s5 + $0x138] sm:$0xff] }
 0x73d   :  { %v9795_v32 = vadd.f32 %v23214_v49, %v9649_v27  ;;  %v9867_v1 = vmax.f32 %v9829_v12, %v9831_v10  ;;  %v9939_v12 = vld [vmem:[%s24019_s5 + $0x118] sm:$0xff]  ;;  %v14079_v15 = vpack.c.bf16 %v9938_v23, %v9936_v63 }
 0x73e   :  { %v9832_v56 = vmax.f32 %v9792_v17, %v9794_v0  ;;  %v9355_v54 = vpop.f32.mrb[130].mxu0  ;;  %v23363_v44 = vmax.f32 %v9866_v51, 0.0  ;;  %v14077_v55 = vpack.c.bf16 %v9939_v12, %v9937_v36  ;;  %v9941_v17 = vld [vmem:[%s24019_s5 + $0x128] sm:$0xff] }
 0x73f   :  { %v9833_v22 = vmax.f32 %v9793_v50, %v9795_v32  ;;  %14068 = vmatpush1.bf16.msra.mxu0 %v14067_v58  ;;  %v9796_v21 = vadd.f32 %v23203_v35, %v9355_v54  ;;  %v9653_v40 = vpop.f32.mrb[142].mxu1  ;;  %v9357_v4 = vpop.f32.mrb[131].mxu0  ;;  %v23359_v24 = vmax.f32 %v9867_v1, 0.0  ;;  %v14081_v7 = vpack.c.bf16 %v9943_v16, %v9941_v17  ;;  %v9942_v54 = vld [vmem:[%s24019_s5 + $0x130] sm:$0xff] }
 0x740   :  { %v9798_v43 = vadd.f32 %v23207_v37, %v9653_v40  ;;  %v9797_v57 = vadd.f32 %v23210_v47, %v9357_v4  ;;  %v9655_v2 = vpop.f32.mrb[143].mxu1  ;;  %14070 = vmatprep.subr.bf16.mxu0 %v14069_v18  ;;  %v9947_v40 = vld [vmem:[%s24019_s5 + $0x158] sm:$0xff] }
 0x741   :  { %v9799_v61 = vadd.f32 %v23214_v49, %v9655_v2  ;;  %10117 = vmatprep.mubr.f32.mxu0 %v23359_v24 }
 0x742   :  { %v9834_v9 = vmax.f32 %v9796_v21, %v9798_v43  ;;  %10118 = vmatmul.mubr.f32.gmra.mrb[146].mxu0 %v23363_v44  ;;  %v9361_v8 = vpop.f32.mrb[132].mxu0  ;;  %v9945_v21 = vld [vmem:[%s24019_s5 + $0x148] sm:$0xff] }
 0x743   :  { %v9835_v26 = vmax.f32 %v9797_v57, %v9799_v61  ;;  %14072 = vmatpush1.bf16.msra.mxu0 %v14071_v59  ;;  %v9800_v60 = vadd.f32 %v23203_v35, %v9361_v8  ;;  %v9659_v52 = vpop.f32.mrb[144].mxu1  ;;  %v9363_v45 = vpop.f32.mrb[133].mxu0  ;;  %v14085_v12 = vpack.c.bf16 %v9947_v40, %v9945_v21  ;;  %v9944_v8 = vld [vmem:[%s24019_s5 + $0x140] sm:$0xff] }
 0x744   :  { %v9802_v42 = vadd.f32 %v23207_v37, %v9659_v52  ;;  %v9801_v31 = vadd.f32 %v23210_v47, %v9363_v45  ;;  %v9661_v3 = vpop.f32.mrb[145].mxu1  ;;  %14074 = vmatprep.subr.bf16.mxu0 %v14073_v5  ;;  %v9872_v62 = vmax.f32 %v9832_v56, %v9834_v9  ;;  %v9940_v56 = vld [vmem:[%s24019_s5 + $0x120] sm:$0xff]  ;;  %v9949_v45 = vld [vmem:[%s24019_s5 + $0x168] sm:$0xff] }
 0x745   :  { %v9803_v53 = vadd.f32 %v23214_v49, %v9661_v3  ;;  %v9873_v10 = vmax.f32 %v9833_v22, %v9835_v26  ;;  %v14083_v14 = vpack.c.bf16 %v9942_v54, %v9940_v56  ;;  %v9946_v26 = vld [vmem:[%s24019_s5 + $0x150] sm:$0xff]  ;;  %v9957_v56 = vld [vmem:[%s24019_s5 + $0x1a8] sm:$0xff]  ;;  %v9959_v54 = vld [vmem:[%s24019_s5 + $0x1b8] sm:$0xff] }
 0x746   :  { %v9836_v19 = vmax.f32 %v9800_v60, %v9802_v42  ;;  %v9367_v58 = vpop.f32.mrb[134].mxu0  ;;  %v23401_v48 = vmax.f32 %v9872_v62, 0.0 }
 0x747   :  { %v9837_v0 = vmax.f32 %v9801_v31, %v9803_v53  ;;  %14076 = vmatpush1.bf16.msra.mxu0 %v14075_v25  ;;  %v9804_v50 = vadd.f32 %v23203_v35, %v9367_v58  ;;  %v9665_v27 = vpop.f32.mrb[146].mxu1  ;;  %v9369_v18 = vpop.f32.mrb[135].mxu0  ;;  %v23397_v51 = vmax.f32 %v9873_v10, 0.0  ;;  %v9951_v25 = vld [vmem:[%s24019_s5 + $0x178] sm:$0xff]  ;;  %v14087_v53 = vpack.c.bf16 %v9946_v26, %v9944_v8  ;;  %v9964_v26 = vld [vmem:[%s24019_s5 + $0x1e0] sm:$0xff] }
 0x748   :  { %v9806_v13 = vadd.f32 %v23207_v37, %v9665_v27  ;;  %v9805_v32 = vadd.f32 %v23210_v47, %v9369_v18  ;;  %v9667_v1 = vpop.f32.mrb[147].mxu1  ;;  %14078 = vmatprep.subr.bf16.mxu0 %v14077_v55  ;;  %v14089_v58 = vpack.c.bf16 %v9951_v25, %v9949_v45  ;;  %v12480_v45 = vld [vmem:[%s24019_s5 + $0x418] sm:$0xff] }
 0x749   :  { %v9807_v22 = vadd.f32 %v23214_v49, %v9667_v1  ;;  %10123 = vmatprep.mubr.f32.mxu0 %v23397_v51  ;;  %v9954_v1 = vld [vmem:[%s24019_s5 + $0x190] sm:$0xff] }
 0x74a   :  { %v9838_v4 = vmax.f32 %v9804_v50, %v9806_v13  ;;  %10124 = vmatmul.mubr.f32.gmra.mrb[148].mxu0 %v23401_v48  ;;  %v9373_v59 = vpop.f32.mrb[136].mxu0 }
 0x74b   :  { %v9839_v43 = vmax.f32 %v9805_v32, %v9807_v22  ;;  %14080 = vmatpush1.bf16.msra.mxu0 %v14079_v15  ;;  %v9808_v57 = vadd.f32 %v23203_v35, %v9373_v59  ;;  %v9671_v2 = vpop.f32.mrb[148].mxu1  ;;  %v9375_v5 = vpop.f32.mrb[137].mxu0  ;;  %v9956_v59 = vld [vmem:[%s24019_s5 + $0x1a0] sm:$0xff] }
 0x74c   :  { %v9810_v30 = vadd.f32 %v23207_v37, %v9671_v2  ;;  %v9809_v61 = vadd.f32 %v23210_v47, %v9375_v5  ;;  %v9673_v36 = vpop.f32.mrb[149].mxu1  ;;  %14082 = vmatprep.subr.bf16.mxu0 %v14081_v7  ;;  %v9878_v9 = vmax.f32 %v9836_v19, %v9838_v4  ;;  %v14097_v4 = vpack.c.bf16 %v9959_v54, %v9957_v56  ;;  %v9963_v2 = vld [vmem:[%s24019_s5 + $0x1d8] sm:$0xff]  ;;  %v12495_v56 = vld [vmem:[%s24019_s5 + $0x490] sm:$0xff]  ;;  %v12498_v54 = vld [vmem:[%s24019_s5 + $0x4a8] sm:$0xff] }
 0x74d   :  { %v9811_v60 = vadd.f32 %v23214_v49, %v9673_v36  ;;  %v9879_v52 = vmax.f32 %v9837_v0, %v9839_v43  ;;  %v9948_v0 = vld [vmem:[%s24019_s5 + $0x160] sm:$0xff]  ;;  %v9958_v43 = vld [vmem:[%s24019_s5 + $0x1b0] sm:$0xff]  ;;  %v9965_v36 = vld [vmem:[%s24019_s5 + $0x1e8] sm:$0xff] }
 0x74e   :  { %v9840_v42 = vmax.f32 %v9808_v57, %v9810_v30  ;;  %v9379_v31 = vpop.f32.mrb[138].mxu0  ;;  %v23439_v19 = vmax.f32 %v9878_v9, 0.0  ;;  %v9961_v57 = vld [vmem:[%s24019_s5 + $0x1c8] sm:$0xff]  ;;  %v14099_v5 = vpack.c.bf16 %v9958_v43, %v9956_v59  ;;  %v9960_v30 = vld [vmem:[%s24019_s5 + $0x1c0] sm:$0xff] }
 0x74f   :  { %v9841_v3 = vmax.f32 %v9809_v61, %v9811_v60  ;;  %14084 = vmatpush1.bf16.msra.mxu0 %v14083_v14  ;;  %v9812_v55 = vadd.f32 %v23203_v35, %v9379_v31  ;;  %v9677_v62 = vpop.f32.mrb[150].mxu1  ;;  %v9381_v63 = vpop.f32.mrb[139].mxu0  ;;  %v23435_v23 = vmax.f32 %v9879_v52, 0.0  ;;  %v9950_v35 = vld [vmem:[%s24019_s5 + $0x170] sm:$0xff]  ;;  %v14101_v14 = vpack.c.bf16 %v9963_v2, %v9961_v57  ;;  %v12478_v52 = vld [vmem:[%s24019_s5 + $0x408] sm:$0xff]  ;;  %v12477_v31 = vld [vmem:[%s24019_s5 + $0x400] sm:$0xff] }
 0x750   :  { %v9814_v10 = vadd.f32 %v23207_v37, %v9677_v62  ;;  %v9813_v17 = vadd.f32 %v23210_v47, %v9381_v63  ;;  %v9679_v16 = vpop.f32.mrb[151].mxu1  ;;  %14086 = vmatprep.subr.bf16.mxu0 %v14085_v12  ;;  %v9953_v37 = vld [vmem:[%s24019_s5 + $0x188] sm:$0xff]  ;;  %v9955_v47 = vld [vmem:[%s24019_s5 + $0x198] sm:$0xff]  ;;  %v14091_v15 = vpack.c.bf16 %v9950_v35, %v9948_v0  ;;  %v9962_v61 = vld [vmem:[%s24019_s5 + $0x1d0] sm:$0xff] }
 0x751   :  { %v9815_v50 = vadd.f32 %v23214_v49, %v9679_v16  ;;  %10129 = vmatprep.mubr.f32.mxu0 %v23435_v23  ;;  %v14093_v13 = vpack.c.bf16 %v9955_v47, %v9953_v37  ;;  %v9952_v49 = vld [vmem:[%s24019_s5 + $0x180] sm:$0xff]  ;;  %v9967_v12 = vld [vmem:[%s24019_s5 + $0x1f8] sm:$0xff]  ;;  %v14103_v9 = vpack.c.bf16 %v9962_v61, %v9960_v30  ;;  %v9966_v60 = vld [vmem:[%s24019_s5 + $0x1f0] sm:$0xff] }
 0x752   :  { %v9842_v27 = vmax.f32 %v9812_v55, %v9814_v10  ;;  %10130 = vmatmul.mubr.f32.gmra.mrb[150].mxu0 %v23439_v19  ;;  %v14095_v21 = vpack.c.bf16 %v9954_v1, %v9952_v49  ;;  %v14105_v8 = vpack.c.bf16 %v9967_v12, %v9965_v36  ;;  %v14107_v25 = vpack.c.bf16 %v9966_v60, %v9964_v26  ;;  %v12482_v55 = vld [vmem:[%s24019_s5 + $0x428] sm:$0xff]  ;;  %v12484_v62 = vld [vmem:[%s24019_s5 + $0x438] sm:$0xff]  ;;  %v12481_v10 = vld [vmem:[%s24019_s5 + $0x420] sm:$0xff] }
 0x753   :  { %v9843_v18 = vmax.f32 %v9813_v17, %v9815_v50  ;;  %14088 = vmatpush1.bf16.msra.mxu0 %v14087_v53  ;;  %v14113_v53 = vpack.c.bf16 %v12484_v62, %v12482_v55  ;;  %v12483_v17 = vld [vmem:[%s24019_s5 + $0x430] sm:$0xff]  ;;  %v12486_v16 = vld [vmem:[%s24019_s5 + $0x448] sm:$0xff]  ;;  %v12485_v50 = vld [vmem:[%s24019_s5 + $0x440] sm:$0xff] }
 0x754   :  { %14090 = vmatprep.subr.bf16.mxu0 %v14089_v58  ;;  %v23456_v32 = vmax.f32 %v9840_v42, %v9842_v27  ;;  %v14109_v42 = vpack.c.bf16 %v12480_v45, %v12478_v52  ;;  %v12488_v58 = vld [vmem:[%s24019_s5 + $0x458] sm:$0xff]  ;;  %v14115_v0 = vpack.c.bf16 %v12483_v17, %v12481_v10  ;;  %v12487_v37 = vld [vmem:[%s24019_s5 + $0x450] sm:$0xff]  ;;  %v12490_v47 = vld [vmem:[%s24019_s5 + $0x468] sm:$0xff] }
 0x755   :  { %v23464_v7 = vmax.f32 %v9841_v3, %v9843_v18  ;;  %v12479_v3 = vld [vmem:[%s24019_s5 + $0x410] sm:$0xff]  ;;  %v14117_v35 = vpack.c.bf16 %v12488_v58, %v12486_v16  ;;  %v14121_v27 = vpack.c.bf16 %v12492_v34, %v12490_v47  ;;  %v12489_v18 = vld [vmem:[%s24019_s5 + $0x460] sm:$0xff]  ;;  %v12502_v2 = vld [vmem:[%s24019_s5 + $0x4c8] sm:$0xff] }
 0x756   :  { %v9886_v40 = vmax.f32 %v23456_v32, 0.0  ;;  %v14111_v63 = vpack.c.bf16 %v12479_v3, %v12477_v31  ;;  %v12493_v1 = vld [vmem:[%s24019_s5 + $0x480] sm:$0xff]  ;;  %v12499_v57 = vld [vmem:[%s24019_s5 + $0x4b0] sm:$0xff]  ;;  %v12506_v12 = vld [vmem:[%s24019_s5 + $0x4e8] sm:$0xff] }
 0x757   :  { %14092 = vmatpush1.bf16.msra.mxu0 %v14091_v15  ;;  %v9887_v22 = vmax.f32 %v23464_v7, 0.0  ;;  %v12491_v15 = vld [vmem:[%s24019_s5 + $0x470] sm:$0xff]  ;;  %v12497_v43 = vld [vmem:[%s24019_s5 + $0x4a0] sm:$0xff]  ;;  %v12510_v45 = vld [vmem:[%s24019_s5 + $0x508] sm:$0xff] }
 0x758   :  { %14094 = vmatprep.subr.bf16.mxu0 %v14093_v13  ;;  %v12494_v13 = vld [vmem:[%s24019_s5 + $0x488] sm:$0xff]  ;;  %v12501_v61 = vld [vmem:[%s24019_s5 + $0x4c0] sm:$0xff]  ;;  %v12503_v36 = vld [vmem:[%s24019_s5 + $0x4d0] sm:$0xff] }
 0x759   :  { %10135 = vmatprep.mubr.f32.mxu0 %v9887_v22  ;;  %v14125_v49 = vpack.c.bf16 %v12496_v28, %v12494_v13  ;;  %v12505_v60 = vld [vmem:[%s24019_s5 + $0x4e0] sm:$0xff]  ;;  %v12507_v52 = vld [vmem:[%s24019_s5 + $0x4f0] sm:$0xff]  ;;  %v12514_v62 = vld [vmem:[%s24019_s5 + $0x528] sm:$0xff] }
 0x75a   :  { %10136 = vmatmul.mubr.f32.gmra.mrb[152].mxu0 %v9886_v40  ;;  %v12509_v3 = vld [vmem:[%s24019_s5 + $0x500] sm:$0xff]  ;;  %v12511_v55 = vld [vmem:[%s24019_s5 + $0x510] sm:$0xff]  ;;  %v12518_v16 = vld [vmem:[%s24019_s5 + $0x548] sm:$0xff] }
 0x75b   :  { %14096 = vmatpush1.bf16.msra.mxu0 %v14095_v21  ;;  %10204 = vmatprep.mubr.f32.mxu0 %v24272_v38  ;;  %v12500_v21 = vld [vmem:[%s24019_s5 + $0x4b8] sm:$0xff]  ;;  %v12513_v10 = vld [vmem:[%s24019_s5 + $0x520] sm:$0xff]  ;;  %v12515_v17 = vld [vmem:[%s24019_s5 + $0x530] sm:$0xff] }
 0x75c   :  { %14098 = vmatprep.subr.bf16.mxu0 %v14097_v4  ;;  %v14127_v4 = vpack.c.bf16 %v12495_v56, %v12493_v1  ;;  %v14129_v59 = vpack.c.bf16 %v12500_v21, %v12498_v54  ;;  %v12520_v58 = vld [vmem:[%s24019_s5 + $0x558] sm:$0xff]  ;;  %v12522_v47 = vld [vmem:[%s24019_s5 + $0x568] sm:$0xff]  ;;  %v12525_v1 = vld [vmem:[%s24019_s5 + $0x580] sm:$0xff] }
 0x75d   :  { %v12524_v34 = vld [vmem:[%s24019_s5 + $0x578] sm:$0xff]  ;;  %v12526_v13 = vld [vmem:[%s24019_s5 + $0x588] sm:$0xff]  ;;  %v12527_v56 = vld [vmem:[%s24019_s5 + $0x590] sm:$0xff] }
 0x75e   :  { %v12528_v28 = vld [vmem:[%s24019_s5 + $0x598] sm:$0xff]  ;;  %v12530_v54 = vld [vmem:[%s24019_s5 + $0x5a8] sm:$0xff]  ;;  %v10489_v32 = vld [vmem:[%s24021_s7 + $0x40] sm:$0xff] }
 0x75f   :  { %14100 = vmatpush1.bf16.msra.mxu0 %v14099_v5  ;;  %v12504_v5 = vld [vmem:[%s24019_s5 + $0x4d8] sm:$0xff]  ;;  %v10490_v7 = vld [vmem:[%s24021_s7 + $0x48] sm:$0xff] }
 0x760   :  { %14102 = vmatprep.subr.bf16.mxu0 %v14101_v14  ;;  %v14131_v14 = vpack.c.bf16 %v12499_v57, %v12497_v43  ;;  %v14133_v30 = vpack.c.bf16 %v12504_v5, %v12502_v2  ;;  %v12532_v21 = vld [vmem:[%s24019_s5 + $0x5b8] sm:$0xff]  ;;  %v12529_v43 = vld [vmem:[%s24019_s5 + $0x5a0] sm:$0xff]  ;;  %v12531_v57 = vld [vmem:[%s24019_s5 + $0x5b0] sm:$0xff] }
 0x761   :  { %v12534_v2 = vld [vmem:[%s24019_s5 + $0x5c8] sm:$0xff]  ;;  %v12536_v5 = vld [vmem:[%s24019_s5 + $0x5d8] sm:$0xff] }
 0x763   :  { %14104 = vmatpush1.bf16.msra.mxu0 %v14103_v9  ;;  %v12508_v9 = vld [vmem:[%s24019_s5 + $0x4f8] sm:$0xff] }
 0x764   :  { %14106 = vmatprep.subr.bf16.mxu0 %v14105_v8  ;;  %v14135_v8 = vpack.c.bf16 %v12503_v36, %v12501_v61  ;;  %v14137_v26 = vpack.c.bf16 %v12508_v9, %v12506_v12  ;;  %v12533_v61 = vld [vmem:[%s24019_s5 + $0x5c0] sm:$0xff]  ;;  %v12535_v36 = vld [vmem:[%s24019_s5 + $0x5d0] sm:$0xff]  ;;  %v12538_v12 = vld [vmem:[%s24019_s5 + $0x5e8] sm:$0xff] }
 0x765   :  { %v12540_v9 = vld [vmem:[%s24019_s5 + $0x5f8] sm:$0xff] }
 0x767   :  { %14108 = vmatpush1.bf16.msra.mxu0 %v14107_v25  ;;  %v12512_v25 = vld [vmem:[%s24019_s5 + $0x518] sm:$0xff] }
 0x768   :  { %14110 = vmatprep.subr.bf16.mxu0 %v14109_v42  ;;  %v14139_v42 = vpack.c.bf16 %v12507_v52, %v12505_v60  ;;  %v14141_v31 = vpack.c.bf16 %v12512_v25, %v12510_v45  ;;  %v12537_v60 = vld [vmem:[%s24019_s5 + $0x5e0] sm:$0xff]  ;;  %v12539_v52 = vld [vmem:[%s24019_s5 + $0x5f0] sm:$0xff]  ;;  %v15561_v25 = vmov 0.0|0.0  }
 0x769   :  { %v14171_v45 = vpack.c.bf16 %v12539_v52, %v12537_v60  ;;  %14173 = vmatprep.subr.bf16.mxu1 %v15561_v25  ;;  %v12546_v52 = vld [vmem:[%s24021_s7 + $0xa0] sm:$0xff] }
 0x76a   :  { %10205 = vmatmul.mubr.f32.vlgmr.msra.gmra.mrb[140].mxu0 %v24272_v38 }
 0x76b   :  { %10210 = vmatprep.mubr.f32.mxu0 %v9851_v39  ;;  %14112 = vmatpush1.bf16.msra.mxu0 %v14111_v63  ;;  %v14119_v39 = vpack.c.bf16 %v12487_v37, %v12485_v50  ;;  %v12516_v63 = vld [vmem:[%s24019_s5 + $0x538] sm:$0xff]  ;;  %v12517_v50 = vld [vmem:[%s24019_s5 + $0x540] sm:$0xff]  ;;  %v12519_v37 = vld [vmem:[%s24019_s5 + $0x550] sm:$0xff] }
 0x76c   :  { %14114 = vmatprep.subr.bf16.mxu0 %v14113_v53  ;;  %v14145_v53 = vpack.c.bf16 %v12516_v63, %v12514_v62  ;;  %v10493_v63 = vld [vmem:[%s24021_s7 + $0x60] sm:$0xff] }
 0x76e   :  { %10211 = vmatmul.mubr.f32.gmra.mrb[142].mxu0 %v9850_v20  ;;  %v14123_v20 = vpack.c.bf16 %v12491_v15, %v12489_v18  ;;  %v12521_v18 = vld [vmem:[%s24019_s5 + $0x560] sm:$0xff]  ;;  %v12523_v15 = vld [vmem:[%s24019_s5 + $0x570] sm:$0xff] }
 0x76f   :  { %10216 = vmatprep.mubr.f32.mxu0 %v23283_v46  ;;  %14116 = vmatpush1.bf16.msra.mxu0 %v14115_v0  ;;  %v14147_v0 = vpack.c.bf16 %v12515_v17, %v12513_v10  ;;  %v10495_v10 = vld [vmem:[%s24021_s7 + $0x70] sm:$0xff]  ;;  %v10496_v17 = vld [vmem:[%s24021_s7 + $0x78] sm:$0xff] }
 0x770   :  { %14118 = vmatprep.subr.bf16.mxu0 %v14117_v35  ;;  %v14149_v35 = vpack.c.bf16 %v12520_v58, %v12518_v16  ;;  %v14195_v16 = vpack.c.bf16 %v10496_v17, %v10495_v10  ;;  %v12553_v10 = vld [vmem:[%s24021_s7 + $0xd8] sm:$0xff] }
 0x772   :  { %10217 = vmatmul.mubr.f32.gmra.mrb[144].mxu0 %v23287_v33 }
 0x773   :  { %10222 = vmatprep.mubr.f32.mxu0 %v23321_v29  ;;  %14120 = vmatpush1.bf16.msra.mxu0 %v14119_v39  ;;  %v14151_v39 = vpack.c.bf16 %v12519_v37, %v12517_v50  ;;  %v10441_v37 = vld [vmem:[%s24022_s6] sm:$0x3] }
 0x774   :  { %14122 = vmatprep.subr.bf16.mxu0 %v14121_v27  ;;  %v14153_v27 = vpack.c.bf16 %v12524_v34, %v12522_v47  ;;  %v10446_v47 = vrot.slane %v10441_v37, %v24300_v6  ;;  %v10450_v34 = vrot.slane %v10441_v37, %v24303_v11  ;;  %v12543_v6 = vld [vmem:[%s24021_s7 + $0x88] sm:$0xff] }
 0x776   :  { %10223 = vmatmul.mubr.f32.gmra.mrb[146].mxu0 %v23325_v41 }
 0x777   :  { %10228 = vmatprep.mubr.f32.mxu0 %v23359_v24  ;;  %14124 = vmatpush1.bf16.msra.mxu0 %v14123_v20  ;;  %v14155_v20 = vpack.c.bf16 %v12523_v15, %v12521_v18 }
 0x778   :  { %14126 = vmatprep.subr.bf16.mxu0 %v14125_v49  ;;  %v14157_v49 = vpack.c.bf16 %v12528_v28, %v12526_v13 }
 0x77a   :  { %10229 = vmatmul.mubr.f32.gmra.mrb[148].mxu0 %v23363_v44 }
 0x77b   :  { %10234 = vmatprep.mubr.f32.mxu0 %v23397_v51  ;;  %14128 = vmatpush1.bf16.msra.mxu0 %v14127_v4  ;;  %v14159_v4 = vpack.c.bf16 %v12527_v56, %v12525_v1 }
 0x77c   :  { %14130 = vmatprep.subr.bf16.mxu0 %v14129_v59  ;;  %v14161_v59 = vpack.c.bf16 %v12532_v21, %v12530_v54  ;;  %v12542_v21 = vld [vmem:[%s24021_s7 + $0x80] sm:$0xff] }
 0x77e   :  { %10235 = vmatmul.mubr.f32.gmra.mrb[150].mxu0 %v23401_v48 }
 0x77f   :  { %10240 = vmatprep.mubr.f32.mxu0 %v23435_v23  ;;  %14132 = vmatpush1.bf16.msra.mxu0 %v14131_v14  ;;  %v14163_v14 = vpack.c.bf16 %v12531_v57, %v12529_v43  ;;  %v14198_v57 = vpack.c.bf16 %v12543_v6, %v12542_v21  ;;  %v12566_v21 = vld [vmem:[%s24021_s7 + $0x140] sm:$0xff]  ;;  %v12567_v6 = vld [vmem:[%s24021_s7 + $0x148] sm:$0xff] }
 0x780   :  { %14134 = vmatprep.subr.bf16.mxu0 %v14133_v30  ;;  %v14165_v30 = vpack.c.bf16 %v12536_v5, %v12534_v2 }
 0x782   :  { %10241 = vmatmul.mubr.f32.gmra.mrb[154].mxu0 %v23439_v19 }
 0x783   :  { %14136 = vmatpush1.bf16.msra.mxu0 %v14135_v8  ;;  %10388 = vmatprep.mubr.f32.mxu0 %v23283_v46  ;;  %v14143_v46 = vpack.c.bf16 %v12511_v55, %v12509_v3  ;;  %v14167_v8 = vpack.c.bf16 %v12535_v36, %v12533_v61  ;;  %v10492_v55 = vld [vmem:[%s24021_s7 + $0x58] sm:$0xff] }
 0x784   :  { %14138 = vmatprep.subr.bf16.mxu0 %v14137_v26  ;;  %v14169_v26 = vpack.c.bf16 %v12540_v9, %v12538_v12  ;;  %v12545_v61 = vld [vmem:[%s24021_s7 + $0x98] sm:$0xff] }
 0x787   :  { %14140 = vmatpush1.bf16.msra.mxu0 %v14139_v42  ;;  %v10481_v42 = vld [vmem:[%s24021_s7] sm:$0xff] }
 0x788   :  { %14142 = vmatprep.subr.bf16.mxu0 %v14141_v31  ;;  %v10482_v31 = vld [vmem:[%s24021_s7 + $0x8] sm:$0xff] }
 0x789   :  { %v14174_v3 = vpack.c.bf16 %v10482_v31, %v10481_v42 }
 0x78b   :  { %14144 = vmatpush1.bf16.msra.mxu0 %v14143_v46  ;;  %14175 = vmatpush3.bf16.msra.mxu1 %v14174_v3  ;;  %v10494_v46 = vld [vmem:[%s24021_s7 + $0x68] sm:$0xff] }
 0x78c   :  { %14146 = vmatprep.subr.bf16.mxu0 %v14145_v53  ;;  %14176 = vmatprep.subr.bf16.mxu1 %v15561_v25  ;;  %v14192_v53 = vpack.c.bf16 %v10494_v46, %v10493_v63 }
 0x78f   :  { %14148 = vmatpush1.bf16.msra.mxu0 %v14147_v0 }
 0x790   :  { %14150 = vmatprep.subr.bf16.mxu0 %v14149_v35 }
 0x793   :  { %14152 = vmatpush1.bf16.msra.mxu0 %v14151_v39 }
 0x794   :  { %14154 = vmatprep.subr.bf16.mxu0 %v14153_v27 }
 0x797   :  { %14156 = vmatpush1.bf16.msra.mxu0 %v14155_v20 }
 0x798   :  { %14158 = vmatprep.subr.bf16.mxu0 %v14157_v49 }
 0x79b   :  { %14160 = vmatpush1.bf16.msra.mxu0 %v14159_v4 }
 0x79c   :  { %14162 = vmatprep.subr.bf16.mxu0 %v14161_v59 }
 0x79f   :  { %14164 = vmatpush1.bf16.msra.mxu0 %v14163_v14 }
 0x7a0   :  { %14166 = vmatprep.subr.bf16.mxu0 %v14165_v30  ;;  %v12544_v30 = vld [vmem:[%s24021_s7 + $0x90] sm:$0xff] }
 0x7a3   :  { %14168 = vmatpush1.bf16.msra.mxu0 %v14167_v8  ;;  %v14201_v8 = vpack.c.bf16 %v12545_v61, %v12544_v30  ;;  %v12573_v30 = vld [vmem:[%s24021_s7 + $0x178] sm:$0xff] }
 0x7a4   :  { %14170 = vmatprep.subr.bf16.mxu0 %v14169_v26 }
 0x7a7   :  { %14172 = vmatpush1.bf16.msra.mxu0 %v14171_v45  ;;  %v12547_v45 = vld [vmem:[%s24021_s7 + $0xa8] sm:$0xff] }
 0x7aa   :  { %10389 = vmatmul.mubr.f32.vlgmr.msra.gmra.mrb[140].mxu0 %v23287_v33  ;;  %v10483_v33 = vld [vmem:[%s24021_s7 + $0x10] sm:$0xff] }
 0x7ab   :  { %10394 = vmatprep.mubr.f32.mxu0 %v23321_v29  ;;  %v10484_v29 = vld [vmem:[%s24021_s7 + $0x18] sm:$0xff] }
 0x7ae   :  { %10395 = vmatmul.mubr.f32.gmra.mrb[142].mxu0 %v23325_v41  ;;  %v10485_v41 = vld [vmem:[%s24021_s7 + $0x20] sm:$0xff] }
 0x7af   :  { %10400 = vmatprep.mubr.f32.mxu0 %v23359_v24  ;;  %v14177_v24 = vpack.c.bf16 %v10484_v29, %v10483_v33  ;;  %v14204_v29 = vpack.c.bf16 %v12547_v45, %v12546_v52  ;;  %v10752_v45 = vld [vmem:[%s24023_s9 + $0x20] sm:$0xff] }
 0x7b1   :  { %14178 = vmatpush3.bf16.msra.mxu1 %v14177_v24 }
 0x7b2   :  { %10401 = vmatmul.mubr.f32.gmra.mrb[144].mxu0 %v23363_v44  ;;  %v10486_v44 = vld [vmem:[%s24021_s7 + $0x28] sm:$0xff]  ;;  %14179 = vmatprep.subr.bf16.mxu1 %v15561_v25 }
 0x7b3   :  { %10406 = vmatprep.mubr.f32.mxu0 %v23397_v51  ;;  %v14180_v51 = vpack.c.bf16 %v10486_v44, %v10485_v41  ;;  %v12548_v44 = vld [vmem:[%s24021_s7 + $0xb0] sm:$0xff] }
 0x7b5   :  { %14181 = vmatpush3.bf16.msra.mxu1 %v14180_v51  ;;  %v12549_v51 = vld [vmem:[%s24021_s7 + $0xb8] sm:$0xff] }
 0x7b6   :  { %10407 = vmatmul.mubr.f32.gmra.mrb[146].mxu0 %v23401_v48  ;;  %v10487_v48 = vld [vmem:[%s24021_s7 + $0x30] sm:$0xff]  ;;  %14182 = vmatprep.subr.bf16.mxu1 %v15561_v25 }
 0x7b7   :  { %10412 = vmatprep.mubr.f32.mxu0 %v23435_v23  ;;  %v10488_v23 = vld [vmem:[%s24021_s7 + $0x38] sm:$0xff] }
 0x7ba   :  { %10413 = vmatmul.mubr.f32.gmra.mrb[148].mxu0 %v23439_v19  ;;  %v14183_v19 = vpack.c.bf16 %v10488_v23, %v10487_v48 }
 0x7bb   :  { %10418 = vmatprep.mubr.f32.mxu0 %v9887_v22  ;;  %v14186_v22 = vpack.c.bf16 %v10490_v7, %v10489_v32  ;;  %v14207_v32 = vpack.c.bf16 %v12549_v51, %v12548_v44  ;;  %v10758_v51 = vld [vmem:[%s24023_s9 + $0x50] sm:$0xff] }
 0x7bc   :  { %14184 = vmatpush3.bf16.msra.mxu1 %v14183_v19 }
 0x7bd   :  { %14185 = vmatprep.subr.bf16.mxu1 %v15561_v25 }
 0x7be   :  { %10419 = vmatmul.mubr.f32.gmra.mrb[150].mxu0 %v9886_v40  ;;  %v10491_v40 = vld [vmem:[%s24021_s7 + $0x50] sm:$0xff] }
 0x7bf   :  { %10424 = vmatprep.mubr.f32.mxu0 %v24272_v38  ;;  %v14189_v62 = vpack.c.bf16 %v10492_v55, %v10491_v40  ;;  %v12551_v40 = vld [vmem:[%s24021_s7 + $0xc8] sm:$0xff] }
 0x7c0   :  { %14187 = vmatpush3.bf16.msra.mxu1 %v14186_v22  ;;  %v12550_v22 = vld [vmem:[%s24021_s7 + $0xc0] sm:$0xff] }
 0x7c1   :  { %14188 = vmatprep.subr.bf16.mxu1 %v15561_v25  ;;  %v14210_v46 = vpack.c.bf16 %v12551_v40, %v12550_v22  ;;  %v10762_v22 = vld [vmem:[%s24023_s9 + $0x70] sm:$0xff]  ;;  %v10763_v40 = vld [vmem:[%s24023_s9 + $0x78] sm:$0xff] }
 0x7c2   :  { %10425 = vmatmul.mubr.f32.gmra.mrb[156].mxu0 %v24272_v38 }
 0x7c4   :  { %14190 = vmatpush3.bf16.msra.mxu1 %v14189_v62 }
 0x7c5   :  { %14191 = vmatprep.subr.bf16.mxu1 %v15561_v25 }
 0x7c8   :  { %14193 = vmatpush3.bf16.msra.mxu1 %v14192_v53  ;;  %v12552_v53 = vld [vmem:[%s24021_s7 + $0xd0] sm:$0xff] }
 0x7c9   :  { %14194 = vmatprep.subr.bf16.mxu1 %v15561_v25  ;;  %v14213_v17 = vpack.c.bf16 %v12553_v10, %v12552_v53 }
 0x7cc   :  { %14196 = vmatpush3.bf16.msra.mxu1 %v14195_v16  ;;  %v12554_v16 = vld [vmem:[%s24021_s7 + $0xe0] sm:$0xff] }
 0x7cd   :  { %14197 = vmatprep.subr.bf16.mxu1 %v15561_v25 }
 0x82d   :  { %v10137_v58 = vpop.f32.mrb[152].mxu0 }
 0x82e   :  { %v10138_v0 = vpop.f32.mrb[153].mxu0  ;;  %v12555_v58 = vld [vmem:[%s24021_s7 + $0xe8] sm:$0xff] }
 0x82f   :  { %v14216_v0 = vpack.c.bf16 %v12555_v58, %v12554_v16  ;;  %v10843_v58 = vld [vmem:[%s24024_s11 + $0x10] sm:$0xff] }
 0x855   :  { %v10242_v35 = vpop.f32.mrb[154].mxu0 }
 0x856   :  { %v10243_v50 = vpop.f32.mrb[155].mxu0  ;;  %v12556_v35 = vld [vmem:[%s24021_s7 + $0xf0] sm:$0xff] }
 0x857   :  { %v12557_v50 = vld [vmem:[%s24021_s7 + $0xf8] sm:$0xff] }
 0x858   :  { %v14219_v37 = vpack.c.bf16 %v12557_v50, %v12556_v35  ;;  %v10845_v50 = vld [vmem:[%s24024_s11 + $0x20] sm:$0xff] }
 0x87d   :  { %v10390_v39 = vpop.f32.mrb[140].mxu0 }
 0x87e   :  { %v10453_v27 = vadd.f32 %v10446_v47, %v10390_v39  ;;  %v10392_v18 = vpop.f32.mrb[141].mxu0 }
 0x87f   :  { %v10454_v15 = vadd.f32 %v10450_v34, %v10392_v18  ;;  %v12560_v18 = vld [vmem:[%s24021_s7 + $0x110] sm:$0xff] }
 0x881   :  { %v10465_v13 = vmax.f32 %v10453_v27, %v10454_v15  ;;  %v10396_v28 = vpop.f32.mrb[142].mxu0  ;;  %v12561_v15 = vld [vmem:[%s24021_s7 + $0x118] sm:$0xff] }
 0x882   :  { %v10455_v20 = vadd.f32 %v10446_v47, %v10396_v28  ;;  %v10398_v49 = vpop.f32.mrb[143].mxu0  ;;  %v12562_v28 = vld [vmem:[%s24021_s7 + $0x120] sm:$0xff] }
 0x883   :  { %v10456_v1 = vadd.f32 %v10450_v34, %v10398_v49 }
 0x885   :  { %v10466_v56 = vmax.f32 %v10455_v20, %v10456_v1  ;;  %v10402_v54 = vpop.f32.mrb[144].mxu0  ;;  %v12563_v20 = vld [vmem:[%s24021_s7 + $0x128] sm:$0xff]  ;;  %v12564_v1 = vld [vmem:[%s24021_s7 + $0x130] sm:$0xff] }
 0x886   :  { %v10457_v11 = vadd.f32 %v10446_v47, %v10402_v54  ;;  %v10404_v4 = vpop.f32.mrb[145].mxu0  ;;  %v14228_v49 = vpack.c.bf16 %v12563_v20, %v12562_v28  ;;  %v12575_v20 = vld [vmem:[%s24027_s12] ss:$0 sm:$0xff] }
 0x887   :  { %v10479_v59 = vmax.f32 %v10465_v13, %v10466_v56  ;;  %v10458_v43 = vadd.f32 %v10450_v34, %v10404_v4  ;;  %v14225_v13 = vpack.c.bf16 %v12561_v15, %v12560_v18  ;;  %v12565_v56 = vld [vmem:[%s24021_s7 + $0x138] sm:$0xff]  ;;  %v12568_v4 = vld [vmem:[%s24021_s7 + $0x150] sm:$0xff] }
 0x888   :  { %v14231_v54 = vpack.c.bf16 %v12565_v56, %v12564_v1 }
 0x889   :  { %v10480_v2 = vmax.f32 %v10479_v59, 0.0  ;;  %v10467_v5 = vmax.f32 %v10457_v11, %v10458_v43  ;;  %v10408_v14 = vpop.f32.mrb[146].mxu0  ;;  %v14234_v11 = vpack.c.bf16 %v12567_v6, %v12566_v21  ;;  %v12569_v59 = vld [vmem:[%s24021_s7 + $0x158] sm:$0xff] }
 0x88a   :  { %v10459_v36 = vadd.f32 %v10446_v47, %v10408_v14  ;;  %v10410_v12 = vpop.f32.mrb[147].mxu0  ;;  %v14237_v43 = vpack.c.bf16 %v12569_v59, %v12568_v4  ;;  %v12572_v14 = vld [vmem:[%s24021_s7 + $0x170] sm:$0xff] }
 0x88b   :  { %v10460_v9 = vadd.f32 %v10450_v34, %v10410_v12  ;;  %12687 = vmatmul.mubr.f32.vlgmr.msra.gmra.mrb[152].mxu1 %v10480_v2  ;;  %v12571_v2 = vld [vmem:[%s24021_s7 + $0x168] sm:$0xff]  ;;  %v14243_v61 = vpack.c.bf16 %v12573_v30, %v12572_v14 }
 0x88c   :  { %14199 = vmatpush3.bf16.msra.mxu1 %v14198_v57  ;;  %12721 = vmatprep.mubr.msk.f32.mxu1 %vm15562_vm2, %v24272_v38  ;;  %v12570_v57 = vld [vmem:[%s24021_s7 + $0x160] sm:$0xff]  ;;  %v10749_v12 = vld [vmem:[%s24023_s9 + $0x8] sm:$0xff] }
 0x88d   :  { %v10468_v26 = vmax.f32 %v10459_v36, %v10460_v9  ;;  %v10414_v60 = vpop.f32.mrb[148].mxu0  ;;  %14200 = vmatprep.subr.bf16.mxu1 %v15561_v25  ;;  %v10748_v36 = vld [vmem:[%s24023_s9] sm:$0xff] }
 0x88e   :  { %v10461_v42 = vadd.f32 %v10446_v47, %v10414_v60  ;;  %v10416_v31 = vpop.f32.mrb[149].mxu0  ;;  %v14246_v9 = vpack.c.bf16 %v10749_v12, %v10748_v36  ;;  %v10751_v60 = vld [vmem:[%s24023_s9 + $0x18] sm:$0xff] }
 0x88f   :  { %v10568_v3 = vmax.f32 %v10467_v5, %v10468_v26  ;;  %v10462_v33 = vadd.f32 %v10450_v34, %v10416_v31  ;;  %v14240_v5 = vpack.c.bf16 %v12571_v2, %v12570_v57  ;;  %v10750_v26 = vld [vmem:[%s24023_s9 + $0x10] sm:$0xff] }
 0x890   :  { %14202 = vmatpush3.bf16.msra.mxu1 %v14201_v8  ;;  %v14249_v52 = vpack.c.bf16 %v10751_v60, %v10750_v26 }
 0x891   :  { %v10469_v41 = vmax.f32 %v10461_v42, %v10462_v33  ;;  %v10420_v24 = vpop.f32.mrb[150].mxu0  ;;  %14203 = vmatprep.subr.bf16.mxu1 %v15561_v25  ;;  %v10569_v27 = vmax.f32 %v10568_v3, 0.0  ;;  %v10753_v42 = vld [vmem:[%s24023_s9 + $0x28] sm:$0xff]  ;;  %v10754_v3 = vld [vmem:[%s24023_s9 + $0x30] sm:$0xff]  ;;  %v10755_v33 = vld [vmem:[%s24023_s9 + $0x38] sm:$0xff] }
 0x892   :  { %v10463_v48 = vadd.f32 %v10446_v47, %v10420_v24  ;;  %v10422_v23 = vpop.f32.mrb[151].mxu0  ;;  %v12558_v47 = vld [vmem:[%s24021_s7 + $0x100] sm:$0xff]  ;;  %v14252_v31 = vpack.c.bf16 %v10753_v42, %v10752_v45  ;;  %v10757_v24 = vld [vmem:[%s24023_s9 + $0x48] sm:$0xff] }
 0x893   :  { %v10464_v19 = vadd.f32 %v10450_v34, %v10422_v23  ;;  %v12559_v34 = vld [vmem:[%s24021_s7 + $0x108] sm:$0xff] }
 0x894   :  { %14205 = vmatpush3.bf16.msra.mxu1 %v14204_v29  ;;  %v14222_v39 = vpack.c.bf16 %v12559_v34, %v12558_v47  ;;  %v14255_v29 = vpack.c.bf16 %v10755_v33, %v10754_v3  ;;  %v10848_v34 = vld [vmem:[%s24024_s11 + $0x38] sm:$0xff] }
 0x895   :  { %v10470_v7 = vmax.f32 %v10463_v48, %v10464_v19  ;;  %14206 = vmatprep.subr.bf16.mxu1 %v15561_v25  ;;  %v10426_v55 = vpop.f32.mrb[156].mxu0  ;;  %v10759_v48 = vld [vmem:[%s24023_s9 + $0x58] sm:$0xff]  ;;  %v10760_v19 = vld [vmem:[%s24023_s9 + $0x60] sm:$0xff] }
 0x896   :  { %v10427_v62 = vpop.f32.mrb[157].mxu0  ;;  %v14261_v23 = vpack.c.bf16 %v10759_v48, %v10758_v51  ;;  %v14267_v55 = vpack.c.bf16 %v10763_v40, %v10762_v22 }
 0x897   :  { %v23831_v63 = vmax.f32 %v10469_v41, %v10470_v7  ;;  %v10756_v41 = vld [vmem:[%s24023_s9 + $0x40] sm:$0xff] }
 0x898   :  { %14208 = vmatpush3.bf16.msra.mxu1 %v14207_v32  ;;  %v14258_v44 = vpack.c.bf16 %v10757_v24, %v10756_v41  ;;  %v10761_v32 = vld [vmem:[%s24023_s9 + $0x68] sm:$0xff]  ;;  %v10841_v62 = vld [vmem:[%s24024_s11] sm:$0xff] }
 0x899   :  { %14209 = vmatprep.subr.bf16.mxu1 %v15561_v25  ;;  %v10659_v8 = vmax.f32 %v23831_v63, 0.0  ;;  %v14264_v7 = vpack.c.bf16 %v10761_v32, %v10760_v19  ;;  %v10842_v63 = vld [vmem:[%s24024_s11 + $0x8] sm:$0xff] }
 0x89a   :  { %v14270_v10 = vpack.c.bf16 %v10842_v63, %v10841_v62 }
 0x89c   :  { %14211 = vmatpush3.bf16.msra.mxu1 %v14210_v46  ;;  %v12541_v46 = vld [vmem:[%s24025_s8] ss:$0 sm:$0xff] }
 0x89d   :  { %14212 = vmatprep.subr.bf16.mxu1 %v15561_v25 }
 0x8a0   :  { %14214 = vmatpush3.bf16.msra.mxu1 %v14213_v17 }
 0x8a1   :  { %14215 = vmatprep.subr.bf16.mxu1 %v15561_v25 }
 0x8a4   :  { %14217 = vmatpush3.bf16.msra.mxu1 %v14216_v0  ;;  %v10844_v0 = vld [vmem:[%s24024_s11 + $0x18] sm:$0xff] }
 0x8a5   :  { %14218 = vmatprep.subr.bf16.mxu1 %v15561_v25  ;;  %v14273_v35 = vpack.c.bf16 %v10844_v0, %v10843_v58 }
 0x8a8   :  { %14220 = vmatpush3.bf16.msra.mxu1 %v14219_v37  ;;  %v10846_v37 = vld [vmem:[%s24024_s11 + $0x28] sm:$0xff] }
 0x8a9   :  { %14221 = vmatprep.subr.bf16.mxu1 %v15561_v25  ;;  %v14276_v47 = vpack.c.bf16 %v10846_v37, %v10845_v50 }
 0x8ab   :  { %12722 = vmatmul.mubr.f32.vlgmr.msra.gmra.mrb[152].mxu1 %v10569_v27  ;;  %v12574_v27 = vld [vmem:[%s24026_s10] ss:$0 sm:$0xff] }
 0x8ac   :  { %14223 = vmatpush3.bf16.msra.mxu1 %v14222_v39  ;;  %12756 = vmatprep.mubr.msk.f32.mxu1 %vm15562_vm2, %v24272_v38 }
 0x8ad   :  { %14224 = vmatprep.subr.bf16.mxu1 %v15561_v25 }
 0x8b0   :  { %14226 = vmatpush3.bf16.msra.mxu1 %v14225_v13 }
 0x8b1   :  { %14227 = vmatprep.subr.bf16.mxu1 %v15561_v25 }
 0x8b4   :  { %14229 = vmatpush3.bf16.msra.mxu1 %v14228_v49 }
 0x8b5   :  { %14230 = vmatprep.subr.bf16.mxu1 %v15561_v25 }
 0x8b8   :  { %14232 = vmatpush3.bf16.msra.mxu1 %v14231_v54 }
 0x8b9   :  { %14233 = vmatprep.subr.bf16.mxu1 %v15561_v25 }
 0x8bc   :  { %14235 = vmatpush3.bf16.msra.mxu1 %v14234_v11 }
 0x8bd   :  { %14236 = vmatprep.subr.bf16.mxu1 %v15561_v25 }
 0x8c0   :  { %14238 = vmatpush3.bf16.msra.mxu1 %v14237_v43 }
 0x8c1   :  { %14239 = vmatprep.subr.bf16.mxu1 %v15561_v25 }
 0x8c4   :  { %14241 = vmatpush3.bf16.msra.mxu1 %v14240_v5 }
 0x8c5   :  { %14242 = vmatprep.subr.bf16.mxu1 %v15561_v25 }
 0x8c8   :  { %14244 = vmatpush3.bf16.msra.mxu1 %v14243_v61 }
 0x8c9   :  { %14245 = vmatprep.subr.bf16.mxu1 %v15561_v25 }
 0x8cb   :  { %12757 = vmatmul.mubr.f32.vlgmr.msra.gmra.mrb[152].mxu1 %v10659_v8 }
 0x8cc   :  { %14247 = vmatpush3.bf16.msra.mxu1 %v14246_v9  ;;  %12791 = vmatprep.mubr.msk.f32.mxu1 %vm15562_vm2, %v24272_v38 }
 0x8cd   :  { %14248 = vmatprep.subr.bf16.mxu1 %v15561_v25 }
 0x8d0   :  { %14250 = vmatpush3.bf16.msra.mxu1 %v14249_v52 }
 0x8d1   :  { %14251 = vmatprep.subr.bf16.mxu1 %v15561_v25 }
 0x8d4   :  { %14253 = vmatpush3.bf16.msra.mxu1 %v14252_v31 }
 0x8d5   :  { %14254 = vmatprep.subr.bf16.mxu1 %v15561_v25 }
 0x8d8   :  { %14256 = vmatpush3.bf16.msra.mxu1 %v14255_v29 }
 0x8d9   :  { %14257 = vmatprep.subr.bf16.mxu1 %v15561_v25 }
 0x8dc   :  { %14259 = vmatpush3.bf16.msra.mxu1 %v14258_v44 }
 0x8dd   :  { %14260 = vmatprep.subr.bf16.mxu1 %v15561_v25 }
 0x8e0   :  { %14262 = vmatpush3.bf16.msra.mxu1 %v14261_v23 }
 0x8e1   :  { %14263 = vmatprep.subr.bf16.mxu1 %v15561_v25 }
 0x8e4   :  { %14265 = vmatpush3.bf16.msra.mxu1 %v14264_v7 }
 0x8e5   :  { %14266 = vmatprep.subr.bf16.mxu1 %v15561_v25 }
 0x8e8   :  { %14268 = vmatpush3.bf16.msra.mxu1 %v14267_v55 }
 0x8e9   :  { %14269 = vmatprep.subr.bf16.mxu1 %v15561_v25 }
 0x99e   :  { %v10743_v53 = vpop.f32.mrb[152].mxu1 }
 0x99f   :  { %v14305_v17 = vadd.f32 %v12541_v46, %v10743_v53  ;;  %v12758_v16 = vpop.f32.mrb[153].mxu1 }
 0x9a1   :  { %12792 = vmatmul.mubr.f32.vlgmr.msra.gmra.mrb[154].mxu1 %v14305_v17 }
 0x9a2   :  { %14271 = vmatpush3.bf16.msra.mxu1 %v14270_v10  ;;  %12810 = vmatprep.mubr.msk.f32.mxu1 %vm15562_vm2, %v24272_v38  ;;  %v10847_v38 = vld [vmem:[%s24024_s11 + $0x30] sm:$0xff] }
 0x9a3   :  { %14272 = vmatprep.subr.bf16.mxu1 %v15561_v25  ;;  %v14279_v39 = vpack.c.bf16 %v10848_v34, %v10847_v38 }
 0x9a6   :  { %14274 = vmatpush3.bf16.msra.mxu1 %v14273_v35 }
 0x9a7   :  { %14275 = vmatprep.subr.bf16.mxu1 %v15561_v25 }
 0x9aa   :  { %14277 = vmatpush3.bf16.msra.mxu1 %v14276_v47 }
 0x9ab   :  { %14278 = vmatprep.subr.bf16.mxu1 %v15561_v25  ;;  %v24305_v25 = vlaneseq }
 0x9ad   :  { %v10931_v28 = vand.u32 127, %v24305_v25 }
 0x9ae   :  { %14280 = vmatpush3.bf16.msra.mxu1 %v14279_v39 }
 0x9af   :  { %vm10932_vm4 = vcmp.lt.s32.totalorder %v10931_v28, 10 }
 0xa74   :  { %v10837_v18 = vpop.f32.mrb[154].mxu1 }
 0xa75   :  { %v10838_v15 = vadd.f32 %v12574_v27, %v10837_v18  ;;  %v12793_v13 = vpop.f32.mrb[155].mxu1 }
 0xa77   :  { %12811 = vmatmul.mubr.msk.f32.vlgmr.msra.gmra.mrb[156].mxu1 %vm10856_vm3, %v10838_v15 }
 0xb4a   :  { %v10926_v49 = vpop.f32.mrb[156].mxu1 }
 0xb4b   :  { %v10927_v1 = vadd.f32 %v12575_v20, %v10926_v49  ;;  %v12812_v56 = vpop.f32.mrb[157].mxu1 }
 0xb4d   :  { %v10933_v54 = vsel %vm10932_vm4, %v10927_v1, -1e+30 }
 0xb4e   :  { %10934 = vmax.xlane.f32.xlu0 %v10933_v54 }
 0xbdb   :  { %v10935_v21 = vpop.xlane.xlu0 %10934 }
 0xbdc   :  { %v10936_v6 = vsub.f32 %v10933_v54, %v10935_v21 }
 0xbde   :  { %v10937_v11 = vmul.f32 1.442695, %v10936_v6 }
 0xbe0   :  { %15501 = vpow2.f32 %v10937_v11 }
 0xbea   :  { %v15502_v4 = vpop.eup %15501 }
 0xbeb   :  { %10939 = vadd.xlane.f32.xlu0 %v15502_v4 }
 0xc78   :  { %v10940_v59 = vpop.xlane.xlu0 %10939 }
 0xc79   :  { %15503 = vlog2.f32 %v10940_v59 }
 0xc83   :  { %v15504_v43 = vpop.eup %15503 }
 0xc84   :  { %v10942_v57 = vmul.f32 0.6931472, %v15504_v43 }
 0xc86   :  { %v10943_v2 = vsub.f32 %v10936_v6, %v10942_v57 }
 0xc88   :  { %10944 = vst [vmem:[%s24028_s13] sm:$0xff] %v10943_v2 }

</bundles_post_ra>
